<compile_context>
chip_gen: v7x
topology: tpu7x:2x2x1
jax: 0.10.0
libtpu: 0.0.40
codegen_flags: <defaults>
</compile_context>

<pallas_src>
import functools

import jax
import jax.numpy as jnp
from jax.experimental import pallas as pl
from jax.experimental.pallas import tpu as pltpu

F32 = jnp.float32
BF16 = jnp.bfloat16


def _round_up(x, m):
    return ((x + m - 1) // m) * m


# ----------------------------- Pallas kernels ------------------------------

def _linear_kernel(a_ref, w_ref, b_ref, o_ref, *, relu):
    acc = jnp.dot(a_ref[...], w_ref[...], preferred_element_type=jnp.float32)
    acc = acc + b_ref[...]
    if relu:
        acc = jnp.maximum(acc, 0.0)
    o_ref[...] = acc.astype(o_ref.dtype)


def linear_pallas(a, w, b, relu=False, tile_m=512):
    """a: [M, K], w: [K, N], b: [N] -> [M, N] f32, optional fused ReLU.

    Tiled over M (grid, double-buffered via BlockSpec pipeline); A/W in bf16,
    f32 accumulation.  tile_m=512 keeps double-buffered tiles well under the
    32 MiB scoped VMEM limit on every generation (incl. v7x's 64 MiB total).
    """
    M, K = a.shape
    N = w.shape[1]
    tm = min(tile_m, _round_up(M, 8))
    m_pad = _round_up(M, tm)

    a16 = a.astype(BF16)
    if m_pad != M:
        a16 = jnp.pad(a16, ((0, m_pad - M), (0, 0)))

    out = pl.pallas_call(
        functools.partial(_linear_kernel, relu=relu),
        grid=(m_pad // tm,),
        in_specs=[
            pl.BlockSpec((tm, K), lambda i: (i, 0)),
            pl.BlockSpec((K, N), lambda i: (0, 0)),
            pl.BlockSpec((1, N), lambda i: (0, 0)),
        ],
        out_specs=pl.BlockSpec((tm, N), lambda i: (i, 0)),
        out_shape=jax.ShapeDtypeStruct((m_pad, N), F32),
        compiler_params=pltpu.CompilerParams(
            dimension_semantics=("parallel",),
            vmem_limit_bytes=32 * 1024 * 1024,
        ),
    )(a16, w.astype(BF16), b.reshape(1, N).astype(F32))

    if m_pad != M:
        out = out[:M]
    return out


def _lstm_heads_kernel(gih_ref, m_ref, h0_ref, c0_ref, whh_ref, whd_ref, bhd_ref,
                       out_ref, hT_ref, cT_ref, h_sc, c_sc, *, seq_len, block_t):
    """Masked LSTM recurrence + fused policy/critic head.

    Processes `block_t` timesteps per grid step.  Only h @ w_hh is on the
    serial path (x @ w_ih was hoisted).  PyTorch gate order (i, f, g, o);
    h and c are reset by mask[t] before each step, matching
    forward_masked_rnn_transposed.
    """
    tb = pl.program_id(0)
    H = h_sc.shape[-1]

    @pl.when(tb == 0)
    def _():
        h_sc[...] = h0_ref[...]
        c_sc[...] = c0_ref[...]

    h = h_sc[...]
    c = c_sc[...]
    needs_guard = (seq_len % block_t) != 0   # static: only guard if T was padded

    for tl in range(block_t):                # fully unrolled (block_t is static)
        m = m_ref[tl]                        # [B, 1] mask for this timestep
        hm = h * m                           # reset state where mask == 0
        cm = c * m
        gates = gih_ref[tl] + jnp.dot(hm, whh_ref[...],
                                      preferred_element_type=jnp.float32)
        i = jax.nn.sigmoid(gates[:, 0:H])
        f = jax.nn.sigmoid(gates[:, H:2 * H])
        g = jnp.tanh(gates[:, 2 * H:3 * H])
        o = jax.nn.sigmoid(gates[:, 3 * H:4 * H])
        c_new = f * cm + i * g
        h_new = o * jnp.tanh(c_new)
        if needs_guard:
            valid = (tb * block_t + tl) < seq_len
            h_new = jnp.where(valid, h_new, h)
            c_new = jnp.where(valid, c_new, c)
        h, c = h_new, c_new
        # Fused heads: policy logits + critic on h while it is still in VMEM.
        out_ref[tl] = (jnp.dot(h, whd_ref[...], preferred_element_type=jnp.float32)
                       + bhd_ref[...])

    h_sc[...] = h
    c_sc[...] = c

    @pl.when(tb == pl.num_programs(0) - 1)
    def _():
        hT_ref[...] = h
        cT_ref[...] = c


def lstm_heads_pallas(gih_tbg, m_tb1, h0, c0, w_hh_t, w_heads, b_heads,
                      block_t=8):
    """gih_tbg: [T, B, 4H] precomputed x@w_ih + bias; m_tb1: [T, B, 1];
    h0/c0: [B, H]; w_hh_t: [H, 4H]; w_heads: [H, NH]; b_heads: [NH].
    Returns heads [T, B, NH], h_T [B, H], c_T [B, H]."""
    T, B, G = gih_tbg.shape
    H = h0.shape[-1]
    NH = w_heads.shape[1]

    b_pad = _round_up(max(B, 8), 8)          # pad B for MXU / sublane alignment
    t_pad = _round_up(T, block_t)

    gih = jnp.pad(gih_tbg.astype(F32), ((0, t_pad - T), (0, b_pad - B), (0, 0)))
    m = jnp.pad(m_tb1.astype(F32), ((0, t_pad - T), (0, b_pad - B), (0, 0)),
                constant_values=1.0)
    h0p = jnp.pad(h0.astype(F32), ((0, b_pad - B), (0, 0)))
    c0p = jnp.pad(c0.astype(F32), ((0, b_pad - B), (0, 0)))

    grid_spec = pltpu.PrefetchScalarGridSpec(
        num_scalar_prefetch=0,
        grid=(t_pad // block_t,),
        in_specs=[
            pl.BlockSpec((block_t, b_pad, G), lambda t: (t, 0, 0)),
            pl.BlockSpec((block_t, b_pad, 1), lambda t: (t, 0, 0)),
            pl.BlockSpec((b_pad, H), lambda t: (0, 0)),
            pl.BlockSpec((b_pad, H), lambda t: (0, 0)),
            pl.BlockSpec((H, G), lambda t: (0, 0)),
            pl.BlockSpec((H, NH), lambda t: (0, 0)),
            pl.BlockSpec((1, NH), lambda t: (0, 0)),
        ],
        out_specs=(
            pl.BlockSpec((block_t, b_pad, NH), lambda t: (t, 0, 0)),
            pl.BlockSpec((b_pad, H), lambda t: (0, 0)),
            pl.BlockSpec((b_pad, H), lambda t: (0, 0)),
        ),
        scratch_shapes=[pltpu.VMEM((b_pad, H), F32),
                        pltpu.VMEM((b_pad, H), F32)],
    )
    heads, hT, cT = pl.pallas_call(
        functools.partial(_lstm_heads_kernel, seq_len=T, block_t=block_t),
        out_shape=(jax.ShapeDtypeStruct((t_pad, b_pad, NH), F32),
                   jax.ShapeDtypeStruct((b_pad, H), F32),
                   jax.ShapeDtypeStruct((b_pad, H), F32)),
        grid_spec=grid_spec,
        compiler_params=pltpu.CompilerParams(
            dimension_semantics=("arbitrary",),
            vmem_limit_bytes=32 * 1024 * 1024,
        ),
    )(gih, m, h0p, c0p, w_hh_t.astype(F32),
      w_heads.astype(F32), b_heads.reshape(1, NH).astype(F32))

    return heads[:T, :B], hT[:B], cT[:B]


# ------------------------------ JAX glue ------------------------------------

def im2col(x, k, s):
    """x: [N, H, W, C] -> [N, OH, OW, C*k*k], features ordered (C, kh, kw)."""
    N, H, W, C = x.shape
    oh = (H - k) // s + 1
    ow = (W - k) // s + 1
    ii = (jnp.arange(oh) * s)[:, None] + jnp.arange(k)[None, :]    # [oh, k]
    jj = (jnp.arange(ow) * s)[:, None] + jnp.arange(k)[None, :]    # [ow, k]
    p = x[:, ii]               # [N, oh, k, W, C]
    p = p[:, :, :, jj]         # [N, oh, k, ow, k, C]
    p = jnp.transpose(p, (0, 1, 3, 5, 2, 4))                       # [N, oh, ow, C, k, k]
    return p.reshape(N, oh, ow, C * k * k)


def xavier_uniform(key, shape, fan_in, fan_out):
    bound = (6.0 / (fan_in + fan_out)) ** 0.5
    return jax.random.uniform(key, shape, F32, -bound, bound)


def init_params(key, num_inputs=1, num_outputs=4, hidden=256):
    ks = jax.random.split(key, 7)
    # conv1: torch weight [16, num_inputs, 8, 8], bias 0
    w1 = xavier_uniform(ks[0], (16, num_inputs, 8, 8), num_inputs * 64, 16 * 64)
    # conv2: torch weight [32, 16, 4, 4], bias 0
    w2 = xavier_uniform(ks[1], (32, 16, 4, 4), 16 * 16, 32 * 16)
    # conv_merge Linear(9*9*32, 256)
    w_fc = xavier_uniform(ks[2], (256, 9 * 9 * 32), 9 * 9 * 32, 256)
    # heads
    w_pi = xavier_uniform(ks[3], (num_outputs, 256), 256, num_outputs)
    w_v = xavier_uniform(ks[4], (1, 256), 256, 1)
    # LSTM: weight_ih_l0 [4H, 256] xavier, weight_hh_l0 [4H, H] orthogonal, biases 0
    w_ih = xavier_uniform(ks[5], (4 * hidden, 256), 256, 4 * hidden)
    w_hh = jax.nn.initializers.orthogonal()(ks[6], (4 * hidden, hidden), F32)

    # fc weight rows permuted once from PyTorch NCHW-flatten (C,h,w) order to
    # (h,w,C) so the runtime NHWC feature map flattens with a free reshape.
    w_fc_hwc = (w_fc.T.reshape(32, 9, 9, 256)
                .transpose(1, 2, 0, 3).reshape(9 * 9 * 32, 256))
    # fused policy+critic head: columns [0:num_outputs] = logits, last = value
    w_heads = jnp.concatenate([w_pi.T, w_v.T], axis=1)      # [256, num_outputs+1]
    b_heads = jnp.zeros((num_outputs + 1,), F32)

    return dict(
        w1=w1.reshape(16, -1).T, b1=jnp.zeros((16,), F32),
        w2=w2.reshape(32, -1).T, b2=jnp.zeros((32,), F32),
        w_fc=w_fc_hwc, b_fc=jnp.zeros((256,), F32),
        w_heads=w_heads, b_heads=b_heads,
        w_ih=w_ih.T, w_hh=w_hh.T, b_lstm=jnp.zeros((4 * hidden,), F32),
        num_outputs=num_outputs,
    )


def lstm_model_forward(params, obs, masks, states):
    """obs: [B, T, 84, 84]; masks: [B, T]; states: ( [B,1,256], [B,1,256] )."""
    B, T, H, W = obs.shape
    x = obs.reshape(B * T, H, W, 1)    # NHWC with the inserted C=1 channel
    # conv1: 1->16, k=8, s=4, + ReLU (im2col GEMM)
    p1 = im2col(x, 8, 4)
    oh1, ow1 = p1.shape[1], p1.shape[2]
    h1 = linear_pallas(p1.reshape(B * T * oh1 * ow1, -1),
                       params["w1"], params["b1"], relu=True)
    f1 = h1.reshape(B * T, oh1, ow1, 16)
    # conv2: 16->32, k=4, s=2, + ReLU
    p2 = im2col(f1, 4, 2)
    oh2, ow2 = p2.shape[1], p2.shape[2]
    h2 = linear_pallas(p2.reshape(B * T * oh2 * ow2, -1),
                       params["w2"], params["b2"], relu=True)
    f2 = h2.reshape(B * T, oh2, ow2, 32)
    # Flatten (free reshape -- fc weight rows already in (h,w,C) order), fc + ReLU
    flat = f2.reshape(B * T, oh2 * ow2 * 32)
    feats = linear_pallas(flat, params["w_fc"], params["b_fc"], relu=True)
    # Hoisted LSTM input projection: one big GEMM over all T*B rows.
    gih = linear_pallas(feats, params["w_ih"], params["b_lstm"], relu=False)
    gih = jnp.transpose(gih.reshape(B, T, -1), (1, 0, 2))    # [T, B, 4H]
    m_t = jnp.transpose(masks, (1, 0))[:, :, None]           # [T, B, 1]
    h0 = states[0][:, 0, :]
    c0 = states[1][:, 0, :]
    heads, hT, cT = lstm_heads_pallas(gih, m_t, h0, c0, params["w_hh"],
                                      params["w_heads"], params["b_heads"])
    heads = jnp.transpose(heads, (1, 0, 2))                  # [B, T, NH]
    num_outputs = params["w_heads"].shape[1] - 1
    policy_logits = heads[..., :num_outputs]
    critic = heads[..., num_outputs:]
    new_states = (hT[:, None, :], cT[:, None, :])
    return policy_logits, critic, new_states


if __name__ == "__main__":
    key = jax.random.PRNGKey(0)
    k_param, k_obs, k_mask = jax.random.split(key, 3)

    B, T, HW = 2, 3, 84        # 84x84 is forced by Linear(9*9*32, 256) in the module
    num_outputs = 4            # Breakout action space

    params = init_params(k_param, num_inputs=1, num_outputs=num_outputs)
    params.pop("num_outputs")
    obs = jax.random.uniform(k_obs, (B, T, HW, HW), F32)
    masks = (jax.random.uniform(k_mask, (B, T)) > 0.2).astype(F32)
    states = (jnp.zeros((B, 1, 256), F32), jnp.zeros((B, 1, 256), F32))

    fwd = jax.jit(lstm_model_forward)
    policy_logits, critic, new_states = fwd(params, obs, masks, states)
    jax.block_until_ready((policy_logits, critic, new_states))

    assert policy_logits.shape == (B, T, num_outputs)
    assert critic.shape == (B, T, 1)
    assert new_states[0].shape == (B, 1, 256) and new_states[1].shape == (B, 1, 256)
    print("KERNEL_OK")
</pallas_src>

<mosaic_0001>
module attributes {stable_mosaic.version = 11 : i64} {
  func.func @_linear_kernel(%arg0: i32, %arg1: memref<512x64xbf16, #tpu.memory_space<vmem>>, %arg2: memref<64x16xbf16, #tpu.memory_space<vmem>>, %arg3: memref<1x16xf32, #tpu.memory_space<vmem>>, %arg4: memref<512x16xf32, #tpu.memory_space<vmem>>) attributes {dimension_semantics = [#tpu.dimension_semantics<parallel>], iteration_bounds = array<i64: 5>, scalar_prefetch = 0 : i64, scratch_operands = 0 : i64, tpu.core_type = #tpu.core_type<tc>, window_params = [{transform_indices = @transform_0, window_bounds = array<i64: 512, 64>}, {pipeline_mode = #tpu.pipeline_mode<synchronous>, transform_indices = @transform_1, window_bounds = array<i64: 64, 16>}, {pipeline_mode = #tpu.pipeline_mode<synchronous>, transform_indices = @transform_2, window_bounds = array<i64: 1, 16>}, {transform_indices = @transform_3, window_bounds = array<i64: 512, 16>}]} {
    %c0 = arith.constant 0 : index
    %c0_0 = arith.constant 0 : index
    %0 = vector.load %arg1[%c0, %c0_0] : memref<512x64xbf16, #tpu.memory_space<vmem>>, vector<512x64xbf16>
    %c0_1 = arith.constant 0 : index
    %c0_2 = arith.constant 0 : index
    %1 = vector.load %arg2[%c0_1, %c0_2] : memref<64x16xbf16, #tpu.memory_space<vmem>>, vector<64x16xbf16>
    %cst = arith.constant dense<0.000000e+00> : vector<512x16xf32>
    %2 = tpu.matmul %0, %1, %cst {dimension_numbers = #tpu.dot_dimension_numbers<[1], [0], [0], [1], [0, 0, 1, 1], [], []>} : vector<512x64xbf16>, vector<64x16xbf16>, vector<512x16xf32> -> vector<512x16xf32>
    %c0_3 = arith.constant 0 : index
    %c0_4 = arith.constant 0 : index
    %3 = vector.load %arg3[%c0_3, %c0_4] : memref<1x16xf32, #tpu.memory_space<vmem>>, vector<1x16xf32>
    %4 = vector.broadcast %3 : vector<1x16xf32> to vector<512x16xf32>
    %5 = arith.addf %2, %4 : vector<512x16xf32>
    %cst_5 = arith.constant 0.000000e+00 : f32
    %6 = vector.broadcast %cst_5 : f32 to vector<512x16xf32>
    %7 = arith.maximumf %5, %6 : vector<512x16xf32>
    %c0_6 = arith.constant 0 : index
    %c0_7 = arith.constant 0 : index
    %8 = vector.load %arg4[%c0_6, %c0_7] : memref<512x16xf32, #tpu.memory_space<vmem>>, vector<512x16xf32>
    tpu.vector_store %arg4[%c0_6, %c0_7], %7 {strides = array<i32>} : memref<512x16xf32, #tpu.memory_space<vmem>>, vector<512x16xf32>,
    return
  }
  func.func @transform_0(%arg0: i32) -> (i32, i32) {
    %c0_i32 = arith.constant 0 : i32
    %c0_i32_0 = arith.constant 0 : i32
    return %arg0, %c0_i32 : i32, i32
  }
  func.func @transform_1(%arg0: i32) -> (i32, i32) {
    %c0_i32 = arith.constant 0 : i32
    %c0_i32_0 = arith.constant 0 : i32
    %c0_i32_1 = arith.constant 0 : i32
    return %c0_i32, %c0_i32_0 : i32, i32
  }
  func.func @transform_2(%arg0: i32) -> (i32, i32) {
    %c0_i32 = arith.constant 0 : i32
    %c0_i32_0 = arith.constant 0 : i32
    %c0_i32_1 = arith.constant 0 : i32
    return %c0_i32, %c0_i32_0 : i32, i32
  }
  func.func @transform_3(%arg0: i32) -> (i32, i32) {
    %c0_i32 = arith.constant 0 : i32
    %c0_i32_0 = arith.constant 0 : i32
    return %arg0, %c0_i32 : i32, i32
  }
}

module attributes {stable_mosaic.version = 11 : i64} {
  func.func @_linear_kernel(%arg0: i32, %arg1: memref<488x256xbf16, #tpu.memory_space<vmem>>, %arg2: memref<256x32xbf16, #tpu.memory_space<vmem>>, %arg3: memref<1x32xf32, #tpu.memory_space<vmem>>, %arg4: memref<488x32xf32, #tpu.memory_space<vmem>>) attributes {dimension_semantics = [#tpu.dimension_semantics<parallel>], iteration_bounds = array<i64: 1>, scalar_prefetch = 0 : i64, scratch_operands = 0 : i64, tpu.core_type = #tpu.core_type<tc>, window_params = [{transform_indices = @transform_0, window_bounds = array<i64: 488, 256>}, {pipeline_mode = #tpu.pipeline_mode<synchronous>, transform_indices = @transform_1, window_bounds = array<i64: 256, 32>}, {pipeline_mode = #tpu.pipeline_mode<synchronous>, transform_indices = @transform_2, window_bounds = array<i64: 1, 32>}, {transform_indices = @transform_3, window_bounds = array<i64: 488, 32>}]} {
    %c0 = arith.constant 0 : index
    %c0_0 = arith.constant 0 : index
    %0 = vector.load %arg1[%c0, %c0_0] : memref<488x256xbf16, #tpu.memory_space<vmem>>, vector<488x256xbf16>
    %c0_1 = arith.constant 0 : index
    %c0_2 = arith.constant 0 : index
    %1 = vector.load %arg2[%c0_1, %c0_2] : memref<256x32xbf16, #tpu.memory_space<vmem>>, vector<256x32xbf16>
    %cst = arith.constant dense<0.000000e+00> : vector<488x32xf32>
    %2 = tpu.matmul %0, %1, %cst {dimension_numbers = #tpu.dot_dimension_numbers<[1], [0], [0], [1], [0, 0, 1, 1], [], []>} : vector<488x256xbf16>, vector<256x32xbf16>, vector<488x32xf32> -> vector<488x32xf32>
    %c0_3 = arith.constant 0 : index
    %c0_4 = arith.constant 0 : index
    %3 = vector.load %arg3[%c0_3, %c0_4] : memref<1x32xf32, #tpu.memory_space<vmem>>, vector<1x32xf32>
    %4 = vector.broadcast %3 : vector<1x32xf32> to vector<488x32xf32>
    %5 = arith.addf %2, %4 : vector<488x32xf32>
    %cst_5 = arith.constant 0.000000e+00 : f32
    %6 = vector.broadcast %cst_5 : f32 to vector<488x32xf32>
    %7 = arith.maximumf %5, %6 : vector<488x32xf32>
    %c0_6 = arith.constant 0 : index
    %c0_7 = arith.constant 0 : index
    %8 = vector.load %arg4[%c0_6, %c0_7] : memref<488x32xf32, #tpu.memory_space<vmem>>, vector<488x32xf32>
    tpu.vector_store %arg4[%c0_6, %c0_7], %7 {strides = array<i32>} : memref<488x32xf32, #tpu.memory_space<vmem>>, vector<488x32xf32>,
    return
  }
  func.func @transform_0(%arg0: i32) -> (i32, i32) {
    %c0_i32 = arith.constant 0 : i32
    %c0_i32_0 = arith.constant 0 : i32
    return %arg0, %c0_i32 : i32, i32
  }
  func.func @transform_1(%arg0: i32) -> (i32, i32) {
    %c0_i32 = arith.constant 0 : i32
    %c0_i32_0 = arith.constant 0 : i32
    %c0_i32_1 = arith.constant 0 : i32
    return %c0_i32, %c0_i32_0 : i32, i32
  }
  func.func @transform_2(%arg0: i32) -> (i32, i32) {
    %c0_i32 = arith.constant 0 : i32
    %c0_i32_0 = arith.constant 0 : i32
    %c0_i32_1 = arith.constant 0 : i32
    return %c0_i32, %c0_i32_0 : i32, i32
  }
  func.func @transform_3(%arg0: i32) -> (i32, i32) {
    %c0_i32 = arith.constant 0 : i32
    %c0_i32_0 = arith.constant 0 : i32
    return %arg0, %c0_i32 : i32, i32
  }
}

module attributes {stable_mosaic.version = 11 : i64} {
  func.func @_linear_kernel(%arg0: i32, %arg1: memref<8x2592xbf16, #tpu.memory_space<vmem>>, %arg2: memref<2592x256xbf16, #tpu.memory_space<vmem>>, %arg3: memref<1x256xf32, #tpu.memory_space<vmem>>, %arg4: memref<8x256xf32, #tpu.memory_space<vmem>>) attributes {dimension_semantics = [#tpu.dimension_semantics<parallel>], iteration_bounds = array<i64: 1>, scalar_prefetch = 0 : i64, scratch_operands = 0 : i64, tpu.core_type = #tpu.core_type<tc>, window_params = [{transform_indices = @transform_0, window_bounds = array<i64: 8, 2592>}, {pipeline_mode = #tpu.pipeline_mode<synchronous>, transform_indices = @transform_1, window_bounds = array<i64: 2592, 256>}, {pipeline_mode = #tpu.pipeline_mode<synchronous>, transform_indices = @transform_2, window_bounds = array<i64: 1, 256>}, {transform_indices = @transform_3, window_bounds = array<i64: 8, 256>}]} {
    %c0 = arith.constant 0 : index
    %c0_0 = arith.constant 0 : index
    %0 = vector.load %arg1[%c0, %c0_0] : memref<8x2592xbf16, #tpu.memory_space<vmem>>, vector<8x2592xbf16>
    %c0_1 = arith.constant 0 : index
    %c0_2 = arith.constant 0 : index
    %1 = vector.load %arg2[%c0_1, %c0_2] : memref<2592x256xbf16, #tpu.memory_space<vmem>>, vector<2592x256xbf16>
    %cst = arith.constant dense<0.000000e+00> : vector<8x256xf32>
    %2 = tpu.matmul %0, %1, %cst {dimension_numbers = #tpu.dot_dimension_numbers<[1], [0], [0], [1], [0, 0, 1, 1], [], []>} : vector<8x2592xbf16>, vector<2592x256xbf16>, vector<8x256xf32> -> vector<8x256xf32>
    %c0_3 = arith.constant 0 : index
    %c0_4 = arith.constant 0 : index
    %3 = vector.load %arg3[%c0_3, %c0_4] : memref<1x256xf32, #tpu.memory_space<vmem>>, vector<1x256xf32>
    %4 = vector.broadcast %3 : vector<1x256xf32> to vector<8x256xf32>
    %5 = arith.addf %2, %4 : vector<8x256xf32>
    %cst_5 = arith.constant 0.000000e+00 : f32
    %6 = vector.broadcast %cst_5 : f32 to vector<8x256xf32>
    %7 = arith.maximumf %5, %6 : vector<8x256xf32>
    %c0_6 = arith.constant 0 : index
    %c0_7 = arith.constant 0 : index
    %8 = vector.load %arg4[%c0_6, %c0_7] : memref<8x256xf32, #tpu.memory_space<vmem>>, vector<8x256xf32>
    tpu.vector_store %arg4[%c0_6, %c0_7], %7 {strides = array<i32>} : memref<8x256xf32, #tpu.memory_space<vmem>>, vector<8x256xf32>,
    return
  }
  func.func @transform_0(%arg0: i32) -> (i32, i32) {
    %c0_i32 = arith.constant 0 : i32
    %c0_i32_0 = arith.constant 0 : i32
    return %arg0, %c0_i32 : i32, i32
  }
  func.func @transform_1(%arg0: i32) -> (i32, i32) {
    %c0_i32 = arith.constant 0 : i32
    %c0_i32_0 = arith.constant 0 : i32
    %c0_i32_1 = arith.constant 0 : i32
    return %c0_i32, %c0_i32_0 : i32, i32
  }
  func.func @transform_2(%arg0: i32) -> (i32, i32) {
    %c0_i32 = arith.constant 0 : i32
    %c0_i32_0 = arith.constant 0 : i32
    %c0_i32_1 = arith.constant 0 : i32
    return %c0_i32, %c0_i32_0 : i32, i32
  }
  func.func @transform_3(%arg0: i32) -> (i32, i32) {
    %c0_i32 = arith.constant 0 : i32
    %c0_i32_0 = arith.constant 0 : i32
    return %arg0, %c0_i32 : i32, i32
  }
}

module attributes {stable_mosaic.version = 11 : i64} {
  func.func @_linear_kernel(%arg0: i32, %arg1: memref<8x256xbf16, #tpu.memory_space<vmem>>, %arg2: memref<256x1024xbf16, #tpu.memory_space<vmem>>, %arg3: memref<1x1024xf32, #tpu.memory_space<vmem>>, %arg4: memref<8x1024xf32, #tpu.memory_space<vmem>>) attributes {dimension_semantics = [#tpu.dimension_semantics<parallel>], iteration_bounds = array<i64: 1>, scalar_prefetch = 0 : i64, scratch_operands = 0 : i64, tpu.core_type = #tpu.core_type<tc>, window_params = [{transform_indices = @transform_0, window_bounds = array<i64: 8, 256>}, {pipeline_mode = #tpu.pipeline_mode<synchronous>, transform_indices = @transform_1, window_bounds = array<i64: 256, 1024>}, {pipeline_mode = #tpu.pipeline_mode<synchronous>, transform_indices = @transform_2, window_bounds = array<i64: 1, 1024>}, {transform_indices = @transform_3, window_bounds = array<i64: 8, 1024>}]} {
    %c0 = arith.constant 0 : index
    %c0_0 = arith.constant 0 : index
    %0 = vector.load %arg1[%c0, %c0_0] : memref<8x256xbf16, #tpu.memory_space<vmem>>, vector<8x256xbf16>
    %c0_1 = arith.constant 0 : index
    %c0_2 = arith.constant 0 : index
    %1 = vector.load %arg2[%c0_1, %c0_2] : memref<256x1024xbf16, #tpu.memory_space<vmem>>, vector<256x1024xbf16>
    %cst = arith.constant dense<0.000000e+00> : vector<8x1024xf32>
    %2 = tpu.matmul %0, %1, %cst {dimension_numbers = #tpu.dot_dimension_numbers<[1], [0], [0], [1], [0, 0, 1, 1], [], []>} : vector<8x256xbf16>, vector<256x1024xbf16>, vector<8x1024xf32> -> vector<8x1024xf32>
    %c0_3 = arith.constant 0 : index
    %c0_4 = arith.constant 0 : index
    %3 = vector.load %arg3[%c0_3, %c0_4] : memref<1x1024xf32, #tpu.memory_space<vmem>>, vector<1x1024xf32>
    %4 = vector.broadcast %3 : vector<1x1024xf32> to vector<8x1024xf32>
    %5 = arith.addf %2, %4 : vector<8x1024xf32>
    %c0_5 = arith.constant 0 : index
    %c0_6 = arith.constant 0 : index
    %6 = vector.load %arg4[%c0_5, %c0_6] : memref<8x1024xf32, #tpu.memory_space<vmem>>, vector<8x1024xf32>
    tpu.vector_store %arg4[%c0_5, %c0_6], %5 {strides = array<i32>} : memref<8x1024xf32, #tpu.memory_space<vmem>>, vector<8x1024xf32>,
    return
  }
  func.func @transform_0(%arg0: i32) -> (i32, i32) {
    %c0_i32 = arith.constant 0 : i32
    %c0_i32_0 = arith.constant 0 : i32
    return %arg0, %c0_i32 : i32, i32
  }
  func.func @transform_1(%arg0: i32) -> (i32, i32) {
    %c0_i32 = arith.constant 0 : i32
    %c0_i32_0 = arith.constant 0 : i32
    %c0_i32_1 = arith.constant 0 : i32
    return %c0_i32, %c0_i32_0 : i32, i32
  }
  func.func @transform_2(%arg0: i32) -> (i32, i32) {
    %c0_i32 = arith.constant 0 : i32
    %c0_i32_0 = arith.constant 0 : i32
    %c0_i32_1 = arith.constant 0 : i32
    return %c0_i32, %c0_i32_0 : i32, i32
  }
  func.func @transform_3(%arg0: i32) -> (i32, i32) {
    %c0_i32 = arith.constant 0 : i32
    %c0_i32_0 = arith.constant 0 : i32
    return %arg0, %c0_i32 : i32, i32
  }
}

module attributes {stable_mosaic.version = 11 : i64} {
  func.func @_lstm_heads_kernel(%arg0: i32, %arg1: memref<8x8x1024xf32, #tpu.memory_space<vmem>>, %arg2: memref<8x8x1xf32, #tpu.memory_space<vmem>>, %arg3: memref<8x256xf32, #tpu.memory_space<vmem>>, %arg4: memref<8x256xf32, #tpu.memory_space<vmem>>, %arg5: memref<256x1024xf32, #tpu.memory_space<vmem>>, %arg6: memref<256x5xf32, #tpu.memory_space<vmem>>, %arg7: memref<1x5xf32, #tpu.memory_space<vmem>>, %arg8: memref<8x8x5xf32, #tpu.memory_space<vmem>>, %arg9: memref<8x256xf32, #tpu.memory_space<vmem>>, %arg10: memref<8x256xf32, #tpu.memory_space<vmem>>, %arg11: memref<8x256xf32, #tpu.memory_space<vmem>>, %arg12: memref<8x256xf32, #tpu.memory_space<vmem>>) attributes {dimension_semantics = [#tpu.dimension_semantics<arbitrary>], iteration_bounds = array<i64: 1>, scalar_prefetch = 0 : i64, scratch_operands = 2 : i64, tpu.core_type = #tpu.core_type<tc>, window_params = [{transform_indices = @transform_0, window_bounds = array<i64: 8, 8, 1024>}, {transform_indices = @transform_1, window_bounds = array<i64: 8, 8, 1>}, {pipeline_mode = #tpu.pipeline_mode<synchronous>, transform_indices = @transform_2, window_bounds = array<i64: 8, 256>}, {pipeline_mode = #tpu.pipeline_mode<synchronous>, transform_indices = @transform_3, window_bounds = array<i64: 8, 256>}, {pipeline_mode = #tpu.pipeline_mode<synchronous>, transform_indices = @transform_4, window_bounds = array<i64: 256, 1024>}, {pipeline_mode = #tpu.pipeline_mode<synchronous>, transform_indices = @transform_5, window_bounds = array<i64: 256, 5>}, {pipeline_mode = #tpu.pipeline_mode<synchronous>, transform_indices = @transform_6, window_bounds = array<i64: 1, 5>}, {transform_indices = @transform_7, window_bounds = array<i64: 8, 8, 5>}, {pipeline_mode = #tpu.pipeline_mode<synchronous>, transform_indices = @transform_8, window_bounds = array<i64: 8, 256>}, {pipeline_mode = #tpu.pipeline_mode<synchronous>, transform_indices = @transform_9, window_bounds = array<i64: 8, 256>}]} {
    %c0_i32 = arith.constant 0 : i32
    %0 = arith.cmpi eq, %arg0, %c0_i32 : i32
    %1 = arith.extui %0 : i1 to i32
    %c0_i32_0 = arith.constant 0 : i32
    %2 = arith.cmpi ne, %1, %c0_i32_0 : i32
    scf.if %2 {
      %c0_178 = arith.constant 0 : index
      %c0_179 = arith.constant 0 : index
      %402 = vector.load %arg3[%c0_178, %c0_179] : memref<8x256xf32, #tpu.memory_space<vmem>>, vector<8x256xf32>
      %c0_180 = arith.constant 0 : index
      %c0_181 = arith.constant 0 : index
      %403 = vector.load %arg11[%c0_180, %c0_181] : memref<8x256xf32, #tpu.memory_space<vmem>>, vector<8x256xf32>
      tpu.vector_store %arg11[%c0_180, %c0_181], %402 {strides = array<i32>} : memref<8x256xf32, #tpu.memory_space<vmem>>, vector<8x256xf32>,
      %c0_182 = arith.constant 0 : index
      %c0_183 = arith.constant 0 : index
      %404 = vector.load %arg4[%c0_182, %c0_183] : memref<8x256xf32, #tpu.memory_space<vmem>>, vector<8x256xf32>
      %c0_184 = arith.constant 0 : index
      %c0_185 = arith.constant 0 : index
      %405 = vector.load %arg12[%c0_184, %c0_185] : memref<8x256xf32, #tpu.memory_space<vmem>>, vector<8x256xf32>
      tpu.vector_store %arg12[%c0_184, %c0_185], %404 {strides = array<i32>} : memref<8x256xf32, #tpu.memory_space<vmem>>, vector<8x256xf32>,
    } else {
    }
    %c0 = arith.constant 0 : index
    %c0_1 = arith.constant 0 : index
    %3 = vector.load %arg11[%c0, %c0_1] : memref<8x256xf32, #tpu.memory_space<vmem>>, vector<8x256xf32>
    %c0_2 = arith.constant 0 : index
    %c0_3 = arith.constant 0 : index
    %4 = vector.load %arg12[%c0_2, %c0_3] : memref<8x256xf32, #tpu.memory_space<vmem>>, vector<8x256xf32>
    %c0_4 = arith.constant 0 : index
    %c0_5 = arith.constant 0 : index
    %c0_6 = arith.constant 0 : index
    %5 = vector.load %arg2[%c0_4, %c0_5, %c0_6] : memref<8x8x1xf32, #tpu.memory_space<vmem>>, vector<1x8x1xf32>
    %6 = vector.shape_cast %5 : vector<1x8x1xf32> to vector<8x1xf32>
    %7 = vector.broadcast %6 : vector<8x1xf32> to vector<8x256xf32>
    %8 = arith.mulf %3, %7 : vector<8x256xf32>
    %9 = vector.broadcast %6 : vector<8x1xf32> to vector<8x256xf32>
    %10 = arith.mulf %4, %9 : vector<8x256xf32>
    %c0_7 = arith.constant 0 : index
    %c0_8 = arith.constant 0 : index
    %c0_9 = arith.constant 0 : index
    %11 = vector.load %arg1[%c0_7, %c0_8, %c0_9] : memref<8x8x1024xf32, #tpu.memory_space<vmem>>, vector<1x8x1024xf32>
    %12 = vector.shape_cast %11 : vector<1x8x1024xf32> to vector<8x1024xf32>
    %c0_10 = arith.constant 0 : index
    %c0_11 = arith.constant 0 : index
    %13 = vector.load %arg5[%c0_10, %c0_11] : memref<256x1024xf32, #tpu.memory_space<vmem>>, vector<256x1024xf32>
    %cst = arith.constant dense<0.000000e+00> : vector<8x1024xf32>
    %14 = tpu.matmul %8, %13, %cst {dimension_numbers = #tpu.dot_dimension_numbers<[1], [0], [0], [1], [0, 0, 1, 1], [], []>} : vector<8x256xf32>, vector<256x1024xf32>, vector<8x1024xf32> -> vector<8x1024xf32>
    %15 = arith.addf %12, %14 : vector<8x1024xf32>
    %16 = vector.extract_strided_slice %15 {offsets = [0, 0], sizes = [8, 256], strides = [1, 1]} : vector<8x1024xf32> to vector<8x256xf32>
    %17 = arith.negf %16 : vector<8x256xf32>
    %18 = math.exp %17 : vector<8x256xf32>
    %cst_12 = arith.constant 1.000000e+00 : f32
    %19 = vector.broadcast %cst_12 : f32 to vector<8x256xf32>
    %20 = arith.addf %19, %18 : vector<8x256xf32>
    %21 = arith.divf %19, %20 : vector<8x256xf32>
    %22 = vector.extract_strided_slice %15 {offsets = [0, 256], sizes = [8, 256], strides = [1, 1]} : vector<8x1024xf32> to vector<8x256xf32>
    %23 = arith.negf %22 : vector<8x256xf32>
    %24 = math.exp %23 : vector<8x256xf32>
    %cst_13 = arith.constant 1.000000e+00 : f32
    %25 = vector.broadcast %cst_13 : f32 to vector<8x256xf32>
    %26 = arith.addf %25, %24 : vector<8x256xf32>
    %27 = arith.divf %25, %26 : vector<8x256xf32>
    %28 = vector.extract_strided_slice %15 {offsets = [0, 512], sizes = [8, 256], strides = [1, 1]} : vector<8x1024xf32> to vector<8x256xf32>
    %29 = math.tanh %28 : vector<8x256xf32>
    %30 = vector.extract_strided_slice %15 {offsets = [0, 768], sizes = [8, 256], strides = [1, 1]} : vector<8x1024xf32> to vector<8x256xf32>
    %31 = arith.negf %30 : vector<8x256xf32>
    %32 = math.exp %31 : vector<8x256xf32>
    %cst_14 = arith.constant 1.000000e+00 : f32
    %33 = vector.broadcast %cst_14 : f32 to vector<8x256xf32>
    %34 = arith.addf %33, %32 : vector<8x256xf32>
    %35 = arith.divf %33, %34 : vector<8x256xf32>
    %36 = arith.mulf %27, %10 : vector<8x256xf32>
    %37 = arith.mulf %21, %29 : vector<8x256xf32>
    %38 = arith.addf %36, %37 : vector<8x256xf32>
    %39 = math.tanh %38 : vector<8x256xf32>
    %40 = arith.mulf %35, %39 : vector<8x256xf32>
    %c8_i32 = arith.constant 8 : i32
    %41 = arith.muli %arg0, %c8_i32 : i32
    %c0_i32_15 = arith.constant 0 : i32
    %42 = arith.addi %41, %c0_i32_15 : i32
    %c3_i32 = arith.constant 3 : i32
    %43 = arith.cmpi slt, %42, %c3_i32 : i32
    %44 = arith.select %43, %40, %3 : vector<8x256xf32>
    %45 = arith.select %43, %38, %4 : vector<8x256xf32>
    %c0_16 = arith.constant 0 : index
    %c0_17 = arith.constant 0 : index
    %46 = vector.load %arg6[%c0_16, %c0_17] : memref<256x5xf32, #tpu.memory_space<vmem>>, vector<256x5xf32>
    %cst_18 = arith.constant dense<0.000000e+00> : vector<8x5xf32>
    %47 = tpu.matmul %44, %46, %cst_18 {dimension_numbers = #tpu.dot_dimension_numbers<[1], [0], [0], [1], [0, 0, 1, 1], [], []>} : vector<8x256xf32>, vector<256x5xf32>, vector<8x5xf32> -> vector<8x5xf32>
    %c0_19 = arith.constant 0 : index
    %c0_20 = arith.constant 0 : index
    %48 = vector.load %arg7[%c0_19, %c0_20] : memref<1x5xf32, #tpu.memory_space<vmem>>, vector<1x5xf32>
    %49 = vector.broadcast %48 : vector<1x5xf32> to vector<8x5xf32>
    %50 = arith.addf %47, %49 : vector<8x5xf32>
    %c0_21 = arith.constant 0 : index
    %c0_22 = arith.constant 0 : index
    %c0_23 = arith.constant 0 : index
    %51 = vector.load %arg8[%c0_21, %c0_22, %c0_23] : memref<8x8x5xf32, #tpu.memory_space<vmem>>, vector<1x8x5xf32>
    %52 = vector.shape_cast %51 : vector<1x8x5xf32> to vector<8x5xf32>
    %53 = vector.shape_cast %50 : vector<8x5xf32> to vector<1x8x5xf32>
    tpu.vector_store %arg8[%c0_21, %c0_22, %c0_23], %53 {strides = array<i32>} : memref<8x8x5xf32, #tpu.memory_space<vmem>>, vector<1x8x5xf32>,
    %c1 = arith.constant 1 : index
    %c0_24 = arith.constant 0 : index
    %c0_25 = arith.constant 0 : index
    %54 = vector.load %arg2[%c1, %c0_24, %c0_25] : memref<8x8x1xf32, #tpu.memory_space<vmem>>, vector<1x8x1xf32>
    %55 = vector.shape_cast %54 : vector<1x8x1xf32> to vector<8x1xf32>
    %56 = vector.broadcast %55 : vector<8x1xf32> to vector<8x256xf32>
    %57 = arith.mulf %44, %56 : vector<8x256xf32>
    %58 = vector.broadcast %55 : vector<8x1xf32> to vector<8x256xf32>
    %59 = arith.mulf %45, %58 : vector<8x256xf32>
    %c1_26 = arith.constant 1 : index
    %c0_27 = arith.constant 0 : index
    %c0_28 = arith.constant 0 : index
    %60 = vector.load %arg1[%c1_26, %c0_27, %c0_28] : memref<8x8x1024xf32, #tpu.memory_space<vmem>>, vector<1x8x1024xf32>
    %61 = vector.shape_cast %60 : vector<1x8x1024xf32> to vector<8x1024xf32>
    %c0_29 = arith.constant 0 : index
    %c0_30 = arith.constant 0 : index
    %62 = vector.load %arg5[%c0_29, %c0_30] : memref<256x1024xf32, #tpu.memory_space<vmem>>, vector<256x1024xf32>
    %cst_31 = arith.constant dense<0.000000e+00> : vector<8x1024xf32>
    %63 = tpu.matmul %57, %62, %cst_31 {dimension_numbers = #tpu.dot_dimension_numbers<[1], [0], [0], [1], [0, 0, 1, 1], [], []>} : vector<8x256xf32>, vector<256x1024xf32>, vector<8x1024xf32> -> vector<8x1024xf32>
    %64 = arith.addf %61, %63 : vector<8x1024xf32>
    %65 = vector.extract_strided_slice %64 {offsets = [0, 0], sizes = [8, 256], strides = [1, 1]} : vector<8x1024xf32> to vector<8x256xf32>
    %66 = arith.negf %65 : vector<8x256xf32>
    %67 = math.exp %66 : vector<8x256xf32>
    %cst_32 = arith.constant 1.000000e+00 : f32
    %68 = vector.broadcast %cst_32 : f32 to vector<8x256xf32>
    %69 = arith.addf %68, %67 : vector<8x256xf32>
    %70 = arith.divf %68, %69 : vector<8x256xf32>
    %71 = vector.extract_strided_slice %64 {offsets = [0, 256], sizes = [8, 256], strides = [1, 1]} : vector<8x1024xf32> to vector<8x256xf32>
    %72 = arith.negf %71 : vector<8x256xf32>
    %73 = math.exp %72 : vector<8x256xf32>
    %cst_33 = arith.constant 1.000000e+00 : f32
    %74 = vector.broadcast %cst_33 : f32 to vector<8x256xf32>
    %75 = arith.addf %74, %73 : vector<8x256xf32>
    %76 = arith.divf %74, %75 : vector<8x256xf32>
    %77 = vector.extract_strided_slice %64 {offsets = [0, 512], sizes = [8, 256], strides = [1, 1]} : vector<8x1024xf32> to vector<8x256xf32>
    %78 = math.tanh %77 : vector<8x256xf32>
    %79 = vector.extract_strided_slice %64 {offsets = [0, 768], sizes = [8, 256], strides = [1, 1]} : vector<8x1024xf32> to vector<8x256xf32>
    %80 = arith.negf %79 : vector<8x256xf32>
    %81 = math.exp %80 : vector<8x256xf32>
    %cst_34 = arith.constant 1.000000e+00 : f32
    %82 = vector.broadcast %cst_34 : f32 to vector<8x256xf32>
    %83 = arith.addf %82, %81 : vector<8x256xf32>
    %84 = arith.divf %82, %83 : vector<8x256xf32>
    %85 = arith.mulf %76, %59 : vector<8x256xf32>
    %86 = arith.mulf %70, %78 : vector<8x256xf32>
    %87 = arith.addf %85, %86 : vector<8x256xf32>
    %88 = math.tanh %87 : vector<8x256xf32>
    %89 = arith.mulf %84, %88 : vector<8x256xf32>
    %c8_i32_35 = arith.constant 8 : i32
    %90 = arith.muli %arg0, %c8_i32_35 : i32
    %c1_i32 = arith.constant 1 : i32
    %91 = arith.addi %90, %c1_i32 : i32
    %c3_i32_36 = arith.constant 3 : i32
    %92 = arith.cmpi slt, %91, %c3_i32_36 : i32
    %93 = arith.select %92, %89, %44 : vector<8x256xf32>
    %94 = arith.select %92, %87, %45 : vector<8x256xf32>
    %c0_37 = arith.constant 0 : index
    %c0_38 = arith.constant 0 : index
    %95 = vector.load %arg6[%c0_37, %c0_38] : memref<256x5xf32, #tpu.memory_space<vmem>>, vector<256x5xf32>
    %cst_39 = arith.constant dense<0.000000e+00> : vector<8x5xf32>
    %96 = tpu.matmul %93, %95, %cst_39 {dimension_numbers = #tpu.dot_dimension_numbers<[1], [0], [0], [1], [0, 0, 1, 1], [], []>} : vector<8x256xf32>, vector<256x5xf32>, vector<8x5xf32> -> vector<8x5xf32>
    %c0_40 = arith.constant 0 : index
    %c0_41 = arith.constant 0 : index
    %97 = vector.load %arg7[%c0_40, %c0_41] : memref<1x5xf32, #tpu.memory_space<vmem>>, vector<1x5xf32>
    %98 = vector.broadcast %97 : vector<1x5xf32> to vector<8x5xf32>
    %99 = arith.addf %96, %98 : vector<8x5xf32>
    %c1_42 = arith.constant 1 : index
    %c0_43 = arith.constant 0 : index
    %c0_44 = arith.constant 0 : index
    %100 = vector.load %arg8[%c1_42, %c0_43, %c0_44] : memref<8x8x5xf32, #tpu.memory_space<vmem>>, vector<1x8x5xf32>
    %101 = vector.shape_cast %100 : vector<1x8x5xf32> to vector<8x5xf32>
    %102 = vector.shape_cast %99 : vector<8x5xf32> to vector<1x8x5xf32>
    tpu.vector_store %arg8[%c1_42, %c0_43, %c0_44], %102 {strides = array<i32>} : memref<8x8x5xf32, #tpu.memory_space<vmem>>, vector<1x8x5xf32>,
    %c2 = arith.constant 2 : index
    %c0_45 = arith.constant 0 : index
    %c0_46 = arith.constant 0 : index
    %103 = vector.load %arg2[%c2, %c0_45, %c0_46] : memref<8x8x1xf32, #tpu.memory_space<vmem>>, vector<1x8x1xf32>
    %104 = vector.shape_cast %103 : vector<1x8x1xf32> to vector<8x1xf32>
    %105 = vector.broadcast %104 : vector<8x1xf32> to vector<8x256xf32>
    %106 = arith.mulf %93, %105 : vector<8x256xf32>
    %107 = vector.broadcast %104 : vector<8x1xf32> to vector<8x256xf32>
    %108 = arith.mulf %94, %107 : vector<8x256xf32>
    %c2_47 = arith.constant 2 : index
    %c0_48 = arith.constant 0 : index
    %c0_49 = arith.constant 0 : index
    %109 = vector.load %arg1[%c2_47, %c0_48, %c0_49] : memref<8x8x1024xf32, #tpu.memory_space<vmem>>, vector<1x8x1024xf32>
    %110 = vector.shape_cast %109 : vector<1x8x1024xf32> to vector<8x1024xf32>
    %c0_50 = arith.constant 0 : index
    %c0_51 = arith.constant 0 : index
    %111 = vector.load %arg5[%c0_50, %c0_51] : memref<256x1024xf32, #tpu.memory_space<vmem>>, vector<256x1024xf32>
    %cst_52 = arith.constant dense<0.000000e+00> : vector<8x1024xf32>
    %112 = tpu.matmul %106, %111, %cst_52 {dimension_numbers = #tpu.dot_dimension_numbers<[1], [0], [0], [1], [0, 0, 1, 1], [], []>} : vector<8x256xf32>, vector<256x1024xf32>, vector<8x1024xf32> -> vector<8x1024xf32>
    %113 = arith.addf %110, %112 : vector<8x1024xf32>
    %114 = vector.extract_strided_slice %113 {offsets = [0, 0], sizes = [8, 256], strides = [1, 1]} : vector<8x1024xf32> to vector<8x256xf32>
    %115 = arith.negf %114 : vector<8x256xf32>
    %116 = math.exp %115 : vector<8x256xf32>
    %cst_53 = arith.constant 1.000000e+00 : f32
    %117 = vector.broadcast %cst_53 : f32 to vector<8x256xf32>
    %118 = arith.addf %117, %116 : vector<8x256xf32>
    %119 = arith.divf %117, %118 : vector<8x256xf32>
    %120 = vector.extract_strided_slice %113 {offsets = [0, 256], sizes = [8, 256], strides = [1, 1]} : vector<8x1024xf32> to vector<8x256xf32>
    %121 = arith.negf %120 : vector<8x256xf32>
    %122 = math.exp %121 : vector<8x256xf32>
    %cst_54 = arith.constant 1.000000e+00 : f32
    %123 = vector.broadcast %cst_54 : f32 to vector<8x256xf32>
    %124 = arith.addf %123, %122 : vector<8x256xf32>
    %125 = arith.divf %123, %124 : vector<8x256xf32>
    %126 = vector.extract_strided_slice %113 {offsets = [0, 512], sizes = [8, 256], strides = [1, 1]} : vector<8x1024xf32> to vector<8x256xf32>
    %127 = math.tanh %126 : vector<8x256xf32>
    %128 = vector.extract_strided_slice %113 {offsets = [0, 768], sizes = [8, 256], strides = [1, 1]} : vector<8x1024xf32> to vector<8x256xf32>
    %129 = arith.negf %128 : vector<8x256xf32>
    %130 = math.exp %129 : vector<8x256xf32>
    %cst_55 = arith.constant 1.000000e+00 : f32
    %131 = vector.broadcast %cst_55 : f32 to vector<8x256xf32>
    %132 = arith.addf %131, %130 : vector<8x256xf32>
    %133 = arith.divf %131, %132 : vector<8x256xf32>
    %134 = arith.mulf %125, %108 : vector<8x256xf32>
    %135 = arith.mulf %119, %127 : vector<8x256xf32>
    %136 = arith.addf %134, %135 : vector<8x256xf32>
    %137 = math.tanh %136 : vector<8x256xf32>
    %138 = arith.mulf %133, %137 : vector<8x256xf32>
    %c8_i32_56 = arith.constant 8 : i32
    %139 = arith.muli %arg0, %c8_i32_56 : i32
    %c2_i32 = arith.constant 2 : i32
    %140 = arith.addi %139, %c2_i32 : i32
    %c3_i32_57 = arith.constant 3 : i32
    %141 = arith.cmpi slt, %140, %c3_i32_57 : i32
    %142 = arith.select %141, %138, %93 : vector<8x256xf32>
    %143 = arith.select %141, %136, %94 : vector<8x256xf32>
    %c0_58 = arith.constant 0 : index
    %c0_59 = arith.constant 0 : index
    %144 = vector.load %arg6[%c0_58, %c0_59] : memref<256x5xf32, #tpu.memory_space<vmem>>, vector<256x5xf32>
    %cst_60 = arith.constant dense<0.000000e+00> : vector<8x5xf32>
    %145 = tpu.matmul %142, %144, %cst_60 {dimension_numbers = #tpu.dot_dimension_numbers<[1], [0], [0], [1], [0, 0, 1, 1], [], []>} : vector<8x256xf32>, vector<256x5xf32>, vector<8x5xf32> -> vector<8x5xf32>
    %c0_61 = arith.constant 0 : index
    %c0_62 = arith.constant 0 : index
    %146 = vector.load %arg7[%c0_61, %c0_62] : memref<1x5xf32, #tpu.memory_space<vmem>>, vector<1x5xf32>
    %147 = vector.broadcast %146 : vector<1x5xf32> to vector<8x5xf32>
    %148 = arith.addf %145, %147 : vector<8x5xf32>
    %c2_63 = arith.constant 2 : index
    %c0_64 = arith.constant 0 : index
    %c0_65 = arith.constant 0 : index
    %149 = vector.load %arg8[%c2_63, %c0_64, %c0_65] : memref<8x8x5xf32, #tpu.memory_space<vmem>>, vector<1x8x5xf32>
    %150 = vector.shape_cast %149 : vector<1x8x5xf32> to vector<8x5xf32>
    %151 = vector.shape_cast %148 : vector<8x5xf32> to vector<1x8x5xf32>
    tpu.vector_store %arg8[%c2_63, %c0_64, %c0_65], %151 {strides = array<i32>} : memref<8x8x5xf32, #tpu.memory_space<vmem>>, vector<1x8x5xf32>,
    %c3 = arith.constant 3 : index
    %c0_66 = arith.constant 0 : index
    %c0_67 = arith.constant 0 : index
    %152 = vector.load %arg2[%c3, %c0_66, %c0_67] : memref<8x8x1xf32, #tpu.memory_space<vmem>>, vector<1x8x1xf32>
    %153 = vector.shape_cast %152 : vector<1x8x1xf32> to vector<8x1xf32>
    %154 = vector.broadcast %153 : vector<8x1xf32> to vector<8x256xf32>
    %155 = arith.mulf %142, %154 : vector<8x256xf32>
    %156 = vector.broadcast %153 : vector<8x1xf32> to vector<8x256xf32>
    %157 = arith.mulf %143, %156 : vector<8x256xf32>
    %c3_68 = arith.constant 3 : index
    %c0_69 = arith.constant 0 : index
    %c0_70 = arith.constant 0 : index
    %158 = vector.load %arg1[%c3_68, %c0_69, %c0_70] : memref<8x8x1024xf32, #tpu.memory_space<vmem>>, vector<1x8x1024xf32>
    %159 = vector.shape_cast %158 : vector<1x8x1024xf32> to vector<8x1024xf32>
    %c0_71 = arith.constant 0 : index
    %c0_72 = arith.constant 0 : index
    %160 = vector.load %arg5[%c0_71, %c0_72] : memref<256x1024xf32, #tpu.memory_space<vmem>>, vector<256x1024xf32>
    %cst_73 = arith.constant dense<0.000000e+00> : vector<8x1024xf32>
    %161 = tpu.matmul %155, %160, %cst_73 {dimension_numbers = #tpu.dot_dimension_numbers<[1], [0], [0], [1], [0, 0, 1, 1], [], []>} : vector<8x256xf32>, vector<256x1024xf32>, vector<8x1024xf32> -> vector<8x1024xf32>
    %162 = arith.addf %159, %161 : vector<8x1024xf32>
    %163 = vector.extract_strided_slice %162 {offsets = [0, 0], sizes = [8, 256], strides = [1, 1]} : vector<8x1024xf32> to vector<8x256xf32>
    %164 = arith.negf %163 : vector<8x256xf32>
    %165 = math.exp %164 : vector<8x256xf32>
    %cst_74 = arith.constant 1.000000e+00 : f32
    %166 = vector.broadcast %cst_74 : f32 to vector<8x256xf32>
    %167 = arith.addf %166, %165 : vector<8x256xf32>
    %168 = arith.divf %166, %167 : vector<8x256xf32>
    %169 = vector.extract_strided_slice %162 {offsets = [0, 256], sizes = [8, 256], strides = [1, 1]} : vector<8x1024xf32> to vector<8x256xf32>
    %170 = arith.negf %169 : vector<8x256xf32>
    %171 = math.exp %170 : vector<8x256xf32>
    %cst_75 = arith.constant 1.000000e+00 : f32
    %172 = vector.broadcast %cst_75 : f32 to vector<8x256xf32>
    %173 = arith.addf %172, %171 : vector<8x256xf32>
    %174 = arith.divf %172, %173 : vector<8x256xf32>
    %175 = vector.extract_strided_slice %162 {offsets = [0, 512], sizes = [8, 256], strides = [1, 1]} : vector<8x1024xf32> to vector<8x256xf32>
    %176 = math.tanh %175 : vector<8x256xf32>
    %177 = vector.extract_strided_slice %162 {offsets = [0, 768], sizes = [8, 256], strides = [1, 1]} : vector<8x1024xf32> to vector<8x256xf32>
    %178 = arith.negf %177 : vector<8x256xf32>
    %179 = math.exp %178 : vector<8x256xf32>
    %cst_76 = arith.constant 1.000000e+00 : f32
    %180 = vector.broadcast %cst_76 : f32 to vector<8x256xf32>
    %181 = arith.addf %180, %179 : vector<8x256xf32>
    %182 = arith.divf %180, %181 : vector<8x256xf32>
    %183 = arith.mulf %174, %157 : vector<8x256xf32>
    %184 = arith.mulf %168, %176 : vector<8x256xf32>
    %185 = arith.addf %183, %184 : vector<8x256xf32>
    %186 = math.tanh %185 : vector<8x256xf32>
    %187 = arith.mulf %182, %186 : vector<8x256xf32>
    %c8_i32_77 = arith.constant 8 : i32
    %188 = arith.muli %arg0, %c8_i32_77 : i32
    %c3_i32_78 = arith.constant 3 : i32
    %189 = arith.addi %188, %c3_i32_78 : i32
    %c3_i32_79 = arith.constant 3 : i32
    %190 = arith.cmpi slt, %189, %c3_i32_79 : i32
    %191 = arith.select %190, %187, %142 : vector<8x256xf32>
    %192 = arith.select %190, %185, %143 : vector<8x256xf32>
    %c0_80 = arith.constant 0 : index
    %c0_81 = arith.constant 0 : index
    %193 = vector.load %arg6[%c0_80, %c0_81] : memref<256x5xf32, #tpu.memory_space<vmem>>, vector<256x5xf32>
    %cst_82 = arith.constant dense<0.000000e+00> : vector<8x5xf32>
    %194 = tpu.matmul %191, %193, %cst_82 {dimension_numbers = #tpu.dot_dimension_numbers<[1], [0], [0], [1], [0, 0, 1, 1], [], []>} : vector<8x256xf32>, vector<256x5xf32>, vector<8x5xf32> -> vector<8x5xf32>
    %c0_83 = arith.constant 0 : index
    %c0_84 = arith.constant 0 : index
    %195 = vector.load %arg7[%c0_83, %c0_84] : memref<1x5xf32, #tpu.memory_space<vmem>>, vector<1x5xf32>
    %196 = vector.broadcast %195 : vector<1x5xf32> to vector<8x5xf32>
    %197 = arith.addf %194, %196 : vector<8x5xf32>
    %c3_85 = arith.constant 3 : index
    %c0_86 = arith.constant 0 : index
    %c0_87 = arith.constant 0 : index
    %198 = vector.load %arg8[%c3_85, %c0_86, %c0_87] : memref<8x8x5xf32, #tpu.memory_space<vmem>>, vector<1x8x5xf32>
    %199 = vector.shape_cast %198 : vector<1x8x5xf32> to vector<8x5xf32>
    %200 = vector.shape_cast %197 : vector<8x5xf32> to vector<1x8x5xf32>
    tpu.vector_store %arg8[%c3_85, %c0_86, %c0_87], %200 {strides = array<i32>} : memref<8x8x5xf32, #tpu.memory_space<vmem>>, vector<1x8x5xf32>,
    %c4 = arith.constant 4 : index
    %c0_88 = arith.constant 0 : index
    %c0_89 = arith.constant 0 : index
    %201 = vector.load %arg2[%c4, %c0_88, %c0_89] : memref<8x8x1xf32, #tpu.memory_space<vmem>>, vector<1x8x1xf32>
    %202 = vector.shape_cast %201 : vector<1x8x1xf32> to vector<8x1xf32>
    %203 = vector.broadcast %202 : vector<8x1xf32> to vector<8x256xf32>
    %204 = arith.mulf %191, %203 : vector<8x256xf32>
    %205 = vector.broadcast %202 : vector<8x1xf32> to vector<8x256xf32>
    %206 = arith.mulf %192, %205 : vector<8x256xf32>
    %c4_90 = arith.constant 4 : index
    %c0_91 = arith.constant 0 : index
    %c0_92 = arith.constant 0 : index
    %207 = vector.load %arg1[%c4_90, %c0_91, %c0_92] : memref<8x8x1024xf32, #tpu.memory_space<vmem>>, vector<1x8x1024xf32>
    %208 = vector.shape_cast %207 : vector<1x8x1024xf32> to vector<8x1024xf32>
    %c0_93 = arith.constant 0 : index
    %c0_94 = arith.constant 0 : index
    %209 = vector.load %arg5[%c0_93, %c0_94] : memref<256x1024xf32, #tpu.memory_space<vmem>>, vector<256x1024xf32>
    %cst_95 = arith.constant dense<0.000000e+00> : vector<8x1024xf32>
    %210 = tpu.matmul %204, %209, %cst_95 {dimension_numbers = #tpu.dot_dimension_numbers<[1], [0], [0], [1], [0, 0, 1, 1], [], []>} : vector<8x256xf32>, vector<256x1024xf32>, vector<8x1024xf32> -> vector<8x1024xf32>
    %211 = arith.addf %208, %210 : vector<8x1024xf32>
    %212 = vector.extract_strided_slice %211 {offsets = [0, 0], sizes = [8, 256], strides = [1, 1]} : vector<8x1024xf32> to vector<8x256xf32>
    %213 = arith.negf %212 : vector<8x256xf32>
    %214 = math.exp %213 : vector<8x256xf32>
    %cst_96 = arith.constant 1.000000e+00 : f32
    %215 = vector.broadcast %cst_96 : f32 to vector<8x256xf32>
    %216 = arith.addf %215, %214 : vector<8x256xf32>
    %217 = arith.divf %215, %216 : vector<8x256xf32>
    %218 = vector.extract_strided_slice %211 {offsets = [0, 256], sizes = [8, 256], strides = [1, 1]} : vector<8x1024xf32> to vector<8x256xf32>
    %219 = arith.negf %218 : vector<8x256xf32>
    %220 = math.exp %219 : vector<8x256xf32>
    %cst_97 = arith.constant 1.000000e+00 : f32
    %221 = vector.broadcast %cst_97 : f32 to vector<8x256xf32>
    %222 = arith.addf %221, %220 : vector<8x256xf32>
    %223 = arith.divf %221, %222 : vector<8x256xf32>
    %224 = vector.extract_strided_slice %211 {offsets = [0, 512], sizes = [8, 256], strides = [1, 1]} : vector<8x1024xf32> to vector<8x256xf32>
    %225 = math.tanh %224 : vector<8x256xf32>
    %226 = vector.extract_strided_slice %211 {offsets = [0, 768], sizes = [8, 256], strides = [1, 1]} : vector<8x1024xf32> to vector<8x256xf32>
    %227 = arith.negf %226 : vector<8x256xf32>
    %228 = math.exp %227 : vector<8x256xf32>
    %cst_98 = arith.constant 1.000000e+00 : f32
    %229 = vector.broadcast %cst_98 : f32 to vector<8x256xf32>
    %230 = arith.addf %229, %228 : vector<8x256xf32>
    %231 = arith.divf %229, %230 : vector<8x256xf32>
    %232 = arith.mulf %223, %206 : vector<8x256xf32>
    %233 = arith.mulf %217, %225 : vector<8x256xf32>
    %234 = arith.addf %232, %233 : vector<8x256xf32>
    %235 = math.tanh %234 : vector<8x256xf32>
    %236 = arith.mulf %231, %235 : vector<8x256xf32>
    %c8_i32_99 = arith.constant 8 : i32
    %237 = arith.muli %arg0, %c8_i32_99 : i32
    %c4_i32 = arith.constant 4 : i32
    %238 = arith.addi %237, %c4_i32 : i32
    %c3_i32_100 = arith.constant 3 : i32
    %239 = arith.cmpi slt, %238, %c3_i32_100 : i32
    %240 = arith.select %239, %236, %191 : vector<8x256xf32>
    %241 = arith.select %239, %234, %192 : vector<8x256xf32>
    %c0_101 = arith.constant 0 : index
    %c0_102 = arith.constant 0 : index
    %242 = vector.load %arg6[%c0_101, %c0_102] : memref<256x5xf32, #tpu.memory_space<vmem>>, vector<256x5xf32>
    %cst_103 = arith.constant dense<0.000000e+00> : vector<8x5xf32>
    %243 = tpu.matmul %240, %242, %cst_103 {dimension_numbers = #tpu.dot_dimension_numbers<[1], [0], [0], [1], [0, 0, 1, 1], [], []>} : vector<8x256xf32>, vector<256x5xf32>, vector<8x5xf32> -> vector<8x5xf32>
    %c0_104 = arith.constant 0 : index
    %c0_105 = arith.constant 0 : index
    %244 = vector.load %arg7[%c0_104, %c0_105] : memref<1x5xf32, #tpu.memory_space<vmem>>, vector<1x5xf32>
    %245 = vector.broadcast %244 : vector<1x5xf32> to vector<8x5xf32>
    %246 = arith.addf %243, %245 : vector<8x5xf32>
    %c4_106 = arith.constant 4 : index
    %c0_107 = arith.constant 0 : index
    %c0_108 = arith.constant 0 : index
    %247 = vector.load %arg8[%c4_106, %c0_107, %c0_108] : memref<8x8x5xf32, #tpu.memory_space<vmem>>, vector<1x8x5xf32>
    %248 = vector.shape_cast %247 : vector<1x8x5xf32> to vector<8x5xf32>
    %249 = vector.shape_cast %246 : vector<8x5xf32> to vector<1x8x5xf32>
    tpu.vector_store %arg8[%c4_106, %c0_107, %c0_108], %249 {strides = array<i32>} : memref<8x8x5xf32, #tpu.memory_space<vmem>>, vector<1x8x5xf32>,
    %c5 = arith.constant 5 : index
    %c0_109 = arith.constant 0 : index
    %c0_110 = arith.constant 0 : index
    %250 = vector.load %arg2[%c5, %c0_109, %c0_110] : memref<8x8x1xf32, #tpu.memory_space<vmem>>, vector<1x8x1xf32>
    %251 = vector.shape_cast %250 : vector<1x8x1xf32> to vector<8x1xf32>
    %252 = vector.broadcast %251 : vector<8x1xf32> to vector<8x256xf32>
    %253 = arith.mulf %240, %252 : vector<8x256xf32>
    %254 = vector.broadcast %251 : vector<8x1xf32> to vector<8x256xf32>
    %255 = arith.mulf %241, %254 : vector<8x256xf32>
    %c5_111 = arith.constant 5 : index
    %c0_112 = arith.constant 0 : index
    %c0_113 = arith.constant 0 : index
    %256 = vector.load %arg1[%c5_111, %c0_112, %c0_113] : memref<8x8x1024xf32, #tpu.memory_space<vmem>>, vector<1x8x1024xf32>
    %257 = vector.shape_cast %256 : vector<1x8x1024xf32> to vector<8x1024xf32>
    %c0_114 = arith.constant 0 : index
    %c0_115 = arith.constant 0 : index
    %258 = vector.load %arg5[%c0_114, %c0_115] : memref<256x1024xf32, #tpu.memory_space<vmem>>, vector<256x1024xf32>
    %cst_116 = arith.constant dense<0.000000e+00> : vector<8x1024xf32>
    %259 = tpu.matmul %253, %258, %cst_116 {dimension_numbers = #tpu.dot_dimension_numbers<[1], [0], [0], [1], [0, 0, 1, 1], [], []>} : vector<8x256xf32>, vector<256x1024xf32>, vector<8x1024xf32> -> vector<8x1024xf32>
    %260 = arith.addf %257, %259 : vector<8x1024xf32>
    %261 = vector.extract_strided_slice %260 {offsets = [0, 0], sizes = [8, 256], strides = [1, 1]} : vector<8x1024xf32> to vector<8x256xf32>
    %262 = arith.negf %261 : vector<8x256xf32>
    %263 = math.exp %262 : vector<8x256xf32>
    %cst_117 = arith.constant 1.000000e+00 : f32
    %264 = vector.broadcast %cst_117 : f32 to vector<8x256xf32>
    %265 = arith.addf %264, %263 : vector<8x256xf32>
    %266 = arith.divf %264, %265 : vector<8x256xf32>
    %267 = vector.extract_strided_slice %260 {offsets = [0, 256], sizes = [8, 256], strides = [1, 1]} : vector<8x1024xf32> to vector<8x256xf32>
    %268 = arith.negf %267 : vector<8x256xf32>
    %269 = math.exp %268 : vector<8x256xf32>
    %cst_118 = arith.constant 1.000000e+00 : f32
    %270 = vector.broadcast %cst_118 : f32 to vector<8x256xf32>
    %271 = arith.addf %270, %269 : vector<8x256xf32>
    %272 = arith.divf %270, %271 : vector<8x256xf32>
    %273 = vector.extract_strided_slice %260 {offsets = [0, 512], sizes = [8, 256], strides = [1, 1]} : vector<8x1024xf32> to vector<8x256xf32>
    %274 = math.tanh %273 : vector<8x256xf32>
    %275 = vector.extract_strided_slice %260 {offsets = [0, 768], sizes = [8, 256], strides = [1, 1]} : vector<8x1024xf32> to vector<8x256xf32>
    %276 = arith.negf %275 : vector<8x256xf32>
    %277 = math.exp %276 : vector<8x256xf32>
    %cst_119 = arith.constant 1.000000e+00 : f32
    %278 = vector.broadcast %cst_119 : f32 to vector<8x256xf32>
    %279 = arith.addf %278, %277 : vector<8x256xf32>
    %280 = arith.divf %278, %279 : vector<8x256xf32>
    %281 = arith.mulf %272, %255 : vector<8x256xf32>
    %282 = arith.mulf %266, %274 : vector<8x256xf32>
    %283 = arith.addf %281, %282 : vector<8x256xf32>
    %284 = math.tanh %283 : vector<8x256xf32>
    %285 = arith.mulf %280, %284 : vector<8x256xf32>
    %c8_i32_120 = arith.constant 8 : i32
    %286 = arith.muli %arg0, %c8_i32_120 : i32
    %c5_i32 = arith.constant 5 : i32
    %287 = arith.addi %286, %c5_i32 : i32
    %c3_i32_121 = arith.constant 3 : i32
    %288 = arith.cmpi slt, %287, %c3_i32_121 : i32
    %289 = arith.select %288, %285, %240 : vector<8x256xf32>
    %290 = arith.select %288, %283, %241 : vector<8x256xf32>
    %c0_122 = arith.constant 0 : index
    %c0_123 = arith.constant 0 : index
    %291 = vector.load %arg6[%c0_122, %c0_123] : memref<256x5xf32, #tpu.memory_space<vmem>>, vector<256x5xf32>
    %cst_124 = arith.constant dense<0.000000e+00> : vector<8x5xf32>
    %292 = tpu.matmul %289, %291, %cst_124 {dimension_numbers = #tpu.dot_dimension_numbers<[1], [0], [0], [1], [0, 0, 1, 1], [], []>} : vector<8x256xf32>, vector<256x5xf32>, vector<8x5xf32> -> vector<8x5xf32>
    %c0_125 = arith.constant 0 : index
    %c0_126 = arith.constant 0 : index
    %293 = vector.load %arg7[%c0_125, %c0_126] : memref<1x5xf32, #tpu.memory_space<vmem>>, vector<1x5xf32>
    %294 = vector.broadcast %293 : vector<1x5xf32> to vector<8x5xf32>
    %295 = arith.addf %292, %294 : vector<8x5xf32>
    %c5_127 = arith.constant 5 : index
    %c0_128 = arith.constant 0 : index
    %c0_129 = arith.constant 0 : index
    %296 = vector.load %arg8[%c5_127, %c0_128, %c0_129] : memref<8x8x5xf32, #tpu.memory_space<vmem>>, vector<1x8x5xf32>
    %297 = vector.shape_cast %296 : vector<1x8x5xf32> to vector<8x5xf32>
    %298 = vector.shape_cast %295 : vector<8x5xf32> to vector<1x8x5xf32>
    tpu.vector_store %arg8[%c5_127, %c0_128, %c0_129], %298 {strides = array<i32>} : memref<8x8x5xf32, #tpu.memory_space<vmem>>, vector<1x8x5xf32>,
    %c6 = arith.constant 6 : index
    %c0_130 = arith.constant 0 : index
    %c0_131 = arith.constant 0 : index
    %299 = vector.load %arg2[%c6, %c0_130, %c0_131] : memref<8x8x1xf32, #tpu.memory_space<vmem>>, vector<1x8x1xf32>
    %300 = vector.shape_cast %299 : vector<1x8x1xf32> to vector<8x1xf32>
    %301 = vector.broadcast %300 : vector<8x1xf32> to vector<8x256xf32>
    %302 = arith.mulf %289, %301 : vector<8x256xf32>
    %303 = vector.broadcast %300 : vector<8x1xf32> to vector<8x256xf32>
    %304 = arith.mulf %290, %303 : vector<8x256xf32>
    %c6_132 = arith.constant 6 : index
    %c0_133 = arith.constant 0 : index
    %c0_134 = arith.constant 0 : index
    %305 = vector.load %arg1[%c6_132, %c0_133, %c0_134] : memref<8x8x1024xf32, #tpu.memory_space<vmem>>, vector<1x8x1024xf32>
    %306 = vector.shape_cast %305 : vector<1x8x1024xf32> to vector<8x1024xf32>
    %c0_135 = arith.constant 0 : index
    %c0_136 = arith.constant 0 : index
    %307 = vector.load %arg5[%c0_135, %c0_136] : memref<256x1024xf32, #tpu.memory_space<vmem>>, vector<256x1024xf32>
    %cst_137 = arith.constant dense<0.000000e+00> : vector<8x1024xf32>
    %308 = tpu.matmul %302, %307, %cst_137 {dimension_numbers = #tpu.dot_dimension_numbers<[1], [0], [0], [1], [0, 0, 1, 1], [], []>} : vector<8x256xf32>, vector<256x1024xf32>, vector<8x1024xf32> -> vector<8x1024xf32>
    %309 = arith.addf %306, %308 : vector<8x1024xf32>
    %310 = vector.extract_strided_slice %309 {offsets = [0, 0], sizes = [8, 256], strides = [1, 1]} : vector<8x1024xf32> to vector<8x256xf32>
    %311 = arith.negf %310 : vector<8x256xf32>
    %312 = math.exp %311 : vector<8x256xf32>
    %cst_138 = arith.constant 1.000000e+00 : f32
    %313 = vector.broadcast %cst_138 : f32 to vector<8x256xf32>
    %314 = arith.addf %313, %312 : vector<8x256xf32>
    %315 = arith.divf %313, %314 : vector<8x256xf32>
    %316 = vector.extract_strided_slice %309 {offsets = [0, 256], sizes = [8, 256], strides = [1, 1]} : vector<8x1024xf32> to vector<8x256xf32>
    %317 = arith.negf %316 : vector<8x256xf32>
    %318 = math.exp %317 : vector<8x256xf32>
    %cst_139 = arith.constant 1.000000e+00 : f32
    %319 = vector.broadcast %cst_139 : f32 to vector<8x256xf32>
    %320 = arith.addf %319, %318 : vector<8x256xf32>
    %321 = arith.divf %319, %320 : vector<8x256xf32>
    %322 = vector.extract_strided_slice %309 {offsets = [0, 512], sizes = [8, 256], strides = [1, 1]} : vector<8x1024xf32> to vector<8x256xf32>
    %323 = math.tanh %322 : vector<8x256xf32>
    %324 = vector.extract_strided_slice %309 {offsets = [0, 768], sizes = [8, 256], strides = [1, 1]} : vector<8x1024xf32> to vector<8x256xf32>
    %325 = arith.negf %324 : vector<8x256xf32>
    %326 = math.exp %325 : vector<8x256xf32>
    %cst_140 = arith.constant 1.000000e+00 : f32
    %327 = vector.broadcast %cst_140 : f32 to vector<8x256xf32>
    %328 = arith.addf %327, %326 : vector<8x256xf32>
    %329 = arith.divf %327, %328 : vector<8x256xf32>
    %330 = arith.mulf %321, %304 : vector<8x256xf32>
    %331 = arith.mulf %315, %323 : vector<8x256xf32>
    %332 = arith.addf %330, %331 : vector<8x256xf32>
    %333 = math.tanh %332 : vector<8x256xf32>
    %334 = arith.mulf %329, %333 : vector<8x256xf32>
    %c8_i32_141 = arith.constant 8 : i32
    %335 = arith.muli %arg0, %c8_i32_141 : i32
    %c6_i32 = arith.constant 6 : i32
    %336 = arith.addi %335, %c6_i32 : i32
    %c3_i32_142 = arith.constant 3 : i32
    %337 = arith.cmpi slt, %336, %c3_i32_142 : i32
    %338 = arith.select %337, %334, %289 : vector<8x256xf32>
    %339 = arith.select %337, %332, %290 : vector<8x256xf32>
    %c0_143 = arith.constant 0 : index
    %c0_144 = arith.constant 0 : index
    %340 = vector.load %arg6[%c0_143, %c0_144] : memref<256x5xf32, #tpu.memory_space<vmem>>, vector<256x5xf32>
    %cst_145 = arith.constant dense<0.000000e+00> : vector<8x5xf32>
    %341 = tpu.matmul %338, %340, %cst_145 {dimension_numbers = #tpu.dot_dimension_numbers<[1], [0], [0], [1], [0, 0, 1, 1], [], []>} : vector<8x256xf32>, vector<256x5xf32>, vector<8x5xf32> -> vector<8x5xf32>
    %c0_146 = arith.constant 0 : index
    %c0_147 = arith.constant 0 : index
    %342 = vector.load %arg7[%c0_146, %c0_147] : memref<1x5xf32, #tpu.memory_space<vmem>>, vector<1x5xf32>
    %343 = vector.broadcast %342 : vector<1x5xf32> to vector<8x5xf32>
    %344 = arith.addf %341, %343 : vector<8x5xf32>
    %c6_148 = arith.constant 6 : index
    %c0_149 = arith.constant 0 : index
    %c0_150 = arith.constant 0 : index
    %345 = vector.load %arg8[%c6_148, %c0_149, %c0_150] : memref<8x8x5xf32, #tpu.memory_space<vmem>>, vector<1x8x5xf32>
    %346 = vector.shape_cast %345 : vector<1x8x5xf32> to vector<8x5xf32>
    %347 = vector.shape_cast %344 : vector<8x5xf32> to vector<1x8x5xf32>
    tpu.vector_store %arg8[%c6_148, %c0_149, %c0_150], %347 {strides = array<i32>} : memref<8x8x5xf32, #tpu.memory_space<vmem>>, vector<1x8x5xf32>,
    %c7 = arith.constant 7 : index
    %c0_151 = arith.constant 0 : index
    %c0_152 = arith.constant 0 : index
    %348 = vector.load %arg2[%c7, %c0_151, %c0_152] : memref<8x8x1xf32, #tpu.memory_space<vmem>>, vector<1x8x1xf32>
    %349 = vector.shape_cast %348 : vector<1x8x1xf32> to vector<8x1xf32>
    %350 = vector.broadcast %349 : vector<8x1xf32> to vector<8x256xf32>
    %351 = arith.mulf %338, %350 : vector<8x256xf32>
    %352 = vector.broadcast %349 : vector<8x1xf32> to vector<8x256xf32>
    %353 = arith.mulf %339, %352 : vector<8x256xf32>
    %c7_153 = arith.constant 7 : index
    %c0_154 = arith.constant 0 : index
    %c0_155 = arith.constant 0 : index
    %354 = vector.load %arg1[%c7_153, %c0_154, %c0_155] : memref<8x8x1024xf32, #tpu.memory_space<vmem>>, vector<1x8x1024xf32>
    %355 = vector.shape_cast %354 : vector<1x8x1024xf32> to vector<8x1024xf32>
    %c0_156 = arith.constant 0 : index
    %c0_157 = arith.constant 0 : index
    %356 = vector.load %arg5[%c0_156, %c0_157] : memref<256x1024xf32, #tpu.memory_space<vmem>>, vector<256x1024xf32>
    %cst_158 = arith.constant dense<0.000000e+00> : vector<8x1024xf32>
    %357 = tpu.matmul %351, %356, %cst_158 {dimension_numbers = #tpu.dot_dimension_numbers<[1], [0], [0], [1], [0, 0, 1, 1], [], []>} : vector<8x256xf32>, vector<256x1024xf32>, vector<8x1024xf32> -> vector<8x1024xf32>
    %358 = arith.addf %355, %357 : vector<8x1024xf32>
    %359 = vector.extract_strided_slice %358 {offsets = [0, 0], sizes = [8, 256], strides = [1, 1]} : vector<8x1024xf32> to vector<8x256xf32>
    %360 = arith.negf %359 : vector<8x256xf32>
    %361 = math.exp %360 : vector<8x256xf32>
    %cst_159 = arith.constant 1.000000e+00 : f32
    %362 = vector.broadcast %cst_159 : f32 to vector<8x256xf32>
    %363 = arith.addf %362, %361 : vector<8x256xf32>
    %364 = arith.divf %362, %363 : vector<8x256xf32>
    %365 = vector.extract_strided_slice %358 {offsets = [0, 256], sizes = [8, 256], strides = [1, 1]} : vector<8x1024xf32> to vector<8x256xf32>
    %366 = arith.negf %365 : vector<8x256xf32>
    %367 = math.exp %366 : vector<8x256xf32>
    %cst_160 = arith.constant 1.000000e+00 : f32
    %368 = vector.broadcast %cst_160 : f32 to vector<8x256xf32>
    %369 = arith.addf %368, %367 : vector<8x256xf32>
    %370 = arith.divf %368, %369 : vector<8x256xf32>
    %371 = vector.extract_strided_slice %358 {offsets = [0, 512], sizes = [8, 256], strides = [1, 1]} : vector<8x1024xf32> to vector<8x256xf32>
    %372 = math.tanh %371 : vector<8x256xf32>
    %373 = vector.extract_strided_slice %358 {offsets = [0, 768], sizes = [8, 256], strides = [1, 1]} : vector<8x1024xf32> to vector<8x256xf32>
    %374 = arith.negf %373 : vector<8x256xf32>
    %375 = math.exp %374 : vector<8x256xf32>
    %cst_161 = arith.constant 1.000000e+00 : f32
    %376 = vector.broadcast %cst_161 : f32 to vector<8x256xf32>
    %377 = arith.addf %376, %375 : vector<8x256xf32>
    %378 = arith.divf %376, %377 : vector<8x256xf32>
    %379 = arith.mulf %370, %353 : vector<8x256xf32>
    %380 = arith.mulf %364, %372 : vector<8x256xf32>
    %381 = arith.addf %379, %380 : vector<8x256xf32>
    %382 = math.tanh %381 : vector<8x256xf32>
    %383 = arith.mulf %378, %382 : vector<8x256xf32>
    %c8_i32_162 = arith.constant 8 : i32
    %384 = arith.muli %arg0, %c8_i32_162 : i32
    %c7_i32 = arith.constant 7 : i32
    %385 = arith.addi %384, %c7_i32 : i32
    %c3_i32_163 = arith.constant 3 : i32
    %386 = arith.cmpi slt, %385, %c3_i32_163 : i32
    %387 = arith.select %386, %383, %338 : vector<8x256xf32>
    %388 = arith.select %386, %381, %339 : vector<8x256xf32>
    %c0_164 = arith.constant 0 : index
    %c0_165 = arith.constant 0 : index
    %389 = vector.load %arg6[%c0_164, %c0_165] : memref<256x5xf32, #tpu.memory_space<vmem>>, vector<256x5xf32>
    %cst_166 = arith.constant dense<0.000000e+00> : vector<8x5xf32>
    %390 = tpu.matmul %387, %389, %cst_166 {dimension_numbers = #tpu.dot_dimension_numbers<[1], [0], [0], [1], [0, 0, 1, 1], [], []>} : vector<8x256xf32>, vector<256x5xf32>, vector<8x5xf32> -> vector<8x5xf32>
    %c0_167 = arith.constant 0 : index
    %c0_168 = arith.constant 0 : index
    %391 = vector.load %arg7[%c0_167, %c0_168] : memref<1x5xf32, #tpu.memory_space<vmem>>, vector<1x5xf32>
    %392 = vector.broadcast %391 : vector<1x5xf32> to vector<8x5xf32>
    %393 = arith.addf %390, %392 : vector<8x5xf32>
    %c7_169 = arith.constant 7 : index
    %c0_170 = arith.constant 0 : index
    %c0_171 = arith.constant 0 : index
    %394 = vector.load %arg8[%c7_169, %c0_170, %c0_171] : memref<8x8x5xf32, #tpu.memory_space<vmem>>, vector<1x8x5xf32>
    %395 = vector.shape_cast %394 : vector<1x8x5xf32> to vector<8x5xf32>
    %396 = vector.shape_cast %393 : vector<8x5xf32> to vector<1x8x5xf32>
    tpu.vector_store %arg8[%c7_169, %c0_170, %c0_171], %396 {strides = array<i32>} : memref<8x8x5xf32, #tpu.memory_space<vmem>>, vector<1x8x5xf32>,
    %c0_172 = arith.constant 0 : index
    %c0_173 = arith.constant 0 : index
    %397 = vector.load %arg11[%c0_172, %c0_173] : memref<8x256xf32, #tpu.memory_space<vmem>>, vector<8x256xf32>
    tpu.vector_store %arg11[%c0_172, %c0_173], %387 {strides = array<i32>} : memref<8x256xf32, #tpu.memory_space<vmem>>, vector<8x256xf32>,
    %c0_174 = arith.constant 0 : index
    %c0_175 = arith.constant 0 : index
    %398 = vector.load %arg12[%c0_174, %c0_175] : memref<8x256xf32, #tpu.memory_space<vmem>>, vector<8x256xf32>
    tpu.vector_store %arg12[%c0_174, %c0_175], %388 {strides = array<i32>} : memref<8x256xf32, #tpu.memory_space<vmem>>, vector<8x256xf32>,
    %c0_i32_176 = arith.constant 0 : i32
    %399 = arith.cmpi eq, %arg0, %c0_i32_176 : i32
    %400 = arith.extui %399 : i1 to i32
    %c0_i32_177 = arith.constant 0 : i32
    %401 = arith.cmpi ne, %400, %c0_i32_177 : i32
    scf.if %401 {
      %c0_178 = arith.constant 0 : index
      %c0_179 = arith.constant 0 : index
      %402 = vector.load %arg9[%c0_178, %c0_179] : memref<8x256xf32, #tpu.memory_space<vmem>>, vector<8x256xf32>
      tpu.vector_store %arg9[%c0_178, %c0_179], %387 {strides = array<i32>} : memref<8x256xf32, #tpu.memory_space<vmem>>, vector<8x256xf32>,
      %c0_180 = arith.constant 0 : index
      %c0_181 = arith.constant 0 : index
      %403 = vector.load %arg10[%c0_180, %c0_181] : memref<8x256xf32, #tpu.memory_space<vmem>>, vector<8x256xf32>
      tpu.vector_store %arg10[%c0_180, %c0_181], %388 {strides = array<i32>} : memref<8x256xf32, #tpu.memory_space<vmem>>, vector<8x256xf32>,
    } else {
    }
    return
  }
  func.func @transform_0(%arg0: i32) -> (i32, i32, i32) {
    %c0_i32 = arith.constant 0 : i32
    %c0_i32_0 = arith.constant 0 : i32
    %c0_i32_1 = arith.constant 0 : i32
    return %arg0, %c0_i32, %c0_i32_0 : i32, i32, i32
  }
  func.func @transform_1(%arg0: i32) -> (i32, i32, i32) {
    %c0_i32 = arith.constant 0 : i32
    %c0_i32_0 = arith.constant 0 : i32
    %c0_i32_1 = arith.constant 0 : i32
    return %arg0, %c0_i32, %c0_i32_0 : i32, i32, i32
  }
  func.func @transform_2(%arg0: i32) -> (i32, i32) {
    %c0_i32 = arith.constant 0 : i32
    %c0_i32_0 = arith.constant 0 : i32
    %c0_i32_1 = arith.constant 0 : i32
    return %c0_i32, %c0_i32_0 : i32, i32
  }
  func.func @transform_3(%arg0: i32) -> (i32, i32) {
    %c0_i32 = arith.constant 0 : i32
    %c0_i32_0 = arith.constant 0 : i32
    %c0_i32_1 = arith.constant 0 : i32
    return %c0_i32, %c0_i32_0 : i32, i32
  }
  func.func @transform_4(%arg0: i32) -> (i32, i32) {
    %c0_i32 = arith.constant 0 : i32
    %c0_i32_0 = arith.constant 0 : i32
    %c0_i32_1 = arith.constant 0 : i32
    return %c0_i32, %c0_i32_0 : i32, i32
  }
  func.func @transform_5(%arg0: i32) -> (i32, i32) {
    %c0_i32 = arith.constant 0 : i32
    %c0_i32_0 = arith.constant 0 : i32
    %c0_i32_1 = arith.constant 0 : i32
    return %c0_i32, %c0_i32_0 : i32, i32
  }
  func.func @transform_6(%arg0: i32) -> (i32, i32) {
    %c0_i32 = arith.constant 0 : i32
    %c0_i32_0 = arith.constant 0 : i32
    %c0_i32_1 = arith.constant 0 : i32
    return %c0_i32, %c0_i32_0 : i32, i32
  }
  func.func @transform_7(%arg0: i32) -> (i32, i32, i32) {
    %c0_i32 = arith.constant 0 : i32
    %c0_i32_0 = arith.constant 0 : i32
    %c0_i32_1 = arith.constant 0 : i32
    return %arg0, %c0_i32, %c0_i32_0 : i32, i32, i32
  }
  func.func @transform_8(%arg0: i32) -> (i32, i32) {
    %c0_i32 = arith.constant 0 : i32
    %c0_i32_0 = arith.constant 0 : i32
    %c0_i32_1 = arith.constant 0 : i32
    return %c0_i32, %c0_i32_0 : i32, i32
  }
  func.func @transform_9(%arg0: i32) -> (i32, i32) {
    %c0_i32 = arith.constant 0 : i32
    %c0_i32_0 = arith.constant 0 : i32
    %c0_i32_1 = arith.constant 0 : i32
    return %c0_i32, %c0_i32_0 : i32, i32
  }
}

</mosaic_0001>

<bundles_post_ra>
// kernel: lstm_model_forward.5
= control target key start
LH: loop header
LB: loop body
LE: loop exit
PB: predicated region body
PF: predicated region fallthrough
CT: control target
= control target key end

     0   :  { %s1277_s12 = smov 0   ;;  %s1575_s0 = inlined_call_operand.vmem [shape: bf16[2560,64], index: 0, kind: input, shape index: {}]   ;;  %s1576_s1 = inlined_call_operand.vmem [shape: bf16[64,16], index: 1, kind: input, shape index: {}]   ;;  %s1577_s2 = inlined_call_operand.vmem [shape: f32[1,16], index: 2, kind: input, shape index: {}]   ;;  %s1578_s3 = inlined_call_operand.vmem [shape: f32[2560,16], index: 3, kind: output, shape index: {}]  }
   0x1 LB: > { %s1009_s13 = sadd.s32 4294967295, %s1255_s12   ;;  %p1013_p0 = scmp.ge.s32.totalorder %s1255_s12, 1  ;;  %s1255_s12 = sphi %s1277_s12, %s13_s12  }
   0x2   : > { %p138_p1 = scmp.lt.s32.totalorder %s1255_s12, 6 }
   0x4   : > { %p139_p2 = pnand %p1013_p0, %p138_p1 }
   0x5   : > { %v1213_v0 = vld [vmem:[%s1576_s1] sm:$0xff] (!%p139_p2)   ;;  %s1014_s16 = sshll.u32 (!%p139_p2), %s1009_s13, 6  ;;  %v1214_v1 = vld [vmem:[%s1576_s1 + $0x8] sm:$0xff] (!%p139_p2)   ;;  %v1215_v2 = vld [vmem:[%s1576_s1 + $0x10] sm:$0xff] (!%p139_p2)   ;;  %vm438_vm0 = vcmask (!%p139_p2), 523264   ;;  %vm888_vm1 = vcmask (!%p139_p2), 130048  }
   0x6   : > { %142 = sbr.rel (%p139_p2) target bundleno = 298 (0x12a), region = 32  ;;  %p163_p3 = scmp.lt.s32.totalorder (!%p139_p2), %s1014_s16, 319  ;;  %1125 = vmatprep.subr.bf16.mxu0 (!%p139_p2), %v1213_v0  ;;  %1197 = vmatprep.subr.bf16.mxu1 (!%p139_p2), %v1213_v0  ;;  %v1216_v3 = vld [vmem:[%s1576_s1 + $0x18] sm:$0xff] (!%p139_p2)   ;;  %v1372_v36 = vld [vmem:[%s1577_s2] ss:$0 sm:$0xff] (!%p139_p2) }
   0x7   : > { %1126 = vmatpush3.bf16.msra.mxu0 (!%p139_p2), %v1213_v0  ;;  %1201 = vmatpush3.bf16.msra.mxu1 (!%p139_p2), %v1213_v0 }
   0x8   : > { %1127 = vmatprep.subr.bf16.mxu0 (!%p139_p2), %v1214_v1  ;;  %1198 = vmatprep.subr.bf16.mxu1 (!%p139_p2), %v1214_v1 }
   0xb   : > { %1128 = vmatpush3.bf16.msra.mxu0 (!%p139_p2), %v1214_v1  ;;  %1202 = vmatpush3.bf16.msra.mxu1 (!%p139_p2), %v1214_v1 }
   0xc   : > { %1129 = vmatprep.subr.bf16.mxu0 (!%p139_p2), %v1215_v2  ;;  %1199 = vmatprep.subr.bf16.mxu1 (!%p139_p2), %v1215_v2 }
   0xd   : > { %s1580_s16 = smov (!%p163_p3, %s1014_s16), 319 }
   0xe   : > { %s1015_s21 = sshll.u32 %s1580_s16, 2  ;;  %s1017_s29 = sshll.u32 %s1580_s16, 3 }
   0xf   : > { %s1303_s26 = scalar_lea.vmem %s1575_s0, %s1015_s21  ;;  %1130 = vmatpush3.bf16.msra.mxu0 %v1215_v2  ;;  %1203 = vmatpush3.bf16.msra.mxu1 %v1215_v2  ;;  %s1380_s5 = scalar_lea.vmem %s1578_s3, %s1017_s29 }
  0x10   : > { %v1217_v4 = vld [vmem:[%s1303_s26] sm:$0xff]   ;;  %1131 = vmatprep.subr.bf16.mxu0 %v1216_v3  ;;  %1200 = vmatprep.subr.bf16.mxu1 %v1216_v3  ;;  %v1219_v6 = vld [vmem:[%s1303_s26 + $0x8] sm:$0xff]   ;;  %v1221_v8 = vld [vmem:[%s1303_s26 + $0x10] sm:$0xff]  }
  0x11   : > { %v1218_v5 = vld [vmem:[%s1303_s26 + $0x80] sm:$0xff]   ;;  %1133 = vmatprep.mubr.msk.bf16.mxu0 %vm438_vm0, %v1217_v4  ;;  %v1220_v7 = vld [vmem:[%s1303_s26 + $0x88] sm:$0xff]   ;;  %v1222_v9 = vld [vmem:[%s1303_s26 + $0x90] sm:$0xff]  }
  0x12   : > { %1165 = vmatprep.mubr.msk.bf16.mxu1 %vm438_vm0, %v1218_v5  ;;  %v1223_v10 = vld [vmem:[%s1303_s26 + $0x18] sm:$0xff]   ;;  %v1225_v12 = vld [vmem:[%s1303_s26 + $0x20] sm:$0xff]   ;;  %v1227_v14 = vld [vmem:[%s1303_s26 + $0x28] sm:$0xff]  }
  0x13   : > { %1132 = vmatpush3.bf16.msra.mxu0 %v1216_v3  ;;  %1204 = vmatpush3.bf16.msra.mxu1 %v1216_v3  ;;  %v1224_v11 = vld [vmem:[%s1303_s26 + $0x98] sm:$0xff]   ;;  %v1226_v13 = vld [vmem:[%s1303_s26 + $0xa0] sm:$0xff]   ;;  %v1228_v15 = vld [vmem:[%s1303_s26 + $0xa8] sm:$0xff]  }
  0x14   : > { %v1229_v16 = vld [vmem:[%s1303_s26 + $0x30] sm:$0xff]   ;;  %v1231_v18 = vld [vmem:[%s1303_s26 + $0x38] sm:$0xff]   ;;  %v1233_v20 = vld [vmem:[%s1303_s26 + $0x40] sm:$0xff]  }
  0x15   : > { %v1230_v17 = vld [vmem:[%s1303_s26 + $0xb0] sm:$0xff]   ;;  %v1232_v19 = vld [vmem:[%s1303_s26 + $0xb8] sm:$0xff]   ;;  %v1234_v21 = vld [vmem:[%s1303_s26 + $0xc0] sm:$0xff]  }
  0x16   : > { %1134 = vmatmul.mubr.msk.bf16.vlgmr.msra.gmra.mrb[0].mxu0 %vm438_vm0, %v1219_v6  ;;  %1166 = vmatmul.mubr.msk.bf16.vlgmr.msra.gmra.mrb[0].mxu1 %vm438_vm0, %v1220_v7  ;;  %v1235_v22 = vld [vmem:[%s1303_s26 + $0x48] sm:$0xff]   ;;  %v1237_v24 = vld [vmem:[%s1303_s26 + $0x50] sm:$0xff]   ;;  %v1239_v26 = vld [vmem:[%s1303_s26 + $0x58] sm:$0xff]  }
  0x17   : > { %1137 = vmatprep.mubr.msk.bf16.mxu0 %vm438_vm0, %v1221_v8  ;;  %1169 = vmatprep.mubr.msk.bf16.mxu1 %vm438_vm0, %v1222_v9  ;;  %v1236_v23 = vld [vmem:[%s1303_s26 + $0xc8] sm:$0xff]   ;;  %v1238_v25 = vld [vmem:[%s1303_s26 + $0xd0] sm:$0xff]   ;;  %v1240_v27 = vld [vmem:[%s1303_s26 + $0xd8] sm:$0xff]  }
  0x18   : > { %v1241_v28 = vld [vmem:[%s1303_s26 + $0x60] sm:$0xff]   ;;  %v1243_v30 = vld [vmem:[%s1303_s26 + $0x68] sm:$0xff]   ;;  %v1245_v32 = vld [vmem:[%s1303_s26 + $0x70] sm:$0xff]  }
  0x19   : > { %v1242_v29 = vld [vmem:[%s1303_s26 + $0xe0] sm:$0xff]   ;;  %v1244_v31 = vld [vmem:[%s1303_s26 + $0xe8] sm:$0xff]   ;;  %v1246_v33 = vld [vmem:[%s1303_s26 + $0xf0] sm:$0xff]  }
  0x1a   : > { %v1247_v34 = vld [vmem:[%s1303_s26 + $0x78] sm:$0xff]  }
  0x1b   : > { %v1248_v35 = vld [vmem:[%s1303_s26 + $0xf8] sm:$0xff]  }
  0x1e   : > { %1138 = vmatmul.mubr.msk.bf16.gmra.mrb[4].mxu0 %vm438_vm0, %v1223_v10  ;;  %1170 = vmatmul.mubr.msk.bf16.gmra.mrb[4].mxu1 %vm438_vm0, %v1224_v11 }
  0x1f   : > { %1141 = vmatprep.mubr.msk.bf16.mxu0 %vm438_vm0, %v1225_v12  ;;  %1173 = vmatprep.mubr.msk.bf16.mxu1 %vm438_vm0, %v1226_v13 }
  0x26   : > { %1142 = vmatmul.mubr.msk.bf16.gmra.mrb[8].mxu0 %vm438_vm0, %v1227_v14  ;;  %1174 = vmatmul.mubr.msk.bf16.gmra.mrb[8].mxu1 %vm438_vm0, %v1228_v15 }
  0x27   : > { %1145 = vmatprep.mubr.msk.bf16.mxu0 %vm438_vm0, %v1229_v16  ;;  %1177 = vmatprep.mubr.msk.bf16.mxu1 %vm438_vm0, %v1230_v17 }
  0x2e   : > { %1146 = vmatmul.mubr.msk.bf16.gmra.mrb[12].mxu0 %vm438_vm0, %v1231_v18  ;;  %1178 = vmatmul.mubr.msk.bf16.gmra.mrb[12].mxu1 %vm438_vm0, %v1232_v19 }
  0x2f   : > { %1149 = vmatprep.mubr.msk.bf16.mxu0 %vm438_vm0, %v1233_v20  ;;  %1181 = vmatprep.mubr.msk.bf16.mxu1 %vm438_vm0, %v1234_v21 }
  0x36   : > { %1150 = vmatmul.mubr.msk.bf16.gmra.mrb[16].mxu0 %vm438_vm0, %v1235_v22  ;;  %1182 = vmatmul.mubr.msk.bf16.gmra.mrb[16].mxu1 %vm438_vm0, %v1236_v23 }
  0x37   : > { %1153 = vmatprep.mubr.msk.bf16.mxu0 %vm438_vm0, %v1237_v24  ;;  %1185 = vmatprep.mubr.msk.bf16.mxu1 %vm438_vm0, %v1238_v25 }
  0x3e   : > { %1154 = vmatmul.mubr.msk.bf16.gmra.mrb[20].mxu0 %vm438_vm0, %v1239_v26  ;;  %1186 = vmatmul.mubr.msk.bf16.gmra.mrb[20].mxu1 %vm438_vm0, %v1240_v27 }
  0x3f   : > { %1157 = vmatprep.mubr.msk.bf16.mxu0 %vm438_vm0, %v1241_v28  ;;  %1189 = vmatprep.mubr.msk.bf16.mxu1 %vm438_vm0, %v1242_v29 }
  0x46   : > { %1158 = vmatmul.mubr.msk.bf16.gmra.mrb[24].mxu0 %vm438_vm0, %v1243_v30  ;;  %1190 = vmatmul.mubr.msk.bf16.gmra.mrb[24].mxu1 %vm438_vm0, %v1244_v31 }
  0x47   : > { %1161 = vmatprep.mubr.msk.bf16.mxu0 %vm438_vm0, %v1245_v32  ;;  %1193 = vmatprep.mubr.msk.bf16.mxu1 %vm438_vm0, %v1246_v33 }
  0x4e   : > { %1162 = vmatmul.mubr.msk.bf16.gmra.mrb[28].mxu0 %vm438_vm0, %v1247_v34  ;;  %1194 = vmatmul.mubr.msk.bf16.gmra.mrb[28].mxu1 %vm438_vm0, %v1248_v35 }
  0xe9   : > { %v1135_v37 = vpop.f32.mrb[0].mxu0  ;;  %v1167_v38 = vpop.f32.mrb[0].mxu1 }
  0xea   : > { %v578_v39 = vadd.f32 %v1135_v37, %v1372_v36  ;;  %v706_v40 = vadd.f32 %v1167_v38, %v1372_v36  ;;  %v569_v41 = vpop.f32.mrb[1].mxu0  ;;  %v697_v42 = vpop.f32.mrb[1].mxu1 }
  0xeb   : > { %v570_v43 = vadd.f32 %v1372_v36, %v569_v41  ;;  %v698_v44 = vadd.f32 %v1372_v36, %v697_v42  ;;  %v1136_v45 = vpop.f32.mrb[2].mxu0  ;;  %v1168_v46 = vpop.f32.mrb[2].mxu1 }
  0xec   : > { %v826_v47 = vmax.f32 %v578_v39, 0.0  ;;  %v858_v48 = vmax.f32 %v706_v40, 0.0  ;;  %v581_v49 = vadd.f32 %v1136_v45, %v1372_v36  ;;  %v709_v50 = vadd.f32 %v1168_v46, %v1372_v36  ;;  %v572_v51 = vpop.f32.mrb[3].mxu0  ;;  %v700_v52 = vpop.f32.mrb[3].mxu1 }
  0xed   : > { %v824_v53 = vmax.f32 %v570_v43, 0.0  ;;  %v856_v54 = vmax.f32 %v698_v44, 0.0  ;;  %v573_v55 = vadd.f32 %v1372_v36, %v572_v51  ;;  %v701_v56 = vadd.f32 %v1372_v36, %v700_v52 }
  0xee   : > { %891 = vst.msk [vmem:[%s1380_s5 + $0x10] sm:$0xff] %vm888_vm1, %v826_v47  ;;  %923 = vst.msk [vmem:[%s1380_s5 + $0x110] sm:$0xff] %vm888_vm1, %v858_v48  ;;  %v827_v57 = vmax.f32 %v581_v49, 0.0  ;;  %v859_v58 = vmax.f32 %v709_v50, 0.0 }
  0xef   : > { %889 = vst.msk [vmem:[%s1380_s5] sm:$0xff] %vm888_vm1, %v824_v53  ;;  %921 = vst.msk [vmem:[%s1380_s5 + $0x100] sm:$0xff] %vm888_vm1, %v856_v54  ;;  %v825_v59 = vmax.f32 %v573_v55, 0.0  ;;  %v857_v60 = vmax.f32 %v701_v56, 0.0 }
  0xf0   : > { %892 = vst.msk [vmem:[%s1380_s5 + $0x18] sm:$0xff] %vm888_vm1, %v827_v57  ;;  %924 = vst.msk [vmem:[%s1380_s5 + $0x118] sm:$0xff] %vm888_vm1, %v859_v58 }
  0xf1   : > { %890 = vst.msk [vmem:[%s1380_s5 + $0x8] sm:$0xff] %vm888_vm1, %v825_v59  ;;  %922 = vst.msk [vmem:[%s1380_s5 + $0x108] sm:$0xff] %vm888_vm1, %v857_v60  ;;  %v1139_v61 = vpop.f32.mrb[4].mxu0  ;;  %v1171_v62 = vpop.f32.mrb[4].mxu1 }
  0xf2   : > { %v594_v63 = vadd.f32 %v1139_v61, %v1372_v36  ;;  %v722_v0 = vadd.f32 %v1171_v62, %v1372_v36  ;;  %v585_v1 = vpop.f32.mrb[5].mxu0  ;;  %v713_v2 = vpop.f32.mrb[5].mxu1 }
  0xf3   : > { %v586_v3 = vadd.f32 %v1372_v36, %v585_v1  ;;  %v714_v4 = vadd.f32 %v1372_v36, %v713_v2  ;;  %v1140_v5 = vpop.f32.mrb[6].mxu0  ;;  %v1172_v6 = vpop.f32.mrb[6].mxu1 }
  0xf4   : > { %v830_v7 = vmax.f32 %v594_v63, 0.0  ;;  %v862_v8 = vmax.f32 %v722_v0, 0.0  ;;  %v597_v9 = vadd.f32 %v1140_v5, %v1372_v36  ;;  %v725_v10 = vadd.f32 %v1172_v6, %v1372_v36  ;;  %v588_v11 = vpop.f32.mrb[7].mxu0  ;;  %v716_v12 = vpop.f32.mrb[7].mxu1 }
  0xf5   : > { %v828_v13 = vmax.f32 %v586_v3, 0.0  ;;  %v860_v14 = vmax.f32 %v714_v4, 0.0  ;;  %v589_v15 = vadd.f32 %v1372_v36, %v588_v11  ;;  %v717_v16 = vadd.f32 %v1372_v36, %v716_v12 }
  0xf6   : > { %895 = vst.msk [vmem:[%s1380_s5 + $0x30] sm:$0xff] %vm888_vm1, %v830_v7  ;;  %927 = vst.msk [vmem:[%s1380_s5 + $0x130] sm:$0xff] %vm888_vm1, %v862_v8  ;;  %v831_v17 = vmax.f32 %v597_v9, 0.0  ;;  %v863_v18 = vmax.f32 %v725_v10, 0.0 }
  0xf7   : > { %893 = vst.msk [vmem:[%s1380_s5 + $0x20] sm:$0xff] %vm888_vm1, %v828_v13  ;;  %925 = vst.msk [vmem:[%s1380_s5 + $0x120] sm:$0xff] %vm888_vm1, %v860_v14  ;;  %v829_v19 = vmax.f32 %v589_v15, 0.0  ;;  %v861_v20 = vmax.f32 %v717_v16, 0.0 }
  0xf8   : > { %896 = vst.msk [vmem:[%s1380_s5 + $0x38] sm:$0xff] %vm888_vm1, %v831_v17  ;;  %928 = vst.msk [vmem:[%s1380_s5 + $0x138] sm:$0xff] %vm888_vm1, %v863_v18 }
  0xf9   : > { %894 = vst.msk [vmem:[%s1380_s5 + $0x28] sm:$0xff] %vm888_vm1, %v829_v19  ;;  %926 = vst.msk [vmem:[%s1380_s5 + $0x128] sm:$0xff] %vm888_vm1, %v861_v20  ;;  %v1143_v21 = vpop.f32.mrb[8].mxu0  ;;  %v1175_v22 = vpop.f32.mrb[8].mxu1 }
  0xfa   : > { %v610_v23 = vadd.f32 %v1143_v21, %v1372_v36  ;;  %v738_v24 = vadd.f32 %v1175_v22, %v1372_v36  ;;  %v601_v25 = vpop.f32.mrb[9].mxu0  ;;  %v729_v26 = vpop.f32.mrb[9].mxu1 }
  0xfb   : > { %v602_v27 = vadd.f32 %v1372_v36, %v601_v25  ;;  %v730_v28 = vadd.f32 %v1372_v36, %v729_v26  ;;  %v1144_v29 = vpop.f32.mrb[10].mxu0  ;;  %v1176_v30 = vpop.f32.mrb[10].mxu1 }
  0xfc   : > { %v834_v31 = vmax.f32 %v610_v23, 0.0  ;;  %v866_v32 = vmax.f32 %v738_v24, 0.0  ;;  %v613_v33 = vadd.f32 %v1144_v29, %v1372_v36  ;;  %v741_v34 = vadd.f32 %v1176_v30, %v1372_v36  ;;  %v604_v35 = vpop.f32.mrb[11].mxu0  ;;  %v732_v37 = vpop.f32.mrb[11].mxu1 }
  0xfd   : > { %v832_v38 = vmax.f32 %v602_v27, 0.0  ;;  %v864_v39 = vmax.f32 %v730_v28, 0.0  ;;  %v605_v40 = vadd.f32 %v1372_v36, %v604_v35  ;;  %v733_v41 = vadd.f32 %v1372_v36, %v732_v37 }
  0xfe   : > { %899 = vst.msk [vmem:[%s1380_s5 + $0x50] sm:$0xff] %vm888_vm1, %v834_v31  ;;  %931 = vst.msk [vmem:[%s1380_s5 + $0x150] sm:$0xff] %vm888_vm1, %v866_v32  ;;  %v835_v42 = vmax.f32 %v613_v33, 0.0  ;;  %v867_v43 = vmax.f32 %v741_v34, 0.0 }
  0xff   : > { %897 = vst.msk [vmem:[%s1380_s5 + $0x40] sm:$0xff] %vm888_vm1, %v832_v38  ;;  %929 = vst.msk [vmem:[%s1380_s5 + $0x140] sm:$0xff] %vm888_vm1, %v864_v39  ;;  %v833_v44 = vmax.f32 %v605_v40, 0.0  ;;  %v865_v45 = vmax.f32 %v733_v41, 0.0 }
 0x100   : > { %900 = vst.msk [vmem:[%s1380_s5 + $0x58] sm:$0xff] %vm888_vm1, %v835_v42  ;;  %932 = vst.msk [vmem:[%s1380_s5 + $0x158] sm:$0xff] %vm888_vm1, %v867_v43 }
 0x101   : > { %898 = vst.msk [vmem:[%s1380_s5 + $0x48] sm:$0xff] %vm888_vm1, %v833_v44  ;;  %930 = vst.msk [vmem:[%s1380_s5 + $0x148] sm:$0xff] %vm888_vm1, %v865_v45  ;;  %v1147_v46 = vpop.f32.mrb[12].mxu0  ;;  %v1179_v47 = vpop.f32.mrb[12].mxu1 }
 0x102   : > { %v626_v48 = vadd.f32 %v1147_v46, %v1372_v36  ;;  %v754_v49 = vadd.f32 %v1179_v47, %v1372_v36  ;;  %v617_v50 = vpop.f32.mrb[13].mxu0  ;;  %v745_v51 = vpop.f32.mrb[13].mxu1 }
 0x103   : > { %v618_v52 = vadd.f32 %v1372_v36, %v617_v50  ;;  %v746_v53 = vadd.f32 %v1372_v36, %v745_v51  ;;  %v1148_v54 = vpop.f32.mrb[14].mxu0  ;;  %v1180_v55 = vpop.f32.mrb[14].mxu1 }
 0x104   : > { %v838_v56 = vmax.f32 %v626_v48, 0.0  ;;  %v870_v57 = vmax.f32 %v754_v49, 0.0  ;;  %v629_v58 = vadd.f32 %v1148_v54, %v1372_v36  ;;  %v757_v59 = vadd.f32 %v1180_v55, %v1372_v36  ;;  %v620_v60 = vpop.f32.mrb[15].mxu0  ;;  %v748_v61 = vpop.f32.mrb[15].mxu1 }
 0x105   : > { %v836_v62 = vmax.f32 %v618_v52, 0.0  ;;  %v868_v63 = vmax.f32 %v746_v53, 0.0  ;;  %v621_v0 = vadd.f32 %v1372_v36, %v620_v60  ;;  %v749_v1 = vadd.f32 %v1372_v36, %v748_v61 }
 0x106   : > { %903 = vst.msk [vmem:[%s1380_s5 + $0x70] sm:$0xff] %vm888_vm1, %v838_v56  ;;  %935 = vst.msk [vmem:[%s1380_s5 + $0x170] sm:$0xff] %vm888_vm1, %v870_v57  ;;  %v839_v2 = vmax.f32 %v629_v58, 0.0  ;;  %v871_v3 = vmax.f32 %v757_v59, 0.0 }
 0x107   : > { %901 = vst.msk [vmem:[%s1380_s5 + $0x60] sm:$0xff] %vm888_vm1, %v836_v62  ;;  %933 = vst.msk [vmem:[%s1380_s5 + $0x160] sm:$0xff] %vm888_vm1, %v868_v63  ;;  %v837_v4 = vmax.f32 %v621_v0, 0.0  ;;  %v869_v5 = vmax.f32 %v749_v1, 0.0 }
 0x108   : > { %904 = vst.msk [vmem:[%s1380_s5 + $0x78] sm:$0xff] %vm888_vm1, %v839_v2  ;;  %936 = vst.msk [vmem:[%s1380_s5 + $0x178] sm:$0xff] %vm888_vm1, %v871_v3 }
 0x109   : > { %902 = vst.msk [vmem:[%s1380_s5 + $0x68] sm:$0xff] %vm888_vm1, %v837_v4  ;;  %934 = vst.msk [vmem:[%s1380_s5 + $0x168] sm:$0xff] %vm888_vm1, %v869_v5  ;;  %v1151_v6 = vpop.f32.mrb[16].mxu0  ;;  %v1183_v7 = vpop.f32.mrb[16].mxu1 }
 0x10a   : > { %v642_v8 = vadd.f32 %v1151_v6, %v1372_v36  ;;  %v770_v9 = vadd.f32 %v1183_v7, %v1372_v36  ;;  %v633_v10 = vpop.f32.mrb[17].mxu0  ;;  %v761_v11 = vpop.f32.mrb[17].mxu1 }
 0x10b   : > { %v634_v12 = vadd.f32 %v1372_v36, %v633_v10  ;;  %v762_v13 = vadd.f32 %v1372_v36, %v761_v11  ;;  %v1152_v14 = vpop.f32.mrb[18].mxu0  ;;  %v1184_v15 = vpop.f32.mrb[18].mxu1 }
 0x10c   : > { %v842_v16 = vmax.f32 %v642_v8, 0.0  ;;  %v874_v17 = vmax.f32 %v770_v9, 0.0  ;;  %v645_v18 = vadd.f32 %v1152_v14, %v1372_v36  ;;  %v773_v19 = vadd.f32 %v1184_v15, %v1372_v36  ;;  %v636_v20 = vpop.f32.mrb[19].mxu0  ;;  %v764_v21 = vpop.f32.mrb[19].mxu1 }
 0x10d   : > { %v840_v22 = vmax.f32 %v634_v12, 0.0  ;;  %v872_v23 = vmax.f32 %v762_v13, 0.0  ;;  %v637_v24 = vadd.f32 %v1372_v36, %v636_v20  ;;  %v765_v25 = vadd.f32 %v1372_v36, %v764_v21 }
 0x10e   : > { %907 = vst.msk [vmem:[%s1380_s5 + $0x90] sm:$0xff] %vm888_vm1, %v842_v16  ;;  %939 = vst.msk [vmem:[%s1380_s5 + $0x190] sm:$0xff] %vm888_vm1, %v874_v17  ;;  %v843_v26 = vmax.f32 %v645_v18, 0.0  ;;  %v875_v27 = vmax.f32 %v773_v19, 0.0 }
 0x10f   : > { %905 = vst.msk [vmem:[%s1380_s5 + $0x80] sm:$0xff] %vm888_vm1, %v840_v22  ;;  %937 = vst.msk [vmem:[%s1380_s5 + $0x180] sm:$0xff] %vm888_vm1, %v872_v23  ;;  %v841_v28 = vmax.f32 %v637_v24, 0.0  ;;  %v873_v29 = vmax.f32 %v765_v25, 0.0 }
 0x110   : > { %908 = vst.msk [vmem:[%s1380_s5 + $0x98] sm:$0xff] %vm888_vm1, %v843_v26  ;;  %940 = vst.msk [vmem:[%s1380_s5 + $0x198] sm:$0xff] %vm888_vm1, %v875_v27 }
 0x111   : > { %906 = vst.msk [vmem:[%s1380_s5 + $0x88] sm:$0xff] %vm888_vm1, %v841_v28  ;;  %938 = vst.msk [vmem:[%s1380_s5 + $0x188] sm:$0xff] %vm888_vm1, %v873_v29  ;;  %v1155_v30 = vpop.f32.mrb[20].mxu0  ;;  %v1187_v31 = vpop.f32.mrb[20].mxu1 }
 0x112   : > { %v658_v32 = vadd.f32 %v1155_v30, %v1372_v36  ;;  %v786_v33 = vadd.f32 %v1187_v31, %v1372_v36  ;;  %v649_v34 = vpop.f32.mrb[21].mxu0  ;;  %v777_v35 = vpop.f32.mrb[21].mxu1 }
 0x113   : > { %v650_v37 = vadd.f32 %v1372_v36, %v649_v34  ;;  %v778_v38 = vadd.f32 %v1372_v36, %v777_v35  ;;  %v1156_v39 = vpop.f32.mrb[22].mxu0  ;;  %v1188_v40 = vpop.f32.mrb[22].mxu1 }
 0x114   : > { %v846_v41 = vmax.f32 %v658_v32, 0.0  ;;  %v878_v42 = vmax.f32 %v786_v33, 0.0  ;;  %v661_v43 = vadd.f32 %v1156_v39, %v1372_v36  ;;  %v789_v44 = vadd.f32 %v1188_v40, %v1372_v36  ;;  %v652_v45 = vpop.f32.mrb[23].mxu0  ;;  %v780_v46 = vpop.f32.mrb[23].mxu1 }
 0x115   : > { %v844_v47 = vmax.f32 %v650_v37, 0.0  ;;  %v876_v48 = vmax.f32 %v778_v38, 0.0  ;;  %v653_v49 = vadd.f32 %v1372_v36, %v652_v45  ;;  %v781_v50 = vadd.f32 %v1372_v36, %v780_v46 }
 0x116   : > { %911 = vst.msk [vmem:[%s1380_s5 + $0xb0] sm:$0xff] %vm888_vm1, %v846_v41  ;;  %943 = vst.msk [vmem:[%s1380_s5 + $0x1b0] sm:$0xff] %vm888_vm1, %v878_v42  ;;  %v847_v51 = vmax.f32 %v661_v43, 0.0  ;;  %v879_v52 = vmax.f32 %v789_v44, 0.0 }
 0x117   : > { %909 = vst.msk [vmem:[%s1380_s5 + $0xa0] sm:$0xff] %vm888_vm1, %v844_v47  ;;  %941 = vst.msk [vmem:[%s1380_s5 + $0x1a0] sm:$0xff] %vm888_vm1, %v876_v48  ;;  %v845_v53 = vmax.f32 %v653_v49, 0.0  ;;  %v877_v54 = vmax.f32 %v781_v50, 0.0 }
 0x118   : > { %912 = vst.msk [vmem:[%s1380_s5 + $0xb8] sm:$0xff] %vm888_vm1, %v847_v51  ;;  %944 = vst.msk [vmem:[%s1380_s5 + $0x1b8] sm:$0xff] %vm888_vm1, %v879_v52 }
 0x119   : > { %910 = vst.msk [vmem:[%s1380_s5 + $0xa8] sm:$0xff] %vm888_vm1, %v845_v53  ;;  %942 = vst.msk [vmem:[%s1380_s5 + $0x1a8] sm:$0xff] %vm888_vm1, %v877_v54  ;;  %v1159_v55 = vpop.f32.mrb[24].mxu0  ;;  %v1191_v56 = vpop.f32.mrb[24].mxu1 }
 0x11a   : > { %v674_v57 = vadd.f32 %v1159_v55, %v1372_v36  ;;  %v802_v58 = vadd.f32 %v1191_v56, %v1372_v36  ;;  %v665_v59 = vpop.f32.mrb[25].mxu0  ;;  %v793_v60 = vpop.f32.mrb[25].mxu1 }
 0x11b   : > { %v666_v61 = vadd.f32 %v1372_v36, %v665_v59  ;;  %v794_v62 = vadd.f32 %v1372_v36, %v793_v60  ;;  %v1160_v63 = vpop.f32.mrb[26].mxu0  ;;  %v1192_v0 = vpop.f32.mrb[26].mxu1 }
 0x11c   : > { %v850_v1 = vmax.f32 %v674_v57, 0.0  ;;  %v882_v2 = vmax.f32 %v802_v58, 0.0  ;;  %v677_v3 = vadd.f32 %v1160_v63, %v1372_v36  ;;  %v805_v4 = vadd.f32 %v1192_v0, %v1372_v36  ;;  %v668_v5 = vpop.f32.mrb[27].mxu0  ;;  %v796_v6 = vpop.f32.mrb[27].mxu1 }
 0x11d   : > { %v848_v7 = vmax.f32 %v666_v61, 0.0  ;;  %v880_v8 = vmax.f32 %v794_v62, 0.0  ;;  %v669_v9 = vadd.f32 %v1372_v36, %v668_v5  ;;  %v797_v10 = vadd.f32 %v1372_v36, %v796_v6 }
 0x11e   : > { %915 = vst.msk [vmem:[%s1380_s5 + $0xd0] sm:$0xff] %vm888_vm1, %v850_v1  ;;  %947 = vst.msk [vmem:[%s1380_s5 + $0x1d0] sm:$0xff] %vm888_vm1, %v882_v2  ;;  %v851_v11 = vmax.f32 %v677_v3, 0.0  ;;  %v883_v12 = vmax.f32 %v805_v4, 0.0 }
 0x11f   : > { %913 = vst.msk [vmem:[%s1380_s5 + $0xc0] sm:$0xff] %vm888_vm1, %v848_v7  ;;  %945 = vst.msk [vmem:[%s1380_s5 + $0x1c0] sm:$0xff] %vm888_vm1, %v880_v8  ;;  %v849_v13 = vmax.f32 %v669_v9, 0.0  ;;  %v881_v14 = vmax.f32 %v797_v10, 0.0 }
 0x120   : > { %916 = vst.msk [vmem:[%s1380_s5 + $0xd8] sm:$0xff] %vm888_vm1, %v851_v11  ;;  %948 = vst.msk [vmem:[%s1380_s5 + $0x1d8] sm:$0xff] %vm888_vm1, %v883_v12 }
 0x121   : > { %914 = vst.msk [vmem:[%s1380_s5 + $0xc8] sm:$0xff] %vm888_vm1, %v849_v13  ;;  %946 = vst.msk [vmem:[%s1380_s5 + $0x1c8] sm:$0xff] %vm888_vm1, %v881_v14  ;;  %v1163_v15 = vpop.f32.mrb[28].mxu0  ;;  %v1195_v16 = vpop.f32.mrb[28].mxu1 }
 0x122   : > { %v690_v17 = vadd.f32 %v1163_v15, %v1372_v36  ;;  %v818_v18 = vadd.f32 %v1195_v16, %v1372_v36  ;;  %v681_v19 = vpop.f32.mrb[29].mxu0  ;;  %v809_v20 = vpop.f32.mrb[29].mxu1 }
 0x123   : > { %v682_v21 = vadd.f32 %v1372_v36, %v681_v19  ;;  %v810_v22 = vadd.f32 %v1372_v36, %v809_v20  ;;  %v1164_v23 = vpop.f32.mrb[30].mxu0  ;;  %v1196_v24 = vpop.f32.mrb[30].mxu1 }
 0x124   : > { %v854_v25 = vmax.f32 %v690_v17, 0.0  ;;  %v886_v26 = vmax.f32 %v818_v18, 0.0  ;;  %v693_v27 = vadd.f32 %v1164_v23, %v1372_v36  ;;  %v821_v28 = vadd.f32 %v1196_v24, %v1372_v36  ;;  %v684_v29 = vpop.f32.mrb[31].mxu0  ;;  %v812_v30 = vpop.f32.mrb[31].mxu1 }
 0x125   : > { %v852_v31 = vmax.f32 %v682_v21, 0.0  ;;  %v884_v32 = vmax.f32 %v810_v22, 0.0  ;;  %v685_v33 = vadd.f32 %v1372_v36, %v684_v29  ;;  %v813_v34 = vadd.f32 %v1372_v36, %v812_v30 }
 0x126   : > { %919 = vst.msk [vmem:[%s1380_s5 + $0xf0] sm:$0xff] %vm888_vm1, %v854_v25  ;;  %951 = vst.msk [vmem:[%s1380_s5 + $0x1f0] sm:$0xff] %vm888_vm1, %v886_v26  ;;  %v855_v35 = vmax.f32 %v693_v27, 0.0  ;;  %v887_v37 = vmax.f32 %v821_v28, 0.0 }
 0x127   : > { %917 = vst.msk [vmem:[%s1380_s5 + $0xe0] sm:$0xff] %vm888_vm1, %v852_v31  ;;  %949 = vst.msk [vmem:[%s1380_s5 + $0x1e0] sm:$0xff] %vm888_vm1, %v884_v32  ;;  %v853_v38 = vmax.f32 %v685_v33, 0.0  ;;  %v885_v39 = vmax.f32 %v813_v34, 0.0 }
 0x128   : > { %920 = vst.msk [vmem:[%s1380_s5 + $0xf8] sm:$0xff] %vm888_vm1, %v855_v35  ;;  %952 = vst.msk [vmem:[%s1380_s5 + $0x1f8] sm:$0xff] %vm888_vm1, %v887_v37 }
 0x129   : > { %918 = vst.msk [vmem:[%s1380_s5 + $0xe8] sm:$0xff] %vm888_vm1, %v853_v38  ;;  %950 = vst.msk [vmem:[%s1380_s5 + $0x1e8] sm:$0xff] %vm888_vm1, %v885_v39 }
 0x12a PF: > { %s13_s12 = sadd.s32 1, %s1255_s12  }
 0x12b   : > { %p10_p4 = scmp.ge.s32.totalorder %s13_s12, 7  }
 0x12d   :  { %12 = sbr.rel (!%p10_p4) target bundleno = 1 (0x1), region = 62 }

// kernel: lstm_model_forward.6
= control target key start
LH: loop header
LB: loop body
LE: loop exit
PB: predicated region body
PF: predicated region fallthrough
CT: control target
= control target key end

     0   :  { %v1145_v0 = vmov 0   ;;  %vm859_vm0 = vcmask 261120   ;;  %s1739_s1 = inlined_call_operand.vmem [shape: bf16[256,32], index: 1, kind: input, shape index: {}]   ;;  %s1740_s0 = inlined_call_operand.vmem [shape: bf16[488,256], index: 0, kind: input, shape index: {}]   ;;  %s1741_s2 = inlined_call_operand.vmem [shape: f32[1,32], index: 2, kind: input, shape index: {}]   ;;  %s1742_s3 = inlined_call_operand.vmem [shape: f32[488,32], index: 3, kind: output, shape index: {}]  }
   0x1   :  { %518 = vmatprep.subr.bf16.mxu0 %v1145_v0  ;;  %v1037_v1 = vld [vmem:[%s1739_s1] sm:$0xff]   ;;  %1004 = vmatprep.subr.bf16.mxu1 %v1145_v0  ;;  %v1038_v2 = vld [vmem:[%s1739_s1 + $0x8] sm:$0xff]   ;;  %v1039_v3 = vld [vmem:[%s1739_s1 + $0x10] sm:$0xff]  }
   0x2   :  { %519 = vmatpush1.bf16.msra.mxu0 %v1037_v1  ;;  %1020 = vmatpush1.bf16.msra.mxu1 %v1037_v1  ;;  %v1040_v4 = vld [vmem:[%s1739_s1 + $0x18] sm:$0xff]   ;;  %v1041_v5 = vld [vmem:[%s1739_s1 + $0x20] sm:$0xff]   ;;  %v1042_v7 = vld [vmem:[%s1739_s1 + $0x28] sm:$0xff]  }
   0x3   :  { %520 = vmatprep.subr.bf16.mxu0 %v1145_v0  ;;  %1005 = vmatprep.subr.bf16.mxu1 %v1145_v0  ;;  %v1055_v6 = vld [vmem:[%s1740_s0 + $0x4] ss:$8 sps:$4 sm:$0xff]   ;;  %v1043_v9 = vld [vmem:[%s1739_s1 + $0x30] sm:$0xff]   ;;  %v1044_v10 = vld [vmem:[%s1739_s1 + $0x38] sm:$0xff]  }
   0x4   :  { %v1058_v8 = vld [vmem:[%s1740_s0 + $0x104] ss:$8 sps:$4 sm:$0xff]   ;;  %550 = vmatprep.mubr.bf16.mxu0 %v1055_v6  ;;  %v1047_v13 = vld [vmem:[%s1739_s1 + $0x50] sm:$0xff]   ;;  %v1048_v14 = vld [vmem:[%s1739_s1 + $0x58] sm:$0xff]  }
   0x5   :  { %678 = vmatprep.mubr.bf16.mxu1 %v1058_v8  ;;  %v1045_v11 = vld [vmem:[%s1739_s1 + $0x40] sm:$0xff]   ;;  %v1046_v12 = vld [vmem:[%s1739_s1 + $0x48] sm:$0xff]   ;;  %v1051_v17 = vld [vmem:[%s1739_s1 + $0x70] sm:$0xff]  }
   0x6   :  { %521 = vmatpush1.bf16.msra.mxu0 %v1038_v2  ;;  %1021 = vmatpush1.bf16.msra.mxu1 %v1038_v2  ;;  %v1049_v15 = vld [vmem:[%s1739_s1 + $0x60] sm:$0xff]   ;;  %v1050_v16 = vld [vmem:[%s1739_s1 + $0x68] sm:$0xff]   ;;  %v1052_v18 = vld [vmem:[%s1739_s1 + $0x78] sm:$0xff]  }
   0x7   :  { %522 = vmatprep.subr.bf16.mxu0 %v1145_v0  ;;  %1006 = vmatprep.subr.bf16.mxu1 %v1145_v0  ;;  %v1053_v19 = vld [vmem:[%s1740_s0] ss:$8 sps:$4 sm:$0xff]   ;;  %v1059_v21 = vld [vmem:[%s1740_s0 + $0x14] ss:$8 sps:$4 sm:$0xff]   ;;  %v1061_v23 = vld [vmem:[%s1740_s0 + $0x10] ss:$8 sps:$4 sm:$0xff]  }
   0x8   :  { %v1056_v20 = vld [vmem:[%s1740_s0 + $0x100] ss:$8 sps:$4 sm:$0xff]   ;;  %v1062_v22 = vld [vmem:[%s1740_s0 + $0x114] ss:$8 sps:$4 sm:$0xff]   ;;  %v1066_v24 = vld [vmem:[%s1740_s0 + $0x110] ss:$8 sps:$4 sm:$0xff]  }
   0x9   :  { %v1064_v25 = vld [vmem:[%s1740_s0 + $0x24] ss:$8 sps:$4 sm:$0xff]   ;;  %v1067_v27 = vld [vmem:[%s1740_s0 + $0x20] ss:$8 sps:$4 sm:$0xff]   ;;  %v1070_v29 = vld [vmem:[%s1740_s0 + $0x34] ss:$8 sps:$4 sm:$0xff]  }
   0xa   :  { %523 = vmatpush1.bf16.msra.mxu0 %v1039_v3  ;;  %1022 = vmatpush1.bf16.msra.mxu1 %v1039_v3  ;;  %v1068_v26 = vld [vmem:[%s1740_s0 + $0x124] ss:$8 sps:$4 sm:$0xff]   ;;  %v1072_v28 = vld [vmem:[%s1740_s0 + $0x120] ss:$8 sps:$4 sm:$0xff]   ;;  %v1074_v30 = vld [vmem:[%s1740_s0 + $0x134] ss:$8 sps:$4 sm:$0xff]  }
   0xb   :  { %524 = vmatprep.subr.bf16.mxu0 %v1145_v0  ;;  %1007 = vmatprep.subr.bf16.mxu1 %v1145_v0  ;;  %v1073_v31 = vld [vmem:[%s1740_s0 + $0x30] ss:$8 sps:$4 sm:$0xff]   ;;  %v1076_v33 = vld [vmem:[%s1740_s0 + $0x44] ss:$8 sps:$4 sm:$0xff]   ;;  %v1079_v35 = vld [vmem:[%s1740_s0 + $0x40] ss:$8 sps:$4 sm:$0xff]  }
   0xc   :  { %v1078_v32 = vld [vmem:[%s1740_s0 + $0x130] ss:$8 sps:$4 sm:$0xff]   ;;  %v1080_v34 = vld [vmem:[%s1740_s0 + $0x144] ss:$8 sps:$4 sm:$0xff]   ;;  %v1084_v36 = vld [vmem:[%s1740_s0 + $0x140] ss:$8 sps:$4 sm:$0xff]  }
   0xd   :  { %v1082_v37 = vld [vmem:[%s1740_s0 + $0x54] ss:$8 sps:$4 sm:$0xff]   ;;  %v1085_v39 = vld [vmem:[%s1740_s0 + $0x50] ss:$8 sps:$4 sm:$0xff]   ;;  %v1088_v41 = vld [vmem:[%s1740_s0 + $0x64] ss:$8 sps:$4 sm:$0xff]  }
   0xe   :  { %525 = vmatpush1.bf16.msra.mxu0 %v1040_v4  ;;  %1023 = vmatpush1.bf16.msra.mxu1 %v1040_v4  ;;  %v1086_v38 = vld [vmem:[%s1740_s0 + $0x154] ss:$8 sps:$4 sm:$0xff]   ;;  %v1090_v40 = vld [vmem:[%s1740_s0 + $0x150] ss:$8 sps:$4 sm:$0xff]   ;;  %v1092_v42 = vld [vmem:[%s1740_s0 + $0x164] ss:$8 sps:$4 sm:$0xff]  }
   0xf   :  { %526 = vmatprep.subr.bf16.mxu0 %v1145_v0  ;;  %1008 = vmatprep.subr.bf16.mxu1 %v1145_v0  ;;  %v1091_v43 = vld [vmem:[%s1740_s0 + $0x60] ss:$8 sps:$4 sm:$0xff]   ;;  %v1094_v45 = vld [vmem:[%s1740_s0 + $0x74] ss:$8 sps:$4 sm:$0xff]   ;;  %v1097_v47 = vld [vmem:[%s1740_s0 + $0x70] ss:$8 sps:$4 sm:$0xff]  }
  0x10   :  { %v1096_v44 = vld [vmem:[%s1740_s0 + $0x160] ss:$8 sps:$4 sm:$0xff]   ;;  %v1098_v46 = vld [vmem:[%s1740_s0 + $0x174] ss:$8 sps:$4 sm:$0xff]   ;;  %v1102_v48 = vld [vmem:[%s1740_s0 + $0x170] ss:$8 sps:$4 sm:$0xff]  }
  0x11   :  { %v1100_v49 = vld [vmem:[%s1740_s0 + $0x84] ss:$8 sps:$4 sm:$0xff]   ;;  %v1103_v51 = vld [vmem:[%s1740_s0 + $0x80] ss:$8 sps:$4 sm:$0xff]   ;;  %v1106_v53 = vld [vmem:[%s1740_s0 + $0x94] ss:$8 sps:$4 sm:$0xff]  }
  0x12   :  { %527 = vmatpush1.bf16.msra.mxu0 %v1041_v5  ;;  %1024 = vmatpush1.bf16.msra.mxu1 %v1041_v5  ;;  %v1104_v50 = vld [vmem:[%s1740_s0 + $0x184] ss:$8 sps:$4 sm:$0xff]   ;;  %v1108_v52 = vld [vmem:[%s1740_s0 + $0x180] ss:$8 sps:$4 sm:$0xff]   ;;  %v1110_v54 = vld [vmem:[%s1740_s0 + $0x194] ss:$8 sps:$4 sm:$0xff]  }
  0x13   :  { %528 = vmatprep.subr.bf16.mxu0 %v1145_v0  ;;  %1009 = vmatprep.subr.bf16.mxu1 %v1145_v0  ;;  %v1109_v55 = vld [vmem:[%s1740_s0 + $0x90] ss:$8 sps:$4 sm:$0xff]   ;;  %v1112_v57 = vld [vmem:[%s1740_s0 + $0xa4] ss:$8 sps:$4 sm:$0xff]   ;;  %v1115_v59 = vld [vmem:[%s1740_s0 + $0xa0] ss:$8 sps:$4 sm:$0xff]  }
  0x14   :  { %v1114_v56 = vld [vmem:[%s1740_s0 + $0x190] ss:$8 sps:$4 sm:$0xff]   ;;  %v1116_v58 = vld [vmem:[%s1740_s0 + $0x1a4] ss:$8 sps:$4 sm:$0xff]   ;;  %v1120_v60 = vld [vmem:[%s1740_s0 + $0x1a0] ss:$8 sps:$4 sm:$0xff]  }
  0x15   :  { %v1118_v61 = vld [vmem:[%s1740_s0 + $0xb4] ss:$8 sps:$4 sm:$0xff]   ;;  %v1121_v63 = vld [vmem:[%s1740_s0 + $0xb0] ss:$8 sps:$4 sm:$0xff]   ;;  %v1124_v1 = vld [vmem:[%s1740_s0 + $0xc4] ss:$8 sps:$4 sm:$0xff]  }
  0x16   :  { %529 = vmatpush1.bf16.msra.mxu0 %v1042_v7  ;;  %1025 = vmatpush1.bf16.msra.mxu1 %v1042_v7  ;;  %v1122_v62 = vld [vmem:[%s1740_s0 + $0x1b4] ss:$8 sps:$4 sm:$0xff]   ;;  %v1128_v2 = vld [vmem:[%s1740_s0 + $0x1c4] ss:$8 sps:$4 sm:$0xff]   ;;  %v1127_v3 = vld [vmem:[%s1740_s0 + $0xc0] ss:$8 sps:$4 sm:$0xff]  }
  0x17   :  { %530 = vmatprep.subr.bf16.mxu0 %v1145_v0  ;;  %1010 = vmatprep.subr.bf16.mxu1 %v1145_v0  ;;  %v1132_v4 = vld [vmem:[%s1740_s0 + $0x1c0] ss:$8 sps:$4 sm:$0xff]   ;;  %v1130_v5 = vld [vmem:[%s1740_s0 + $0xd4] ss:$8 sps:$4 sm:$0xff]   ;;  %v1133_v8 = vld [vmem:[%s1740_s0 + $0xd0] ss:$8 sps:$4 sm:$0xff]  }
  0x18   :  { %v1134_v6 = vld [vmem:[%s1740_s0 + $0x1d4] ss:$8 sps:$4 sm:$0xff]   ;;  %v75_v7 = vld [vmem:[%s1740_s0 + $0x1e0] sm:$0xff] }
  0x1a   :  { %531 = vmatpush1.bf16.msra.mxu0 %v1043_v9  ;;  %1026 = vmatpush1.bf16.msra.mxu1 %v1043_v9  ;;  %v1138_v9 = vld [vmem:[%s1740_s0 + $0x1d0] ss:$8 sps:$4 sm:$0xff]  }
  0x1b   :  { %532 = vmatprep.subr.bf16.mxu0 %v1145_v0  ;;  %1011 = vmatprep.subr.bf16.mxu1 %v1145_v0 }
  0x1e   :  { %533 = vmatpush1.bf16.msra.mxu0 %v1044_v10  ;;  %1027 = vmatpush1.bf16.msra.mxu1 %v1044_v10  ;;  %v1136_v10 = vld [vmem:[%s1740_s0 + $0xe4] ss:$8 sps:$4 sm:$0xff]  }
  0x1f   :  { %534 = vmatprep.subr.bf16.mxu0 %v1145_v0  ;;  %1012 = vmatprep.subr.bf16.mxu1 %v1145_v0 }
  0x22   :  { %535 = vmatpush1.bf16.msra.mxu0 %v1045_v11  ;;  %1028 = vmatpush1.bf16.msra.mxu1 %v1045_v11  ;;  %v987_v11 = vcombine.high %v75_v7, %v75_v7 }
  0x23   :  { %536 = vmatprep.subr.bf16.mxu0 %v1145_v0  ;;  %1013 = vmatprep.subr.bf16.mxu1 %v1145_v0 }
  0x26   :  { %537 = vmatpush1.bf16.msra.mxu0 %v1046_v12  ;;  %1029 = vmatpush1.bf16.msra.mxu1 %v1046_v12  ;;  %v1139_v12 = vld [vmem:[%s1740_s0 + $0xe0] ss:$8 sps:$4 sm:$0xff]  }
  0x27   :  { %538 = vmatprep.subr.bf16.mxu0 %v1145_v0  ;;  %1014 = vmatprep.subr.bf16.mxu1 %v1145_v0 }
  0x2a   :  { %539 = vmatpush1.bf16.msra.mxu0 %v1047_v13  ;;  %1030 = vmatpush1.bf16.msra.mxu1 %v1047_v13  ;;  %v986_v13 = vcombine.low %v75_v7, %v75_v7 }
  0x2b   :  { %540 = vmatprep.subr.bf16.mxu0 %v1145_v0  ;;  %1015 = vmatprep.subr.bf16.mxu1 %v1145_v0 }
  0x2e   :  { %541 = vmatpush1.bf16.msra.mxu0 %v1048_v14  ;;  %1031 = vmatpush1.bf16.msra.mxu1 %v1048_v14  ;;  %v1141_v14 = vld [vmem:[%s1740_s0 + $0xf4] ss:$8 sps:$4 sm:$0xff]  }
  0x2f   :  { %542 = vmatprep.subr.bf16.mxu0 %v1145_v0  ;;  %1016 = vmatprep.subr.bf16.mxu1 %v1145_v0 }
  0x32   :  { %543 = vmatpush1.bf16.msra.mxu0 %v1049_v15  ;;  %1032 = vmatpush1.bf16.msra.mxu1 %v1049_v15  ;;  %v1144_v15 = vld [vmem:[%s1740_s0 + $0xf0] ss:$8 sps:$4 sm:$0xff]  }
  0x33   :  { %544 = vmatprep.subr.bf16.mxu0 %v1145_v0  ;;  %1017 = vmatprep.subr.bf16.mxu1 %v1145_v0 }
  0x36   :  { %545 = vmatpush1.bf16.msra.mxu0 %v1050_v16  ;;  %1033 = vmatpush1.bf16.msra.mxu1 %v1050_v16  ;;  %v1432_v16 = vld [vmem:[%s1741_s2] ss:$0 sm:$0xff] }
  0x37   :  { %546 = vmatprep.subr.bf16.mxu0 %v1145_v0  ;;  %1018 = vmatprep.subr.bf16.mxu1 %v1145_v0 }
  0x3a   :  { %547 = vmatpush1.bf16.msra.mxu0 %v1051_v17  ;;  %1034 = vmatpush1.bf16.msra.mxu1 %v1051_v17 }
  0x3b   :  { %548 = vmatprep.subr.bf16.mxu0 %v1145_v0  ;;  %1019 = vmatprep.subr.bf16.mxu1 %v1145_v0  ;;  %v1126_v0 = vld [vmem:[%s1740_s0 + $0x1b0] ss:$8 sps:$4 sm:$0xff]  }
  0x3e   :  { %549 = vmatpush1.bf16.msra.mxu0 %v1052_v18  ;;  %1035 = vmatpush1.bf16.msra.mxu1 %v1052_v18 }
  0x41   :  { %551 = vmatmul.mubr.bf16.vlgmr.msra.gmra.mrb[0].mxu0 %v1053_v19  ;;  %679 = vmatmul.mubr.bf16.vlgmr.msra.gmra.mrb[0].mxu1 %v1056_v20 }
  0x42   :  { %558 = vmatprep.mubr.bf16.mxu0 %v1059_v21  ;;  %686 = vmatprep.mubr.bf16.mxu1 %v1062_v22 }
  0x49   :  { %559 = vmatmul.mubr.bf16.gmra.mrb[4].mxu0 %v1061_v23  ;;  %687 = vmatmul.mubr.bf16.gmra.mrb[4].mxu1 %v1066_v24 }
  0x4a   :  { %566 = vmatprep.mubr.bf16.mxu0 %v1064_v25  ;;  %694 = vmatprep.mubr.bf16.mxu1 %v1068_v26 }
  0x51   :  { %567 = vmatmul.mubr.bf16.gmra.mrb[8].mxu0 %v1067_v27  ;;  %695 = vmatmul.mubr.bf16.gmra.mrb[8].mxu1 %v1072_v28 }
  0x52   :  { %574 = vmatprep.mubr.bf16.mxu0 %v1070_v29  ;;  %702 = vmatprep.mubr.bf16.mxu1 %v1074_v30 }
  0x59   :  { %575 = vmatmul.mubr.bf16.gmra.mrb[12].mxu0 %v1073_v31  ;;  %703 = vmatmul.mubr.bf16.gmra.mrb[12].mxu1 %v1078_v32 }
  0x5a   :  { %582 = vmatprep.mubr.bf16.mxu0 %v1076_v33  ;;  %710 = vmatprep.mubr.bf16.mxu1 %v1080_v34 }
  0x61   :  { %583 = vmatmul.mubr.bf16.gmra.mrb[16].mxu0 %v1079_v35  ;;  %711 = vmatmul.mubr.bf16.gmra.mrb[16].mxu1 %v1084_v36 }
  0x62   :  { %590 = vmatprep.mubr.bf16.mxu0 %v1082_v37  ;;  %718 = vmatprep.mubr.bf16.mxu1 %v1086_v38 }
  0x69   :  { %591 = vmatmul.mubr.bf16.gmra.mrb[20].mxu0 %v1085_v39  ;;  %719 = vmatmul.mubr.bf16.gmra.mrb[20].mxu1 %v1090_v40 }
  0x6a   :  { %598 = vmatprep.mubr.bf16.mxu0 %v1088_v41  ;;  %726 = vmatprep.mubr.bf16.mxu1 %v1092_v42 }
  0x71   :  { %599 = vmatmul.mubr.bf16.gmra.mrb[24].mxu0 %v1091_v43  ;;  %727 = vmatmul.mubr.bf16.gmra.mrb[24].mxu1 %v1096_v44 }
  0x72   :  { %606 = vmatprep.mubr.bf16.mxu0 %v1094_v45  ;;  %734 = vmatprep.mubr.bf16.mxu1 %v1098_v46 }
  0x79   :  { %607 = vmatmul.mubr.bf16.gmra.mrb[28].mxu0 %v1097_v47  ;;  %735 = vmatmul.mubr.bf16.gmra.mrb[28].mxu1 %v1102_v48 }
  0x7a   :  { %614 = vmatprep.mubr.bf16.mxu0 %v1100_v49  ;;  %742 = vmatprep.mubr.bf16.mxu1 %v1104_v50 }
  0x81   :  { %615 = vmatmul.mubr.bf16.gmra.mrb[32].mxu0 %v1103_v51  ;;  %743 = vmatmul.mubr.bf16.gmra.mrb[32].mxu1 %v1108_v52 }
  0x82   :  { %622 = vmatprep.mubr.bf16.mxu0 %v1106_v53  ;;  %750 = vmatprep.mubr.bf16.mxu1 %v1110_v54 }
  0x89   :  { %623 = vmatmul.mubr.bf16.gmra.mrb[36].mxu0 %v1109_v55  ;;  %751 = vmatmul.mubr.bf16.gmra.mrb[36].mxu1 %v1114_v56 }
  0x8a   :  { %630 = vmatprep.mubr.bf16.mxu0 %v1112_v57  ;;  %758 = vmatprep.mubr.bf16.mxu1 %v1116_v58 }
  0x91   :  { %631 = vmatmul.mubr.bf16.gmra.mrb[40].mxu0 %v1115_v59  ;;  %759 = vmatmul.mubr.bf16.gmra.mrb[40].mxu1 %v1120_v60 }
  0x92   :  { %638 = vmatprep.mubr.bf16.mxu0 %v1118_v61  ;;  %766 = vmatprep.mubr.bf16.mxu1 %v1122_v62 }
  0x99   :  { %639 = vmatmul.mubr.bf16.gmra.mrb[44].mxu0 %v1121_v63  ;;  %767 = vmatmul.mubr.bf16.gmra.mrb[44].mxu1 %v1126_v0 }
  0x9a   :  { %646 = vmatprep.mubr.bf16.mxu0 %v1124_v1  ;;  %774 = vmatprep.mubr.bf16.mxu1 %v1128_v2 }
  0xa1   :  { %647 = vmatmul.mubr.bf16.gmra.mrb[48].mxu0 %v1127_v3  ;;  %775 = vmatmul.mubr.bf16.gmra.mrb[48].mxu1 %v1132_v4 }
  0xa2   :  { %654 = vmatprep.mubr.bf16.mxu0 %v1130_v5  ;;  %782 = vmatprep.mubr.bf16.mxu1 %v1134_v6 }
  0xa9   :  { %655 = vmatmul.mubr.bf16.gmra.mrb[52].mxu0 %v1133_v8  ;;  %783 = vmatmul.mubr.bf16.gmra.mrb[52].mxu1 %v1138_v9 }
  0xaa   :  { %662 = vmatprep.mubr.bf16.mxu0 %v1136_v10  ;;  %790 = vmatprep.mubr.bf16.mxu1 %v987_v11 }
  0xb1   :  { %663 = vmatmul.mubr.bf16.gmra.mrb[56].mxu0 %v1139_v12  ;;  %791 = vmatmul.mubr.bf16.gmra.mrb[56].mxu1 %v986_v13 }
  0xb2   :  { %670 = vmatprep.mubr.bf16.mxu0 %v1141_v14 }
  0xb9   :  { %671 = vmatmul.mubr.bf16.gmra.mrb[60].mxu0 %v1144_v15 }
 0x114   :  { %v552_v17 = vpop.f32.mrb[0].mxu0  ;;  %v680_v18 = vpop.f32.mrb[0].mxu1 }
 0x115   :  { %v553_v19 = vadd.f32 %v1432_v16, %v552_v17  ;;  %v554_v20 = vpop.f32.mrb[1].mxu0  ;;  %v681_v21 = vadd.f32 %v1432_v16, %v680_v18  ;;  %v682_v22 = vpop.f32.mrb[1].mxu1 }
 0x116   :  { %v555_v23 = vpop.f32.mrb[2].mxu0  ;;  %v683_v24 = vpop.f32.mrb[2].mxu1 }
 0x117   :  { %v798_v25 = vmax.f32 %v553_v19, 0.0  ;;  %v556_v26 = vadd.f32 %v1432_v16, %v555_v23  ;;  %v557_v27 = vpop.f32.mrb[3].mxu0  ;;  %v830_v28 = vmax.f32 %v681_v21, 0.0  ;;  %v684_v29 = vadd.f32 %v1432_v16, %v683_v24  ;;  %v685_v30 = vpop.f32.mrb[3].mxu1 }
 0x119   :  { %860 = vst.msk [vmem:[%s1742_s3] sm:$0xff] %vm859_vm0, %v798_v25  ;;  %v799_v31 = vmax.f32 %v556_v26, 0.0  ;;  %892 = vst.msk [vmem:[%s1742_s3 + $0x100] sm:$0xff] %vm859_vm0, %v830_v28  ;;  %v831_v32 = vmax.f32 %v684_v29, 0.0 }
 0x11b   :  { %861 = vst.msk [vmem:[%s1742_s3 + $0x8] sm:$0xff] %vm859_vm0, %v799_v31  ;;  %893 = vst.msk [vmem:[%s1742_s3 + $0x108] sm:$0xff] %vm859_vm0, %v831_v32 }
 0x11c   :  { %v560_v33 = vpop.f32.mrb[4].mxu0  ;;  %v688_v34 = vpop.f32.mrb[4].mxu1 }
 0x11d   :  { %v561_v35 = vadd.f32 %v1432_v16, %v560_v33  ;;  %v562_v36 = vpop.f32.mrb[5].mxu0  ;;  %v689_v37 = vadd.f32 %v1432_v16, %v688_v34  ;;  %v690_v38 = vpop.f32.mrb[5].mxu1 }
 0x11e   :  { %v563_v39 = vpop.f32.mrb[6].mxu0  ;;  %v691_v40 = vpop.f32.mrb[6].mxu1 }
 0x11f   :  { %v800_v41 = vmax.f32 %v561_v35, 0.0  ;;  %v564_v42 = vadd.f32 %v1432_v16, %v563_v39  ;;  %v565_v43 = vpop.f32.mrb[7].mxu0  ;;  %v832_v44 = vmax.f32 %v689_v37, 0.0  ;;  %v692_v45 = vadd.f32 %v1432_v16, %v691_v40  ;;  %v693_v46 = vpop.f32.mrb[7].mxu1 }
 0x121   :  { %862 = vst.msk [vmem:[%s1742_s3 + $0x10] sm:$0xff] %vm859_vm0, %v800_v41  ;;  %v801_v47 = vmax.f32 %v564_v42, 0.0  ;;  %894 = vst.msk [vmem:[%s1742_s3 + $0x110] sm:$0xff] %vm859_vm0, %v832_v44  ;;  %v833_v48 = vmax.f32 %v692_v45, 0.0 }
 0x123   :  { %863 = vst.msk [vmem:[%s1742_s3 + $0x18] sm:$0xff] %vm859_vm0, %v801_v47  ;;  %895 = vst.msk [vmem:[%s1742_s3 + $0x118] sm:$0xff] %vm859_vm0, %v833_v48 }
 0x124   :  { %v568_v49 = vpop.f32.mrb[8].mxu0  ;;  %v696_v50 = vpop.f32.mrb[8].mxu1 }
 0x125   :  { %v569_v51 = vadd.f32 %v1432_v16, %v568_v49  ;;  %v570_v52 = vpop.f32.mrb[9].mxu0  ;;  %v697_v53 = vadd.f32 %v1432_v16, %v696_v50  ;;  %v698_v54 = vpop.f32.mrb[9].mxu1 }
 0x126   :  { %v571_v55 = vpop.f32.mrb[10].mxu0  ;;  %v699_v56 = vpop.f32.mrb[10].mxu1 }
 0x127   :  { %v802_v57 = vmax.f32 %v569_v51, 0.0  ;;  %v572_v58 = vadd.f32 %v1432_v16, %v571_v55  ;;  %v573_v59 = vpop.f32.mrb[11].mxu0  ;;  %v834_v60 = vmax.f32 %v697_v53, 0.0  ;;  %v700_v61 = vadd.f32 %v1432_v16, %v699_v56  ;;  %v701_v62 = vpop.f32.mrb[11].mxu1 }
 0x129   :  { %864 = vst.msk [vmem:[%s1742_s3 + $0x20] sm:$0xff] %vm859_vm0, %v802_v57  ;;  %v803_v63 = vmax.f32 %v572_v58, 0.0  ;;  %896 = vst.msk [vmem:[%s1742_s3 + $0x120] sm:$0xff] %vm859_vm0, %v834_v60  ;;  %v835_v0 = vmax.f32 %v700_v61, 0.0 }
 0x12b   :  { %865 = vst.msk [vmem:[%s1742_s3 + $0x28] sm:$0xff] %vm859_vm0, %v803_v63  ;;  %897 = vst.msk [vmem:[%s1742_s3 + $0x128] sm:$0xff] %vm859_vm0, %v835_v0 }
 0x12c   :  { %v576_v1 = vpop.f32.mrb[12].mxu0  ;;  %v704_v2 = vpop.f32.mrb[12].mxu1 }
 0x12d   :  { %v577_v3 = vadd.f32 %v1432_v16, %v576_v1  ;;  %v578_v4 = vpop.f32.mrb[13].mxu0  ;;  %v705_v5 = vadd.f32 %v1432_v16, %v704_v2  ;;  %v706_v6 = vpop.f32.mrb[13].mxu1 }
 0x12e   :  { %v579_v7 = vpop.f32.mrb[14].mxu0  ;;  %v707_v8 = vpop.f32.mrb[14].mxu1 }
 0x12f   :  { %v804_v9 = vmax.f32 %v577_v3, 0.0  ;;  %v580_v10 = vadd.f32 %v1432_v16, %v579_v7  ;;  %v581_v11 = vpop.f32.mrb[15].mxu0  ;;  %v836_v12 = vmax.f32 %v705_v5, 0.0  ;;  %v708_v13 = vadd.f32 %v1432_v16, %v707_v8  ;;  %v709_v14 = vpop.f32.mrb[15].mxu1 }
 0x131   :  { %866 = vst.msk [vmem:[%s1742_s3 + $0x30] sm:$0xff] %vm859_vm0, %v804_v9  ;;  %v805_v15 = vmax.f32 %v580_v10, 0.0  ;;  %898 = vst.msk [vmem:[%s1742_s3 + $0x130] sm:$0xff] %vm859_vm0, %v836_v12  ;;  %v837_v17 = vmax.f32 %v708_v13, 0.0 }
 0x133   :  { %867 = vst.msk [vmem:[%s1742_s3 + $0x38] sm:$0xff] %vm859_vm0, %v805_v15  ;;  %899 = vst.msk [vmem:[%s1742_s3 + $0x138] sm:$0xff] %vm859_vm0, %v837_v17 }
 0x134   :  { %v584_v18 = vpop.f32.mrb[16].mxu0  ;;  %v712_v19 = vpop.f32.mrb[16].mxu1 }
 0x135   :  { %v585_v20 = vadd.f32 %v1432_v16, %v584_v18  ;;  %v586_v21 = vpop.f32.mrb[17].mxu0  ;;  %v713_v22 = vadd.f32 %v1432_v16, %v712_v19  ;;  %v714_v23 = vpop.f32.mrb[17].mxu1 }
 0x136   :  { %v587_v24 = vpop.f32.mrb[18].mxu0  ;;  %v715_v25 = vpop.f32.mrb[18].mxu1 }
 0x137   :  { %v806_v26 = vmax.f32 %v585_v20, 0.0  ;;  %v588_v27 = vadd.f32 %v1432_v16, %v587_v24  ;;  %v589_v28 = vpop.f32.mrb[19].mxu0  ;;  %v838_v29 = vmax.f32 %v713_v22, 0.0  ;;  %v716_v30 = vadd.f32 %v1432_v16, %v715_v25  ;;  %v717_v31 = vpop.f32.mrb[19].mxu1 }
 0x139   :  { %868 = vst.msk [vmem:[%s1742_s3 + $0x40] sm:$0xff] %vm859_vm0, %v806_v26  ;;  %v807_v32 = vmax.f32 %v588_v27, 0.0  ;;  %900 = vst.msk [vmem:[%s1742_s3 + $0x140] sm:$0xff] %vm859_vm0, %v838_v29  ;;  %v839_v33 = vmax.f32 %v716_v30, 0.0 }
 0x13b   :  { %869 = vst.msk [vmem:[%s1742_s3 + $0x48] sm:$0xff] %vm859_vm0, %v807_v32  ;;  %901 = vst.msk [vmem:[%s1742_s3 + $0x148] sm:$0xff] %vm859_vm0, %v839_v33 }
 0x13c   :  { %v592_v34 = vpop.f32.mrb[20].mxu0  ;;  %v720_v35 = vpop.f32.mrb[20].mxu1 }
 0x13d   :  { %v593_v36 = vadd.f32 %v1432_v16, %v592_v34  ;;  %v594_v37 = vpop.f32.mrb[21].mxu0  ;;  %v721_v38 = vadd.f32 %v1432_v16, %v720_v35  ;;  %v722_v39 = vpop.f32.mrb[21].mxu1 }
 0x13e   :  { %v595_v40 = vpop.f32.mrb[22].mxu0  ;;  %v723_v41 = vpop.f32.mrb[22].mxu1 }
 0x13f   :  { %v808_v42 = vmax.f32 %v593_v36, 0.0  ;;  %v596_v43 = vadd.f32 %v1432_v16, %v595_v40  ;;  %v597_v44 = vpop.f32.mrb[23].mxu0  ;;  %v840_v45 = vmax.f32 %v721_v38, 0.0  ;;  %v724_v46 = vadd.f32 %v1432_v16, %v723_v41  ;;  %v725_v47 = vpop.f32.mrb[23].mxu1 }
 0x141   :  { %870 = vst.msk [vmem:[%s1742_s3 + $0x50] sm:$0xff] %vm859_vm0, %v808_v42  ;;  %v809_v48 = vmax.f32 %v596_v43, 0.0  ;;  %902 = vst.msk [vmem:[%s1742_s3 + $0x150] sm:$0xff] %vm859_vm0, %v840_v45  ;;  %v841_v49 = vmax.f32 %v724_v46, 0.0 }
 0x143   :  { %871 = vst.msk [vmem:[%s1742_s3 + $0x58] sm:$0xff] %vm859_vm0, %v809_v48  ;;  %903 = vst.msk [vmem:[%s1742_s3 + $0x158] sm:$0xff] %vm859_vm0, %v841_v49 }
 0x144   :  { %v600_v50 = vpop.f32.mrb[24].mxu0  ;;  %v728_v51 = vpop.f32.mrb[24].mxu1 }
 0x145   :  { %v601_v52 = vadd.f32 %v1432_v16, %v600_v50  ;;  %v602_v53 = vpop.f32.mrb[25].mxu0  ;;  %v729_v54 = vadd.f32 %v1432_v16, %v728_v51  ;;  %v730_v55 = vpop.f32.mrb[25].mxu1 }
 0x146   :  { %v603_v56 = vpop.f32.mrb[26].mxu0  ;;  %v731_v57 = vpop.f32.mrb[26].mxu1 }
 0x147   :  { %v810_v58 = vmax.f32 %v601_v52, 0.0  ;;  %v604_v59 = vadd.f32 %v1432_v16, %v603_v56  ;;  %v605_v60 = vpop.f32.mrb[27].mxu0  ;;  %v842_v61 = vmax.f32 %v729_v54, 0.0  ;;  %v732_v62 = vadd.f32 %v1432_v16, %v731_v57  ;;  %v733_v63 = vpop.f32.mrb[27].mxu1 }
 0x149   :  { %872 = vst.msk [vmem:[%s1742_s3 + $0x60] sm:$0xff] %vm859_vm0, %v810_v58  ;;  %v811_v0 = vmax.f32 %v604_v59, 0.0  ;;  %904 = vst.msk [vmem:[%s1742_s3 + $0x160] sm:$0xff] %vm859_vm0, %v842_v61  ;;  %v843_v1 = vmax.f32 %v732_v62, 0.0 }
 0x14b   :  { %873 = vst.msk [vmem:[%s1742_s3 + $0x68] sm:$0xff] %vm859_vm0, %v811_v0  ;;  %905 = vst.msk [vmem:[%s1742_s3 + $0x168] sm:$0xff] %vm859_vm0, %v843_v1 }
 0x14c   :  { %v608_v2 = vpop.f32.mrb[28].mxu0  ;;  %v736_v3 = vpop.f32.mrb[28].mxu1 }
 0x14d   :  { %v609_v4 = vadd.f32 %v1432_v16, %v608_v2  ;;  %v610_v5 = vpop.f32.mrb[29].mxu0  ;;  %v737_v6 = vadd.f32 %v1432_v16, %v736_v3  ;;  %v738_v7 = vpop.f32.mrb[29].mxu1 }
 0x14e   :  { %v611_v8 = vpop.f32.mrb[30].mxu0  ;;  %v739_v9 = vpop.f32.mrb[30].mxu1 }
 0x14f   :  { %v812_v10 = vmax.f32 %v609_v4, 0.0  ;;  %v612_v11 = vadd.f32 %v1432_v16, %v611_v8  ;;  %v613_v12 = vpop.f32.mrb[31].mxu0  ;;  %v844_v13 = vmax.f32 %v737_v6, 0.0  ;;  %v740_v14 = vadd.f32 %v1432_v16, %v739_v9  ;;  %v741_v15 = vpop.f32.mrb[31].mxu1 }
 0x151   :  { %874 = vst.msk [vmem:[%s1742_s3 + $0x70] sm:$0xff] %vm859_vm0, %v812_v10  ;;  %v813_v17 = vmax.f32 %v612_v11, 0.0  ;;  %906 = vst.msk [vmem:[%s1742_s3 + $0x170] sm:$0xff] %vm859_vm0, %v844_v13  ;;  %v845_v18 = vmax.f32 %v740_v14, 0.0 }
 0x153   :  { %875 = vst.msk [vmem:[%s1742_s3 + $0x78] sm:$0xff] %vm859_vm0, %v813_v17  ;;  %907 = vst.msk [vmem:[%s1742_s3 + $0x178] sm:$0xff] %vm859_vm0, %v845_v18 }
 0x154   :  { %v616_v19 = vpop.f32.mrb[32].mxu0  ;;  %v744_v20 = vpop.f32.mrb[32].mxu1 }
 0x155   :  { %v617_v21 = vadd.f32 %v1432_v16, %v616_v19  ;;  %v618_v22 = vpop.f32.mrb[33].mxu0  ;;  %v745_v23 = vadd.f32 %v1432_v16, %v744_v20  ;;  %v746_v24 = vpop.f32.mrb[33].mxu1 }
 0x156   :  { %v619_v25 = vpop.f32.mrb[34].mxu0  ;;  %v747_v26 = vpop.f32.mrb[34].mxu1 }
 0x157   :  { %v814_v27 = vmax.f32 %v617_v21, 0.0  ;;  %v620_v28 = vadd.f32 %v1432_v16, %v619_v25  ;;  %v621_v29 = vpop.f32.mrb[35].mxu0  ;;  %v846_v30 = vmax.f32 %v745_v23, 0.0  ;;  %v748_v31 = vadd.f32 %v1432_v16, %v747_v26  ;;  %v749_v32 = vpop.f32.mrb[35].mxu1 }
 0x159   :  { %876 = vst.msk [vmem:[%s1742_s3 + $0x80] sm:$0xff] %vm859_vm0, %v814_v27  ;;  %v815_v33 = vmax.f32 %v620_v28, 0.0  ;;  %908 = vst.msk [vmem:[%s1742_s3 + $0x180] sm:$0xff] %vm859_vm0, %v846_v30  ;;  %v847_v34 = vmax.f32 %v748_v31, 0.0 }
 0x15b   :  { %877 = vst.msk [vmem:[%s1742_s3 + $0x88] sm:$0xff] %vm859_vm0, %v815_v33  ;;  %909 = vst.msk [vmem:[%s1742_s3 + $0x188] sm:$0xff] %vm859_vm0, %v847_v34 }
 0x15c   :  { %v624_v35 = vpop.f32.mrb[36].mxu0  ;;  %v752_v36 = vpop.f32.mrb[36].mxu1 }
 0x15d   :  { %v625_v37 = vadd.f32 %v1432_v16, %v624_v35  ;;  %v626_v38 = vpop.f32.mrb[37].mxu0  ;;  %v753_v39 = vadd.f32 %v1432_v16, %v752_v36  ;;  %v754_v40 = vpop.f32.mrb[37].mxu1 }
 0x15e   :  { %v627_v41 = vpop.f32.mrb[38].mxu0  ;;  %v755_v42 = vpop.f32.mrb[38].mxu1 }
 0x15f   :  { %v816_v43 = vmax.f32 %v625_v37, 0.0  ;;  %v628_v44 = vadd.f32 %v1432_v16, %v627_v41  ;;  %v629_v45 = vpop.f32.mrb[39].mxu0  ;;  %v848_v46 = vmax.f32 %v753_v39, 0.0  ;;  %v756_v47 = vadd.f32 %v1432_v16, %v755_v42  ;;  %v757_v48 = vpop.f32.mrb[39].mxu1 }
 0x161   :  { %878 = vst.msk [vmem:[%s1742_s3 + $0x90] sm:$0xff] %vm859_vm0, %v816_v43  ;;  %v817_v49 = vmax.f32 %v628_v44, 0.0  ;;  %910 = vst.msk [vmem:[%s1742_s3 + $0x190] sm:$0xff] %vm859_vm0, %v848_v46  ;;  %v849_v50 = vmax.f32 %v756_v47, 0.0 }
 0x163   :  { %879 = vst.msk [vmem:[%s1742_s3 + $0x98] sm:$0xff] %vm859_vm0, %v817_v49  ;;  %911 = vst.msk [vmem:[%s1742_s3 + $0x198] sm:$0xff] %vm859_vm0, %v849_v50 }
 0x164   :  { %v632_v51 = vpop.f32.mrb[40].mxu0  ;;  %v760_v52 = vpop.f32.mrb[40].mxu1 }
 0x165   :  { %v633_v53 = vadd.f32 %v1432_v16, %v632_v51  ;;  %v634_v54 = vpop.f32.mrb[41].mxu0  ;;  %v761_v55 = vadd.f32 %v1432_v16, %v760_v52  ;;  %v762_v56 = vpop.f32.mrb[41].mxu1 }
 0x166   :  { %v635_v57 = vpop.f32.mrb[42].mxu0  ;;  %v763_v58 = vpop.f32.mrb[42].mxu1 }
 0x167   :  { %v818_v59 = vmax.f32 %v633_v53, 0.0  ;;  %v636_v60 = vadd.f32 %v1432_v16, %v635_v57  ;;  %v637_v61 = vpop.f32.mrb[43].mxu0  ;;  %v850_v62 = vmax.f32 %v761_v55, 0.0  ;;  %v764_v63 = vadd.f32 %v1432_v16, %v763_v58  ;;  %v765_v0 = vpop.f32.mrb[43].mxu1 }
 0x169   :  { %880 = vst.msk [vmem:[%s1742_s3 + $0xa0] sm:$0xff] %vm859_vm0, %v818_v59  ;;  %v819_v1 = vmax.f32 %v636_v60, 0.0  ;;  %912 = vst.msk [vmem:[%s1742_s3 + $0x1a0] sm:$0xff] %vm859_vm0, %v850_v62  ;;  %v851_v2 = vmax.f32 %v764_v63, 0.0 }
 0x16b   :  { %881 = vst.msk [vmem:[%s1742_s3 + $0xa8] sm:$0xff] %vm859_vm0, %v819_v1  ;;  %913 = vst.msk [vmem:[%s1742_s3 + $0x1a8] sm:$0xff] %vm859_vm0, %v851_v2 }
 0x16c   :  { %v640_v3 = vpop.f32.mrb[44].mxu0  ;;  %v768_v4 = vpop.f32.mrb[44].mxu1 }
 0x16d   :  { %v641_v5 = vadd.f32 %v1432_v16, %v640_v3  ;;  %v642_v6 = vpop.f32.mrb[45].mxu0  ;;  %v769_v7 = vadd.f32 %v1432_v16, %v768_v4  ;;  %v770_v8 = vpop.f32.mrb[45].mxu1 }
 0x16e   :  { %v643_v9 = vpop.f32.mrb[46].mxu0  ;;  %v771_v10 = vpop.f32.mrb[46].mxu1 }
 0x16f   :  { %v820_v11 = vmax.f32 %v641_v5, 0.0  ;;  %v644_v12 = vadd.f32 %v1432_v16, %v643_v9  ;;  %v645_v13 = vpop.f32.mrb[47].mxu0  ;;  %v852_v14 = vmax.f32 %v769_v7, 0.0  ;;  %v772_v15 = vadd.f32 %v1432_v16, %v771_v10  ;;  %v773_v17 = vpop.f32.mrb[47].mxu1 }
 0x171   :  { %882 = vst.msk [vmem:[%s1742_s3 + $0xb0] sm:$0xff] %vm859_vm0, %v820_v11  ;;  %v821_v18 = vmax.f32 %v644_v12, 0.0  ;;  %914 = vst.msk [vmem:[%s1742_s3 + $0x1b0] sm:$0xff] %vm859_vm0, %v852_v14  ;;  %v853_v19 = vmax.f32 %v772_v15, 0.0 }
 0x173   :  { %883 = vst.msk [vmem:[%s1742_s3 + $0xb8] sm:$0xff] %vm859_vm0, %v821_v18  ;;  %915 = vst.msk [vmem:[%s1742_s3 + $0x1b8] sm:$0xff] %vm859_vm0, %v853_v19 }
 0x174   :  { %v648_v20 = vpop.f32.mrb[48].mxu0  ;;  %v776_v21 = vpop.f32.mrb[48].mxu1 }
 0x175   :  { %v649_v22 = vadd.f32 %v1432_v16, %v648_v20  ;;  %v650_v23 = vpop.f32.mrb[49].mxu0  ;;  %v777_v24 = vadd.f32 %v1432_v16, %v776_v21  ;;  %v778_v25 = vpop.f32.mrb[49].mxu1 }
 0x176   :  { %v651_v26 = vpop.f32.mrb[50].mxu0  ;;  %v779_v27 = vpop.f32.mrb[50].mxu1 }
 0x177   :  { %v822_v28 = vmax.f32 %v649_v22, 0.0  ;;  %v652_v29 = vadd.f32 %v1432_v16, %v651_v26  ;;  %v653_v30 = vpop.f32.mrb[51].mxu0  ;;  %v854_v31 = vmax.f32 %v777_v24, 0.0  ;;  %v780_v32 = vadd.f32 %v1432_v16, %v779_v27  ;;  %v781_v33 = vpop.f32.mrb[51].mxu1 }
 0x179   :  { %884 = vst.msk [vmem:[%s1742_s3 + $0xc0] sm:$0xff] %vm859_vm0, %v822_v28  ;;  %v823_v34 = vmax.f32 %v652_v29, 0.0  ;;  %916 = vst.msk [vmem:[%s1742_s3 + $0x1c0] sm:$0xff] %vm859_vm0, %v854_v31  ;;  %v855_v35 = vmax.f32 %v780_v32, 0.0 }
 0x17b   :  { %885 = vst.msk [vmem:[%s1742_s3 + $0xc8] sm:$0xff] %vm859_vm0, %v823_v34  ;;  %917 = vst.msk [vmem:[%s1742_s3 + $0x1c8] sm:$0xff] %vm859_vm0, %v855_v35 }
 0x17c   :  { %v656_v36 = vpop.f32.mrb[52].mxu0  ;;  %v784_v37 = vpop.f32.mrb[52].mxu1 }
 0x17d   :  { %v657_v38 = vadd.f32 %v1432_v16, %v656_v36  ;;  %v658_v39 = vpop.f32.mrb[53].mxu0  ;;  %v785_v40 = vadd.f32 %v1432_v16, %v784_v37  ;;  %v786_v41 = vpop.f32.mrb[53].mxu1 }
 0x17e   :  { %v659_v42 = vpop.f32.mrb[54].mxu0  ;;  %v787_v43 = vpop.f32.mrb[54].mxu1 }
 0x17f   :  { %v824_v44 = vmax.f32 %v657_v38, 0.0  ;;  %v660_v45 = vadd.f32 %v1432_v16, %v659_v42  ;;  %v661_v46 = vpop.f32.mrb[55].mxu0  ;;  %v856_v47 = vmax.f32 %v785_v40, 0.0  ;;  %v788_v48 = vadd.f32 %v1432_v16, %v787_v43  ;;  %v789_v49 = vpop.f32.mrb[55].mxu1 }
 0x181   :  { %886 = vst.msk [vmem:[%s1742_s3 + $0xd0] sm:$0xff] %vm859_vm0, %v824_v44  ;;  %v825_v50 = vmax.f32 %v660_v45, 0.0  ;;  %918 = vst.msk [vmem:[%s1742_s3 + $0x1d0] sm:$0xff] %vm859_vm0, %v856_v47  ;;  %v857_v51 = vmax.f32 %v788_v48, 0.0 }
 0x183   :  { %887 = vst.msk [vmem:[%s1742_s3 + $0xd8] sm:$0xff] %vm859_vm0, %v825_v50  ;;  %919 = vst.msk [vmem:[%s1742_s3 + $0x1d8] sm:$0xff] %vm859_vm0, %v857_v51 }
 0x184   :  { %v664_v52 = vpop.f32.mrb[56].mxu0  ;;  %v792_v53 = vpop.f32.mrb[56].mxu1 }
 0x185   :  { %v665_v54 = vadd.f32 %v1432_v16, %v664_v52  ;;  %v666_v55 = vpop.f32.mrb[57].mxu0  ;;  %v793_v56 = vadd.f32 %v1432_v16, %v792_v53  ;;  %v794_v57 = vpop.f32.mrb[57].mxu1 }
 0x186   :  { %v667_v58 = vpop.f32.mrb[58].mxu0  ;;  %v795_v59 = vpop.f32.mrb[58].mxu1 }
 0x187   :  { %v826_v60 = vmax.f32 %v665_v54, 0.0  ;;  %v668_v61 = vadd.f32 %v1432_v16, %v667_v58  ;;  %v669_v62 = vpop.f32.mrb[59].mxu0  ;;  %v858_v63 = vmax.f32 %v793_v56, 0.0  ;;  %v796_v0 = vpop.f32.mrb[59].mxu1 }
 0x189   :  { %888 = vst.msk [vmem:[%s1742_s3 + $0xe0] sm:$0xff] %vm859_vm0, %v826_v60  ;;  %v827_v1 = vmax.f32 %v668_v61, 0.0  ;;  %920 = vst.msk [vmem:[%s1742_s3 + $0x1e0] sm:$0xff] %vm859_vm0, %v858_v63 }
 0x18b   :  { %889 = vst.msk [vmem:[%s1742_s3 + $0xe8] sm:$0xff] %vm859_vm0, %v827_v1 }
 0x18c   :  { %v672_v2 = vpop.f32.mrb[60].mxu0 }
 0x18d   :  { %v673_v3 = vadd.f32 %v1432_v16, %v672_v2  ;;  %v674_v4 = vpop.f32.mrb[61].mxu0 }
 0x18e   :  { %v675_v5 = vpop.f32.mrb[62].mxu0 }
 0x18f   :  { %v828_v6 = vmax.f32 %v673_v3, 0.0  ;;  %v676_v7 = vadd.f32 %v1432_v16, %v675_v5  ;;  %v677_v8 = vpop.f32.mrb[63].mxu0 }
 0x191   :  { %890 = vst.msk [vmem:[%s1742_s3 + $0xf0] sm:$0xff] %vm859_vm0, %v828_v6  ;;  %v829_v9 = vmax.f32 %v676_v7, 0.0 }
 0x193   :  { %891 = vst.msk [vmem:[%s1742_s3 + $0xf8] sm:$0xff] %vm859_vm0, %v829_v9 }

// kernel: lstm_model_forward.7
= control target key start
LH: loop header
LB: loop body
LE: loop exit
PB: predicated region body
PF: predicated region fallthrough
CT: control target
= control target key end

     0   :  { %vm2055_vm0 = vcmask 261120   ;;  %s4495_s1 = inlined_call_operand.vmem [shape: bf16[2592,256], index: 1, kind: input, shape index: {}]   ;;  %s4496_s0 = inlined_call_operand.vmem [shape: bf16[8,2592], index: 0, kind: input, shape index: {}]   ;;  %s4497_s2 = inlined_call_operand.vmem [shape: f32[1,256], index: 2, kind: input, shape index: {}]   ;;  %s4498_s3 = inlined_call_operand.vmem [shape: f32[8,256], index: 3, kind: output, shape index: {}]  }
   0x1   :  { %v2905_v0 = vld [vmem:[%s4495_s1 + $0x4] ss:$8 sps:$4 sm:$0xff]   ;;  %v2909_v2 = vld [vmem:[%s4495_s1] ss:$8 sps:$4 sm:$0xff]   ;;  %v2911_v4 = vld [vmem:[%s4495_s1 + $0x14] ss:$8 sps:$4 sm:$0xff]  }
   0x2   :  { %v2907_v1 = vld [vmem:[%s4495_s1 + $0x504] ss:$8 sps:$4 sm:$0xff]   ;;  %2059 = vmatprep.subr.bf16.mxu1 %v2905_v0  ;;  %v2910_v3 = vld [vmem:[%s4495_s1 + $0x500] ss:$8 sps:$4 sm:$0xff]   ;;  %v2913_v5 = vld [vmem:[%s4495_s1 + $0x514] ss:$8 sps:$4 sm:$0xff]  }
   0x3   :  { %2264 = vmatprep.subr.bf16.mxu0 %v2907_v1  ;;  %2060 = vmatpush1.bf16.msra.mxu1 %v2909_v2  ;;  %v2915_v6 = vld [vmem:[%s4495_s1 + $0x10] ss:$8 sps:$4 sm:$0xff]   ;;  %v2917_v8 = vld [vmem:[%s4495_s1 + $0x24] ss:$8 sps:$4 sm:$0xff]   ;;  %v2921_v10 = vld [vmem:[%s4495_s1 + $0x20] ss:$8 sps:$4 sm:$0xff]  }
   0x4   :  { %2265 = vmatpush1.bf16.msra.mxu0 %v2910_v3  ;;  %2061 = vmatprep.subr.bf16.mxu1 %v2911_v4  ;;  %v2916_v7 = vld [vmem:[%s4495_s1 + $0x510] ss:$8 sps:$4 sm:$0xff]   ;;  %v2919_v9 = vld [vmem:[%s4495_s1 + $0x524] ss:$8 sps:$4 sm:$0xff]   ;;  %v2922_v11 = vld [vmem:[%s4495_s1 + $0x520] ss:$8 sps:$4 sm:$0xff]  }
   0x5   :  { %2266 = vmatprep.subr.bf16.mxu0 %v2913_v5  ;;  %v2923_v12 = vld [vmem:[%s4495_s1 + $0x34] ss:$8 sps:$4 sm:$0xff]   ;;  %v2927_v14 = vld [vmem:[%s4495_s1 + $0x30] ss:$8 sps:$4 sm:$0xff]   ;;  %v2929_v16 = vld [vmem:[%s4495_s1 + $0x44] ss:$8 sps:$4 sm:$0xff]  }
   0x6   :  { %v2925_v13 = vld [vmem:[%s4495_s1 + $0x534] ss:$8 sps:$4 sm:$0xff]   ;;  %v2928_v15 = vld [vmem:[%s4495_s1 + $0x530] ss:$8 sps:$4 sm:$0xff]   ;;  %v2931_v17 = vld [vmem:[%s4495_s1 + $0x544] ss:$8 sps:$4 sm:$0xff]  }
   0x7   :  { %2062 = vmatpush1.bf16.msra.mxu1 %v2915_v6  ;;  %v2933_v18 = vld [vmem:[%s4495_s1 + $0x40] ss:$8 sps:$4 sm:$0xff]   ;;  %v2935_v20 = vld [vmem:[%s4495_s1 + $0x54] ss:$8 sps:$4 sm:$0xff]   ;;  %v2939_v22 = vld [vmem:[%s4495_s1 + $0x50] ss:$8 sps:$4 sm:$0xff]  }
   0x8   :  { %2267 = vmatpush1.bf16.msra.mxu0 %v2916_v7  ;;  %2063 = vmatprep.subr.bf16.mxu1 %v2917_v8  ;;  %v2934_v19 = vld [vmem:[%s4495_s1 + $0x540] ss:$8 sps:$4 sm:$0xff]   ;;  %v2937_v21 = vld [vmem:[%s4495_s1 + $0x554] ss:$8 sps:$4 sm:$0xff]   ;;  %v2940_v23 = vld [vmem:[%s4495_s1 + $0x550] ss:$8 sps:$4 sm:$0xff]  }
   0x9   :  { %2268 = vmatprep.subr.bf16.mxu0 %v2919_v9  ;;  %v2941_v24 = vld [vmem:[%s4495_s1 + $0x64] ss:$8 sps:$4 sm:$0xff]   ;;  %v2945_v26 = vld [vmem:[%s4495_s1 + $0x60] ss:$8 sps:$4 sm:$0xff]   ;;  %v2947_v28 = vld [vmem:[%s4495_s1 + $0x74] ss:$8 sps:$4 sm:$0xff]  }
   0xa   :  { %v2943_v25 = vld [vmem:[%s4495_s1 + $0x564] ss:$8 sps:$4 sm:$0xff]   ;;  %v2946_v27 = vld [vmem:[%s4495_s1 + $0x560] ss:$8 sps:$4 sm:$0xff]   ;;  %v2949_v29 = vld [vmem:[%s4495_s1 + $0x574] ss:$8 sps:$4 sm:$0xff]  }
   0xb   :  { %2064 = vmatpush1.bf16.msra.mxu1 %v2921_v10  ;;  %v2951_v30 = vld [vmem:[%s4495_s1 + $0x70] ss:$8 sps:$4 sm:$0xff]   ;;  %v2953_v32 = vld [vmem:[%s4495_s1 + $0x84] ss:$8 sps:$4 sm:$0xff]   ;;  %v2957_v34 = vld [vmem:[%s4495_s1 + $0x80] ss:$8 sps:$4 sm:$0xff]  }
   0xc   :  { %2269 = vmatpush1.bf16.msra.mxu0 %v2922_v11  ;;  %2065 = vmatprep.subr.bf16.mxu1 %v2923_v12  ;;  %v2952_v31 = vld [vmem:[%s4495_s1 + $0x570] ss:$8 sps:$4 sm:$0xff]   ;;  %v2955_v33 = vld [vmem:[%s4495_s1 + $0x584] ss:$8 sps:$4 sm:$0xff]   ;;  %v2958_v35 = vld [vmem:[%s4495_s1 + $0x580] ss:$8 sps:$4 sm:$0xff]  }
   0xd   :  { %2270 = vmatprep.subr.bf16.mxu0 %v2925_v13  ;;  %v2959_v36 = vld [vmem:[%s4495_s1 + $0x94] ss:$8 sps:$4 sm:$0xff]   ;;  %v2963_v38 = vld [vmem:[%s4495_s1 + $0x90] ss:$8 sps:$4 sm:$0xff]   ;;  %v2965_v40 = vld [vmem:[%s4495_s1 + $0xa4] ss:$8 sps:$4 sm:$0xff]  }
   0xe   :  { %v2961_v37 = vld [vmem:[%s4495_s1 + $0x594] ss:$8 sps:$4 sm:$0xff]   ;;  %v2964_v39 = vld [vmem:[%s4495_s1 + $0x590] ss:$8 sps:$4 sm:$0xff]   ;;  %v2967_v41 = vld [vmem:[%s4495_s1 + $0x5a4] ss:$8 sps:$4 sm:$0xff]  }
   0xf   :  { %2066 = vmatpush1.bf16.msra.mxu1 %v2927_v14  ;;  %v2969_v42 = vld [vmem:[%s4495_s1 + $0xa0] ss:$8 sps:$4 sm:$0xff]   ;;  %v2971_v44 = vld [vmem:[%s4495_s1 + $0xb4] ss:$8 sps:$4 sm:$0xff]   ;;  %v2975_v47 = vld [vmem:[%s4495_s1 + $0xb0] ss:$8 sps:$4 sm:$0xff]  }
  0x10   :  { %2271 = vmatpush1.bf16.msra.mxu0 %v2928_v15  ;;  %2067 = vmatprep.subr.bf16.mxu1 %v2929_v16  ;;  %v2970_v43 = vld [vmem:[%s4495_s1 + $0x5a0] ss:$8 sps:$4 sm:$0xff]   ;;  %v2973_v45 = vld [vmem:[%s4495_s1 + $0x5b4] ss:$8 sps:$4 sm:$0xff]   ;;  %v2976_v49 = vld [vmem:[%s4495_s1 + $0x5b0] ss:$8 sps:$4 sm:$0xff]  }
  0x11   :  { %2272 = vmatprep.subr.bf16.mxu0 %v2931_v17  ;;  %v15_v46 = vld [vmem:[%s4496_s0] sm:$0xff]  ;;  %v20_v50 = vld [vmem:[%s4496_s0 + $0x28] sm:$0xff]  ;;  %v2983_v56 = vld [vmem:[%s4495_s1 + $0xd4] ss:$8 sps:$4 sm:$0xff]  }
  0x12   :  { %v2519_v48 = vcombine.high %v15_v46, %v15_v46  ;;  %v2977_v51 = vld [vmem:[%s4495_s1 + $0xc4] ss:$8 sps:$4 sm:$0xff]   ;;  %v2529_v53 = vcombine.high %v20_v50, %v20_v50  ;;  %v2981_v54 = vld [vmem:[%s4495_s1 + $0xc0] ss:$8 sps:$4 sm:$0xff]   ;;  %v2985_v57 = vld [vmem:[%s4495_s1 + $0x5d4] ss:$8 sps:$4 sm:$0xff]   ;;  %v2518_v6 = vcombine.low %v15_v46, %v15_v46  ;;  %v2528_v7 = vcombine.low %v20_v50, %v20_v50 }
  0x13   :  { %2068 = vmatpush1.bf16.msra.mxu1 %v2933_v18  ;;  %v2979_v52 = vld [vmem:[%s4495_s1 + $0x5c4] ss:$8 sps:$4 sm:$0xff]   ;;  %v2982_v55 = vld [vmem:[%s4495_s1 + $0x5c0] ss:$8 sps:$4 sm:$0xff]   ;;  %v2987_v58 = vld [vmem:[%s4495_s1 + $0xd0] ss:$8 sps:$4 sm:$0xff]  }
  0x14   :  { %2273 = vmatpush1.bf16.msra.mxu0 %v2934_v19  ;;  %2069 = vmatprep.subr.bf16.mxu1 %v2935_v20  ;;  %v2988_v59 = vld [vmem:[%s4495_s1 + $0x5d0] ss:$8 sps:$4 sm:$0xff]   ;;  %v2989_v60 = vld [vmem:[%s4495_s1 + $0xe4] ss:$8 sps:$4 sm:$0xff]   ;;  %v2993_v62 = vld [vmem:[%s4495_s1 + $0xe0] ss:$8 sps:$4 sm:$0xff]  }
  0x15   :  { %2274 = vmatprep.subr.bf16.mxu0 %v2937_v21  ;;  %2091 = vmatprep.mubr.bf16.mxu1 %v2519_v48  ;;  %v2991_v61 = vld [vmem:[%s4495_s1 + $0x5e4] ss:$8 sps:$4 sm:$0xff]   ;;  %v2994_v63 = vld [vmem:[%s4495_s1 + $0x5e0] ss:$8 sps:$4 sm:$0xff]   ;;  %v2995_v0 = vld [vmem:[%s4495_s1 + $0xf4] ss:$8 sps:$4 sm:$0xff]  }
  0x16   :  { %2296 = vmatprep.mubr.bf16.mxu0 %v2529_v53  ;;  %v2997_v1 = vld [vmem:[%s4495_s1 + $0x5f4] ss:$8 sps:$4 sm:$0xff]   ;;  %v2999_v2 = vld [vmem:[%s4495_s1 + $0xf0] ss:$8 sps:$4 sm:$0xff]   ;;  %v3005_v4 = vld [vmem:[%s4495_s1 + $0x104] ss:$8 sps:$4 sm:$0xff]  }
  0x17   :  { %2070 = vmatpush1.bf16.msra.mxu1 %v2939_v22  ;;  %v3000_v3 = vld [vmem:[%s4495_s1 + $0x5f0] ss:$8 sps:$4 sm:$0xff]   ;;  %v3010_v5 = vld [vmem:[%s4495_s1 + $0x604] ss:$8 sps:$4 sm:$0xff]   ;;  %v3003_v8 = vld [vmem:[%s4495_s1 + $0x100] ss:$8 sps:$4 sm:$0xff]  }
  0x18   :  { %2275 = vmatpush1.bf16.msra.mxu0 %v2940_v23  ;;  %2071 = vmatprep.subr.bf16.mxu1 %v2941_v24  ;;  %v3008_v9 = vld [vmem:[%s4495_s1 + $0x600] ss:$8 sps:$4 sm:$0xff]   ;;  %v3013_v10 = vld [vmem:[%s4495_s1 + $0x114] ss:$8 sps:$4 sm:$0xff]   ;;  %v3011_v12 = vld [vmem:[%s4495_s1 + $0x110] ss:$8 sps:$4 sm:$0xff]  }
  0x19   :  { %2276 = vmatprep.subr.bf16.mxu0 %v2943_v25  ;;  %v3016_v11 = vld [vmem:[%s4495_s1 + $0x614] ss:$8 sps:$4 sm:$0xff]   ;;  %v3014_v13 = vld [vmem:[%s4495_s1 + $0x610] ss:$8 sps:$4 sm:$0xff]   ;;  %v3019_v14 = vld [vmem:[%s4495_s1 + $0x124] ss:$8 sps:$4 sm:$0xff]  }
  0x1a   :  { %v3022_v15 = vld [vmem:[%s4495_s1 + $0x624] ss:$8 sps:$4 sm:$0xff]   ;;  %v3017_v16 = vld [vmem:[%s4495_s1 + $0x120] ss:$8 sps:$4 sm:$0xff]   ;;  %v3025_v18 = vld [vmem:[%s4495_s1 + $0x134] ss:$8 sps:$4 sm:$0xff]  }
  0x1b   :  { %2072 = vmatpush1.bf16.msra.mxu1 %v2945_v26  ;;  %v3020_v17 = vld [vmem:[%s4495_s1 + $0x620] ss:$8 sps:$4 sm:$0xff]   ;;  %v3028_v19 = vld [vmem:[%s4495_s1 + $0x634] ss:$8 sps:$4 sm:$0xff]   ;;  %v3023_v20 = vld [vmem:[%s4495_s1 + $0x130] ss:$8 sps:$4 sm:$0xff]  }
  0x1c   :  { %2277 = vmatpush1.bf16.msra.mxu0 %v2946_v27  ;;  %2073 = vmatprep.subr.bf16.mxu1 %v2947_v28  ;;  %v3026_v21 = vld [vmem:[%s4495_s1 + $0x630] ss:$8 sps:$4 sm:$0xff]   ;;  %v3031_v22 = vld [vmem:[%s4495_s1 + $0x144] ss:$8 sps:$4 sm:$0xff]   ;;  %v3029_v24 = vld [vmem:[%s4495_s1 + $0x140] ss:$8 sps:$4 sm:$0xff]  }
  0x1d   :  { %2278 = vmatprep.subr.bf16.mxu0 %v2949_v29  ;;  %v3034_v23 = vld [vmem:[%s4495_s1 + $0x644] ss:$8 sps:$4 sm:$0xff]   ;;  %v3032_v25 = vld [vmem:[%s4495_s1 + $0x640] ss:$8 sps:$4 sm:$0xff]   ;;  %v3037_v26 = vld [vmem:[%s4495_s1 + $0x154] ss:$8 sps:$4 sm:$0xff]  }
  0x1e   :  { %v3040_v27 = vld [vmem:[%s4495_s1 + $0x654] ss:$8 sps:$4 sm:$0xff]   ;;  %v3035_v28 = vld [vmem:[%s4495_s1 + $0x150] ss:$8 sps:$4 sm:$0xff]   ;;  %v3067_v50 = vld [vmem:[%s4495_s1 + $0x1a4] ss:$8 sps:$4 sm:$0xff]  }
  0x1f   :  { %2074 = vmatpush1.bf16.msra.mxu1 %v2951_v30  ;;  %v3038_v29 = vld [vmem:[%s4495_s1 + $0x650] ss:$8 sps:$4 sm:$0xff]   ;;  %v3043_v30 = vld [vmem:[%s4495_s1 + $0x164] ss:$8 sps:$4 sm:$0xff]   ;;  %v3061_v46 = vld [vmem:[%s4495_s1 + $0x194] ss:$8 sps:$4 sm:$0xff]  }
  0x20   :  { %2279 = vmatpush1.bf16.msra.mxu0 %v2952_v31  ;;  %2075 = vmatprep.subr.bf16.mxu1 %v2953_v32  ;;  %v3046_v31 = vld [vmem:[%s4495_s1 + $0x664] ss:$8 sps:$4 sm:$0xff]   ;;  %v3059_v48 = vld [vmem:[%s4495_s1 + $0x190] ss:$8 sps:$4 sm:$0xff]   ;;  %v3068_v53 = vld [vmem:[%s4495_s1 + $0x6a0] ss:$8 sps:$4 sm:$0xff]  }
  0x21   :  { %2280 = vmatprep.subr.bf16.mxu0 %v2955_v33  ;;  %v3712_v32 = vld [vmem:[%s4496_s0 + $0x8] sm:$0xff] }
  0x22   :  { %v3041_v33 = vld [vmem:[%s4495_s1 + $0x160] ss:$8 sps:$4 sm:$0xff]  }
  0x23   :  { %2076 = vmatpush1.bf16.msra.mxu1 %v2957_v34  ;;  %v3044_v34 = vld [vmem:[%s4495_s1 + $0x660] ss:$8 sps:$4 sm:$0xff]  }
  0x24   :  { %2281 = vmatpush1.bf16.msra.mxu0 %v2958_v35  ;;  %2077 = vmatprep.subr.bf16.mxu1 %v2959_v36  ;;  %v2521_v35 = vcombine.high %v3712_v32, %v3712_v32  ;;  %v3725_v36 = vld [vmem:[%s4496_s0 + $0x30] sm:$0xff] }
  0x25   :  { %2282 = vmatprep.subr.bf16.mxu0 %v2961_v37  ;;  %v3049_v37 = vld [vmem:[%s4495_s1 + $0x174] ss:$8 sps:$4 sm:$0xff]  }
  0x27   :  { %2078 = vmatpush1.bf16.msra.mxu1 %v2963_v38  ;;  %v2531_v38 = vcombine.high %v3725_v36, %v3725_v36 }
  0x28   :  { %2283 = vmatpush1.bf16.msra.mxu0 %v2964_v39  ;;  %2079 = vmatprep.subr.bf16.mxu1 %v2965_v40  ;;  %v3052_v39 = vld [vmem:[%s4495_s1 + $0x674] ss:$8 sps:$4 sm:$0xff]   ;;  %v3047_v40 = vld [vmem:[%s4495_s1 + $0x170] ss:$8 sps:$4 sm:$0xff]  }
  0x29   :  { %2284 = vmatprep.subr.bf16.mxu0 %v2967_v41  ;;  %v3050_v41 = vld [vmem:[%s4495_s1 + $0x670] ss:$8 sps:$4 sm:$0xff]  }
  0x2b   :  { %2080 = vmatpush1.bf16.msra.mxu1 %v2969_v42  ;;  %v3055_v42 = vld [vmem:[%s4495_s1 + $0x184] ss:$8 sps:$4 sm:$0xff]  }
  0x2c   :  { %2285 = vmatpush1.bf16.msra.mxu0 %v2970_v43  ;;  %2081 = vmatprep.subr.bf16.mxu1 %v2971_v44  ;;  %v3058_v43 = vld [vmem:[%s4495_s1 + $0x684] ss:$8 sps:$4 sm:$0xff]   ;;  %v3053_v44 = vld [vmem:[%s4495_s1 + $0x180] ss:$8 sps:$4 sm:$0xff]  }
  0x2d   :  { %2286 = vmatprep.subr.bf16.mxu0 %v2973_v45  ;;  %v3056_v45 = vld [vmem:[%s4495_s1 + $0x680] ss:$8 sps:$4 sm:$0xff]  }
  0x2f   :  { %2082 = vmatpush1.bf16.msra.mxu1 %v2975_v47  ;;  %v3064_v47 = vld [vmem:[%s4495_s1 + $0x694] ss:$8 sps:$4 sm:$0xff]  }
  0x30   :  { %2287 = vmatpush1.bf16.msra.mxu0 %v2976_v49  ;;  %2083 = vmatprep.subr.bf16.mxu1 %v2977_v51  ;;  %v3062_v49 = vld [vmem:[%s4495_s1 + $0x690] ss:$8 sps:$4 sm:$0xff]   ;;  %v3070_v51 = vld [vmem:[%s4495_s1 + $0x6a4] ss:$8 sps:$4 sm:$0xff]  }
  0x31   :  { %2288 = vmatprep.subr.bf16.mxu0 %v2979_v52  ;;  %v3065_v52 = vld [vmem:[%s4495_s1 + $0x1a0] ss:$8 sps:$4 sm:$0xff]  }
  0x33   :  { %2084 = vmatpush1.bf16.msra.mxu1 %v2981_v54  ;;  %v3073_v54 = vld [vmem:[%s4495_s1 + $0x1b4] ss:$8 sps:$4 sm:$0xff]  }
  0x34   :  { %2289 = vmatpush1.bf16.msra.mxu0 %v2982_v55  ;;  %2085 = vmatprep.subr.bf16.mxu1 %v2983_v56  ;;  %v3076_v55 = vld [vmem:[%s4495_s1 + $0x6b4] ss:$8 sps:$4 sm:$0xff]   ;;  %v3071_v56 = vld [vmem:[%s4495_s1 + $0x1b0] ss:$8 sps:$4 sm:$0xff]  }
  0x35   :  { %2290 = vmatprep.subr.bf16.mxu0 %v2985_v57  ;;  %v3074_v57 = vld [vmem:[%s4495_s1 + $0x6b0] ss:$8 sps:$4 sm:$0xff]  }
  0x37   :  { %2086 = vmatpush1.bf16.msra.mxu1 %v2987_v58  ;;  %v3079_v58 = vld [vmem:[%s4495_s1 + $0x1c4] ss:$8 sps:$4 sm:$0xff]  }
  0x38   :  { %2291 = vmatpush1.bf16.msra.mxu0 %v2988_v59  ;;  %2087 = vmatprep.subr.bf16.mxu1 %v2989_v60  ;;  %v3082_v59 = vld [vmem:[%s4495_s1 + $0x6c4] ss:$8 sps:$4 sm:$0xff]   ;;  %v3077_v60 = vld [vmem:[%s4495_s1 + $0x1c0] ss:$8 sps:$4 sm:$0xff]  }
  0x39   :  { %2292 = vmatprep.subr.bf16.mxu0 %v2991_v61  ;;  %v3080_v61 = vld [vmem:[%s4495_s1 + $0x6c0] ss:$8 sps:$4 sm:$0xff]  }
  0x3b   :  { %2088 = vmatpush1.bf16.msra.mxu1 %v2993_v62  ;;  %v3085_v62 = vld [vmem:[%s4495_s1 + $0x1d4] ss:$8 sps:$4 sm:$0xff]  }
  0x3c   :  { %2293 = vmatpush1.bf16.msra.mxu0 %v2994_v63  ;;  %2089 = vmatprep.subr.bf16.mxu1 %v2995_v0  ;;  %v3088_v63 = vld [vmem:[%s4495_s1 + $0x6d4] ss:$8 sps:$4 sm:$0xff]   ;;  %v3083_v0 = vld [vmem:[%s4495_s1 + $0x1d0] ss:$8 sps:$4 sm:$0xff]  }
  0x3d   :  { %2294 = vmatprep.subr.bf16.mxu0 %v2997_v1  ;;  %v3086_v1 = vld [vmem:[%s4495_s1 + $0x6d0] ss:$8 sps:$4 sm:$0xff]  }
  0x3f   :  { %2090 = vmatpush1.bf16.msra.mxu1 %v2999_v2  ;;  %v3091_v2 = vld [vmem:[%s4495_s1 + $0x1e4] ss:$8 sps:$4 sm:$0xff]  }
  0x40   :  { %2295 = vmatpush1.bf16.msra.mxu0 %v3000_v3  ;;  %2100 = vmatprep.subr.bf16.mxu1 %v3005_v4  ;;  %v3094_v3 = vld [vmem:[%s4495_s1 + $0x6e4] ss:$8 sps:$4 sm:$0xff]   ;;  %v3089_v4 = vld [vmem:[%s4495_s1 + $0x1e0] ss:$8 sps:$4 sm:$0xff]  }
  0x41   :  { %2305 = vmatprep.subr.bf16.mxu0 %v3010_v5  ;;  %v3092_v5 = vld [vmem:[%s4495_s1 + $0x6e0] ss:$8 sps:$4 sm:$0xff]  }
  0x42   :  { %2092 = vmatmul.mubr.bf16.vlgmr.msra.gmra.mrb[0].mxu1 %v2518_v6  ;;  %v3097_v6 = vld [vmem:[%s4495_s1 + $0x1f4] ss:$8 sps:$4 sm:$0xff]  }
  0x43   :  { %2297 = vmatmul.mubr.bf16.vlgmr.msra.gmra.mrb[0].mxu0 %v2528_v7  ;;  %2101 = vmatpush1.bf16.msra.mxu1 %v3003_v8  ;;  %v3100_v7 = vld [vmem:[%s4495_s1 + $0x6f4] ss:$8 sps:$4 sm:$0xff]   ;;  %v3095_v8 = vld [vmem:[%s4495_s1 + $0x1f0] ss:$8 sps:$4 sm:$0xff]  }
  0x44   :  { %2306 = vmatpush1.bf16.msra.mxu0 %v3008_v9  ;;  %2102 = vmatprep.subr.bf16.mxu1 %v3013_v10  ;;  %v3098_v9 = vld [vmem:[%s4495_s1 + $0x6f0] ss:$8 sps:$4 sm:$0xff]   ;;  %v3105_v10 = vld [vmem:[%s4495_s1 + $0x204] ss:$8 sps:$4 sm:$0xff]  }
  0x45   :  { %2307 = vmatprep.subr.bf16.mxu0 %v3016_v11  ;;  %2132 = vmatprep.mubr.bf16.mxu1 %v2521_v35  ;;  %v3110_v11 = vld [vmem:[%s4495_s1 + $0x704] ss:$8 sps:$4 sm:$0xff]   ;;  %v3132_v35 = vld [vmem:[%s4495_s1 + $0x740] ss:$8 sps:$4 sm:$0xff]  }
  0x46   :  { %2337 = vmatprep.mubr.bf16.mxu0 %v2531_v38  ;;  %v3135_v38 = vld [vmem:[%s4495_s1 + $0x250] ss:$8 sps:$4 sm:$0xff]  }
  0x47   :  { %2103 = vmatpush1.bf16.msra.mxu1 %v3011_v12  ;;  %v2520_v12 = vcombine.low %v3712_v32, %v3712_v32  ;;  %v3131_v32 = vld [vmem:[%s4495_s1 + $0x244] ss:$8 sps:$4 sm:$0xff]  }
  0x48   :  { %2308 = vmatpush1.bf16.msra.mxu0 %v3014_v13  ;;  %2104 = vmatprep.subr.bf16.mxu1 %v3019_v14  ;;  %v3103_v13 = vld [vmem:[%s4495_s1 + $0x200] ss:$8 sps:$4 sm:$0xff]   ;;  %v2530_v14 = vcombine.low %v3725_v36, %v3725_v36  ;;  %v3137_v36 = vld [vmem:[%s4495_s1 + $0x254] ss:$8 sps:$4 sm:$0xff]  }
  0x49   :  { %2309 = vmatprep.subr.bf16.mxu0 %v3022_v15  ;;  %v3108_v15 = vld [vmem:[%s4495_s1 + $0x700] ss:$8 sps:$4 sm:$0xff]  }
  0x4b   :  { %2105 = vmatpush1.bf16.msra.mxu1 %v3017_v16  ;;  %v3113_v16 = vld [vmem:[%s4495_s1 + $0x214] ss:$8 sps:$4 sm:$0xff]  }
  0x4c   :  { %2310 = vmatpush1.bf16.msra.mxu0 %v3020_v17  ;;  %2106 = vmatprep.subr.bf16.mxu1 %v3025_v18  ;;  %v3116_v17 = vld [vmem:[%s4495_s1 + $0x714] ss:$8 sps:$4 sm:$0xff]  }
  0x4d   :  { %2311 = vmatprep.subr.bf16.mxu0 %v3028_v19  ;;  %v3862_v18 = vld [vmem:[%s4496_s0 + $0x10] sm:$0xff] }
  0x4e   :  { %v2523_v19 = vcombine.high %v3862_v18, %v3862_v18 }
  0x4f   :  { %2107 = vmatpush1.bf16.msra.mxu1 %v3023_v20  ;;  %v3869_v20 = vld [vmem:[%s4496_s0 + $0x38] sm:$0xff] }
  0x50   :  { %2312 = vmatpush1.bf16.msra.mxu0 %v3026_v21  ;;  %2108 = vmatprep.subr.bf16.mxu1 %v3031_v22  ;;  %v3111_v21 = vld [vmem:[%s4495_s1 + $0x210] ss:$8 sps:$4 sm:$0xff]  }
  0x51   :  { %2313 = vmatprep.subr.bf16.mxu0 %v3034_v23  ;;  %v3114_v22 = vld [vmem:[%s4495_s1 + $0x710] ss:$8 sps:$4 sm:$0xff]   ;;  %v2533_v23 = vcombine.high %v3869_v20, %v3869_v20 }
  0x53   :  { %2109 = vmatpush1.bf16.msra.mxu1 %v3029_v24  ;;  %v3119_v24 = vld [vmem:[%s4495_s1 + $0x224] ss:$8 sps:$4 sm:$0xff]  }
  0x54   :  { %2314 = vmatpush1.bf16.msra.mxu0 %v3032_v25  ;;  %2110 = vmatprep.subr.bf16.mxu1 %v3037_v26  ;;  %v3122_v25 = vld [vmem:[%s4495_s1 + $0x724] ss:$8 sps:$4 sm:$0xff]   ;;  %v3117_v26 = vld [vmem:[%s4495_s1 + $0x220] ss:$8 sps:$4 sm:$0xff]  }
  0x55   :  { %2315 = vmatprep.subr.bf16.mxu0 %v3040_v27  ;;  %v3120_v27 = vld [vmem:[%s4495_s1 + $0x720] ss:$8 sps:$4 sm:$0xff]  }
  0x57   :  { %2111 = vmatpush1.bf16.msra.mxu1 %v3035_v28  ;;  %v3125_v28 = vld [vmem:[%s4495_s1 + $0x234] ss:$8 sps:$4 sm:$0xff]  }
  0x58   :  { %2316 = vmatpush1.bf16.msra.mxu0 %v3038_v29  ;;  %2112 = vmatprep.subr.bf16.mxu1 %v3043_v30  ;;  %v3128_v29 = vld [vmem:[%s4495_s1 + $0x734] ss:$8 sps:$4 sm:$0xff]   ;;  %v3123_v30 = vld [vmem:[%s4495_s1 + $0x230] ss:$8 sps:$4 sm:$0xff]  }
  0x59   :  { %2317 = vmatprep.subr.bf16.mxu0 %v3046_v31  ;;  %v3126_v31 = vld [vmem:[%s4495_s1 + $0x730] ss:$8 sps:$4 sm:$0xff]  }
  0x5b   :  { %2113 = vmatpush1.bf16.msra.mxu1 %v3041_v33  ;;  %v3134_v33 = vld [vmem:[%s4495_s1 + $0x744] ss:$8 sps:$4 sm:$0xff]  }
  0x5c   :  { %2318 = vmatpush1.bf16.msra.mxu0 %v3044_v34  ;;  %2114 = vmatprep.subr.bf16.mxu1 %v3049_v37  ;;  %v3129_v34 = vld [vmem:[%s4495_s1 + $0x240] ss:$8 sps:$4 sm:$0xff]   ;;  %v3140_v37 = vld [vmem:[%s4495_s1 + $0x754] ss:$8 sps:$4 sm:$0xff]  }
  0x5d   :  { %2319 = vmatprep.subr.bf16.mxu0 %v3052_v39  ;;  %v3138_v39 = vld [vmem:[%s4495_s1 + $0x750] ss:$8 sps:$4 sm:$0xff]  }
  0x5f   :  { %2115 = vmatpush1.bf16.msra.mxu1 %v3047_v40  ;;  %v3143_v40 = vld [vmem:[%s4495_s1 + $0x264] ss:$8 sps:$4 sm:$0xff]  }
  0x60   :  { %2320 = vmatpush1.bf16.msra.mxu0 %v3050_v41  ;;  %2116 = vmatprep.subr.bf16.mxu1 %v3055_v42  ;;  %v3146_v41 = vld [vmem:[%s4495_s1 + $0x764] ss:$8 sps:$4 sm:$0xff]   ;;  %v3141_v42 = vld [vmem:[%s4495_s1 + $0x260] ss:$8 sps:$4 sm:$0xff]  }
  0x61   :  { %2321 = vmatprep.subr.bf16.mxu0 %v3058_v43  ;;  %v3144_v43 = vld [vmem:[%s4495_s1 + $0x760] ss:$8 sps:$4 sm:$0xff]  }
  0x63   :  { %2117 = vmatpush1.bf16.msra.mxu1 %v3053_v44  ;;  %v3149_v44 = vld [vmem:[%s4495_s1 + $0x274] ss:$8 sps:$4 sm:$0xff]  }
  0x64   :  { %2322 = vmatpush1.bf16.msra.mxu0 %v3056_v45  ;;  %2118 = vmatprep.subr.bf16.mxu1 %v3061_v46  ;;  %v3152_v45 = vld [vmem:[%s4495_s1 + $0x774] ss:$8 sps:$4 sm:$0xff]   ;;  %v3147_v46 = vld [vmem:[%s4495_s1 + $0x270] ss:$8 sps:$4 sm:$0xff]  }
  0x65   :  { %2323 = vmatprep.subr.bf16.mxu0 %v3064_v47  ;;  %v3150_v47 = vld [vmem:[%s4495_s1 + $0x770] ss:$8 sps:$4 sm:$0xff]  }
  0x67   :  { %2119 = vmatpush1.bf16.msra.mxu1 %v3059_v48  ;;  %v3155_v48 = vld [vmem:[%s4495_s1 + $0x284] ss:$8 sps:$4 sm:$0xff]  }
  0x68   :  { %2324 = vmatpush1.bf16.msra.mxu0 %v3062_v49  ;;  %2120 = vmatprep.subr.bf16.mxu1 %v3067_v50  ;;  %v3158_v49 = vld [vmem:[%s4495_s1 + $0x784] ss:$8 sps:$4 sm:$0xff]   ;;  %v3153_v50 = vld [vmem:[%s4495_s1 + $0x280] ss:$8 sps:$4 sm:$0xff]  }
  0x69   :  { %2325 = vmatprep.subr.bf16.mxu0 %v3070_v51  ;;  %v3156_v51 = vld [vmem:[%s4495_s1 + $0x780] ss:$8 sps:$4 sm:$0xff]  }
  0x6b   :  { %2121 = vmatpush1.bf16.msra.mxu1 %v3065_v52  ;;  %v3161_v52 = vld [vmem:[%s4495_s1 + $0x294] ss:$8 sps:$4 sm:$0xff]  }
  0x6c   :  { %2326 = vmatpush1.bf16.msra.mxu0 %v3068_v53  ;;  %2122 = vmatprep.subr.bf16.mxu1 %v3073_v54  ;;  %v3164_v53 = vld [vmem:[%s4495_s1 + $0x794] ss:$8 sps:$4 sm:$0xff]   ;;  %v3159_v54 = vld [vmem:[%s4495_s1 + $0x290] ss:$8 sps:$4 sm:$0xff]  }
  0x6d   :  { %2327 = vmatprep.subr.bf16.mxu0 %v3076_v55  ;;  %v3162_v55 = vld [vmem:[%s4495_s1 + $0x790] ss:$8 sps:$4 sm:$0xff]  }
  0x6f   :  { %2123 = vmatpush1.bf16.msra.mxu1 %v3071_v56  ;;  %v3167_v56 = vld [vmem:[%s4495_s1 + $0x2a4] ss:$8 sps:$4 sm:$0xff]  }
  0x70   :  { %2328 = vmatpush1.bf16.msra.mxu0 %v3074_v57  ;;  %2124 = vmatprep.subr.bf16.mxu1 %v3079_v58  ;;  %v3170_v57 = vld [vmem:[%s4495_s1 + $0x7a4] ss:$8 sps:$4 sm:$0xff]   ;;  %v3165_v58 = vld [vmem:[%s4495_s1 + $0x2a0] ss:$8 sps:$4 sm:$0xff]  }
  0x71   :  { %2329 = vmatprep.subr.bf16.mxu0 %v3082_v59  ;;  %v3168_v59 = vld [vmem:[%s4495_s1 + $0x7a0] ss:$8 sps:$4 sm:$0xff]  }
  0x73   :  { %2125 = vmatpush1.bf16.msra.mxu1 %v3077_v60  ;;  %v3173_v60 = vld [vmem:[%s4495_s1 + $0x2b4] ss:$8 sps:$4 sm:$0xff]  }
  0x74   :  { %2330 = vmatpush1.bf16.msra.mxu0 %v3080_v61  ;;  %2126 = vmatprep.subr.bf16.mxu1 %v3085_v62  ;;  %v3176_v61 = vld [vmem:[%s4495_s1 + $0x7b4] ss:$8 sps:$4 sm:$0xff]   ;;  %v3171_v62 = vld [vmem:[%s4495_s1 + $0x2b0] ss:$8 sps:$4 sm:$0xff]  }
  0x75   :  { %2331 = vmatprep.subr.bf16.mxu0 %v3088_v63  ;;  %v3174_v63 = vld [vmem:[%s4495_s1 + $0x7b0] ss:$8 sps:$4 sm:$0xff]  }
  0x77   :  { %2127 = vmatpush1.bf16.msra.mxu1 %v3083_v0  ;;  %v3179_v0 = vld [vmem:[%s4495_s1 + $0x2c4] ss:$8 sps:$4 sm:$0xff]  }
  0x78   :  { %2332 = vmatpush1.bf16.msra.mxu0 %v3086_v1  ;;  %2128 = vmatprep.subr.bf16.mxu1 %v3091_v2  ;;  %v3182_v1 = vld [vmem:[%s4495_s1 + $0x7c4] ss:$8 sps:$4 sm:$0xff]   ;;  %v3177_v2 = vld [vmem:[%s4495_s1 + $0x2c0] ss:$8 sps:$4 sm:$0xff]  }
  0x79   :  { %2333 = vmatprep.subr.bf16.mxu0 %v3094_v3  ;;  %v3180_v3 = vld [vmem:[%s4495_s1 + $0x7c0] ss:$8 sps:$4 sm:$0xff]  }
  0x7b   :  { %2129 = vmatpush1.bf16.msra.mxu1 %v3089_v4  ;;  %v3185_v4 = vld [vmem:[%s4495_s1 + $0x2d4] ss:$8 sps:$4 sm:$0xff]  }
  0x7c   :  { %2334 = vmatpush1.bf16.msra.mxu0 %v3092_v5  ;;  %2130 = vmatprep.subr.bf16.mxu1 %v3097_v6  ;;  %v3188_v5 = vld [vmem:[%s4495_s1 + $0x7d4] ss:$8 sps:$4 sm:$0xff]   ;;  %v3183_v6 = vld [vmem:[%s4495_s1 + $0x2d0] ss:$8 sps:$4 sm:$0xff]  }
  0x7d   :  { %2335 = vmatprep.subr.bf16.mxu0 %v3100_v7  ;;  %v3186_v7 = vld [vmem:[%s4495_s1 + $0x7d0] ss:$8 sps:$4 sm:$0xff]  }
  0x7f   :  { %2131 = vmatpush1.bf16.msra.mxu1 %v3095_v8  ;;  %v3191_v8 = vld [vmem:[%s4495_s1 + $0x2e4] ss:$8 sps:$4 sm:$0xff]  }
  0x80   :  { %2336 = vmatpush1.bf16.msra.mxu0 %v3098_v9  ;;  %2141 = vmatprep.subr.bf16.mxu1 %v3105_v10  ;;  %v3194_v9 = vld [vmem:[%s4495_s1 + $0x7e4] ss:$8 sps:$4 sm:$0xff]   ;;  %v3189_v10 = vld [vmem:[%s4495_s1 + $0x2e0] ss:$8 sps:$4 sm:$0xff]  }
  0x81   :  { %2346 = vmatprep.subr.bf16.mxu0 %v3110_v11  ;;  %v3192_v11 = vld [vmem:[%s4495_s1 + $0x7e0] ss:$8 sps:$4 sm:$0xff]  }
  0x82   :  { %2133 = vmatmul.mubr.bf16.vlgmr.msra.gmra.mrb[0].mxu1 %v2520_v12  ;;  %v3197_v12 = vld [vmem:[%s4495_s1 + $0x2f4] ss:$8 sps:$4 sm:$0xff]  }
  0x83   :  { %2338 = vmatmul.mubr.bf16.vlgmr.msra.gmra.mrb[0].mxu0 %v2530_v14  ;;  %2142 = vmatpush1.bf16.msra.mxu1 %v3103_v13  ;;  %v3200_v13 = vld [vmem:[%s4495_s1 + $0x7f4] ss:$8 sps:$4 sm:$0xff]   ;;  %v3195_v14 = vld [vmem:[%s4495_s1 + $0x2f0] ss:$8 sps:$4 sm:$0xff]  }
  0x84   :  { %2347 = vmatpush1.bf16.msra.mxu0 %v3108_v15  ;;  %2143 = vmatprep.subr.bf16.mxu1 %v3113_v16  ;;  %v3198_v15 = vld [vmem:[%s4495_s1 + $0x7f0] ss:$8 sps:$4 sm:$0xff]   ;;  %v3205_v16 = vld [vmem:[%s4495_s1 + $0x304] ss:$8 sps:$4 sm:$0xff]  }
  0x85   :  { %2348 = vmatprep.subr.bf16.mxu0 %v3116_v17  ;;  %2173 = vmatprep.mubr.bf16.mxu1 %v2523_v19  ;;  %v3210_v17 = vld [vmem:[%s4495_s1 + $0x804] ss:$8 sps:$4 sm:$0xff]   ;;  %v3203_v19 = vld [vmem:[%s4495_s1 + $0x300] ss:$8 sps:$4 sm:$0xff]  }
  0x86   :  { %2378 = vmatprep.mubr.bf16.mxu0 %v2533_v23  ;;  %v2532_v23 = vcombine.low %v3869_v20, %v3869_v20 }
  0x87   :  { %2144 = vmatpush1.bf16.msra.mxu1 %v3111_v21  ;;  %v3208_v21 = vld [vmem:[%s4495_s1 + $0x800] ss:$8 sps:$4 sm:$0xff]  }
  0x88   :  { %2349 = vmatpush1.bf16.msra.mxu0 %v3114_v22  ;;  %2145 = vmatprep.subr.bf16.mxu1 %v3119_v24  ;;  %v2522_v22 = vcombine.low %v3862_v18, %v3862_v18  ;;  %v4066_v24 = vld [vmem:[%s4496_s0 + $0x18] sm:$0xff] }
  0x89   :  { %2350 = vmatprep.subr.bf16.mxu0 %v3122_v25  ;;  %v4071_v25 = vld [vmem:[%s4496_s0 + $0x40] sm:$0xff]  ;;  %v3216_v18 = vld [vmem:[%s4495_s1 + $0x814] ss:$8 sps:$4 sm:$0xff]   ;;  %v2525_v20 = vcombine.high %v4066_v24, %v4066_v24 }
  0x8b   :  { %2146 = vmatpush1.bf16.msra.mxu1 %v3117_v26  ;;  %v3213_v26 = vld [vmem:[%s4495_s1 + $0x314] ss:$8 sps:$4 sm:$0xff]  }
  0x8c   :  { %2351 = vmatpush1.bf16.msra.mxu0 %v3120_v27  ;;  %2147 = vmatprep.subr.bf16.mxu1 %v3125_v28  ;;  %v2535_v27 = vcombine.high %v4071_v25, %v4071_v25  ;;  %v3211_v28 = vld [vmem:[%s4495_s1 + $0x310] ss:$8 sps:$4 sm:$0xff]  }
  0x8d   :  { %2352 = vmatprep.subr.bf16.mxu0 %v3128_v29  ;;  %v3214_v29 = vld [vmem:[%s4495_s1 + $0x810] ss:$8 sps:$4 sm:$0xff]  }
  0x8f   :  { %2148 = vmatpush1.bf16.msra.mxu1 %v3123_v30  ;;  %v3219_v30 = vld [vmem:[%s4495_s1 + $0x324] ss:$8 sps:$4 sm:$0xff]  }
  0x90   :  { %2353 = vmatpush1.bf16.msra.mxu0 %v3126_v31  ;;  %2149 = vmatprep.subr.bf16.mxu1 %v3131_v32  ;;  %v3222_v31 = vld [vmem:[%s4495_s1 + $0x824] ss:$8 sps:$4 sm:$0xff]   ;;  %v3217_v32 = vld [vmem:[%s4495_s1 + $0x320] ss:$8 sps:$4 sm:$0xff]  }
  0x91   :  { %2354 = vmatprep.subr.bf16.mxu0 %v3134_v33  ;;  %v3220_v33 = vld [vmem:[%s4495_s1 + $0x820] ss:$8 sps:$4 sm:$0xff]  }
  0x93   :  { %2150 = vmatpush1.bf16.msra.mxu1 %v3129_v34  ;;  %v3225_v34 = vld [vmem:[%s4495_s1 + $0x334] ss:$8 sps:$4 sm:$0xff]  }
  0x94   :  { %2355 = vmatpush1.bf16.msra.mxu0 %v3132_v35  ;;  %2151 = vmatprep.subr.bf16.mxu1 %v3137_v36  ;;  %v3228_v35 = vld [vmem:[%s4495_s1 + $0x834] ss:$8 sps:$4 sm:$0xff]   ;;  %v3223_v36 = vld [vmem:[%s4495_s1 + $0x330] ss:$8 sps:$4 sm:$0xff]  }
  0x95   :  { %2356 = vmatprep.subr.bf16.mxu0 %v3140_v37  ;;  %v3226_v37 = vld [vmem:[%s4495_s1 + $0x830] ss:$8 sps:$4 sm:$0xff]  }
  0x97   :  { %2152 = vmatpush1.bf16.msra.mxu1 %v3135_v38  ;;  %v3231_v38 = vld [vmem:[%s4495_s1 + $0x344] ss:$8 sps:$4 sm:$0xff]  }
  0x98   :  { %2357 = vmatpush1.bf16.msra.mxu0 %v3138_v39  ;;  %2153 = vmatprep.subr.bf16.mxu1 %v3143_v40  ;;  %v3234_v39 = vld [vmem:[%s4495_s1 + $0x844] ss:$8 sps:$4 sm:$0xff]   ;;  %v3229_v40 = vld [vmem:[%s4495_s1 + $0x340] ss:$8 sps:$4 sm:$0xff]  }
  0x99   :  { %2358 = vmatprep.subr.bf16.mxu0 %v3146_v41  ;;  %v3232_v41 = vld [vmem:[%s4495_s1 + $0x840] ss:$8 sps:$4 sm:$0xff]  }
  0x9b   :  { %2154 = vmatpush1.bf16.msra.mxu1 %v3141_v42  ;;  %v3237_v42 = vld [vmem:[%s4495_s1 + $0x354] ss:$8 sps:$4 sm:$0xff]  }
  0x9c   :  { %2359 = vmatpush1.bf16.msra.mxu0 %v3144_v43  ;;  %2155 = vmatprep.subr.bf16.mxu1 %v3149_v44  ;;  %v3240_v43 = vld [vmem:[%s4495_s1 + $0x854] ss:$8 sps:$4 sm:$0xff]   ;;  %v3235_v44 = vld [vmem:[%s4495_s1 + $0x350] ss:$8 sps:$4 sm:$0xff]  }
  0x9d   :  { %2360 = vmatprep.subr.bf16.mxu0 %v3152_v45  ;;  %v3238_v45 = vld [vmem:[%s4495_s1 + $0x850] ss:$8 sps:$4 sm:$0xff]  }
  0x9f   :  { %2156 = vmatpush1.bf16.msra.mxu1 %v3147_v46  ;;  %v3243_v46 = vld [vmem:[%s4495_s1 + $0x364] ss:$8 sps:$4 sm:$0xff]  }
  0xa0   :  { %2361 = vmatpush1.bf16.msra.mxu0 %v3150_v47  ;;  %2157 = vmatprep.subr.bf16.mxu1 %v3155_v48  ;;  %v3246_v47 = vld [vmem:[%s4495_s1 + $0x864] ss:$8 sps:$4 sm:$0xff]   ;;  %v3241_v48 = vld [vmem:[%s4495_s1 + $0x360] ss:$8 sps:$4 sm:$0xff]  }
  0xa1   :  { %2362 = vmatprep.subr.bf16.mxu0 %v3158_v49  ;;  %v3244_v49 = vld [vmem:[%s4495_s1 + $0x860] ss:$8 sps:$4 sm:$0xff]  }
  0xa3   :  { %2158 = vmatpush1.bf16.msra.mxu1 %v3153_v50  ;;  %v3249_v50 = vld [vmem:[%s4495_s1 + $0x374] ss:$8 sps:$4 sm:$0xff]  }
  0xa4   :  { %2363 = vmatpush1.bf16.msra.mxu0 %v3156_v51  ;;  %2159 = vmatprep.subr.bf16.mxu1 %v3161_v52  ;;  %v3252_v51 = vld [vmem:[%s4495_s1 + $0x874] ss:$8 sps:$4 sm:$0xff]   ;;  %v3247_v52 = vld [vmem:[%s4495_s1 + $0x370] ss:$8 sps:$4 sm:$0xff]  }
  0xa5   :  { %2364 = vmatprep.subr.bf16.mxu0 %v3164_v53  ;;  %v3250_v53 = vld [vmem:[%s4495_s1 + $0x870] ss:$8 sps:$4 sm:$0xff]  }
  0xa7   :  { %2160 = vmatpush1.bf16.msra.mxu1 %v3159_v54  ;;  %v3255_v54 = vld [vmem:[%s4495_s1 + $0x384] ss:$8 sps:$4 sm:$0xff]  }
  0xa8   :  { %2365 = vmatpush1.bf16.msra.mxu0 %v3162_v55  ;;  %2161 = vmatprep.subr.bf16.mxu1 %v3167_v56  ;;  %v3258_v55 = vld [vmem:[%s4495_s1 + $0x884] ss:$8 sps:$4 sm:$0xff]   ;;  %v3253_v56 = vld [vmem:[%s4495_s1 + $0x380] ss:$8 sps:$4 sm:$0xff]  }
  0xa9   :  { %2366 = vmatprep.subr.bf16.mxu0 %v3170_v57  ;;  %v3256_v57 = vld [vmem:[%s4495_s1 + $0x880] ss:$8 sps:$4 sm:$0xff]  }
  0xab   :  { %2162 = vmatpush1.bf16.msra.mxu1 %v3165_v58  ;;  %v3261_v58 = vld [vmem:[%s4495_s1 + $0x394] ss:$8 sps:$4 sm:$0xff]  }
  0xac   :  { %2367 = vmatpush1.bf16.msra.mxu0 %v3168_v59  ;;  %2163 = vmatprep.subr.bf16.mxu1 %v3173_v60  ;;  %v3264_v59 = vld [vmem:[%s4495_s1 + $0x894] ss:$8 sps:$4 sm:$0xff]   ;;  %v3259_v60 = vld [vmem:[%s4495_s1 + $0x390] ss:$8 sps:$4 sm:$0xff]  }
  0xad   :  { %2368 = vmatprep.subr.bf16.mxu0 %v3176_v61  ;;  %v3262_v61 = vld [vmem:[%s4495_s1 + $0x890] ss:$8 sps:$4 sm:$0xff]  }
  0xaf   :  { %2164 = vmatpush1.bf16.msra.mxu1 %v3171_v62  ;;  %v3267_v62 = vld [vmem:[%s4495_s1 + $0x3a4] ss:$8 sps:$4 sm:$0xff]  }
  0xb0   :  { %2369 = vmatpush1.bf16.msra.mxu0 %v3174_v63  ;;  %2165 = vmatprep.subr.bf16.mxu1 %v3179_v0  ;;  %v3270_v63 = vld [vmem:[%s4495_s1 + $0x8a4] ss:$8 sps:$4 sm:$0xff]   ;;  %v3265_v0 = vld [vmem:[%s4495_s1 + $0x3a0] ss:$8 sps:$4 sm:$0xff]  }
  0xb1   :  { %2370 = vmatprep.subr.bf16.mxu0 %v3182_v1  ;;  %v3268_v1 = vld [vmem:[%s4495_s1 + $0x8a0] ss:$8 sps:$4 sm:$0xff]  }
  0xb3   :  { %2166 = vmatpush1.bf16.msra.mxu1 %v3177_v2  ;;  %v3273_v2 = vld [vmem:[%s4495_s1 + $0x3b4] ss:$8 sps:$4 sm:$0xff]  }
  0xb4   :  { %2371 = vmatpush1.bf16.msra.mxu0 %v3180_v3  ;;  %2167 = vmatprep.subr.bf16.mxu1 %v3185_v4  ;;  %v3276_v3 = vld [vmem:[%s4495_s1 + $0x8b4] ss:$8 sps:$4 sm:$0xff]   ;;  %v3271_v4 = vld [vmem:[%s4495_s1 + $0x3b0] ss:$8 sps:$4 sm:$0xff]  }
  0xb5   :  { %2372 = vmatprep.subr.bf16.mxu0 %v3188_v5  ;;  %v3274_v5 = vld [vmem:[%s4495_s1 + $0x8b0] ss:$8 sps:$4 sm:$0xff]  }
  0xb7   :  { %2168 = vmatpush1.bf16.msra.mxu1 %v3183_v6  ;;  %v3279_v6 = vld [vmem:[%s4495_s1 + $0x3c4] ss:$8 sps:$4 sm:$0xff]  }
  0xb8   :  { %2373 = vmatpush1.bf16.msra.mxu0 %v3186_v7  ;;  %2169 = vmatprep.subr.bf16.mxu1 %v3191_v8  ;;  %v3282_v7 = vld [vmem:[%s4495_s1 + $0x8c4] ss:$8 sps:$4 sm:$0xff]   ;;  %v3277_v8 = vld [vmem:[%s4495_s1 + $0x3c0] ss:$8 sps:$4 sm:$0xff]  }
  0xb9   :  { %2374 = vmatprep.subr.bf16.mxu0 %v3194_v9  ;;  %v3280_v9 = vld [vmem:[%s4495_s1 + $0x8c0] ss:$8 sps:$4 sm:$0xff]  }
  0xbb   :  { %2170 = vmatpush1.bf16.msra.mxu1 %v3189_v10  ;;  %v3285_v10 = vld [vmem:[%s4495_s1 + $0x3d4] ss:$8 sps:$4 sm:$0xff]  }
  0xbc   :  { %2375 = vmatpush1.bf16.msra.mxu0 %v3192_v11  ;;  %2171 = vmatprep.subr.bf16.mxu1 %v3197_v12  ;;  %v3288_v11 = vld [vmem:[%s4495_s1 + $0x8d4] ss:$8 sps:$4 sm:$0xff]   ;;  %v3283_v12 = vld [vmem:[%s4495_s1 + $0x3d0] ss:$8 sps:$4 sm:$0xff]  }
  0xbd   :  { %2376 = vmatprep.subr.bf16.mxu0 %v3200_v13  ;;  %v3286_v13 = vld [vmem:[%s4495_s1 + $0x8d0] ss:$8 sps:$4 sm:$0xff]  }
  0xbf   :  { %2172 = vmatpush1.bf16.msra.mxu1 %v3195_v14  ;;  %v3291_v14 = vld [vmem:[%s4495_s1 + $0x3e4] ss:$8 sps:$4 sm:$0xff]  }
  0xc0   :  { %2377 = vmatpush1.bf16.msra.mxu0 %v3198_v15  ;;  %2182 = vmatprep.subr.bf16.mxu1 %v3205_v16  ;;  %v3294_v15 = vld [vmem:[%s4495_s1 + $0x8e4] ss:$8 sps:$4 sm:$0xff]   ;;  %v3289_v16 = vld [vmem:[%s4495_s1 + $0x3e0] ss:$8 sps:$4 sm:$0xff]  }
  0xc1   :  { %2387 = vmatprep.subr.bf16.mxu0 %v3210_v17  ;;  %v3292_v17 = vld [vmem:[%s4495_s1 + $0x8e0] ss:$8 sps:$4 sm:$0xff]  }
  0xc2   :  { %2174 = vmatmul.mubr.bf16.vlgmr.msra.gmra.mrb[0].mxu1 %v2522_v22  ;;  %v3295_v22 = vld [vmem:[%s4495_s1 + $0x3f0] ss:$8 sps:$4 sm:$0xff]  }
  0xc3   :  { %2379 = vmatmul.mubr.bf16.vlgmr.msra.gmra.mrb[0].mxu0 %v2532_v23  ;;  %2183 = vmatpush1.bf16.msra.mxu1 %v3203_v19  ;;  %v3297_v19 = vld [vmem:[%s4495_s1 + $0x3f4] ss:$8 sps:$4 sm:$0xff]   ;;  %v3298_v23 = vld [vmem:[%s4495_s1 + $0x8f0] ss:$8 sps:$4 sm:$0xff]  }
  0xc4   :  { %2388 = vmatpush1.bf16.msra.mxu0 %v3208_v21  ;;  %2184 = vmatprep.subr.bf16.mxu1 %v3213_v26  ;;  %v3300_v21 = vld [vmem:[%s4495_s1 + $0x8f4] ss:$8 sps:$4 sm:$0xff]   ;;  %v3305_v26 = vld [vmem:[%s4495_s1 + $0x404] ss:$8 sps:$4 sm:$0xff]  }
  0xc5   :  { %2389 = vmatprep.subr.bf16.mxu0 %v3216_v18  ;;  %2214 = vmatprep.mubr.bf16.mxu1 %v2525_v20  ;;  %v3310_v18 = vld [vmem:[%s4495_s1 + $0x904] ss:$8 sps:$4 sm:$0xff]   ;;  %v2524_v20 = vcombine.low %v4066_v24, %v4066_v24  ;;  %v3308_v24 = vld [vmem:[%s4495_s1 + $0x900] ss:$8 sps:$4 sm:$0xff]  }
  0xc6   :  { %2419 = vmatprep.mubr.bf16.mxu0 %v2535_v27  ;;  %v2534_v27 = vcombine.low %v4071_v25, %v4071_v25  ;;  %v3313_v25 = vld [vmem:[%s4495_s1 + $0x414] ss:$8 sps:$4 sm:$0xff]  }
  0xc7   :  { %2185 = vmatpush1.bf16.msra.mxu1 %v3211_v28  ;;  %v4270_v28 = vld [vmem:[%s4496_s0 + $0x20] sm:$0xff] }
  0xc8   :  { %2390 = vmatpush1.bf16.msra.mxu0 %v3214_v29  ;;  %2186 = vmatprep.subr.bf16.mxu1 %v3219_v30  ;;  %v4275_v29 = vld [vmem:[%s4496_s0 + $0x48] sm:$0xff] }
  0xc9   :  { %2391 = vmatprep.subr.bf16.mxu0 %v3222_v31  ;;  %v3303_v30 = vld [vmem:[%s4495_s1 + $0x400] ss:$8 sps:$4 sm:$0xff]   ;;  %v3316_v31 = vld [vmem:[%s4495_s1 + $0x914] ss:$8 sps:$4 sm:$0xff]  }
  0xcb   :  { %2187 = vmatpush1.bf16.msra.mxu1 %v3217_v32  ;;  %v2527_v32 = vcombine.high %v4270_v28, %v4270_v28 }
  0xcc   :  { %2392 = vmatpush1.bf16.msra.mxu0 %v3220_v33  ;;  %2188 = vmatprep.subr.bf16.mxu1 %v3225_v34  ;;  %v2537_v33 = vcombine.high %v4275_v29, %v4275_v29  ;;  %v3311_v34 = vld [vmem:[%s4495_s1 + $0x410] ss:$8 sps:$4 sm:$0xff]  }
  0xcd   :  { %2393 = vmatprep.subr.bf16.mxu0 %v3228_v35  ;;  %v3314_v35 = vld [vmem:[%s4495_s1 + $0x910] ss:$8 sps:$4 sm:$0xff]  }
  0xcf   :  { %2189 = vmatpush1.bf16.msra.mxu1 %v3223_v36  ;;  %v3319_v36 = vld [vmem:[%s4495_s1 + $0x424] ss:$8 sps:$4 sm:$0xff]  }
  0xd0   :  { %2394 = vmatpush1.bf16.msra.mxu0 %v3226_v37  ;;  %2190 = vmatprep.subr.bf16.mxu1 %v3231_v38  ;;  %v3322_v37 = vld [vmem:[%s4495_s1 + $0x924] ss:$8 sps:$4 sm:$0xff]   ;;  %v3317_v38 = vld [vmem:[%s4495_s1 + $0x420] ss:$8 sps:$4 sm:$0xff]  }
  0xd1   :  { %2395 = vmatprep.subr.bf16.mxu0 %v3234_v39  ;;  %v3320_v39 = vld [vmem:[%s4495_s1 + $0x920] ss:$8 sps:$4 sm:$0xff]  }
  0xd3   :  { %2191 = vmatpush1.bf16.msra.mxu1 %v3229_v40  ;;  %v3325_v40 = vld [vmem:[%s4495_s1 + $0x434] ss:$8 sps:$4 sm:$0xff]  }
  0xd4   :  { %2396 = vmatpush1.bf16.msra.mxu0 %v3232_v41  ;;  %2192 = vmatprep.subr.bf16.mxu1 %v3237_v42  ;;  %v3328_v41 = vld [vmem:[%s4495_s1 + $0x934] ss:$8 sps:$4 sm:$0xff]   ;;  %v3323_v42 = vld [vmem:[%s4495_s1 + $0x430] ss:$8 sps:$4 sm:$0xff]  }
  0xd5   :  { %2397 = vmatprep.subr.bf16.mxu0 %v3240_v43  ;;  %v3326_v43 = vld [vmem:[%s4495_s1 + $0x930] ss:$8 sps:$4 sm:$0xff]  }
  0xd7   :  { %2193 = vmatpush1.bf16.msra.mxu1 %v3235_v44  ;;  %v3331_v44 = vld [vmem:[%s4495_s1 + $0x444] ss:$8 sps:$4 sm:$0xff]  }
  0xd8   :  { %2398 = vmatpush1.bf16.msra.mxu0 %v3238_v45  ;;  %2194 = vmatprep.subr.bf16.mxu1 %v3243_v46  ;;  %v3334_v45 = vld [vmem:[%s4495_s1 + $0x944] ss:$8 sps:$4 sm:$0xff]   ;;  %v3329_v46 = vld [vmem:[%s4495_s1 + $0x440] ss:$8 sps:$4 sm:$0xff]  }
  0xd9   :  { %2399 = vmatprep.subr.bf16.mxu0 %v3246_v47  ;;  %v3332_v47 = vld [vmem:[%s4495_s1 + $0x940] ss:$8 sps:$4 sm:$0xff]  }
  0xdb   :  { %2195 = vmatpush1.bf16.msra.mxu1 %v3241_v48  ;;  %v3337_v48 = vld [vmem:[%s4495_s1 + $0x454] ss:$8 sps:$4 sm:$0xff]  }
  0xdc   :  { %2400 = vmatpush1.bf16.msra.mxu0 %v3244_v49  ;;  %2196 = vmatprep.subr.bf16.mxu1 %v3249_v50  ;;  %v3340_v49 = vld [vmem:[%s4495_s1 + $0x954] ss:$8 sps:$4 sm:$0xff]   ;;  %v3335_v50 = vld [vmem:[%s4495_s1 + $0x450] ss:$8 sps:$4 sm:$0xff]  }
  0xdd   :  { %2401 = vmatprep.subr.bf16.mxu0 %v3252_v51  ;;  %v3338_v51 = vld [vmem:[%s4495_s1 + $0x950] ss:$8 sps:$4 sm:$0xff]  }
  0xdf   :  { %2197 = vmatpush1.bf16.msra.mxu1 %v3247_v52  ;;  %v3343_v52 = vld [vmem:[%s4495_s1 + $0x464] ss:$8 sps:$4 sm:$0xff]  }
  0xe0   :  { %2402 = vmatpush1.bf16.msra.mxu0 %v3250_v53  ;;  %2198 = vmatprep.subr.bf16.mxu1 %v3255_v54  ;;  %v3346_v53 = vld [vmem:[%s4495_s1 + $0x964] ss:$8 sps:$4 sm:$0xff]   ;;  %v3341_v54 = vld [vmem:[%s4495_s1 + $0x460] ss:$8 sps:$4 sm:$0xff]  }
  0xe1   :  { %2403 = vmatprep.subr.bf16.mxu0 %v3258_v55  ;;  %v3344_v55 = vld [vmem:[%s4495_s1 + $0x960] ss:$8 sps:$4 sm:$0xff]  }
  0xe3   :  { %2199 = vmatpush1.bf16.msra.mxu1 %v3253_v56  ;;  %v3349_v56 = vld [vmem:[%s4495_s1 + $0x474] ss:$8 sps:$4 sm:$0xff]  }
  0xe4   :  { %2404 = vmatpush1.bf16.msra.mxu0 %v3256_v57  ;;  %2200 = vmatprep.subr.bf16.mxu1 %v3261_v58  ;;  %v3352_v57 = vld [vmem:[%s4495_s1 + $0x974] ss:$8 sps:$4 sm:$0xff]   ;;  %v3347_v58 = vld [vmem:[%s4495_s1 + $0x470] ss:$8 sps:$4 sm:$0xff]  }
  0xe5   :  { %2405 = vmatprep.subr.bf16.mxu0 %v3264_v59  ;;  %v3350_v59 = vld [vmem:[%s4495_s1 + $0x970] ss:$8 sps:$4 sm:$0xff]  }
  0xe7   :  { %2201 = vmatpush1.bf16.msra.mxu1 %v3259_v60  ;;  %v3355_v60 = vld [vmem:[%s4495_s1 + $0x484] ss:$8 sps:$4 sm:$0xff]  }
  0xe8   :  { %2406 = vmatpush1.bf16.msra.mxu0 %v3262_v61  ;;  %2202 = vmatprep.subr.bf16.mxu1 %v3267_v62  ;;  %v3358_v61 = vld [vmem:[%s4495_s1 + $0x984] ss:$8 sps:$4 sm:$0xff]   ;;  %v3353_v62 = vld [vmem:[%s4495_s1 + $0x480] ss:$8 sps:$4 sm:$0xff]  }
  0xe9   :  { %2407 = vmatprep.subr.bf16.mxu0 %v3270_v63  ;;  %v3356_v63 = vld [vmem:[%s4495_s1 + $0x980] ss:$8 sps:$4 sm:$0xff]  }
  0xeb   :  { %2203 = vmatpush1.bf16.msra.mxu1 %v3265_v0  ;;  %v3361_v0 = vld [vmem:[%s4495_s1 + $0x494] ss:$8 sps:$4 sm:$0xff]  }
  0xec   :  { %2408 = vmatpush1.bf16.msra.mxu0 %v3268_v1  ;;  %2204 = vmatprep.subr.bf16.mxu1 %v3273_v2  ;;  %v3364_v1 = vld [vmem:[%s4495_s1 + $0x994] ss:$8 sps:$4 sm:$0xff]   ;;  %v3359_v2 = vld [vmem:[%s4495_s1 + $0x490] ss:$8 sps:$4 sm:$0xff]  }
  0xed   :  { %2409 = vmatprep.subr.bf16.mxu0 %v3276_v3  ;;  %v3362_v3 = vld [vmem:[%s4495_s1 + $0x990] ss:$8 sps:$4 sm:$0xff]  }
  0xef   :  { %2205 = vmatpush1.bf16.msra.mxu1 %v3271_v4  ;;  %v3367_v4 = vld [vmem:[%s4495_s1 + $0x4a4] ss:$8 sps:$4 sm:$0xff]  }
  0xf0   :  { %2410 = vmatpush1.bf16.msra.mxu0 %v3274_v5  ;;  %2206 = vmatprep.subr.bf16.mxu1 %v3279_v6  ;;  %v3370_v5 = vld [vmem:[%s4495_s1 + $0x9a4] ss:$8 sps:$4 sm:$0xff]   ;;  %v3365_v6 = vld [vmem:[%s4495_s1 + $0x4a0] ss:$8 sps:$4 sm:$0xff]  }
  0xf1   :  { %2411 = vmatprep.subr.bf16.mxu0 %v3282_v7  ;;  %v3368_v7 = vld [vmem:[%s4495_s1 + $0x9a0] ss:$8 sps:$4 sm:$0xff]  }
  0xf3   :  { %2207 = vmatpush1.bf16.msra.mxu1 %v3277_v8  ;;  %v3373_v8 = vld [vmem:[%s4495_s1 + $0x4b4] ss:$8 sps:$4 sm:$0xff]  }
  0xf4   :  { %2412 = vmatpush1.bf16.msra.mxu0 %v3280_v9  ;;  %2208 = vmatprep.subr.bf16.mxu1 %v3285_v10  ;;  %v3376_v9 = vld [vmem:[%s4495_s1 + $0x9b4] ss:$8 sps:$4 sm:$0xff]   ;;  %v3371_v10 = vld [vmem:[%s4495_s1 + $0x4b0] ss:$8 sps:$4 sm:$0xff]  }
  0xf5   :  { %2413 = vmatprep.subr.bf16.mxu0 %v3288_v11  ;;  %v3374_v11 = vld [vmem:[%s4495_s1 + $0x9b0] ss:$8 sps:$4 sm:$0xff]  }
  0xf7   :  { %2209 = vmatpush1.bf16.msra.mxu1 %v3283_v12  ;;  %v3379_v12 = vld [vmem:[%s4495_s1 + $0x4c4] ss:$8 sps:$4 sm:$0xff]  }
  0xf8   :  { %2414 = vmatpush1.bf16.msra.mxu0 %v3286_v13  ;;  %2210 = vmatprep.subr.bf16.mxu1 %v3291_v14  ;;  %v3382_v13 = vld [vmem:[%s4495_s1 + $0x9c4] ss:$8 sps:$4 sm:$0xff]   ;;  %v3377_v14 = vld [vmem:[%s4495_s1 + $0x4c0] ss:$8 sps:$4 sm:$0xff]  }
  0xf9   :  { %2415 = vmatprep.subr.bf16.mxu0 %v3294_v15  ;;  %v3380_v15 = vld [vmem:[%s4495_s1 + $0x9c0] ss:$8 sps:$4 sm:$0xff]  }
  0xfb   :  { %2211 = vmatpush1.bf16.msra.mxu1 %v3289_v16  ;;  %v3385_v16 = vld [vmem:[%s4495_s1 + $0x4d4] ss:$8 sps:$4 sm:$0xff]  }
  0xfc   :  { %2416 = vmatpush1.bf16.msra.mxu0 %v3292_v17  ;;  %2212 = vmatprep.subr.bf16.mxu1 %v3297_v19  ;;  %v3388_v17 = vld [vmem:[%s4495_s1 + $0x9d4] ss:$8 sps:$4 sm:$0xff]   ;;  %v3383_v19 = vld [vmem:[%s4495_s1 + $0x4d0] ss:$8 sps:$4 sm:$0xff]  }
  0xfd   :  { %2417 = vmatprep.subr.bf16.mxu0 %v3300_v21  ;;  %v3386_v21 = vld [vmem:[%s4495_s1 + $0x9d0] ss:$8 sps:$4 sm:$0xff]  }
  0xff   :  { %2213 = vmatpush1.bf16.msra.mxu1 %v3295_v22  ;;  %v3391_v22 = vld [vmem:[%s4495_s1 + $0x4e4] ss:$8 sps:$4 sm:$0xff]  }
 0x100   :  { %2418 = vmatpush1.bf16.msra.mxu0 %v3298_v23  ;;  %2223 = vmatprep.subr.bf16.mxu1 %v3305_v26  ;;  %v3394_v23 = vld [vmem:[%s4495_s1 + $0x9e4] ss:$8 sps:$4 sm:$0xff]   ;;  %v3389_v26 = vld [vmem:[%s4495_s1 + $0x4e0] ss:$8 sps:$4 sm:$0xff]  }
 0x101   :  { %2428 = vmatprep.subr.bf16.mxu0 %v3310_v18  ;;  %v3392_v18 = vld [vmem:[%s4495_s1 + $0x9e0] ss:$8 sps:$4 sm:$0xff]  }
 0x102   :  { %2215 = vmatmul.mubr.bf16.vlgmr.msra.gmra.mrb[0].mxu1 %v2524_v20  ;;  %v3397_v20 = vld [vmem:[%s4495_s1 + $0x4f4] ss:$8 sps:$4 sm:$0xff]  }
 0x103   :  { %2420 = vmatmul.mubr.bf16.vlgmr.msra.gmra.mrb[0].mxu0 %v2534_v27  ;;  %2224 = vmatpush1.bf16.msra.mxu1 %v3303_v30  ;;  %v3400_v27 = vld [vmem:[%s4495_s1 + $0x9f4] ss:$8 sps:$4 sm:$0xff]   ;;  %v3395_v30 = vld [vmem:[%s4495_s1 + $0x4f0] ss:$8 sps:$4 sm:$0xff]  }
 0x104   :  { %2429 = vmatpush1.bf16.msra.mxu0 %v3308_v24  ;;  %2225 = vmatprep.subr.bf16.mxu1 %v3313_v25  ;;  %v3398_v24 = vld [vmem:[%s4495_s1 + $0x9f0] ss:$8 sps:$4 sm:$0xff]   ;;  %v3407_v25 = vld [vmem:[%s4495_s1 + $0xa04] ss:$8 sps:$4 sm:$0xff]  }
 0x105   :  { %2430 = vmatprep.subr.bf16.mxu0 %v3316_v31  ;;  %2255 = vmatprep.mubr.bf16.mxu1 %v2527_v32  ;;  %v2526_v31 = vcombine.low %v4270_v28, %v4270_v28  ;;  %v2536_v32 = vcombine.low %v4275_v29, %v4275_v29  ;;  %v3408_v28 = vld [vmem:[%s4495_s1 + $0xa10] ss:$8 sps:$4 sm:$0xff]  }
 0x106   :  { %2460 = vmatprep.mubr.bf16.mxu0 %v2537_v33  ;;  %v3405_v33 = vld [vmem:[%s4495_s1 + $0xa00] ss:$8 sps:$4 sm:$0xff]   ;;  %v3411_v29 = vld [vmem:[%s4496_s0 + $0x50] ss:$0 sps:$4 sm:$0xff]  }
 0x107   :  { %2226 = vmatpush1.bf16.msra.mxu1 %v3311_v34  ;;  %v3410_v34 = vld [vmem:[%s4495_s1 + $0xa14] ss:$8 sps:$4 sm:$0xff]  }
 0x108   :  { %2431 = vmatpush1.bf16.msra.mxu0 %v3314_v35  ;;  %2227 = vmatprep.subr.bf16.mxu1 %v3319_v36  ;;  %v3412_v35 = vmov 0   ;;  %v352_v36 = vlaneseq }
 0x109   :  { %2432 = vmatprep.subr.bf16.mxu0 %v3322_v37 }
 0x10a   :  { %v353_v37 = vshrl.u32 %v352_v36, 7 }
 0x10b   :  { %2228 = vmatpush1.bf16.msra.mxu1 %v3317_v38 }
 0x10c   :  { %2433 = vmatpush1.bf16.msra.mxu0 %v3320_v39  ;;  %2229 = vmatprep.subr.bf16.mxu1 %v3325_v40 }
 0x10d   :  { %2434 = vmatprep.subr.bf16.mxu0 %v3328_v41  ;;  %v354_v41 = vsub.s32 0, %v353_v37 }
 0x10f   :  { %2230 = vmatpush1.bf16.msra.mxu1 %v3323_v42 }
 0x110   :  { %2435 = vmatpush1.bf16.msra.mxu0 %v3326_v43  ;;  %2231 = vmatprep.subr.bf16.mxu1 %v3331_v44  ;;  %v350_v43 = vld [vmem:[%s4497_s2] sm:$0x3]  ;;  %v358_v44 = vsub.s32 1, %v353_v37 }
 0x111   :  { %2436 = vmatprep.subr.bf16.mxu0 %v3334_v45  ;;  %v355_v45 = vrot.slane %v350_v43, %v354_v41 }
 0x113   :  { %2232 = vmatpush1.bf16.msra.mxu1 %v3329_v46  ;;  %v359_v46 = vrot.slane %v350_v43, %v358_v44 }
 0x114   :  { %2437 = vmatpush1.bf16.msra.mxu0 %v3332_v47  ;;  %2233 = vmatprep.subr.bf16.mxu1 %v3337_v48 }
 0x115   :  { %2438 = vmatprep.subr.bf16.mxu0 %v3340_v49 }
 0x117   :  { %2234 = vmatpush1.bf16.msra.mxu1 %v3335_v50 }
 0x118   :  { %2439 = vmatpush1.bf16.msra.mxu0 %v3338_v51  ;;  %2235 = vmatprep.subr.bf16.mxu1 %v3343_v52 }
 0x119   :  { %2440 = vmatprep.subr.bf16.mxu0 %v3346_v53 }
 0x11b   :  { %2236 = vmatpush1.bf16.msra.mxu1 %v3341_v54 }
 0x11c   :  { %2441 = vmatpush1.bf16.msra.mxu0 %v3344_v55  ;;  %2237 = vmatprep.subr.bf16.mxu1 %v3349_v56 }
 0x11d   :  { %2442 = vmatprep.subr.bf16.mxu0 %v3352_v57 }
 0x11f   :  { %2238 = vmatpush1.bf16.msra.mxu1 %v3347_v58 }
 0x120   :  { %2443 = vmatpush1.bf16.msra.mxu0 %v3350_v59  ;;  %2239 = vmatprep.subr.bf16.mxu1 %v3355_v60 }
 0x121   :  { %2444 = vmatprep.subr.bf16.mxu0 %v3358_v61 }
 0x123   :  { %2240 = vmatpush1.bf16.msra.mxu1 %v3353_v62 }
 0x124   :  { %2445 = vmatpush1.bf16.msra.mxu0 %v3356_v63  ;;  %2241 = vmatprep.subr.bf16.mxu1 %v3361_v0 }
 0x125   :  { %2446 = vmatprep.subr.bf16.mxu0 %v3364_v1 }
 0x127   :  { %2242 = vmatpush1.bf16.msra.mxu1 %v3359_v2 }
 0x128   :  { %2447 = vmatpush1.bf16.msra.mxu0 %v3362_v3  ;;  %2243 = vmatprep.subr.bf16.mxu1 %v3367_v4 }
 0x129   :  { %2448 = vmatprep.subr.bf16.mxu0 %v3370_v5 }
 0x12b   :  { %2244 = vmatpush1.bf16.msra.mxu1 %v3365_v6 }
 0x12c   :  { %2449 = vmatpush1.bf16.msra.mxu0 %v3368_v7  ;;  %2245 = vmatprep.subr.bf16.mxu1 %v3373_v8 }
 0x12d   :  { %2450 = vmatprep.subr.bf16.mxu0 %v3376_v9 }
 0x12f   :  { %2246 = vmatpush1.bf16.msra.mxu1 %v3371_v10 }
 0x130   :  { %2451 = vmatpush1.bf16.msra.mxu0 %v3374_v11  ;;  %2247 = vmatprep.subr.bf16.mxu1 %v3379_v12 }
 0x131   :  { %2452 = vmatprep.subr.bf16.mxu0 %v3382_v13 }
 0x133   :  { %2248 = vmatpush1.bf16.msra.mxu1 %v3377_v14 }
 0x134   :  { %2453 = vmatpush1.bf16.msra.mxu0 %v3380_v15  ;;  %2249 = vmatprep.subr.bf16.mxu1 %v3385_v16 }
 0x135   :  { %2454 = vmatprep.subr.bf16.mxu0 %v3388_v17 }
 0x137   :  { %2250 = vmatpush1.bf16.msra.mxu1 %v3383_v19 }
 0x138   :  { %2455 = vmatpush1.bf16.msra.mxu0 %v3386_v21  ;;  %2251 = vmatprep.subr.bf16.mxu1 %v3391_v22 }
 0x139   :  { %2456 = vmatprep.subr.bf16.mxu0 %v3394_v23 }
 0x13b   :  { %2252 = vmatpush1.bf16.msra.mxu1 %v3389_v26 }
 0x13c   :  { %2457 = vmatpush1.bf16.msra.mxu0 %v3392_v18  ;;  %2253 = vmatprep.subr.bf16.mxu1 %v3397_v20 }
 0x13d   :  { %2458 = vmatprep.subr.bf16.mxu0 %v3400_v27 }
 0x13f   :  { %2254 = vmatpush1.bf16.msra.mxu1 %v3395_v30 }
 0x140   :  { %2459 = vmatpush1.bf16.msra.mxu0 %v3398_v24 }
 0x141   :  { %2469 = vmatprep.subr.bf16.mxu0 %v3407_v25 }
 0x142   :  { %2256 = vmatmul.mubr.bf16.vlgmr.msra.gmra.mrb[0].mxu1 %v2526_v31 }
 0x143   :  { %2461 = vmatmul.mubr.bf16.vlgmr.msra.gmra.mrb[0].mxu0 %v2536_v32 }
 0x144   :  { %2470 = vmatpush1.bf16.msra.mxu0 %v3405_v33  ;;  %2501 = vmatprep.mubr.bf16.mxu0 %v3412_v35 }
 0x145   :  { %2471 = vmatprep.subr.bf16.mxu0 %v3410_v34 }
 0x148   :  { %2472 = vmatpush1.bf16.msra.mxu0 %v3408_v28 }
 0x14f   :  { %2863 = vmatmul.mubr.msk.bf16.vlgmr.msra.gmra.mrb[0].mxu0 %vm2055_vm0, %v3411_v29 }
 0x215   :  { %v2257_v38 = vpop.f32.mrb[0].mxu1 }
 0x216   :  { %v2259_v39 = vpop.f32.mrb[1].mxu1  ;;  %v2864_v47 = vadd.f32 %v2257_v38, %v355_v45 }
 0x217   :  { %v2261_v40 = vpop.f32.mrb[2].mxu1  ;;  %v2866_v48 = vadd.f32 %v2259_v39, %v359_v46 }
 0x218   :  { %v2262_v42 = vpop.f32.mrb[3].mxu1 }
 0x222   :  { %v2503_v49 = vpop.f32.mrb[0].mxu0 }
 0x223   :  { %v2865_v50 = vadd.f32 %v2864_v47, %v2503_v49  ;;  %v2505_v51 = vpop.f32.mrb[1].mxu0 }
 0x224   :  { %v2867_v52 = vadd.f32 %v2866_v48, %v2505_v51  ;;  %v2507_v53 = vpop.f32.mrb[2].mxu0 }
 0x225   :  { %v2510_v54 = vmax.f32 %v2865_v50, 0.0  ;;  %v2508_v55 = vpop.f32.mrb[3].mxu0 }
 0x226   :  { %v2511_v56 = vmax.f32 %v2867_v52, 0.0 }
 0x227   :  { %2512 = vst [vmem:[%s4498_s3] sm:$0xff] %v2510_v54 }
 0x228   :  { %2513 = vst [vmem:[%s4498_s3 + $0x8] sm:$0xff] %v2511_v56 }

// kernel: lstm_model_forward.8
= control target key start
LH: loop header
LB: loop body
LE: loop exit
PB: predicated region body
PF: predicated region fallthrough
CT: control target
= control target key end

     0   :  { %s1592_s1 = inlined_call_operand.vmem [shape: bf16[256,1024], index: 1, kind: input, shape index: {}]   ;;  %s1593_s0 = inlined_call_operand.vmem [shape: bf16[8,256], index: 0, kind: input, shape index: {}]   ;;  %s1594_s2 = inlined_call_operand.vmem [shape: f32[1,1024], index: 2, kind: input, shape index: {}]   ;;  %s1595_s3 = inlined_call_operand.vmem [shape: f32[8,1024], index: 3, kind: output, shape index: {}]  }
   0x1   :  { %v15_v0 = vld [vmem:[%s1592_s1] sm:$0xff]  ;;  %v16_v2 = vld [vmem:[%s1592_s1 + $0x8] sm:$0xff] }
   0x2   :  { %v19_v1 = vld [vmem:[%s1592_s1 + $0x20] sm:$0xff]  ;;  %v20_v4 = vld [vmem:[%s1592_s1 + $0x28] sm:$0xff] }
   0x3   :  { %v1011_v3 = vcombine.high %v15_v0, %v19_v1  ;;  %v1010_v5 = vcombine.low %v15_v0, %v19_v1  ;;  %v23_v6 = vld [vmem:[%s1592_s1 + $0x40] sm:$0xff]  ;;  %v1013_v8 = vcombine.high %v16_v2, %v20_v4  ;;  %v1012_v9 = vcombine.low %v16_v2, %v20_v4  ;;  %v24_v11 = vld [vmem:[%s1592_s1 + $0x48] sm:$0xff] }
   0x4   :  { %v27_v7 = vld [vmem:[%s1592_s1 + $0x60] sm:$0xff]  ;;  %v28_v12 = vld [vmem:[%s1592_s1 + $0x68] sm:$0xff] }
   0x5   :  { %v1019_v10 = vcombine.high %v23_v6, %v27_v7  ;;  %v31_v13 = vld [vmem:[%s1592_s1 + $0x80] sm:$0xff]  ;;  %832 = vmatprep.subr.bf16.mxu0 %v1011_v3  ;;  %v1021_v14 = vcombine.high %v24_v11, %v28_v12  ;;  %v32_v16 = vld [vmem:[%s1592_s1 + $0x88] sm:$0xff]  ;;  %873 = vmatprep.subr.bf16.mxu1 %v1013_v8  ;;  %v1018_v18 = vcombine.low %v23_v6, %v27_v7 }
   0x6   :  { %v35_v15 = vld [vmem:[%s1592_s1 + $0xa0] sm:$0xff]  ;;  %v36_v17 = vld [vmem:[%s1592_s1 + $0xa8] sm:$0xff]  ;;  %833 = vmatpush1.bf16.msra.mxu0 %v1010_v5  ;;  %874 = vmatpush1.bf16.msra.mxu1 %v1012_v9  ;;  %v1020_v19 = vcombine.low %v24_v11, %v28_v12 }
   0x7   :  { %834 = vmatprep.subr.bf16.mxu0 %v1019_v10  ;;  %v1027_v20 = vcombine.high %v31_v13, %v35_v15  ;;  %875 = vmatprep.subr.bf16.mxu1 %v1021_v14  ;;  %v1029_v21 = vcombine.high %v32_v16, %v36_v17  ;;  %v39_v22 = vld [vmem:[%s1592_s1 + $0xc0] sm:$0xff]  ;;  %v40_v24 = vld [vmem:[%s1592_s1 + $0xc8] sm:$0xff]  ;;  %v1026_v26 = vcombine.low %v31_v13, %v35_v15 }
   0x8   :  { %v43_v23 = vld [vmem:[%s1592_s1 + $0xe0] sm:$0xff]  ;;  %v44_v25 = vld [vmem:[%s1592_s1 + $0xe8] sm:$0xff]  ;;  %v1028_v27 = vcombine.low %v32_v16, %v36_v17 }
   0x9   :  { %v1035_v28 = vcombine.high %v39_v22, %v43_v23  ;;  %v1037_v29 = vcombine.high %v40_v24, %v44_v25  ;;  %v47_v30 = vld [vmem:[%s1592_s1 + $0x100] sm:$0xff]  ;;  %v48_v32 = vld [vmem:[%s1592_s1 + $0x108] sm:$0xff]  ;;  %v1034_v34 = vcombine.low %v39_v22, %v43_v23  ;;  %v1036_v35 = vcombine.low %v40_v24, %v44_v25 }
   0xa   :  { %835 = vmatpush1.bf16.msra.mxu0 %v1018_v18  ;;  %876 = vmatpush1.bf16.msra.mxu1 %v1020_v19  ;;  %v51_v31 = vld [vmem:[%s1592_s1 + $0x120] sm:$0xff]  ;;  %v52_v33 = vld [vmem:[%s1592_s1 + $0x128] sm:$0xff] }
   0xb   :  { %836 = vmatprep.subr.bf16.mxu0 %v1027_v20  ;;  %877 = vmatprep.subr.bf16.mxu1 %v1029_v21  ;;  %v1043_v36 = vcombine.high %v47_v30, %v51_v31  ;;  %v1045_v37 = vcombine.high %v48_v32, %v52_v33  ;;  %v55_v38 = vld [vmem:[%s1592_s1 + $0x140] sm:$0xff]  ;;  %v56_v40 = vld [vmem:[%s1592_s1 + $0x148] sm:$0xff]  ;;  %v1042_v42 = vcombine.low %v47_v30, %v51_v31 }
   0xc   :  { %v59_v39 = vld [vmem:[%s1592_s1 + $0x160] sm:$0xff]  ;;  %v60_v41 = vld [vmem:[%s1592_s1 + $0x168] sm:$0xff]  ;;  %v1044_v43 = vcombine.low %v48_v32, %v52_v33 }
   0xd   :  { %v1051_v44 = vcombine.high %v55_v38, %v59_v39  ;;  %v1053_v45 = vcombine.high %v56_v40, %v60_v41  ;;  %v63_v46 = vld [vmem:[%s1592_s1 + $0x180] sm:$0xff]  ;;  %v64_v48 = vld [vmem:[%s1592_s1 + $0x188] sm:$0xff]  ;;  %v1050_v50 = vcombine.low %v55_v38, %v59_v39  ;;  %v1052_v51 = vcombine.low %v56_v40, %v60_v41 }
   0xe   :  { %837 = vmatpush1.bf16.msra.mxu0 %v1026_v26  ;;  %878 = vmatpush1.bf16.msra.mxu1 %v1028_v27  ;;  %v67_v47 = vld [vmem:[%s1592_s1 + $0x1a0] sm:$0xff]  ;;  %v68_v49 = vld [vmem:[%s1592_s1 + $0x1a8] sm:$0xff] }
   0xf   :  { %838 = vmatprep.subr.bf16.mxu0 %v1035_v28  ;;  %879 = vmatprep.subr.bf16.mxu1 %v1037_v29  ;;  %v1059_v52 = vcombine.high %v63_v46, %v67_v47  ;;  %v1247_v53 = vld [vmem:[%s1593_s0] sm:$0xff]  ;;  %v1061_v54 = vcombine.high %v64_v48, %v68_v49  ;;  %v72_v58 = vld [vmem:[%s1592_s1 + $0x1c8] sm:$0xff]  ;;  %v1058_v60 = vcombine.low %v63_v46, %v67_v47 }
  0x10   :  { %v71_v55 = vld [vmem:[%s1592_s1 + $0x1c0] sm:$0xff]  ;;  %v1257_v57 = vcombine.high %v1247_v53, %v1247_v53  ;;  %v76_v59 = vld [vmem:[%s1592_s1 + $0x1e8] sm:$0xff]  ;;  %v1060_v61 = vcombine.low %v64_v48, %v68_v49 }
  0x11   :  { %v75_v56 = vld [vmem:[%s1592_s1 + $0x1e0] sm:$0xff]  ;;  %v1069_v63 = vcombine.high %v72_v58, %v76_v59  ;;  %v80_v2 = vld [vmem:[%s1592_s1 + $0x208] sm:$0xff]  ;;  %v1068_v5 = vcombine.low %v72_v58, %v76_v59 }
  0x12   :  { %839 = vmatpush1.bf16.msra.mxu0 %v1034_v34  ;;  %880 = vmatpush1.bf16.msra.mxu1 %v1036_v35  ;;  %v1067_v62 = vcombine.high %v71_v55, %v75_v56  ;;  %v79_v0 = vld [vmem:[%s1592_s1 + $0x200] sm:$0xff]  ;;  %v84_v3 = vld [vmem:[%s1592_s1 + $0x228] sm:$0xff]  ;;  %v1066_v4 = vcombine.low %v71_v55, %v75_v56 }
  0x13   :  { %840 = vmatprep.subr.bf16.mxu0 %v1043_v36  ;;  %881 = vmatprep.subr.bf16.mxu1 %v1045_v37  ;;  %v83_v1 = vld [vmem:[%s1592_s1 + $0x220] sm:$0xff]  ;;  %v1077_v7 = vcombine.high %v80_v2, %v84_v3  ;;  %v88_v10 = vld [vmem:[%s1592_s1 + $0x248] sm:$0xff]  ;;  %v1076_v13 = vcombine.low %v80_v2, %v84_v3  ;;  %v17_v2 = vld [vmem:[%s1592_s1 + $0x10] sm:$0xff] }
  0x14   :  { %864 = vmatprep.mubr.bf16.mxu0 %v1257_v57  ;;  %905 = vmatprep.mubr.bf16.mxu1 %v1257_v57  ;;  %v1075_v6 = vcombine.high %v79_v0, %v83_v1  ;;  %v87_v8 = vld [vmem:[%s1592_s1 + $0x240] sm:$0xff]  ;;  %v92_v11 = vld [vmem:[%s1592_s1 + $0x268] sm:$0xff]  ;;  %v1074_v12 = vcombine.low %v79_v0, %v83_v1  ;;  %v21_v3 = vld [vmem:[%s1592_s1 + $0x30] sm:$0xff] }
  0x15   :  { %v91_v9 = vld [vmem:[%s1592_s1 + $0x260] sm:$0xff]  ;;  %v1085_v15 = vcombine.high %v88_v10, %v92_v11  ;;  %v96_v18 = vld [vmem:[%s1592_s1 + $0x288] sm:$0xff]  ;;  %v1084_v21 = vcombine.low %v88_v10, %v92_v11  ;;  %v25_v10 = vld [vmem:[%s1592_s1 + $0x50] sm:$0xff] }
  0x16   :  { %841 = vmatpush1.bf16.msra.mxu0 %v1042_v42  ;;  %882 = vmatpush1.bf16.msra.mxu1 %v1044_v43  ;;  %v1083_v14 = vcombine.high %v87_v8, %v91_v9  ;;  %v95_v16 = vld [vmem:[%s1592_s1 + $0x280] sm:$0xff]  ;;  %v100_v19 = vld [vmem:[%s1592_s1 + $0x2a8] sm:$0xff]  ;;  %v1082_v20 = vcombine.low %v87_v8, %v91_v9  ;;  %v1015_v8 = vcombine.high %v17_v2, %v21_v3  ;;  %v29_v11 = vld [vmem:[%s1592_s1 + $0x70] sm:$0xff] }
  0x17   :  { %842 = vmatprep.subr.bf16.mxu0 %v1051_v44  ;;  %883 = vmatprep.subr.bf16.mxu1 %v1053_v45  ;;  %v99_v17 = vld [vmem:[%s1592_s1 + $0x2a0] sm:$0xff]  ;;  %v1093_v23 = vcombine.high %v96_v18, %v100_v19  ;;  %v104_v26 = vld [vmem:[%s1592_s1 + $0x2c8] sm:$0xff]  ;;  %v1092_v29 = vcombine.low %v96_v18, %v100_v19  ;;  %v37_v19 = vld [vmem:[%s1592_s1 + $0xb0] sm:$0xff] }
  0x18   :  { %v1091_v22 = vcombine.high %v95_v16, %v99_v17  ;;  %v103_v24 = vld [vmem:[%s1592_s1 + $0x2c0] sm:$0xff]  ;;  %v108_v27 = vld [vmem:[%s1592_s1 + $0x2e8] sm:$0xff]  ;;  %v1090_v28 = vcombine.low %v95_v16, %v99_v17  ;;  %v1023_v17 = vcombine.high %v25_v10, %v29_v11 }
  0x19   :  { %v107_v25 = vld [vmem:[%s1592_s1 + $0x2e0] sm:$0xff]  ;;  %v1101_v31 = vcombine.high %v104_v26, %v108_v27  ;;  %v112_v34 = vld [vmem:[%s1592_s1 + $0x308] sm:$0xff]  ;;  %v1100_v37 = vcombine.low %v104_v26, %v108_v27  ;;  %v41_v26 = vld [vmem:[%s1592_s1 + $0xd0] sm:$0xff] }
  0x1a   :  { %843 = vmatpush1.bf16.msra.mxu0 %v1050_v50  ;;  %884 = vmatpush1.bf16.msra.mxu1 %v1052_v51  ;;  %v1099_v30 = vcombine.high %v103_v24, %v107_v25  ;;  %v111_v32 = vld [vmem:[%s1592_s1 + $0x300] sm:$0xff]  ;;  %v116_v35 = vld [vmem:[%s1592_s1 + $0x328] sm:$0xff]  ;;  %v1098_v36 = vcombine.low %v103_v24, %v107_v25  ;;  %v45_v27 = vld [vmem:[%s1592_s1 + $0xf0] sm:$0xff] }
  0x1b   :  { %844 = vmatprep.subr.bf16.mxu0 %v1059_v52  ;;  %885 = vmatprep.subr.bf16.mxu1 %v1061_v54  ;;  %v115_v33 = vld [vmem:[%s1592_s1 + $0x320] sm:$0xff]  ;;  %v1109_v39 = vcombine.high %v112_v34, %v116_v35  ;;  %v120_v42 = vld [vmem:[%s1592_s1 + $0x348] sm:$0xff]  ;;  %v1108_v45 = vcombine.low %v112_v34, %v116_v35  ;;  %v49_v34 = vld [vmem:[%s1592_s1 + $0x110] sm:$0xff] }
  0x1c   :  { %v1107_v38 = vcombine.high %v111_v32, %v115_v33  ;;  %v119_v40 = vld [vmem:[%s1592_s1 + $0x340] sm:$0xff]  ;;  %v124_v43 = vld [vmem:[%s1592_s1 + $0x368] sm:$0xff]  ;;  %v1106_v44 = vcombine.low %v111_v32, %v115_v33  ;;  %v1039_v32 = vcombine.high %v41_v26, %v45_v27  ;;  %v53_v35 = vld [vmem:[%s1592_s1 + $0x130] sm:$0xff] }
  0x1d   :  { %v123_v41 = vld [vmem:[%s1592_s1 + $0x360] sm:$0xff]  ;;  %v1117_v47 = vcombine.high %v120_v42, %v124_v43  ;;  %v128_v50 = vld [vmem:[%s1592_s1 + $0x388] sm:$0xff]  ;;  %v1116_v54 = vcombine.low %v120_v42, %v124_v43  ;;  %v61_v42 = vld [vmem:[%s1592_s1 + $0x170] sm:$0xff] }
  0x1e   :  { %845 = vmatpush1.bf16.msra.mxu0 %v1058_v60  ;;  %886 = vmatpush1.bf16.msra.mxu1 %v1060_v61  ;;  %v1115_v46 = vcombine.high %v119_v40, %v123_v41  ;;  %v127_v48 = vld [vmem:[%s1592_s1 + $0x380] sm:$0xff]  ;;  %v132_v51 = vld [vmem:[%s1592_s1 + $0x3a8] sm:$0xff]  ;;  %v1114_v52 = vcombine.low %v119_v40, %v123_v41  ;;  %v57_v41 = vld [vmem:[%s1592_s1 + $0x150] sm:$0xff] }
  0x1f   :  { %846 = vmatprep.subr.bf16.mxu0 %v1067_v62  ;;  %887 = vmatprep.subr.bf16.mxu1 %v1069_v63  ;;  %v131_v49 = vld [vmem:[%s1592_s1 + $0x3a0] sm:$0xff]  ;;  %v1125_v56 = vcombine.high %v128_v50, %v132_v51  ;;  %v136_v60 = vld [vmem:[%s1592_s1 + $0x3c8] sm:$0xff]  ;;  %v1124_v63 = vcombine.low %v128_v50, %v132_v51  ;;  %v58_v43 = vld [vmem:[%s1592_s1 + $0x158] sm:$0xff] }
  0x20   :  { %v1123_v55 = vcombine.high %v127_v48, %v131_v49  ;;  %v135_v58 = vld [vmem:[%s1592_s1 + $0x3c0] sm:$0xff]  ;;  %v140_v61 = vld [vmem:[%s1592_s1 + $0x3e8] sm:$0xff]  ;;  %v1122_v62 = vcombine.low %v127_v48, %v131_v49  ;;  %v65_v49 = vld [vmem:[%s1592_s1 + $0x190] sm:$0xff] }
  0x21   :  { %v139_v59 = vld [vmem:[%s1592_s1 + $0x3e0] sm:$0xff]  ;;  %v1133_v1 = vcombine.high %v136_v60, %v140_v61  ;;  %v69_v50 = vld [vmem:[%s1592_s1 + $0x1b0] sm:$0xff]  ;;  %v66_v51 = vld [vmem:[%s1592_s1 + $0x198] sm:$0xff] }
  0x22   :  { %847 = vmatpush1.bf16.msra.mxu0 %v1066_v4  ;;  %888 = vmatpush1.bf16.msra.mxu1 %v1068_v5  ;;  %v1131_v0 = vcombine.high %v135_v58, %v139_v59  ;;  %v18_v4 = vld [vmem:[%s1592_s1 + $0x18] sm:$0xff] }
  0x23   :  { %848 = vmatprep.subr.bf16.mxu0 %v1075_v6  ;;  %889 = vmatprep.subr.bf16.mxu1 %v1077_v7  ;;  %v22_v5 = vld [vmem:[%s1592_s1 + $0x38] sm:$0xff]  ;;  %v1130_v6 = vcombine.low %v135_v58, %v139_v59  ;;  %v1132_v7 = vcombine.low %v136_v60, %v140_v61  ;;  %v73_v59 = vld [vmem:[%s1592_s1 + $0x1d0] sm:$0xff] }
  0x24   :  { %v1017_v9 = vcombine.high %v18_v4, %v22_v5  ;;  %v1016_v16 = vcombine.low %v18_v4, %v22_v5  ;;  %v77_v60 = vld [vmem:[%s1592_s1 + $0x1f0] sm:$0xff]  ;;  %v74_v61 = vld [vmem:[%s1592_s1 + $0x1d8] sm:$0xff] }
  0x25   :  { %v85_v4 = vld [vmem:[%s1592_s1 + $0x230] sm:$0xff]  ;;  %v82_v5 = vld [vmem:[%s1592_s1 + $0x218] sm:$0xff] }
  0x26   :  { %849 = vmatpush1.bf16.msra.mxu0 %v1074_v12  ;;  %890 = vmatpush1.bf16.msra.mxu1 %v1076_v13  ;;  %v1383_v12 = vcombine.low %v1247_v53, %v1247_v53  ;;  %v26_v13 = vld [vmem:[%s1592_s1 + $0x58] sm:$0xff]  ;;  %v33_v53 = vld [vmem:[%s1592_s1 + $0x90] sm:$0xff] }
  0x27   :  { %850 = vmatprep.subr.bf16.mxu0 %v1083_v14  ;;  %891 = vmatprep.subr.bf16.mxu1 %v1085_v15  ;;  %v30_v14 = vld [vmem:[%s1592_s1 + $0x78] sm:$0xff]  ;;  %v1014_v15 = vcombine.low %v17_v2, %v21_v3  ;;  %v1031_v24 = vcombine.high %v33_v53, %v37_v19  ;;  %v81_v3 = vld [vmem:[%s1592_s1 + $0x210] sm:$0xff] }
  0x28   :  { %v1025_v18 = vcombine.high %v26_v13, %v30_v14 }
  0x2a   :  { %851 = vmatpush1.bf16.msra.mxu0 %v1082_v20  ;;  %892 = vmatpush1.bf16.msra.mxu1 %v1084_v21  ;;  %v34_v20 = vld [vmem:[%s1592_s1 + $0x98] sm:$0xff] }
  0x2b   :  { %852 = vmatprep.subr.bf16.mxu0 %v1091_v22  ;;  %893 = vmatprep.subr.bf16.mxu1 %v1093_v23  ;;  %v38_v21 = vld [vmem:[%s1592_s1 + $0xb8] sm:$0xff]  ;;  %v1022_v22 = vcombine.low %v25_v10, %v29_v11  ;;  %v1024_v23 = vcombine.low %v26_v13, %v30_v14  ;;  %v89_v11 = vld [vmem:[%s1592_s1 + $0x250] sm:$0xff] }
  0x2c   :  { %v1033_v25 = vcombine.high %v34_v20, %v38_v21  ;;  %v93_v13 = vld [vmem:[%s1592_s1 + $0x270] sm:$0xff]  ;;  %v90_v14 = vld [vmem:[%s1592_s1 + $0x258] sm:$0xff] }
  0x2e   :  { %853 = vmatpush1.bf16.msra.mxu0 %v1090_v28  ;;  %894 = vmatpush1.bf16.msra.mxu1 %v1092_v29  ;;  %v42_v28 = vld [vmem:[%s1592_s1 + $0xd8] sm:$0xff] }
  0x2f   :  { %854 = vmatprep.subr.bf16.mxu0 %v1099_v30  ;;  %895 = vmatprep.subr.bf16.mxu1 %v1101_v31  ;;  %v46_v29 = vld [vmem:[%s1592_s1 + $0xf8] sm:$0xff]  ;;  %v1030_v30 = vcombine.low %v33_v53, %v37_v19  ;;  %v1032_v31 = vcombine.low %v34_v20, %v38_v21  ;;  %v97_v19 = vld [vmem:[%s1592_s1 + $0x290] sm:$0xff] }
  0x30   :  { %v1041_v33 = vcombine.high %v42_v28, %v46_v29  ;;  %v101_v20 = vld [vmem:[%s1592_s1 + $0x2b0] sm:$0xff]  ;;  %v98_v21 = vld [vmem:[%s1592_s1 + $0x298] sm:$0xff] }
  0x32   :  { %855 = vmatpush1.bf16.msra.mxu0 %v1098_v36  ;;  %896 = vmatpush1.bf16.msra.mxu1 %v1100_v37  ;;  %v54_v36 = vld [vmem:[%s1592_s1 + $0x138] sm:$0xff]  ;;  %v1038_v37 = vcombine.low %v41_v26, %v45_v27  ;;  %v105_v27 = vld [vmem:[%s1592_s1 + $0x2d0] sm:$0xff] }
  0x33   :  { %856 = vmatprep.subr.bf16.mxu0 %v1107_v38  ;;  %897 = vmatprep.subr.bf16.mxu1 %v1109_v39  ;;  %v1040_v38 = vcombine.low %v42_v28, %v46_v29  ;;  %v1047_v39 = vcombine.high %v49_v34, %v53_v35  ;;  %v109_v28 = vld [vmem:[%s1592_s1 + $0x2f0] sm:$0xff]  ;;  %v106_v29 = vld [vmem:[%s1592_s1 + $0x2d8] sm:$0xff] }
  0x36   :  { %857 = vmatpush1.bf16.msra.mxu0 %v1106_v44  ;;  %898 = vmatpush1.bf16.msra.mxu1 %v1108_v45  ;;  %v62_v44 = vld [vmem:[%s1592_s1 + $0x178] sm:$0xff]  ;;  %v1046_v45 = vcombine.low %v49_v34, %v53_v35  ;;  %v113_v35 = vld [vmem:[%s1592_s1 + $0x310] sm:$0xff] }
  0x37   :  { %858 = vmatprep.subr.bf16.mxu0 %v1115_v46  ;;  %899 = vmatprep.subr.bf16.mxu1 %v1117_v47  ;;  %v1055_v47 = vcombine.high %v57_v41, %v61_v42  ;;  %v1057_v48 = vcombine.high %v58_v43, %v62_v44 }
  0x3a   :  { %859 = vmatpush1.bf16.msra.mxu0 %v1114_v52  ;;  %900 = vmatpush1.bf16.msra.mxu1 %v1116_v54  ;;  %v70_v52 = vld [vmem:[%s1592_s1 + $0x1b8] sm:$0xff]  ;;  %v1054_v54 = vcombine.low %v57_v41, %v61_v42  ;;  %v121_v42 = vld [vmem:[%s1592_s1 + $0x350] sm:$0xff] }
  0x3b   :  { %860 = vmatprep.subr.bf16.mxu0 %v1123_v55  ;;  %901 = vmatprep.subr.bf16.mxu1 %v1125_v56  ;;  %v1056_v55 = vcombine.low %v58_v43, %v62_v44  ;;  %v1063_v56 = vcombine.high %v65_v49, %v69_v50  ;;  %v1065_v58 = vcombine.high %v66_v51, %v70_v52  ;;  %v125_v43 = vld [vmem:[%s1592_s1 + $0x370] sm:$0xff]  ;;  %v122_v44 = vld [vmem:[%s1592_s1 + $0x358] sm:$0xff] }
  0x3e   :  { %861 = vmatpush1.bf16.msra.mxu0 %v1122_v62  ;;  %902 = vmatpush1.bf16.msra.mxu1 %v1124_v63  ;;  %v78_v62 = vld [vmem:[%s1592_s1 + $0x1f8] sm:$0xff]  ;;  %v1062_v63 = vcombine.low %v65_v49, %v69_v50  ;;  %v129_v50 = vld [vmem:[%s1592_s1 + $0x390] sm:$0xff] }
  0x3f   :  { %862 = vmatprep.subr.bf16.mxu0 %v1131_v0  ;;  %903 = vmatprep.subr.bf16.mxu1 %v1133_v1  ;;  %v1064_v0 = vcombine.low %v66_v51, %v70_v52  ;;  %v1071_v1 = vcombine.high %v73_v59, %v77_v60  ;;  %v1073_v2 = vcombine.high %v74_v61, %v78_v62  ;;  %v133_v51 = vld [vmem:[%s1592_s1 + $0x3b0] sm:$0xff]  ;;  %v130_v52 = vld [vmem:[%s1592_s1 + $0x398] sm:$0xff] }
  0x42   :  { %863 = vmatpush1.bf16.msra.mxu0 %v1130_v6  ;;  %904 = vmatpush1.bf16.msra.mxu1 %v1132_v7  ;;  %v86_v6 = vld [vmem:[%s1592_s1 + $0x238] sm:$0xff]  ;;  %v1070_v7 = vcombine.low %v73_v59, %v77_v60  ;;  %v137_v60 = vld [vmem:[%s1592_s1 + $0x3d0] sm:$0xff] }
  0x43   :  { %914 = vmatprep.subr.bf16.mxu0 %v1015_v8  ;;  %955 = vmatprep.subr.bf16.mxu1 %v1017_v9  ;;  %v1072_v8 = vcombine.low %v74_v61, %v78_v62  ;;  %v1079_v9 = vcombine.high %v81_v3, %v85_v4  ;;  %v1081_v10 = vcombine.high %v82_v5, %v86_v6  ;;  %v141_v61 = vld [vmem:[%s1592_s1 + $0x3f0] sm:$0xff]  ;;  %v138_v62 = vld [vmem:[%s1592_s1 + $0x3d8] sm:$0xff] }
  0x45   :  { %865 = vmatmul.mubr.bf16.vlgmr.msra.gmra.mrb[0].mxu0 %v1383_v12  ;;  %906 = vmatmul.mubr.bf16.vlgmr.msra.gmra.mrb[0].mxu1 %v1383_v12 }
  0x46   :  { %915 = vmatpush1.bf16.msra.mxu0 %v1014_v15  ;;  %956 = vmatpush1.bf16.msra.mxu1 %v1016_v16  ;;  %v94_v15 = vld [vmem:[%s1592_s1 + $0x278] sm:$0xff]  ;;  %v1078_v16 = vcombine.low %v81_v3, %v85_v4  ;;  %v1134_v4 = vcombine.low %v137_v60, %v141_v61 }
  0x47   :  { %916 = vmatprep.subr.bf16.mxu0 %v1023_v17  ;;  %957 = vmatprep.subr.bf16.mxu1 %v1025_v18  ;;  %v1080_v17 = vcombine.low %v82_v5, %v86_v6  ;;  %v1087_v18 = vcombine.high %v89_v11, %v93_v13  ;;  %v1089_v53 = vcombine.high %v90_v14, %v94_v15  ;;  %v145_v6 = vlaneseq }
  0x48   :  { %946 = vmatprep.mubr.bf16.mxu0 %v1257_v57  ;;  %987 = vmatprep.mubr.bf16.mxu1 %v1257_v57  ;;  %v50_v57 = vld [vmem:[%s1592_s1 + $0x118] sm:$0xff] }
  0x49   :  { %v1049_v40 = vcombine.high %v50_v57, %v54_v36  ;;  %v1048_v46 = vcombine.low %v50_v57, %v54_v36  ;;  %v117_v57 = vld [vmem:[%s1592_s1 + $0x330] sm:$0xff]  ;;  %v114_v36 = vld [vmem:[%s1592_s1 + $0x318] sm:$0xff] }
  0x4a   :  { %917 = vmatpush1.bf16.msra.mxu0 %v1022_v22  ;;  %958 = vmatpush1.bf16.msra.mxu1 %v1024_v23  ;;  %v102_v22 = vld [vmem:[%s1592_s1 + $0x2b8] sm:$0xff]  ;;  %v1086_v23 = vcombine.low %v89_v11, %v93_v13 }
  0x4b   :  { %918 = vmatprep.subr.bf16.mxu0 %v1031_v24  ;;  %959 = vmatprep.subr.bf16.mxu1 %v1033_v25  ;;  %v1088_v24 = vcombine.low %v90_v14, %v94_v15  ;;  %v1095_v25 = vcombine.high %v97_v19, %v101_v20  ;;  %v1097_v26 = vcombine.high %v98_v21, %v102_v22 }
  0x4e   :  { %919 = vmatpush1.bf16.msra.mxu0 %v1030_v30  ;;  %960 = vmatpush1.bf16.msra.mxu1 %v1032_v31  ;;  %v110_v30 = vld [vmem:[%s1592_s1 + $0x2f8] sm:$0xff]  ;;  %v1094_v31 = vcombine.low %v97_v19, %v101_v20 }
  0x4f   :  { %920 = vmatprep.subr.bf16.mxu0 %v1039_v32  ;;  %961 = vmatprep.subr.bf16.mxu1 %v1041_v33  ;;  %v1096_v32 = vcombine.low %v98_v21, %v102_v22  ;;  %v1103_v33 = vcombine.high %v105_v27, %v109_v28  ;;  %v1105_v34 = vcombine.high %v106_v29, %v110_v30 }
  0x52   :  { %921 = vmatpush1.bf16.msra.mxu0 %v1038_v37  ;;  %962 = vmatpush1.bf16.msra.mxu1 %v1040_v38  ;;  %v118_v37 = vld [vmem:[%s1592_s1 + $0x338] sm:$0xff]  ;;  %v1102_v38 = vcombine.low %v105_v27, %v109_v28 }
  0x53   :  { %922 = vmatprep.subr.bf16.mxu0 %v1047_v39  ;;  %963 = vmatprep.subr.bf16.mxu1 %v1049_v40  ;;  %v1104_v39 = vcombine.low %v106_v29, %v110_v30  ;;  %v1111_v40 = vcombine.high %v113_v35, %v117_v57  ;;  %v1113_v41 = vcombine.high %v114_v36, %v118_v37 }
  0x56   :  { %923 = vmatpush1.bf16.msra.mxu0 %v1046_v45  ;;  %964 = vmatpush1.bf16.msra.mxu1 %v1048_v46  ;;  %v126_v45 = vld [vmem:[%s1592_s1 + $0x378] sm:$0xff]  ;;  %v1110_v46 = vcombine.low %v113_v35, %v117_v57 }
  0x57   :  { %924 = vmatprep.subr.bf16.mxu0 %v1055_v47  ;;  %965 = vmatprep.subr.bf16.mxu1 %v1057_v48  ;;  %v1112_v47 = vcombine.low %v114_v36, %v118_v37  ;;  %v1119_v48 = vcombine.high %v121_v42, %v125_v43  ;;  %v1121_v49 = vcombine.high %v122_v44, %v126_v45 }
  0x5a   :  { %925 = vmatpush1.bf16.msra.mxu0 %v1054_v54  ;;  %966 = vmatpush1.bf16.msra.mxu1 %v1056_v55  ;;  %v134_v54 = vld [vmem:[%s1592_s1 + $0x3b8] sm:$0xff]  ;;  %v1118_v55 = vcombine.low %v121_v42, %v125_v43 }
  0x5b   :  { %926 = vmatprep.subr.bf16.mxu0 %v1063_v56  ;;  %967 = vmatprep.subr.bf16.mxu1 %v1065_v58  ;;  %v1120_v56 = vcombine.low %v122_v44, %v126_v45  ;;  %v1127_v58 = vcombine.high %v129_v50, %v133_v51  ;;  %v1129_v59 = vcombine.high %v130_v52, %v134_v54 }
  0x5e   :  { %927 = vmatpush1.bf16.msra.mxu0 %v1062_v63  ;;  %968 = vmatpush1.bf16.msra.mxu1 %v1064_v0  ;;  %v142_v63 = vld [vmem:[%s1592_s1 + $0x3f8] sm:$0xff]  ;;  %v1126_v0 = vcombine.low %v129_v50, %v133_v51 }
  0x5f   :  { %928 = vmatprep.subr.bf16.mxu0 %v1071_v1  ;;  %969 = vmatprep.subr.bf16.mxu1 %v1073_v2  ;;  %v1128_v1 = vcombine.low %v130_v52, %v134_v54  ;;  %v1135_v2 = vcombine.high %v137_v60, %v141_v61  ;;  %v1137_v3 = vcombine.high %v138_v62, %v142_v63 }
  0x60   :  { %v1136_v5 = vcombine.low %v138_v62, %v142_v63 }
  0x62   :  { %929 = vmatpush1.bf16.msra.mxu0 %v1070_v7  ;;  %970 = vmatpush1.bf16.msra.mxu1 %v1072_v8  ;;  %v146_v7 = vshrl.u32 %v145_v6, 7 }
  0x63   :  { %930 = vmatprep.subr.bf16.mxu0 %v1079_v9  ;;  %971 = vmatprep.subr.bf16.mxu1 %v1081_v10  ;;  %v143_v9 = vld [vmem:[%s1594_s2] sm:$0xff] }
  0x64   :  { %v147_v8 = vsub.s32 0, %v146_v7  ;;  %v155_v10 = vsub.s32 2, %v146_v7  ;;  %v151_v11 = vsub.s32 1, %v146_v7  ;;  %v159_v13 = vsub.s32 3, %v146_v7 }
  0x65   :  { %v163_v28 = vsub.s32 4, %v146_v7  ;;  %v171_v29 = vsub.s32 6, %v146_v7  ;;  %v167_v30 = vsub.s32 5, %v146_v7 }
  0x66   :  { %931 = vmatpush1.bf16.msra.mxu0 %v1078_v16  ;;  %972 = vmatpush1.bf16.msra.mxu1 %v1080_v17  ;;  %v148_v14 = vrot.slane %v143_v9, %v147_v8  ;;  %v156_v15 = vrot.slane %v143_v9, %v155_v10  ;;  %v152_v16 = vrot.slane %v143_v9, %v151_v11 }
  0x67   :  { %932 = vmatprep.subr.bf16.mxu0 %v1087_v18  ;;  %973 = vmatprep.subr.bf16.mxu1 %v1089_v53  ;;  %v160_v17 = vrot.slane %v143_v9, %v159_v13 }
  0x6a   :  { %933 = vmatpush1.bf16.msra.mxu0 %v1086_v23  ;;  %974 = vmatpush1.bf16.msra.mxu1 %v1088_v24 }
  0x6b   :  { %934 = vmatprep.subr.bf16.mxu0 %v1095_v25  ;;  %975 = vmatprep.subr.bf16.mxu1 %v1097_v26 }
  0x6e   :  { %935 = vmatpush1.bf16.msra.mxu0 %v1094_v31  ;;  %976 = vmatpush1.bf16.msra.mxu1 %v1096_v32  ;;  %v175_v31 = vsub.s32 7, %v146_v7  ;;  %v164_v32 = vrot.slane %v143_v9, %v163_v28 }
  0x6f   :  { %936 = vmatprep.subr.bf16.mxu0 %v1103_v33  ;;  %977 = vmatprep.subr.bf16.mxu1 %v1105_v34  ;;  %v172_v33 = vrot.slane %v143_v9, %v171_v29  ;;  %v168_v34 = vrot.slane %v143_v9, %v167_v30 }
  0x70   :  { %v176_v35 = vrot.slane %v143_v9, %v175_v31 }
  0x72   :  { %937 = vmatpush1.bf16.msra.mxu0 %v1102_v38  ;;  %978 = vmatpush1.bf16.msra.mxu1 %v1104_v39 }
  0x73   :  { %938 = vmatprep.subr.bf16.mxu0 %v1111_v40  ;;  %979 = vmatprep.subr.bf16.mxu1 %v1113_v41 }
  0x76   :  { %939 = vmatpush1.bf16.msra.mxu0 %v1110_v46  ;;  %980 = vmatpush1.bf16.msra.mxu1 %v1112_v47 }
  0x77   :  { %940 = vmatprep.subr.bf16.mxu0 %v1119_v48  ;;  %981 = vmatprep.subr.bf16.mxu1 %v1121_v49 }
  0x7a   :  { %941 = vmatpush1.bf16.msra.mxu0 %v1118_v55  ;;  %982 = vmatpush1.bf16.msra.mxu1 %v1120_v56 }
  0x7b   :  { %942 = vmatprep.subr.bf16.mxu0 %v1127_v58  ;;  %983 = vmatprep.subr.bf16.mxu1 %v1129_v59 }
  0x7e   :  { %943 = vmatpush1.bf16.msra.mxu0 %v1126_v0  ;;  %984 = vmatpush1.bf16.msra.mxu1 %v1128_v1 }
  0x7f   :  { %944 = vmatprep.subr.bf16.mxu0 %v1135_v2  ;;  %985 = vmatprep.subr.bf16.mxu1 %v1137_v3 }
  0x82   :  { %945 = vmatpush1.bf16.msra.mxu0 %v1134_v4  ;;  %986 = vmatpush1.bf16.msra.mxu1 %v1136_v5 }
  0x85   :  { %947 = vmatmul.mubr.bf16.vlgmr.msra.gmra.mrb[4].mxu0 %v1383_v12  ;;  %988 = vmatmul.mubr.bf16.vlgmr.msra.gmra.mrb[4].mxu1 %v1383_v12 }
 0x118   :  { %v866_v18 = vpop.f32.mrb[0].mxu0  ;;  %v907_v19 = vpop.f32.mrb[0].mxu1 }
 0x119   :  { %v867_v53 = vadd.f32 %v866_v18, %v148_v14  ;;  %v868_v20 = vpop.f32.mrb[1].mxu0  ;;  %v908_v21 = vadd.f32 %v907_v19, %v156_v15  ;;  %v909_v22 = vpop.f32.mrb[1].mxu1 }
 0x11a   :  { %v869_v12 = vadd.f32 %v868_v20, %v152_v16  ;;  %v870_v23 = vpop.f32.mrb[2].mxu0  ;;  %v910_v24 = vadd.f32 %v909_v22, %v160_v17  ;;  %v911_v25 = vpop.f32.mrb[2].mxu1 }
 0x11b   :  { %996 = vst [vmem:[%s1595_s3] sm:$0xff] %v867_v53  ;;  %v871_v26 = vpop.f32.mrb[3].mxu0  ;;  %998 = vst [vmem:[%s1595_s3 + $0x10] sm:$0xff] %v908_v21  ;;  %v912_v27 = vpop.f32.mrb[3].mxu1 }
 0x11c   :  { %997 = vst [vmem:[%s1595_s3 + $0x8] sm:$0xff] %v869_v12  ;;  %999 = vst [vmem:[%s1595_s3 + $0x18] sm:$0xff] %v910_v24 }
 0x158   :  { %v948_v57 = vpop.f32.mrb[4].mxu0  ;;  %v989_v37 = vpop.f32.mrb[4].mxu1 }
 0x159   :  { %v949_v36 = vadd.f32 %v948_v57, %v164_v32  ;;  %v950_v38 = vpop.f32.mrb[5].mxu0  ;;  %v990_v39 = vadd.f32 %v989_v37, %v172_v33  ;;  %v991_v41 = vpop.f32.mrb[5].mxu1 }
 0x15a   :  { %v951_v40 = vadd.f32 %v950_v38, %v168_v34  ;;  %v952_v42 = vpop.f32.mrb[6].mxu0  ;;  %v992_v43 = vadd.f32 %v991_v41, %v176_v35  ;;  %v993_v44 = vpop.f32.mrb[6].mxu1 }
 0x15b   :  { %1000 = vst [vmem:[%s1595_s3 + $0x20] sm:$0xff] %v949_v36  ;;  %v953_v45 = vpop.f32.mrb[7].mxu0  ;;  %1002 = vst [vmem:[%s1595_s3 + $0x30] sm:$0xff] %v990_v39  ;;  %v994_v46 = vpop.f32.mrb[7].mxu1 }
 0x15c   :  { %1001 = vst [vmem:[%s1595_s3 + $0x28] sm:$0xff] %v951_v40  ;;  %1003 = vst [vmem:[%s1595_s3 + $0x38] sm:$0xff] %v992_v43 }

// kernel: lstm_model_forward.9
= control target key start
LH: loop header
LB: loop body
LE: loop exit
PB: predicated region body
PF: predicated region fallthrough
CT: control target
= control target key end

     0   :  { %v8768_v0 = vmov 0   ;;  %vm777_vm0 = vcmask 39936   ;;  %s15496_s1 = inlined_call_operand.vmem [shape: f32[8,8,1], index: 1, kind: input, shape index: {}]   ;;  %s15497_s4 = inlined_call_operand.vmem [shape: f32[256,1024], index: 4, kind: input, shape index: {}]   ;;  %s15498_s2 = inlined_call_operand.vmem [shape: f32[8,256], index: 2, kind: input, shape index: {}]   ;;  %s15499_s5 = inlined_call_operand.vmem [shape: f32[256,5], index: 5, kind: input, shape index: {}]   ;;  %s15500_s0 = inlined_call_operand.vmem [shape: f32[8,8,1024], index: 0, kind: input, shape index: {}]   ;;  %s15501_s3 = inlined_call_operand.vmem [shape: f32[8,256], index: 3, kind: input, shape index: {}]   ;;  %s15502_s6 = inlined_call_operand.vmem [shape: f32[1,5], index: 6, kind: input, shape index: {}]   ;;  %s15503_s7 = inlined_call_operand.vmem [shape: f32[8,8,5], index: 7, kind: output, shape index: {0}]   ;;  %s15504_s9 = inlined_call_operand.vmem [shape: f32[8,256], index: 9, kind: output, shape index: {2}]   ;;  %s15505_s8 = inlined_call_operand.vmem [shape: f32[8,256], index: 8, kind: output, shape index: {1}]  }
   0x1   :  { %8665 = vset.pattern.permute.xlu0 %v8768_v0  ;;  %v45_v1 = vld [vmem:[%s15496_s1] sm:$0xff]  ;;  %8666 = vset.pattern.permute.xlu1 %v8768_v0  ;;  %v5961_v2 = vld [vmem:[%s15496_s1 + $0x8] sm:$0xff]  ;;  %v66_v6 = vld [vmem:[%s15497_s4 + $0x18] sm:$0xff] }
   0x2   :  { %48 = vperm.xlu0 %8665, %v45_v1   ;;  %v64_v3 = vld [vmem:[%s15497_s4 + $0x8] sm:$0xff]  ;;  %v74_v7 = vld [vmem:[%s15497_s4 + $0x58] sm:$0xff]  ;;  %v63_v8 = vld [vmem:[%s15497_s4] sm:$0xff] }
   0x3   :  { %v72_v4 = vld [vmem:[%s15497_s4 + $0x48] sm:$0xff]  ;;  %v6424_v9 = vpack.c.bf16 %v74_v7, %v66_v6  ;;  %v71_v10 = vld [vmem:[%s15497_s4 + $0x40] sm:$0xff]  ;;  %v65_v11 = vld [vmem:[%s15497_s4 + $0x10] sm:$0xff] }
   0x4   :  { %v6360_v5 = vpack.c.bf16 %v72_v4, %v64_v3  ;;  %v73_v12 = vld [vmem:[%s15497_s4 + $0x50] sm:$0xff]  ;;  %v6012_v13 = vld [vmem:[%s15496_s1 + $0x20] sm:$0xff]  ;;  %v6362_v14 = vpack.c.bf16 %v71_v10, %v63_v8  ;;  %v80_v16 = vld [vmem:[%s15497_s4 + $0x88] sm:$0xff] }
   0x5   :  { %v6426_v15 = vpack.c.bf16 %v73_v12, %v65_v11  ;;  %v88_v17 = vld [vmem:[%s15497_s4 + $0xc8] sm:$0xff]  ;;  %v82_v18 = vld [vmem:[%s15497_s4 + $0x98] sm:$0xff]  ;;  %6425 = vmatprep.subr.bf16.mxu1 %v6424_v9  ;;  %v79_v21 = vld [vmem:[%s15497_s4 + $0x80] sm:$0xff] }
   0x6   :  { %6361 = vmatprep.subr.bf16.mxu0 %v6360_v5  ;;  %783 = vperm.xlu0 %8665, %v5961_v2   ;;  %v6364_v19 = vpack.c.bf16 %v88_v17, %v80_v16  ;;  %v90_v20 = vld [vmem:[%s15497_s4 + $0xd8] sm:$0xff]  ;;  %v87_v22 = vld [vmem:[%s15497_s4 + $0xc0] sm:$0xff]  ;;  %v81_v25 = vld [vmem:[%s15497_s4 + $0x90] sm:$0xff] }
   0x7   :  { %6363 = vmatpush1.bf16.msra.mxu0 %v6362_v14  ;;  %6427 = vmatpush1.bf16.msra.mxu1 %v6426_v15  ;;  %v6428_v23 = vpack.c.bf16 %v90_v20, %v82_v18  ;;  %v6366_v24 = vpack.c.bf16 %v87_v22, %v79_v21  ;;  %v89_v26 = vld [vmem:[%s15497_s4 + $0xd0] sm:$0xff]  ;;  %v96_v27 = vld [vmem:[%s15497_s4 + $0x108] sm:$0xff]  ;;  %v98_v30 = vld [vmem:[%s15497_s4 + $0x118] sm:$0xff] }
   0x8   :  { %6365 = vmatprep.subr.bf16.mxu0 %v6364_v19  ;;  %v6430_v28 = vpack.c.bf16 %v89_v26, %v81_v25  ;;  %v104_v29 = vld [vmem:[%s15497_s4 + $0x148] sm:$0xff]  ;;  %v106_v31 = vld [vmem:[%s15497_s4 + $0x158] sm:$0xff]  ;;  %v6046_v32 = vld [vmem:[%s15496_s1 + $0x30] sm:$0xff] }
   0x9   :  { %6429 = vmatprep.subr.bf16.mxu1 %v6428_v23  ;;  %v6368_v33 = vpack.c.bf16 %v104_v29, %v96_v27  ;;  %v6432_v34 = vpack.c.bf16 %v106_v31, %v98_v30  ;;  %v95_v35 = vld [vmem:[%s15497_s4 + $0x100] sm:$0xff]  ;;  %v97_v37 = vld [vmem:[%s15497_s4 + $0x110] sm:$0xff]  ;;  %v112_v39 = vld [vmem:[%s15497_s4 + $0x188] sm:$0xff] }
   0xa   :  { %v103_v36 = vld [vmem:[%s15497_s4 + $0x140] sm:$0xff]  ;;  %2991 = vperm.xlu0 %8665, %v6012_v13   ;;  %v105_v38 = vld [vmem:[%s15497_s4 + $0x150] sm:$0xff]  ;;  %v120_v40 = vld [vmem:[%s15497_s4 + $0x1c8] sm:$0xff] }
   0xb   :  { %6367 = vmatpush1.bf16.msra.mxu0 %v6366_v24  ;;  %6431 = vmatpush1.bf16.msra.mxu1 %v6430_v28  ;;  %v6370_v41 = vpack.c.bf16 %v103_v36, %v95_v35  ;;  %v6434_v42 = vpack.c.bf16 %v105_v38, %v97_v37  ;;  %v114_v43 = vld [vmem:[%s15497_s4 + $0x198] sm:$0xff]  ;;  %v111_v45 = vld [vmem:[%s15497_s4 + $0x180] sm:$0xff]  ;;  %v6372_v46 = vpack.c.bf16 %v120_v40, %v112_v39  ;;  %v113_v49 = vld [vmem:[%s15497_s4 + $0x190] sm:$0xff] }
   0xc   :  { %v122_v44 = vld [vmem:[%s15497_s4 + $0x1d8] sm:$0xff]  ;;  %6369 = vmatprep.subr.bf16.mxu0 %v6368_v33  ;;  %6433 = vmatprep.subr.bf16.mxu1 %v6432_v34  ;;  %v119_v48 = vld [vmem:[%s15497_s4 + $0x1c0] sm:$0xff]  ;;  %v121_v50 = vld [vmem:[%s15497_s4 + $0x1d0] sm:$0xff] }
   0xd   :  { %v6436_v47 = vpack.c.bf16 %v122_v44, %v114_v43  ;;  %v128_v51 = vld [vmem:[%s15497_s4 + $0x208] sm:$0xff]  ;;  %v130_v53 = vld [vmem:[%s15497_s4 + $0x218] sm:$0xff]  ;;  %v6374_v55 = vpack.c.bf16 %v119_v48, %v111_v45  ;;  %v6438_v56 = vpack.c.bf16 %v121_v50, %v113_v49  ;;  %v127_v57 = vld [vmem:[%s15497_s4 + $0x200] sm:$0xff] }
   0xe   :  { %v136_v52 = vld [vmem:[%s15497_s4 + $0x248] sm:$0xff]  ;;  %4463 = vperm.xlu0 %8665, %v6046_v32   ;;  %v138_v54 = vld [vmem:[%s15497_s4 + $0x258] sm:$0xff]  ;;  %v135_v58 = vld [vmem:[%s15497_s4 + $0x240] sm:$0xff] }
   0xf   :  { %6371 = vmatpush1.bf16.msra.mxu0 %v6370_v41  ;;  %6435 = vmatpush1.bf16.msra.mxu1 %v6434_v42  ;;  %v6376_v59 = vpack.c.bf16 %v136_v52, %v128_v51  ;;  %v6440_v60 = vpack.c.bf16 %v138_v54, %v130_v53  ;;  %v129_v61 = vld [vmem:[%s15497_s4 + $0x210] sm:$0xff]  ;;  %v144_v63 = vld [vmem:[%s15497_s4 + $0x288] sm:$0xff]  ;;  %v146_v1 = vld [vmem:[%s15497_s4 + $0x298] sm:$0xff]  ;;  %v6378_v3 = vpack.c.bf16 %v135_v58, %v127_v57 }
  0x10   :  { %6373 = vmatprep.subr.bf16.mxu0 %v6372_v46  ;;  %6437 = vmatprep.subr.bf16.mxu1 %v6436_v47  ;;  %v137_v62 = vld [vmem:[%s15497_s4 + $0x250] sm:$0xff]  ;;  %v152_v0 = vld [vmem:[%s15497_s4 + $0x2c8] sm:$0xff]  ;;  %v154_v2 = vld [vmem:[%s15497_s4 + $0x2d8] sm:$0xff] }
  0x11   :  { %v6442_v4 = vpack.c.bf16 %v137_v62, %v129_v61  ;;  %v143_v5 = vld [vmem:[%s15497_s4 + $0x280] sm:$0xff]  ;;  %v6380_v7 = vpack.c.bf16 %v152_v0, %v144_v63  ;;  %v6444_v8 = vpack.c.bf16 %v154_v2, %v146_v1  ;;  %v145_v9 = vld [vmem:[%s15497_s4 + $0x290] sm:$0xff]  ;;  %v160_v11 = vld [vmem:[%s15497_s4 + $0x308] sm:$0xff] }
  0x12   :  { %v151_v6 = vld [vmem:[%s15497_s4 + $0x2c0] sm:$0xff]  ;;  %v153_v10 = vld [vmem:[%s15497_s4 + $0x2d0] sm:$0xff]  ;;  %v168_v12 = vld [vmem:[%s15497_s4 + $0x348] sm:$0xff] }
  0x13   :  { %6375 = vmatpush1.bf16.msra.mxu0 %v6374_v55  ;;  %6439 = vmatpush1.bf16.msra.mxu1 %v6438_v56  ;;  %v162_v13 = vld [vmem:[%s15497_s4 + $0x318] sm:$0xff]  ;;  %v6382_v15 = vpack.c.bf16 %v151_v6, %v143_v5  ;;  %v6446_v16 = vpack.c.bf16 %v153_v10, %v145_v9  ;;  %v159_v17 = vld [vmem:[%s15497_s4 + $0x300] sm:$0xff]  ;;  %v6384_v19 = vpack.c.bf16 %v168_v12, %v160_v11  ;;  %v161_v21 = vld [vmem:[%s15497_s4 + $0x310] sm:$0xff] }
  0x14   :  { %6377 = vmatprep.subr.bf16.mxu0 %v6376_v59  ;;  %6441 = vmatprep.subr.bf16.mxu1 %v6440_v60  ;;  %v170_v14 = vld [vmem:[%s15497_s4 + $0x358] sm:$0xff]  ;;  %v167_v18 = vld [vmem:[%s15497_s4 + $0x340] sm:$0xff]  ;;  %v169_v22 = vld [vmem:[%s15497_s4 + $0x350] sm:$0xff] }
  0x15   :  { %v6448_v20 = vpack.c.bf16 %v170_v14, %v162_v13  ;;  %v176_v23 = vld [vmem:[%s15497_s4 + $0x388] sm:$0xff]  ;;  %v178_v25 = vld [vmem:[%s15497_s4 + $0x398] sm:$0xff]  ;;  %v6386_v27 = vpack.c.bf16 %v167_v18, %v159_v17  ;;  %v6450_v28 = vpack.c.bf16 %v169_v22, %v161_v21  ;;  %v175_v29 = vld [vmem:[%s15497_s4 + $0x380] sm:$0xff] }
  0x16   :  { %v184_v24 = vld [vmem:[%s15497_s4 + $0x3c8] sm:$0xff]  ;;  %v186_v26 = vld [vmem:[%s15497_s4 + $0x3d8] sm:$0xff]  ;;  %v183_v30 = vld [vmem:[%s15497_s4 + $0x3c0] sm:$0xff] }
  0x17   :  { %6379 = vmatpush1.bf16.msra.mxu0 %v6378_v3  ;;  %6443 = vmatpush1.bf16.msra.mxu1 %v6442_v4  ;;  %v9017_v31 = vpack.c.bf16 %v184_v24, %v176_v23  ;;  %v6452_v32 = vpack.c.bf16 %v186_v26, %v178_v25  ;;  %v177_v33 = vld [vmem:[%s15497_s4 + $0x390] sm:$0xff]  ;;  %v192_v35 = vld [vmem:[%s15497_s4 + $0x408] sm:$0xff]  ;;  %v194_v37 = vld [vmem:[%s15497_s4 + $0x418] sm:$0xff]  ;;  %v9037_v39 = vpack.c.bf16 %v183_v30, %v175_v29 }
  0x18   :  { %6381 = vmatprep.subr.bf16.mxu0 %v6380_v7  ;;  %6445 = vmatprep.subr.bf16.mxu1 %v6444_v8  ;;  %v185_v34 = vld [vmem:[%s15497_s4 + $0x3d0] sm:$0xff]  ;;  %v200_v36 = vld [vmem:[%s15497_s4 + $0x448] sm:$0xff]  ;;  %v202_v38 = vld [vmem:[%s15497_s4 + $0x458] sm:$0xff] }
  0x19   :  { %v6454_v40 = vpack.c.bf16 %v185_v34, %v177_v33  ;;  %v191_v41 = vld [vmem:[%s15497_s4 + $0x400] sm:$0xff]  ;;  %v6392_v43 = vpack.c.bf16 %v200_v36, %v192_v35  ;;  %v6456_v44 = vpack.c.bf16 %v202_v38, %v194_v37  ;;  %v193_v45 = vld [vmem:[%s15497_s4 + $0x410] sm:$0xff]  ;;  %v208_v47 = vld [vmem:[%s15497_s4 + $0x488] sm:$0xff] }
  0x1a   :  { %v199_v42 = vld [vmem:[%s15497_s4 + $0x440] sm:$0xff]  ;;  %v201_v46 = vld [vmem:[%s15497_s4 + $0x450] sm:$0xff]  ;;  %v216_v48 = vld [vmem:[%s15497_s4 + $0x4c8] sm:$0xff] }
  0x1b   :  { %6383 = vmatpush1.bf16.msra.mxu0 %v6382_v15  ;;  %6447 = vmatpush1.bf16.msra.mxu1 %v6446_v16  ;;  %v210_v49 = vld [vmem:[%s15497_s4 + $0x498] sm:$0xff]  ;;  %v6394_v51 = vpack.c.bf16 %v199_v42, %v191_v41  ;;  %v6458_v52 = vpack.c.bf16 %v201_v46, %v193_v45  ;;  %v207_v53 = vld [vmem:[%s15497_s4 + $0x480] sm:$0xff]  ;;  %v6396_v55 = vpack.c.bf16 %v216_v48, %v208_v47  ;;  %v209_v57 = vld [vmem:[%s15497_s4 + $0x490] sm:$0xff] }
  0x1c   :  { %6385 = vmatprep.subr.bf16.mxu0 %v6384_v19  ;;  %6449 = vmatprep.subr.bf16.mxu1 %v6448_v20  ;;  %v218_v50 = vld [vmem:[%s15497_s4 + $0x4d8] sm:$0xff]  ;;  %v215_v54 = vld [vmem:[%s15497_s4 + $0x4c0] sm:$0xff]  ;;  %v217_v58 = vld [vmem:[%s15497_s4 + $0x4d0] sm:$0xff] }
  0x1d   :  { %v6460_v56 = vpack.c.bf16 %v218_v50, %v210_v49  ;;  %v224_v59 = vld [vmem:[%s15497_s4 + $0x508] sm:$0xff]  ;;  %v226_v61 = vld [vmem:[%s15497_s4 + $0x518] sm:$0xff]  ;;  %v6398_v63 = vpack.c.bf16 %v215_v54, %v207_v53  ;;  %v6462_v0 = vpack.c.bf16 %v217_v58, %v209_v57  ;;  %v223_v1 = vld [vmem:[%s15497_s4 + $0x500] sm:$0xff] }
  0x1e   :  { %v232_v60 = vld [vmem:[%s15497_s4 + $0x548] sm:$0xff]  ;;  %v234_v62 = vld [vmem:[%s15497_s4 + $0x558] sm:$0xff]  ;;  %v231_v2 = vld [vmem:[%s15497_s4 + $0x540] sm:$0xff] }
  0x1f   :  { %6387 = vmatpush1.bf16.msra.mxu0 %v6386_v27  ;;  %6451 = vmatpush1.bf16.msra.mxu1 %v6450_v28  ;;  %v6400_v3 = vpack.c.bf16 %v232_v60, %v224_v59  ;;  %v6464_v4 = vpack.c.bf16 %v234_v62, %v226_v61  ;;  %v225_v5 = vld [vmem:[%s15497_s4 + $0x510] sm:$0xff]  ;;  %v240_v7 = vld [vmem:[%s15497_s4 + $0x588] sm:$0xff]  ;;  %v242_v9 = vld [vmem:[%s15497_s4 + $0x598] sm:$0xff]  ;;  %v6402_v11 = vpack.c.bf16 %v231_v2, %v223_v1 }
  0x20   :  { %6389 = vmatprep.subr.bf16.mxu0 %v9017_v31  ;;  %6453 = vmatprep.subr.bf16.mxu1 %v6452_v32  ;;  %v233_v6 = vld [vmem:[%s15497_s4 + $0x550] sm:$0xff]  ;;  %v248_v8 = vld [vmem:[%s15497_s4 + $0x5c8] sm:$0xff]  ;;  %v250_v10 = vld [vmem:[%s15497_s4 + $0x5d8] sm:$0xff] }
  0x21   :  { %v6466_v12 = vpack.c.bf16 %v233_v6, %v225_v5  ;;  %v239_v13 = vld [vmem:[%s15497_s4 + $0x580] sm:$0xff]  ;;  %v6404_v15 = vpack.c.bf16 %v248_v8, %v240_v7  ;;  %v6468_v16 = vpack.c.bf16 %v250_v10, %v242_v9  ;;  %v241_v17 = vld [vmem:[%s15497_s4 + $0x590] sm:$0xff]  ;;  %v256_v19 = vld [vmem:[%s15497_s4 + $0x608] sm:$0xff] }
  0x22   :  { %v247_v14 = vld [vmem:[%s15497_s4 + $0x5c0] sm:$0xff]  ;;  %v249_v18 = vld [vmem:[%s15497_s4 + $0x5d0] sm:$0xff]  ;;  %v264_v20 = vld [vmem:[%s15497_s4 + $0x648] sm:$0xff] }
  0x23   :  { %6391 = vmatpush1.bf16.msra.mxu0 %v9037_v39  ;;  %6455 = vmatpush1.bf16.msra.mxu1 %v6454_v40  ;;  %v258_v21 = vld [vmem:[%s15497_s4 + $0x618] sm:$0xff]  ;;  %v6406_v23 = vpack.c.bf16 %v247_v14, %v239_v13  ;;  %v6470_v24 = vpack.c.bf16 %v249_v18, %v241_v17  ;;  %v255_v25 = vld [vmem:[%s15497_s4 + $0x600] sm:$0xff]  ;;  %v6408_v27 = vpack.c.bf16 %v264_v20, %v256_v19  ;;  %v257_v29 = vld [vmem:[%s15497_s4 + $0x610] sm:$0xff] }
  0x24   :  { %6393 = vmatprep.subr.bf16.mxu0 %v6392_v43  ;;  %6457 = vmatprep.subr.bf16.mxu1 %v6456_v44  ;;  %v266_v22 = vld [vmem:[%s15497_s4 + $0x658] sm:$0xff]  ;;  %v263_v26 = vld [vmem:[%s15497_s4 + $0x640] sm:$0xff]  ;;  %v265_v30 = vld [vmem:[%s15497_s4 + $0x650] sm:$0xff] }
  0x25   :  { %v6472_v28 = vpack.c.bf16 %v266_v22, %v258_v21  ;;  %v272_v32 = vld [vmem:[%s15497_s4 + $0x688] sm:$0xff]  ;;  %v274_v34 = vld [vmem:[%s15497_s4 + $0x698] sm:$0xff]  ;;  %v6410_v36 = vpack.c.bf16 %v263_v26, %v255_v25  ;;  %v6474_v37 = vpack.c.bf16 %v265_v30, %v257_v29  ;;  %v271_v38 = vld [vmem:[%s15497_s4 + $0x680] sm:$0xff] }
  0x26   :  { %v280_v33 = vld [vmem:[%s15497_s4 + $0x6c8] sm:$0xff]  ;;  %v282_v35 = vld [vmem:[%s15497_s4 + $0x6d8] sm:$0xff]  ;;  %v279_v40 = vld [vmem:[%s15497_s4 + $0x6c0] sm:$0xff] }
  0x27   :  { %6395 = vmatpush1.bf16.msra.mxu0 %v6394_v51  ;;  %6459 = vmatpush1.bf16.msra.mxu1 %v6458_v52  ;;  %v6412_v41 = vpack.c.bf16 %v280_v33, %v272_v32  ;;  %v6476_v42 = vpack.c.bf16 %v282_v35, %v274_v34  ;;  %v273_v43 = vld [vmem:[%s15497_s4 + $0x690] sm:$0xff]  ;;  %v288_v45 = vld [vmem:[%s15497_s4 + $0x708] sm:$0xff]  ;;  %v290_v47 = vld [vmem:[%s15497_s4 + $0x718] sm:$0xff]  ;;  %v6414_v49 = vpack.c.bf16 %v279_v40, %v271_v38 }
  0x28   :  { %6397 = vmatprep.subr.bf16.mxu0 %v6396_v55  ;;  %6461 = vmatprep.subr.bf16.mxu1 %v6460_v56  ;;  %v281_v44 = vld [vmem:[%s15497_s4 + $0x6d0] sm:$0xff]  ;;  %v296_v46 = vld [vmem:[%s15497_s4 + $0x748] sm:$0xff]  ;;  %v298_v48 = vld [vmem:[%s15497_s4 + $0x758] sm:$0xff] }
  0x29   :  { %v6478_v50 = vpack.c.bf16 %v281_v44, %v273_v43  ;;  %v287_v51 = vld [vmem:[%s15497_s4 + $0x700] sm:$0xff]  ;;  %v6416_v53 = vpack.c.bf16 %v296_v46, %v288_v45  ;;  %v6480_v54 = vpack.c.bf16 %v298_v48, %v290_v47  ;;  %v289_v55 = vld [vmem:[%s15497_s4 + $0x710] sm:$0xff]  ;;  %v304_v57 = vld [vmem:[%s15497_s4 + $0x788] sm:$0xff] }
  0x2a   :  { %v295_v52 = vld [vmem:[%s15497_s4 + $0x740] sm:$0xff]  ;;  %v297_v56 = vld [vmem:[%s15497_s4 + $0x750] sm:$0xff]  ;;  %v312_v58 = vld [vmem:[%s15497_s4 + $0x7c8] sm:$0xff] }
  0x2b   :  { %6399 = vmatpush1.bf16.msra.mxu0 %v6398_v63  ;;  %6463 = vmatpush1.bf16.msra.mxu1 %v6462_v0  ;;  %v306_v59 = vld [vmem:[%s15497_s4 + $0x798] sm:$0xff]  ;;  %v6418_v61 = vpack.c.bf16 %v295_v52, %v287_v51  ;;  %v6482_v62 = vpack.c.bf16 %v297_v56, %v289_v55  ;;  %v303_v63 = vld [vmem:[%s15497_s4 + $0x780] sm:$0xff]  ;;  %v6420_v1 = vpack.c.bf16 %v312_v58, %v304_v57  ;;  %v68_v5 = vld [vmem:[%s15497_s4 + $0x28] sm:$0xff] }
  0x2c   :  { %6401 = vmatprep.subr.bf16.mxu0 %v6400_v3  ;;  %6465 = vmatprep.subr.bf16.mxu1 %v6464_v4  ;;  %v314_v60 = vld [vmem:[%s15497_s4 + $0x7d8] sm:$0xff]  ;;  %v311_v0 = vld [vmem:[%s15497_s4 + $0x7c0] sm:$0xff]  ;;  %v305_v3 = vld [vmem:[%s15497_s4 + $0x790] sm:$0xff] }
  0x2d   :  { %v6484_v2 = vpack.c.bf16 %v314_v60, %v306_v59  ;;  %v313_v4 = vld [vmem:[%s15497_s4 + $0x7d0] sm:$0xff]  ;;  %v76_v6 = vld [vmem:[%s15497_s4 + $0x68] sm:$0xff]  ;;  %v70_v7 = vld [vmem:[%s15497_s4 + $0x38] sm:$0xff]  ;;  %v6422_v9 = vpack.c.bf16 %v311_v0, %v303_v63 }
  0x2e   :  { %v78_v8 = vld [vmem:[%s15497_s4 + $0x78] sm:$0xff]  ;;  %v6486_v10 = vpack.c.bf16 %v313_v4, %v305_v3  ;;  %v33_v13 = vld [vmem:[%s15498_s2] sm:$0xff]  ;;  %v34_v14 = vld [vmem:[%s15498_s2 + $0x8] sm:$0xff] }
  0x2f   :  { %6403 = vmatpush1.bf16.msra.mxu0 %v6402_v11  ;;  %6467 = vmatpush1.bf16.msra.mxu1 %v6466_v12  ;;  %v6488_v11 = vpack.c.bf16 %v76_v6, %v68_v5  ;;  %v6552_v12 = vpack.c.bf16 %v78_v8, %v70_v7  ;;  %v69_v17 = vld [vmem:[%s15497_s4 + $0x30] sm:$0xff]  ;;  %v84_v19 = vld [vmem:[%s15497_s4 + $0xa8] sm:$0xff]  ;;  %v86_v22 = vld [vmem:[%s15497_s4 + $0xb8] sm:$0xff] }
  0x30   :  { %6405 = vmatprep.subr.bf16.mxu0 %v6404_v15  ;;  %6469 = vmatprep.subr.bf16.mxu1 %v6468_v16  ;;  %v67_v15 = vld [vmem:[%s15497_s4 + $0x20] sm:$0xff]  ;;  %v77_v18 = vld [vmem:[%s15497_s4 + $0x70] sm:$0xff]  ;;  %v92_v21 = vld [vmem:[%s15497_s4 + $0xe8] sm:$0xff] }
  0x31   :  { %v75_v16 = vld [vmem:[%s15497_s4 + $0x60] sm:$0xff]  ;;  %v85_v30 = vld [vmem:[%s15497_s4 + $0xb0] sm:$0xff]  ;;  %v100_v33 = vld [vmem:[%s15497_s4 + $0x128] sm:$0xff]  ;;  %v6492_v34 = vpack.c.bf16 %v92_v21, %v84_v19 }
  0x32   :  { %v6490_v26 = vpack.c.bf16 %v75_v16, %v67_v15  ;;  %v91_v29 = vld [vmem:[%s15497_s4 + $0xe0] sm:$0xff]  ;;  %v93_v32 = vld [vmem:[%s15497_s4 + $0xf0] sm:$0xff]  ;;  %v110_v38 = vld [vmem:[%s15497_s4 + $0x178] sm:$0xff] }
  0x33   :  { %6407 = vmatpush1.bf16.msra.mxu0 %v6406_v23  ;;  %6471 = vmatpush1.bf16.msra.mxu1 %v6470_v24  ;;  %v94_v23 = vld [vmem:[%s15497_s4 + $0xf8] sm:$0xff]  ;;  %v107_v43 = vld [vmem:[%s15497_s4 + $0x160] sm:$0xff]  ;;  %v101_v46 = vld [vmem:[%s15497_s4 + $0x130] sm:$0xff] }
  0x34   :  { %6409 = vmatprep.subr.bf16.mxu0 %v6408_v27  ;;  %6473 = vmatprep.subr.bf16.mxu1 %v6472_v28  ;;  %v6554_v27 = vpack.c.bf16 %v77_v18, %v69_v17  ;;  %v83_v28 = vld [vmem:[%s15497_s4 + $0xa0] sm:$0xff]  ;;  %v6556_v35 = vpack.c.bf16 %v94_v23, %v86_v22  ;;  %v109_v47 = vld [vmem:[%s15497_s4 + $0x170] sm:$0xff]  ;;  %v116_v48 = vld [vmem:[%s15497_s4 + $0x1a8] sm:$0xff] }
  0x35   :  { %v6494_v40 = vpack.c.bf16 %v91_v29, %v83_v28  ;;  %v126_v51 = vld [vmem:[%s15497_s4 + $0x1f8] sm:$0xff]  ;;  %v123_v55 = vld [vmem:[%s15497_s4 + $0x1e0] sm:$0xff]  ;;  %v117_v58 = vld [vmem:[%s15497_s4 + $0x1b0] sm:$0xff] }
  0x36   :  { %v125_v59 = vld [vmem:[%s15497_s4 + $0x1f0] sm:$0xff]  ;;  %v132_v60 = vld [vmem:[%s15497_s4 + $0x228] sm:$0xff]  ;;  %v142_v63 = vld [vmem:[%s15497_s4 + $0x278] sm:$0xff] }
  0x37   :  { %6411 = vmatpush1.bf16.msra.mxu0 %v6410_v36  ;;  %6475 = vmatpush1.bf16.msra.mxu1 %v6474_v37  ;;  %v108_v36 = vld [vmem:[%s15497_s4 + $0x168] sm:$0xff]  ;;  %v102_v37 = vld [vmem:[%s15497_s4 + $0x138] sm:$0xff]  ;;  %v139_v3 = vld [vmem:[%s15497_s4 + $0x260] sm:$0xff] }
  0x38   :  { %6413 = vmatprep.subr.bf16.mxu0 %v6412_v41  ;;  %6477 = vmatprep.subr.bf16.mxu1 %v6476_v42  ;;  %v6558_v41 = vpack.c.bf16 %v93_v32, %v85_v30  ;;  %v99_v42 = vld [vmem:[%s15497_s4 + $0x120] sm:$0xff]  ;;  %v6496_v44 = vpack.c.bf16 %v108_v36, %v100_v33  ;;  %v6560_v45 = vpack.c.bf16 %v110_v38, %v102_v37  ;;  %v133_v6 = vld [vmem:[%s15497_s4 + $0x230] sm:$0xff]  ;;  %v148_v8 = vld [vmem:[%s15497_s4 + $0x2a8] sm:$0xff] }
  0x39   :  { %v6498_v52 = vpack.c.bf16 %v107_v43, %v99_v42  ;;  %v141_v7 = vld [vmem:[%s15497_s4 + $0x270] sm:$0xff]  ;;  %v155_v15 = vld [vmem:[%s15497_s4 + $0x2e0] sm:$0xff]  ;;  %v164_v21 = vld [vmem:[%s15497_s4 + $0x328] sm:$0xff] }
  0x3a   :  { %v149_v18 = vld [vmem:[%s15497_s4 + $0x2b0] sm:$0xff]  ;;  %v172_v22 = vld [vmem:[%s15497_s4 + $0x368] sm:$0xff]  ;;  %v166_v23 = vld [vmem:[%s15497_s4 + $0x338] sm:$0xff] }
  0x3b   :  { %6415 = vmatpush1.bf16.msra.mxu0 %v6414_v49  ;;  %6479 = vmatpush1.bf16.msra.mxu1 %v6478_v50  ;;  %v124_v49 = vld [vmem:[%s15497_s4 + $0x1e8] sm:$0xff]  ;;  %v118_v50 = vld [vmem:[%s15497_s4 + $0x1b8] sm:$0xff]  ;;  %v157_v19 = vld [vmem:[%s15497_s4 + $0x2f0] sm:$0xff]  ;;  %v6512_v30 = vpack.c.bf16 %v172_v22, %v164_v21 }
  0x3c   :  { %6417 = vmatprep.subr.bf16.mxu0 %v6416_v53  ;;  %6481 = vmatprep.subr.bf16.mxu1 %v6480_v54  ;;  %v6562_v53 = vpack.c.bf16 %v109_v47, %v101_v46  ;;  %v115_v54 = vld [vmem:[%s15497_s4 + $0x1a0] sm:$0xff]  ;;  %v6500_v56 = vpack.c.bf16 %v124_v49, %v116_v48  ;;  %v6564_v57 = vpack.c.bf16 %v126_v51, %v118_v50  ;;  %v165_v33 = vld [vmem:[%s15497_s4 + $0x330] sm:$0xff]  ;;  %v188_v36 = vld [vmem:[%s15497_s4 + $0x3e8] sm:$0xff] }
  0x3d   :  { %v6502_v0 = vpack.c.bf16 %v123_v55, %v115_v54  ;;  %v163_v28 = vld [vmem:[%s15497_s4 + $0x320] sm:$0xff]  ;;  %v182_v37 = vld [vmem:[%s15497_s4 + $0x3b8] sm:$0xff]  ;;  %v181_v46 = vld [vmem:[%s15497_s4 + $0x3b0] sm:$0xff] }
  0x3e   :  { %v171_v29 = vld [vmem:[%s15497_s4 + $0x360] sm:$0xff]  ;;  %v190_v38 = vld [vmem:[%s15497_s4 + $0x3f8] sm:$0xff]  ;;  %v189_v47 = vld [vmem:[%s15497_s4 + $0x3f0] sm:$0xff] }
  0x3f   :  { %6419 = vmatpush1.bf16.msra.mxu0 %v6418_v61  ;;  %6483 = vmatpush1.bf16.msra.mxu1 %v6482_v62  ;;  %v140_v61 = vld [vmem:[%s15497_s4 + $0x268] sm:$0xff]  ;;  %v134_v62 = vld [vmem:[%s15497_s4 + $0x238] sm:$0xff]  ;;  %v179_v42 = vld [vmem:[%s15497_s4 + $0x3a0] sm:$0xff] }
  0x40   :  { %6421 = vmatprep.subr.bf16.mxu0 %v6420_v1  ;;  %6485 = vmatprep.subr.bf16.mxu1 %v6484_v2  ;;  %v6566_v1 = vpack.c.bf16 %v125_v59, %v117_v58  ;;  %v131_v2 = vld [vmem:[%s15497_s4 + $0x220] sm:$0xff]  ;;  %v6504_v4 = vpack.c.bf16 %v140_v61, %v132_v60  ;;  %v6568_v5 = vpack.c.bf16 %v142_v63, %v134_v62  ;;  %v196_v48 = vld [vmem:[%s15497_s4 + $0x428] sm:$0xff]  ;;  %v198_v50 = vld [vmem:[%s15497_s4 + $0x438] sm:$0xff] }
  0x41   :  { %v187_v43 = vld [vmem:[%s15497_s4 + $0x3e0] sm:$0xff]  ;;  %v204_v49 = vld [vmem:[%s15497_s4 + $0x468] sm:$0xff]  ;;  %v206_v51 = vld [vmem:[%s15497_s4 + $0x478] sm:$0xff] }
  0x42   :  { %v195_v54 = vld [vmem:[%s15497_s4 + $0x420] sm:$0xff]  ;;  %v197_v58 = vld [vmem:[%s15497_s4 + $0x430] sm:$0xff]  ;;  %v212_v60 = vld [vmem:[%s15497_s4 + $0x4a8] sm:$0xff] }
  0x43   :  { %6423 = vmatpush1.bf16.msra.mxu0 %v6422_v9  ;;  %6487 = vmatpush1.bf16.msra.mxu1 %v6486_v10  ;;  %v156_v9 = vld [vmem:[%s15497_s4 + $0x2e8] sm:$0xff]  ;;  %v150_v10 = vld [vmem:[%s15497_s4 + $0x2b8] sm:$0xff]  ;;  %v203_v55 = vld [vmem:[%s15497_s4 + $0x460] sm:$0xff] }
  0x44   :  { %6489 = vmatprep.subr.bf16.mxu0 %v6488_v11  ;;  %6553 = vmatprep.subr.bf16.mxu1 %v6552_v12  ;;  %v158_v11 = vld [vmem:[%s15497_s4 + $0x2f8] sm:$0xff]  ;;  %v6506_v12 = vpack.c.bf16 %v139_v3, %v131_v2  ;;  %v6508_v16 = vpack.c.bf16 %v156_v9, %v148_v8  ;;  %v205_v59 = vld [vmem:[%s15497_s4 + $0x470] sm:$0xff]  ;;  %v220_v61 = vld [vmem:[%s15497_s4 + $0x4e8] sm:$0xff] }
  0x45   :  { %v6572_v17 = vpack.c.bf16 %v158_v11, %v150_v10  ;;  %v214_v62 = vld [vmem:[%s15497_s4 + $0x4b8] sm:$0xff]  ;;  %v211_v2 = vld [vmem:[%s15497_s4 + $0x4a0] sm:$0xff]  ;;  %v228_v8 = vld [vmem:[%s15497_s4 + $0x528] sm:$0xff] }
  0x46   :  { %v222_v63 = vld [vmem:[%s15497_s4 + $0x4f8] sm:$0xff]  ;;  %v219_v3 = vld [vmem:[%s15497_s4 + $0x4e0] sm:$0xff]  ;;  %v236_v9 = vld [vmem:[%s15497_s4 + $0x568] sm:$0xff] }
  0x47   :  { %v230_v10 = vld [vmem:[%s15497_s4 + $0x538] sm:$0xff]  ;;  %v244_v21 = vld [vmem:[%s15497_s4 + $0x5a8] sm:$0xff] }
  0x48   :  { %v238_v11 = vld [vmem:[%s15497_s4 + $0x578] sm:$0xff]  ;;  %v252_v22 = vld [vmem:[%s15497_s4 + $0x5e8] sm:$0xff] }
  0x81   :  { %v9254_v20 = vpop.permute.xlu0 %48 }
  0x82   :  { %v9266_v24 = vmul.f32 %v9254_v20, %v33_v13  ;;  %v52_v25 = vmul.f32 %v9254_v20, %v34_v14  ;;  %v6570_v13 = vpack.c.bf16 %v141_v7, %v133_v6  ;;  %v147_v14 = vld [vmem:[%s15497_s4 + $0x2a0] sm:$0xff]  ;;  %v213_v6 = vld [vmem:[%s15497_s4 + $0x4b0] sm:$0xff] }
  0x83   :  { %v221_v7 = vld [vmem:[%s15497_s4 + $0x4f0] sm:$0xff] }
  0x84   :  { %383 = vmatprep.mubr.f32.mxu0 %v52_v25  ;;  %454 = vmatprep.mubr.f32.mxu1 %v52_v25 }
  0x85   :  { %384 = vmatmul.mubr.f32.vlgmr.msra.gmra.mrb[0].mxu0 %v9266_v24  ;;  %455 = vmatmul.mubr.f32.vlgmr.msra.gmra.mrb[0].mxu1 %v9266_v24 }
  0x86   :  { %6491 = vmatpush1.bf16.msra.mxu0 %v6490_v26  ;;  %6555 = vmatpush1.bf16.msra.mxu1 %v6554_v27  ;;  %v6510_v26 = vpack.c.bf16 %v155_v15, %v147_v14  ;;  %v6574_v27 = vpack.c.bf16 %v157_v19, %v149_v18  ;;  %v227_v14 = vld [vmem:[%s15497_s4 + $0x520] sm:$0xff]  ;;  %v229_v18 = vld [vmem:[%s15497_s4 + $0x530] sm:$0xff] }
  0x87   :  { %525 = vmatprep.mubr.f32.mxu0 %v52_v25  ;;  %596 = vmatprep.mubr.f32.mxu1 %v52_v25  ;;  %v174_v25 = vld [vmem:[%s15497_s4 + $0x378] sm:$0xff]  ;;  %v235_v15 = vld [vmem:[%s15497_s4 + $0x560] sm:$0xff]  ;;  %v237_v19 = vld [vmem:[%s15497_s4 + $0x570] sm:$0xff] }
  0x88   :  { %6493 = vmatprep.subr.bf16.mxu0 %v6492_v34  ;;  %6557 = vmatprep.subr.bf16.mxu1 %v6556_v35  ;;  %v6576_v32 = vpack.c.bf16 %v174_v25, %v166_v23  ;;  %v173_v34 = vld [vmem:[%s15497_s4 + $0x370] sm:$0xff]  ;;  %v180_v35 = vld [vmem:[%s15497_s4 + $0x3a8] sm:$0xff]  ;;  %v246_v23 = vld [vmem:[%s15497_s4 + $0x5b8] sm:$0xff] }
  0x89   :  { %v254_v25 = vld [vmem:[%s15497_s4 + $0x5f8] sm:$0xff] }
  0x8a   :  { %6495 = vmatpush1.bf16.msra.mxu0 %v6494_v40  ;;  %6559 = vmatpush1.bf16.msra.mxu1 %v6558_v41  ;;  %v6514_v40 = vpack.c.bf16 %v171_v29, %v163_v28  ;;  %v6578_v41 = vpack.c.bf16 %v173_v34, %v165_v33  ;;  %v243_v28 = vld [vmem:[%s15497_s4 + $0x5a0] sm:$0xff]  ;;  %v245_v33 = vld [vmem:[%s15497_s4 + $0x5b0] sm:$0xff] }
  0x8b   :  { %6497 = vmatprep.subr.bf16.mxu0 %v6496_v44  ;;  %6561 = vmatprep.subr.bf16.mxu1 %v6560_v45  ;;  %v6516_v44 = vpack.c.bf16 %v188_v36, %v180_v35  ;;  %v6580_v45 = vpack.c.bf16 %v190_v38, %v182_v37  ;;  %v251_v29 = vld [vmem:[%s15497_s4 + $0x5e0] sm:$0xff]  ;;  %v253_v34 = vld [vmem:[%s15497_s4 + $0x5f0] sm:$0xff]  ;;  %v260_v35 = vld [vmem:[%s15497_s4 + $0x628] sm:$0xff] }
  0x8c   :  { %v268_v36 = vld [vmem:[%s15497_s4 + $0x668] sm:$0xff]  ;;  %v262_v37 = vld [vmem:[%s15497_s4 + $0x638] sm:$0xff] }
  0x8d   :  { %v270_v38 = vld [vmem:[%s15497_s4 + $0x678] sm:$0xff] }
  0x8e   :  { %6499 = vmatpush1.bf16.msra.mxu0 %v6498_v52  ;;  %6563 = vmatpush1.bf16.msra.mxu1 %v6562_v53  ;;  %v6518_v52 = vpack.c.bf16 %v187_v43, %v179_v42  ;;  %v6582_v53 = vpack.c.bf16 %v189_v47, %v181_v46  ;;  %v259_v42 = vld [vmem:[%s15497_s4 + $0x620] sm:$0xff]  ;;  %v261_v46 = vld [vmem:[%s15497_s4 + $0x630] sm:$0xff] }
  0x8f   :  { %6501 = vmatprep.subr.bf16.mxu0 %v6500_v56  ;;  %6565 = vmatprep.subr.bf16.mxu1 %v6564_v57  ;;  %v6520_v56 = vpack.c.bf16 %v204_v49, %v196_v48  ;;  %v6584_v57 = vpack.c.bf16 %v206_v51, %v198_v50  ;;  %v267_v43 = vld [vmem:[%s15497_s4 + $0x660] sm:$0xff]  ;;  %v269_v47 = vld [vmem:[%s15497_s4 + $0x670] sm:$0xff]  ;;  %v276_v48 = vld [vmem:[%s15497_s4 + $0x6a8] sm:$0xff] }
  0x90   :  { %v284_v49 = vld [vmem:[%s15497_s4 + $0x6e8] sm:$0xff]  ;;  %v278_v50 = vld [vmem:[%s15497_s4 + $0x6b8] sm:$0xff] }
  0x91   :  { %v286_v51 = vld [vmem:[%s15497_s4 + $0x6f8] sm:$0xff] }
  0x92   :  { %6503 = vmatpush1.bf16.msra.mxu0 %v6502_v0  ;;  %6567 = vmatpush1.bf16.msra.mxu1 %v6566_v1  ;;  %v6522_v0 = vpack.c.bf16 %v203_v55, %v195_v54  ;;  %v6586_v1 = vpack.c.bf16 %v205_v59, %v197_v58  ;;  %v275_v54 = vld [vmem:[%s15497_s4 + $0x6a0] sm:$0xff]  ;;  %v277_v58 = vld [vmem:[%s15497_s4 + $0x6b0] sm:$0xff] }
  0x93   :  { %6505 = vmatprep.subr.bf16.mxu0 %v6504_v4  ;;  %6569 = vmatprep.subr.bf16.mxu1 %v6568_v5  ;;  %v6524_v4 = vpack.c.bf16 %v220_v61, %v212_v60  ;;  %v6588_v5 = vpack.c.bf16 %v222_v63, %v214_v62  ;;  %v283_v55 = vld [vmem:[%s15497_s4 + $0x6e0] sm:$0xff]  ;;  %v285_v59 = vld [vmem:[%s15497_s4 + $0x6f0] sm:$0xff]  ;;  %v292_v60 = vld [vmem:[%s15497_s4 + $0x728] sm:$0xff] }
  0x94   :  { %v300_v61 = vld [vmem:[%s15497_s4 + $0x768] sm:$0xff]  ;;  %v294_v62 = vld [vmem:[%s15497_s4 + $0x738] sm:$0xff] }
  0x95   :  { %v302_v63 = vld [vmem:[%s15497_s4 + $0x778] sm:$0xff] }
  0x96   :  { %6507 = vmatpush1.bf16.msra.mxu0 %v6506_v12  ;;  %6571 = vmatpush1.bf16.msra.mxu1 %v6570_v13  ;;  %v6526_v12 = vpack.c.bf16 %v219_v3, %v211_v2  ;;  %v6590_v13 = vpack.c.bf16 %v221_v7, %v213_v6  ;;  %v291_v2 = vld [vmem:[%s15497_s4 + $0x720] sm:$0xff]  ;;  %v293_v6 = vld [vmem:[%s15497_s4 + $0x730] sm:$0xff] }
  0x97   :  { %6509 = vmatprep.subr.bf16.mxu0 %v6508_v16  ;;  %6573 = vmatprep.subr.bf16.mxu1 %v6572_v17  ;;  %v6528_v16 = vpack.c.bf16 %v236_v9, %v228_v8  ;;  %v6592_v17 = vpack.c.bf16 %v238_v11, %v230_v10  ;;  %v299_v3 = vld [vmem:[%s15497_s4 + $0x760] sm:$0xff]  ;;  %v301_v7 = vld [vmem:[%s15497_s4 + $0x770] sm:$0xff]  ;;  %v308_v8 = vld [vmem:[%s15497_s4 + $0x7a8] sm:$0xff] }
  0x98   :  { %v316_v9 = vld [vmem:[%s15497_s4 + $0x7e8] sm:$0xff]  ;;  %v310_v10 = vld [vmem:[%s15497_s4 + $0x7b8] sm:$0xff] }
  0x99   :  { %v318_v11 = vld [vmem:[%s15497_s4 + $0x7f8] sm:$0xff] }
  0x9a   :  { %6511 = vmatpush1.bf16.msra.mxu0 %v6510_v26  ;;  %6575 = vmatpush1.bf16.msra.mxu1 %v6574_v27  ;;  %v6530_v26 = vpack.c.bf16 %v235_v15, %v227_v14  ;;  %v6594_v27 = vpack.c.bf16 %v237_v19, %v229_v18  ;;  %v307_v14 = vld [vmem:[%s15497_s4 + $0x7a0] sm:$0xff]  ;;  %v6548_v15 = vpack.c.bf16 %v316_v9, %v308_v8  ;;  %v309_v18 = vld [vmem:[%s15497_s4 + $0x7b0] sm:$0xff]  ;;  %v928_v8 = vld [vmem:[%s15497_s4 + $0x408] sm:$0xff] }
  0x9b   :  { %6513 = vmatprep.subr.bf16.mxu0 %v6512_v30  ;;  %6577 = vmatprep.subr.bf16.mxu1 %v6576_v32  ;;  %v6532_v30 = vpack.c.bf16 %v252_v22, %v244_v21  ;;  %v6596_v32 = vpack.c.bf16 %v254_v25, %v246_v23  ;;  %v317_v19 = vld [vmem:[%s15497_s4 + $0x7f0] sm:$0xff]  ;;  %v800_v23 = vld [vmem:[%s15497_s4 + $0x8] sm:$0xff] }
  0x9c   :  { %v6614_v22 = vpack.c.bf16 %v317_v19, %v309_v18  ;;  %v808_v25 = vld [vmem:[%s15497_s4 + $0x48] sm:$0xff] }
  0x9d   :  { %v936_v9 = vld [vmem:[%s15497_s4 + $0x448] sm:$0xff] }
  0x9e   :  { %6515 = vmatpush1.bf16.msra.mxu0 %v6514_v40  ;;  %6579 = vmatpush1.bf16.msra.mxu1 %v6578_v41  ;;  %v6534_v40 = vpack.c.bf16 %v251_v29, %v243_v28  ;;  %v6598_v41 = vpack.c.bf16 %v253_v34, %v245_v33  ;;  %v807_v28 = vld [vmem:[%s15497_s4 + $0x40] sm:$0xff]  ;;  %v824_v29 = vld [vmem:[%s15497_s4 + $0xc8] sm:$0xff] }
  0x9f   :  { %6517 = vmatprep.subr.bf16.mxu0 %v6516_v44  ;;  %6581 = vmatprep.subr.bf16.mxu1 %v6580_v45  ;;  %v6536_v44 = vpack.c.bf16 %v268_v36, %v260_v35  ;;  %v6600_v45 = vpack.c.bf16 %v270_v38, %v262_v37  ;;  %v815_v33 = vld [vmem:[%s15497_s4 + $0x80] sm:$0xff]  ;;  %v832_v35 = vld [vmem:[%s15497_s4 + $0x108] sm:$0xff] }
  0xa0   :  { %v823_v34 = vld [vmem:[%s15497_s4 + $0xc0] sm:$0xff]  ;;  %v840_v36 = vld [vmem:[%s15497_s4 + $0x148] sm:$0xff] }
  0xa1   :  { %v6654_v37 = vpack.c.bf16 %v823_v34, %v815_v33  ;;  %v6656_v38 = vpack.c.bf16 %v840_v36, %v832_v35  ;;  %v944_v19 = vld [vmem:[%s15497_s4 + $0x488] sm:$0xff]  ;;  %v959_v36 = vld [vmem:[%s15497_s4 + $0x500] sm:$0xff] }
  0xa2   :  { %6519 = vmatpush1.bf16.msra.mxu0 %v6518_v52  ;;  %6583 = vmatpush1.bf16.msra.mxu1 %v6582_v53  ;;  %v6538_v52 = vpack.c.bf16 %v267_v43, %v259_v42  ;;  %v6602_v53 = vpack.c.bf16 %v269_v47, %v261_v46  ;;  %v848_v42 = vld [vmem:[%s15497_s4 + $0x188] sm:$0xff]  ;;  %v847_v46 = vld [vmem:[%s15497_s4 + $0x180] sm:$0xff] }
  0xa3   :  { %6521 = vmatprep.subr.bf16.mxu0 %v6520_v56  ;;  %6585 = vmatprep.subr.bf16.mxu1 %v6584_v57  ;;  %v6540_v56 = vpack.c.bf16 %v284_v49, %v276_v48  ;;  %v6604_v57 = vpack.c.bf16 %v286_v51, %v278_v50  ;;  %v856_v43 = vld [vmem:[%s15497_s4 + $0x1c8] sm:$0xff]  ;;  %v855_v47 = vld [vmem:[%s15497_s4 + $0x1c0] sm:$0xff] }
  0xa4   :  { %v864_v48 = vld [vmem:[%s15497_s4 + $0x208] sm:$0xff]  ;;  %v6662_v50 = vpack.c.bf16 %v855_v47, %v847_v46 }
  0xa5   :  { %v872_v49 = vld [vmem:[%s15497_s4 + $0x248] sm:$0xff] }
  0xa6   :  { %6523 = vmatpush1.bf16.msra.mxu0 %v6522_v0  ;;  %6587 = vmatpush1.bf16.msra.mxu1 %v6586_v1  ;;  %v6542_v0 = vpack.c.bf16 %v283_v55, %v275_v54  ;;  %v6606_v1 = vpack.c.bf16 %v285_v59, %v277_v58  ;;  %v6664_v51 = vpack.c.bf16 %v872_v49, %v864_v48  ;;  %v880_v54 = vld [vmem:[%s15497_s4 + $0x288] sm:$0xff]  ;;  %v879_v58 = vld [vmem:[%s15497_s4 + $0x280] sm:$0xff] }
  0xa7   :  { %6525 = vmatprep.subr.bf16.mxu0 %v6524_v4  ;;  %6589 = vmatprep.subr.bf16.mxu1 %v6588_v5  ;;  %v6544_v4 = vpack.c.bf16 %v300_v61, %v292_v60  ;;  %v6608_v5 = vpack.c.bf16 %v302_v63, %v294_v62  ;;  %v888_v55 = vld [vmem:[%s15497_s4 + $0x2c8] sm:$0xff]  ;;  %v887_v59 = vld [vmem:[%s15497_s4 + $0x2c0] sm:$0xff] }
  0xa8   :  { %v896_v60 = vld [vmem:[%s15497_s4 + $0x308] sm:$0xff]  ;;  %v6670_v62 = vpack.c.bf16 %v887_v59, %v879_v58  ;;  %v975_v49 = vld [vmem:[%s15497_s4 + $0x580] sm:$0xff] }
  0xa9   :  { %v904_v61 = vld [vmem:[%s15497_s4 + $0x348] sm:$0xff] }
  0xaa   :  { %6527 = vmatpush1.bf16.msra.mxu0 %v6526_v12  ;;  %6591 = vmatpush1.bf16.msra.mxu1 %v6590_v13  ;;  %v6546_v12 = vpack.c.bf16 %v299_v3, %v291_v2  ;;  %v6610_v13 = vpack.c.bf16 %v301_v7, %v293_v6  ;;  %v6672_v63 = vpack.c.bf16 %v904_v61, %v896_v60  ;;  %v684_v3 = vld [vmem:[%s15499_s5 + $0x80] sm:$0xff]  ;;  %v669_v7 = vld [vmem:[%s15499_s5 + $0x8] sm:$0xff] }
  0xab   :  { %6529 = vmatprep.subr.bf16.mxu0 %v6528_v16  ;;  %6593 = vmatprep.subr.bf16.mxu1 %v6592_v17  ;;  %v6612_v16 = vpack.c.bf16 %v318_v11, %v310_v10  ;;  %v315_v17 = vld [vmem:[%s15497_s4 + $0x7e0] sm:$0xff]  ;;  %v6680_v10 = vpack.c.bf16 %v936_v9, %v928_v8  ;;  %v960_v33 = vld [vmem:[%s15497_s4 + $0x508] sm:$0xff] }
  0xac   :  { %v6550_v21 = vpack.c.bf16 %v315_v17, %v307_v14  ;;  %v668_v6 = vld [vmem:[%s15499_s5] sm:$0xff]  ;;  %v687_v14 = vld [vmem:[%s15499_s5 + $0x98] sm:$0xff]  ;;  %v968_v34 = vld [vmem:[%s15497_s4 + $0x548] sm:$0xff] }
  0xad   :  { %v927_v11 = vld [vmem:[%s15497_s4 + $0x400] sm:$0xff]  ;;  %v6688_v35 = vpack.c.bf16 %v968_v34, %v960_v33  ;;  %v976_v46 = vld [vmem:[%s15497_s4 + $0x588] sm:$0xff] }
  0xae   :  { %6531 = vmatpush1.bf16.msra.mxu0 %v6530_v26  ;;  %6595 = vmatpush1.bf16.msra.mxu1 %v6594_v27  ;;  %v799_v26 = vld [vmem:[%s15497_s4] sm:$0xff]  ;;  %v6648_v27 = vpack.c.bf16 %v808_v25, %v800_v23  ;;  %v984_v47 = vld [vmem:[%s15497_s4 + $0x5c8] sm:$0xff] }
  0xaf   :  { %6533 = vmatprep.subr.bf16.mxu0 %v6532_v30  ;;  %6597 = vmatprep.subr.bf16.mxu1 %v6596_v32  ;;  %v6650_v30 = vpack.c.bf16 %v807_v28, %v799_v26  ;;  %v943_v23 = vld [vmem:[%s15497_s4 + $0x480] sm:$0xff]  ;;  %v689_v28 = vld [vmem:[%s15499_s5 + $0xa8] sm:$0xff]  ;;  %v6692_v48 = vpack.c.bf16 %v984_v47, %v976_v46 }
  0xb0   :  { %v951_v25 = vld [vmem:[%s15497_s4 + $0x4c0] sm:$0xff]  ;;  %v992_v58 = vld [vmem:[%s15497_s4 + $0x608] sm:$0xff] }
  0xb1   :  { %v6686_v26 = vpack.c.bf16 %v951_v25, %v943_v23  ;;  %v1000_v59 = vld [vmem:[%s15497_s4 + $0x648] sm:$0xff]  ;;  %v991_v61 = vld [vmem:[%s15497_s4 + $0x600] sm:$0xff]  ;;  %v698_v23 = vld [vmem:[%s15499_s5 + $0xf0] sm:$0xff] }
  0xb2   :  { %6535 = vmatpush1.bf16.msra.mxu0 %v6534_v40  ;;  %6599 = vmatpush1.bf16.msra.mxu1 %v6598_v41  ;;  %v831_v40 = vld [vmem:[%s15497_s4 + $0x100] sm:$0xff]  ;;  %v6696_v60 = vpack.c.bf16 %v1000_v59, %v992_v58  ;;  %v699_v25 = vld [vmem:[%s15499_s5 + $0xf8] sm:$0xff]  ;;  %v38_v58 = vld [vmem:[%s15501_s3 + $0x8] sm:$0xff] }
  0xb3   :  { %6537 = vmatprep.subr.bf16.mxu0 %v6536_v44  ;;  %6601 = vmatprep.subr.bf16.mxu1 %v6600_v45  ;;  %v839_v41 = vld [vmem:[%s15497_s4 + $0x140] sm:$0xff]  ;;  %v6660_v45 = vpack.c.bf16 %v856_v43, %v848_v42  ;;  %v674_v43 = vld [vmem:[%s15499_s5 + $0x30] sm:$0xff] }
  0xb4   :  { %v6658_v44 = vpack.c.bf16 %v839_v41, %v831_v40  ;;  %v690_v40 = vld [vmem:[%s15499_s5 + $0xb0] sm:$0xff]  ;;  %v691_v41 = vld [vmem:[%s15499_s5 + $0xb8] sm:$0xff]  ;;  %v1015_v9 = vld [vmem:[%s15497_s4 + $0x6c0] sm:$0xff] }
  0xb5   :  { %v6628_v42 = vpack.c.bf16 %v691_v41, %v690_v40  ;;  %v1047_v33 = vld [vmem:[%s15497_s4 + $0x7c0] sm:$0xff]  ;;  %v804_v40 = vld [vmem:[%s15497_s4 + $0x28] sm:$0xff] }
  0xb6   :  { %6539 = vmatpush1.bf16.msra.mxu0 %v6538_v52  ;;  %6603 = vmatpush1.bf16.msra.mxu1 %v6602_v53  ;;  %v863_v52 = vld [vmem:[%s15497_s4 + $0x200] sm:$0xff]  ;;  %v812_v41 = vld [vmem:[%s15497_s4 + $0x68] sm:$0xff] }
  0xb7   :  { %6541 = vmatprep.subr.bf16.mxu0 %v6540_v56  ;;  %6605 = vmatprep.subr.bf16.mxu1 %v6604_v57  ;;  %v871_v53 = vld [vmem:[%s15497_s4 + $0x240] sm:$0xff]  ;;  %v6668_v57 = vpack.c.bf16 %v888_v55, %v880_v54 }
  0xb8   :  { %v6666_v56 = vpack.c.bf16 %v871_v53, %v863_v52  ;;  %v692_v52 = vld [vmem:[%s15499_s5 + $0xc0] sm:$0xff]  ;;  %v693_v53 = vld [vmem:[%s15499_s5 + $0xc8] sm:$0xff] }
  0xb9   :  { %v6632_v54 = vpack.c.bf16 %v693_v53, %v692_v52  ;;  %v676_v55 = vld [vmem:[%s15499_s5 + $0x40] sm:$0xff] }
  0xba   :  { %6543 = vmatpush1.bf16.msra.mxu0 %v6542_v0  ;;  %6607 = vmatpush1.bf16.msra.mxu1 %v6606_v1  ;;  %v895_v0 = vld [vmem:[%s15497_s4 + $0x300] sm:$0xff] }
  0xbb   :  { %6545 = vmatprep.subr.bf16.mxu0 %v6544_v4  ;;  %6609 = vmatprep.subr.bf16.mxu1 %v6608_v5  ;;  %v903_v1 = vld [vmem:[%s15497_s4 + $0x340] sm:$0xff]  ;;  %v685_v4 = vld [vmem:[%s15499_s5 + $0x88] sm:$0xff] }
  0xbc   :  { %v6674_v2 = vpack.c.bf16 %v903_v1, %v895_v0  ;;  %v6616_v5 = vpack.c.bf16 %v685_v4, %v684_v3  ;;  %v694_v0 = vld [vmem:[%s15499_s5 + $0xd0] sm:$0xff]  ;;  %v695_v1 = vld [vmem:[%s15499_s5 + $0xd8] sm:$0xff] }
  0xbd   :  { %v678_v3 = vld [vmem:[%s15499_s5 + $0x50] sm:$0xff]  ;;  %v679_v4 = vld [vmem:[%s15499_s5 + $0x58] sm:$0xff] }
  0xbe   :  { %6547 = vmatpush1.bf16.msra.mxu0 %v6546_v12  ;;  %6611 = vmatpush1.bf16.msra.mxu1 %v6610_v13  ;;  %v935_v12 = vld [vmem:[%s15497_s4 + $0x440] sm:$0xff]  ;;  %v686_v13 = vld [vmem:[%s15499_s5 + $0x90] sm:$0xff] }
  0xbf   :  { %6549 = vmatprep.subr.bf16.mxu0 %v6548_v15  ;;  %6613 = vmatprep.subr.bf16.mxu1 %v6612_v16  ;;  %v670_v15 = vld [vmem:[%s15499_s5 + $0x10] sm:$0xff]  ;;  %v671_v16 = vld [vmem:[%s15499_s5 + $0x18] sm:$0xff]  ;;  %v6620_v17 = vpack.c.bf16 %v687_v14, %v686_v13  ;;  %v680_v13 = vld [vmem:[%s15499_s5 + $0x60] sm:$0xff] }
  0xc0   :  { %v6622_v18 = vpack.c.bf16 %v671_v16, %v670_v15  ;;  %v681_v14 = vld [vmem:[%s15499_s5 + $0x68] sm:$0xff] }
  0xc1   :  { %v1024_v15 = vld [vmem:[%s15497_s4 + $0x708] sm:$0xff]  ;;  %v6642_v16 = vpack.c.bf16 %v681_v14, %v680_v13 }
  0xc2   :  { %6551 = vmatpush1.bf16.msra.mxu0 %v6550_v21  ;;  %6615 = vmatpush1.bf16.msra.mxu1 %v6614_v22  ;;  %v952_v21 = vld [vmem:[%s15497_s4 + $0x4c8] sm:$0xff] }
  0xc3   :  { %6649 = vmatprep.subr.bf16.mxu1 %v6648_v27  ;;  %6617 = vmatprep.subr.bf16.mxu0 %v6616_v5  ;;  %v6684_v22 = vpack.c.bf16 %v952_v21, %v944_v19  ;;  %v688_v27 = vld [vmem:[%s15499_s5 + $0xa0] sm:$0xff]  ;;  %v6638_v5 = vpack.c.bf16 %v679_v4, %v678_v3 }
  0xc4   :  { %v1031_v19 = vld [vmem:[%s15497_s4 + $0x740] sm:$0xff] }
  0xc5   :  { %526 = vmatmul.mubr.f32.vlgmr.msra.gmra.mrb[2].mxu0 %v9266_v24  ;;  %597 = vmatmul.mubr.f32.vlgmr.msra.gmra.mrb[2].mxu1 %v9266_v24  ;;  %v816_v24 = vld [vmem:[%s15497_s4 + $0x88] sm:$0xff] }
  0xc6   :  { %v6652_v32 = vpack.c.bf16 %v824_v29, %v816_v24  ;;  %6651 = vmatpush1.bf16.msra.mxu1 %v6650_v30  ;;  %v6624_v24 = vpack.c.bf16 %v689_v28, %v688_v27  ;;  %v672_v29 = vld [vmem:[%s15499_s5 + $0x20] sm:$0xff]  ;;  %v673_v30 = vld [vmem:[%s15499_s5 + $0x28] sm:$0xff]  ;;  %v6644_v27 = vpack.c.bf16 %v699_v25, %v698_v23  ;;  %v683_v28 = vld [vmem:[%s15499_s5 + $0x78] sm:$0xff] }
  0xc8   :  { %6653 = vmatprep.subr.bf16.mxu1 %v6652_v32  ;;  %v6626_v32 = vpack.c.bf16 %v673_v30, %v672_v29  ;;  %v1048_v29 = vld [vmem:[%s15497_s4 + $0x7c8] sm:$0xff] }
  0xca   :  { %6655 = vmatpush1.bf16.msra.mxu1 %v6654_v37  ;;  %v967_v37 = vld [vmem:[%s15497_s4 + $0x540] sm:$0xff] }
  0xcb   :  { %6657 = vmatprep.subr.bf16.mxu1 %v6656_v38  ;;  %v6690_v38 = vpack.c.bf16 %v967_v37, %v959_v36  ;;  %v802_v36 = vld [vmem:[%s15497_s4 + $0x18] sm:$0xff] }
  0xcc   :  { %v810_v37 = vld [vmem:[%s15497_s4 + $0x58] sm:$0xff] }
  0xce   :  { %6659 = vmatpush1.bf16.msra.mxu1 %v6658_v44  ;;  %v675_v44 = vld [vmem:[%s15499_s5 + $0x38] sm:$0xff] }
  0xcf   :  { %6661 = vmatprep.subr.bf16.mxu1 %v6660_v45  ;;  %v6630_v45 = vpack.c.bf16 %v675_v44, %v674_v43  ;;  %v57_v43 = vld [vmem:[%s15500_s0 + $0x10] sm:$0xff]  ;;  %v58_v44 = vld [vmem:[%s15500_s0 + $0x18] sm:$0xff] }
  0xd2   :  { %6663 = vmatpush1.bf16.msra.mxu1 %v6662_v50  ;;  %v983_v50 = vld [vmem:[%s15497_s4 + $0x5c0] sm:$0xff] }
  0xd3   :  { %6665 = vmatprep.subr.bf16.mxu1 %v6664_v51  ;;  %v6694_v51 = vpack.c.bf16 %v983_v50, %v975_v49 }
  0xd6   :  { %6667 = vmatpush1.bf16.msra.mxu1 %v6666_v56  ;;  %v677_v56 = vld [vmem:[%s15499_s5 + $0x48] sm:$0xff] }
  0xd7   :  { %6669 = vmatprep.subr.bf16.mxu1 %v6668_v57  ;;  %v6634_v57 = vpack.c.bf16 %v677_v56, %v676_v55 }
  0xda   :  { %6671 = vmatpush1.bf16.msra.mxu1 %v6670_v62  ;;  %v999_v62 = vld [vmem:[%s15497_s4 + $0x640] sm:$0xff] }
  0xdb   :  { %6673 = vmatprep.subr.bf16.mxu1 %v6672_v63  ;;  %v6698_v63 = vpack.c.bf16 %v999_v62, %v991_v61  ;;  %v54_v61 = vmul.f32 %v9254_v20, %v38_v58  ;;  %v834_v58 = vld [vmem:[%s15497_s4 + $0x118] sm:$0xff] }
  0xde   :  { %6675 = vmatpush1.bf16.msra.mxu1 %v6674_v2  ;;  %v6636_v2 = vpack.c.bf16 %v695_v1, %v694_v0  ;;  %v55_v1 = vld [vmem:[%s15500_s0] sm:$0xff] }
  0xdf   :  { %6677 = vmatprep.subr.bf16.mxu1 %v9017_v31  ;;  %v6618_v31 = vpack.c.bf16 %v669_v7, %v668_v6  ;;  %v1008_v6 = vld [vmem:[%s15497_s4 + $0x688] sm:$0xff] }
  0xe0   :  { %v1016_v7 = vld [vmem:[%s15497_s4 + $0x6c8] sm:$0xff] }
  0xe1   :  { %6619 = vmatpush3.bf16.msra.mxu0 %v6618_v31  ;;  %v1007_v31 = vld [vmem:[%s15497_s4 + $0x680] sm:$0xff]  ;;  %v6700_v8 = vpack.c.bf16 %v1016_v7, %v1008_v6 }
  0xe2   :  { %6679 = vmatpush1.bf16.msra.mxu1 %v9037_v39  ;;  %v6682_v39 = vpack.c.bf16 %v935_v12, %v927_v11  ;;  %6621 = vmatprep.subr.bf16.mxu0 %v6620_v17  ;;  %v697_v11 = vld [vmem:[%s15499_s5 + $0xe8] sm:$0xff]  ;;  %v6702_v12 = vpack.c.bf16 %v1015_v9, %v1007_v31  ;;  %v59_v9 = vld [vmem:[%s15500_s0 + $0x20] sm:$0xff] }
  0xe3   :  { %6681 = vmatprep.subr.bf16.mxu1 %v6680_v10  ;;  %v696_v10 = vld [vmem:[%s15499_s5 + $0xe0] sm:$0xff]  ;;  %v1032_v17 = vld [vmem:[%s15497_s4 + $0x748] sm:$0xff] }
  0xe4   :  { %v6704_v21 = vpack.c.bf16 %v1032_v17, %v1024_v15 }
  0xe5   :  { %6623 = vmatpush3.bf16.msra.mxu0 %v6622_v18  ;;  %v1023_v18 = vld [vmem:[%s15497_s4 + $0x700] sm:$0xff] }
  0xe6   :  { %6683 = vmatpush1.bf16.msra.mxu1 %v6682_v39  ;;  %6625 = vmatprep.subr.bf16.mxu0 %v6624_v24  ;;  %v6640_v39 = vpack.c.bf16 %v697_v11, %v696_v10  ;;  %v1040_v24 = vld [vmem:[%s15497_s4 + $0x788] sm:$0xff]  ;;  %v61_v10 = vld [vmem:[%s15500_s0 + $0x30] sm:$0xff] }
  0xe7   :  { %6685 = vmatprep.subr.bf16.mxu1 %v6684_v22  ;;  %v6706_v22 = vpack.c.bf16 %v1031_v19, %v1023_v18  ;;  %v6708_v30 = vpack.c.bf16 %v1048_v29, %v1040_v24  ;;  %v60_v11 = vld [vmem:[%s15500_s0 + $0x28] sm:$0xff] }
  0xe9   :  { %6627 = vmatpush3.bf16.msra.mxu0 %v6626_v32  ;;  %v1039_v32 = vld [vmem:[%s15497_s4 + $0x780] sm:$0xff] }
  0xea   :  { %6687 = vmatpush1.bf16.msra.mxu1 %v6686_v26  ;;  %6629 = vmatprep.subr.bf16.mxu0 %v6628_v42  ;;  %v682_v26 = vld [vmem:[%s15499_s5 + $0x70] sm:$0xff]  ;;  %v6776_v42 = vpack.c.bf16 %v812_v41, %v804_v40 }
  0xeb   :  { %6689 = vmatprep.subr.bf16.mxu1 %v6688_v35  ;;  %v6646_v34 = vpack.c.bf16 %v683_v28, %v682_v26  ;;  %v6710_v35 = vpack.c.bf16 %v1047_v33, %v1039_v32  ;;  %v809_v40 = vld [vmem:[%s15497_s4 + $0x50] sm:$0xff] }
  0xed   :  { %6631 = vmatpush3.bf16.msra.mxu0 %v6630_v45 }
  0xee   :  { %6691 = vmatpush1.bf16.msra.mxu1 %v6690_v38  ;;  %6633 = vmatprep.subr.bf16.mxu0 %v6632_v54  ;;  %v6712_v38 = vpack.c.bf16 %v810_v37, %v802_v36 }
  0xef   :  { %6693 = vmatprep.subr.bf16.mxu1 %v6692_v48 }
  0xf1   :  { %6635 = vmatpush3.bf16.msra.mxu0 %v6634_v57  ;;  %v37_v57 = vld [vmem:[%s15501_s3] sm:$0xff] }
  0xf2   :  { %6695 = vmatpush1.bf16.msra.mxu1 %v6694_v51  ;;  %6637 = vmatprep.subr.bf16.mxu0 %v6636_v2  ;;  %v53_v59 = vmul.f32 %v9254_v20, %v37_v57  ;;  %v56_v2 = vld [vmem:[%s15500_s0 + $0x8] sm:$0xff] }
  0xf3   :  { %6697 = vmatprep.subr.bf16.mxu1 %v6696_v60 }
  0xf5   :  { %6639 = vmatpush3.bf16.msra.mxu0 %v6638_v5 }
  0xf6   :  { %6699 = vmatpush1.bf16.msra.mxu1 %v6698_v63  ;;  %6641 = vmatprep.subr.bf16.mxu0 %v6640_v39 }
  0xf7   :  { %6701 = vmatprep.subr.bf16.mxu1 %v6700_v8 }
  0xf9   :  { %6643 = vmatpush3.bf16.msra.mxu0 %v6642_v16 }
  0xfa   :  { %6703 = vmatpush1.bf16.msra.mxu1 %v6702_v12  ;;  %6645 = vmatprep.subr.bf16.mxu0 %v6644_v27  ;;  %v62_v12 = vld [vmem:[%s15500_s0 + $0x38] sm:$0xff] }
  0xfb   :  { %6705 = vmatprep.subr.bf16.mxu1 %v6704_v21 }
  0xfd   :  { %6647 = vmatpush3.bf16.msra.mxu0 %v6646_v34 }
  0xfe   :  { %6707 = vmatpush1.bf16.msra.mxu1 %v6706_v22  ;;  %6713 = vmatprep.subr.bf16.mxu0 %v6712_v38  ;;  %v801_v38 = vld [vmem:[%s15497_s4 + $0x10] sm:$0xff] }
  0xff   :  { %6709 = vmatprep.subr.bf16.mxu1 %v6708_v30 }
 0x102   :  { %6711 = vmatpush1.bf16.msra.mxu1 %v6710_v35 }
 0x103   :  { %6777 = vmatprep.subr.bf16.mxu1 %v6776_v42 }
 0x158   :  { %v385_v45 = vpop.f32.mrb[0].mxu0  ;;  %v456_v46 = vpop.f32.mrb[0].mxu1 }
 0x159   :  { %v605_v47 = vadd.f32 %v456_v46, %v57_v43  ;;  %v387_v48 = vpop.f32.mrb[1].mxu0  ;;  %v458_v49 = vpop.f32.mrb[1].mxu1  ;;  %v603_v3 = vadd.f32 %v385_v45, %v55_v1  ;;  %v803_v43 = vld [vmem:[%s15497_s4 + $0x20] sm:$0xff]  ;;  %v818_v46 = vld [vmem:[%s15497_s4 + $0x98] sm:$0xff]  ;;  %v836_v1 = vld [vmem:[%s15497_s4 + $0x128] sm:$0xff] }
 0x15a   :  { %v606_v50 = vadd.f32 %v458_v49, %v58_v44  ;;  %v604_v4 = vadd.f32 %v387_v48, %v56_v2  ;;  %v811_v45 = vld [vmem:[%s15497_s4 + $0x60] sm:$0xff]  ;;  %v6714_v49 = vpack.c.bf16 %v809_v40, %v801_v38  ;;  %v844_v2 = vld [vmem:[%s15497_s4 + $0x168] sm:$0xff] }
 0x15b   :  { %v5956_v51 = vmul.f32 -1.442695, %v605_v47  ;;  %v5954_v5 = vmul.f32 -1.442695, %v603_v3  ;;  %v826_v47 = vld [vmem:[%s15497_s4 + $0xd8] sm:$0xff]  ;;  %v884_v40 = vld [vmem:[%s15497_s4 + $0x2a8] sm:$0xff] }
 0x15c   :  { %v5957_v52 = vmul.f32 -1.442695, %v606_v50  ;;  %v5955_v6 = vmul.f32 -1.442695, %v604_v4  ;;  %v820_v50 = vld [vmem:[%s15497_s4 + $0xa8] sm:$0xff]  ;;  %v6716_v57 = vpack.c.bf16 %v826_v47, %v818_v46  ;;  %v833_v4 = vld [vmem:[%s15497_s4 + $0x110] sm:$0xff] }
 0x15d   :  { %8667 = vpow2.f32 %v5956_v51  ;;  %v828_v51 = vld [vmem:[%s15497_s4 + $0xe8] sm:$0xff]  ;;  %v898_v46 = vld [vmem:[%s15497_s4 + $0x318] sm:$0xff] }
 0x15e   :  { %8669 = vpow2.f32 %v5957_v52  ;;  %v9973_v52 = vpop.permute.xlu0 %783  ;;  %v906_v47 = vld [vmem:[%s15497_s4 + $0x358] sm:$0xff] }
 0x167   :  { %v8668_v53 = vpop.eup %8667 }
 0x168   :  { %v629_v54 = vadd.f32 1.0, %v8668_v53  ;;  %v8670_v55 = vpop.eup %8669  ;;  %v817_v53 = vld [vmem:[%s15497_s4 + $0x90] sm:$0xff] }
 0x169   :  { %v630_v56 = vadd.f32 1.0, %v8670_v55 }
 0x16a   :  { %8671 = vrcp.f32 %v629_v54  ;;  %v825_v54 = vld [vmem:[%s15497_s4 + $0xd0] sm:$0xff] }
 0x16b   :  { %8673 = vrcp.f32 %v630_v56  ;;  %v6778_v56 = vpack.c.bf16 %v811_v45, %v803_v43  ;;  %v881_v43 = vld [vmem:[%s15497_s4 + $0x290] sm:$0xff] }
 0x16c   :  { %8675 = vpow2.f32 %v5954_v5  ;;  %v841_v5 = vld [vmem:[%s15497_s4 + $0x150] sm:$0xff] }
 0x16d   :  { %8677 = vpow2.f32 %v5955_v6  ;;  %v5978_v6 = vld [vmem:[%s15496_s1 + $0x10] sm:$0xff] }
 0x16e   :  { %1519 = vperm.xlu1 %8666, %v5978_v6   ;;  %v913_v6 = vld [vmem:[%s15497_s4 + $0x390] sm:$0xff] }
 0x174   :  { %v8672_v60 = vpop.eup %8671 }
 0x175   :  { %v649_v62 = vmul.f32 %v8672_v60, %v53_v59  ;;  %v8674_v63 = vpop.eup %8673  ;;  %v842_v59 = vld [vmem:[%s15497_s4 + $0x158] sm:$0xff] }
 0x176   :  { %v650_v0 = vmul.f32 %v8674_v63, %v54_v61  ;;  %v8676_v7 = vpop.eup %8675  ;;  %v6780_v61 = vpack.c.bf16 %v828_v51, %v820_v50  ;;  %v827_v63 = vld [vmem:[%s15497_s4 + $0xe0] sm:$0xff]  ;;  %v6720_v3 = vpack.c.bf16 %v842_v59, %v834_v58  ;;  %v905_v58 = vld [vmem:[%s15497_s4 + $0x350] sm:$0xff] }
 0x177   :  { %v8678_v31 = vpop.eup %8677  ;;  %v617_v20 = vadd.f32 1.0, %v8676_v7  ;;  %v891_v50 = vld [vmem:[%s15497_s4 + $0x2e0] sm:$0xff] }
 0x178   :  { %v618_v8 = vadd.f32 1.0, %v8678_v31  ;;  %v850_v31 = vld [vmem:[%s15497_s4 + $0x198] sm:$0xff] }
 0x179   :  { %8679 = vrcp.f32 %v617_v20  ;;  %v858_v20 = vld [vmem:[%s15497_s4 + $0x1d8] sm:$0xff] }
 0x17a   :  { %8681 = vrcp.f32 %v618_v8  ;;  %v6784_v8 = vpack.c.bf16 %v844_v2, %v836_v1  ;;  %v907_v1 = vld [vmem:[%s15497_s4 + $0x360] sm:$0xff] }
 0x183   :  { %v8680_v23 = vpop.eup %8679 }
 0x184   :  { %v8682_v25 = vpop.eup %8681 }
 0x198   :  { %v527_v39 = vpop.f32.mrb[2].mxu0  ;;  %v598_v13 = vpop.f32.mrb[2].mxu1 }
 0x199   :  { %v607_v14 = vadd.f32 %v527_v39, %v59_v9  ;;  %v609_v15 = vadd.f32 %v598_v13, %v61_v10  ;;  %v529_v16 = vpop.f32.mrb[3].mxu0  ;;  %v600_v17 = vpop.f32.mrb[3].mxu1  ;;  %v835_v9 = vld [vmem:[%s15497_s4 + $0x120] sm:$0xff]  ;;  %v860_v39 = vld [vmem:[%s15497_s4 + $0x1e8] sm:$0xff]  ;;  %v6724_v13 = vpack.c.bf16 %v858_v20, %v850_v31  ;;  %v930_v20 = vld [vmem:[%s15497_s4 + $0x418] sm:$0xff] }
 0x19a   :  { %v608_v18 = vadd.f32 %v529_v16, %v60_v11  ;;  %v610_v19 = vadd.f32 %v600_v17, %v62_v12  ;;  %v843_v10 = vld [vmem:[%s15497_s4 + $0x160] sm:$0xff]  ;;  %v6722_v11 = vpack.c.bf16 %v841_v5, %v833_v4  ;;  %v852_v12 = vld [vmem:[%s15497_s4 + $0x1a8] sm:$0xff]  ;;  %v866_v17 = vld [vmem:[%s15497_s4 + $0x218] sm:$0xff] }
 0x19b   :  { %8683 = vtanh.f32 %v607_v14  ;;  %v5958_v21 = vmul.f32 -1.442695, %v609_v15  ;;  %v849_v14 = vld [vmem:[%s15497_s4 + $0x190] sm:$0xff]  ;;  %v6786_v16 = vpack.c.bf16 %v843_v10, %v835_v9  ;;  %v924_v4 = vld [vmem:[%s15497_s4 + $0x3e8] sm:$0xff]  ;;  %v915_v10 = vld [vmem:[%s15497_s4 + $0x3a0] sm:$0xff] }
 0x19c   :  { %8685 = vtanh.f32 %v608_v18  ;;  %v5959_v22 = vmul.f32 -1.442695, %v610_v19  ;;  %v857_v15 = vld [vmem:[%s15497_s4 + $0x1d0] sm:$0xff]  ;;  %v874_v18 = vld [vmem:[%s15497_s4 + $0x258] sm:$0xff]  ;;  %v6788_v19 = vpack.c.bf16 %v860_v39, %v852_v12  ;;  %v932_v39 = vld [vmem:[%s15497_s4 + $0x428] sm:$0xff] }
 0x19d   :  { %8687 = vpow2.f32 %v5958_v21  ;;  %v851_v21 = vld [vmem:[%s15497_s4 + $0x1a0] sm:$0xff] }
 0x19e   :  { %8689 = vpow2.f32 %v5959_v22  ;;  %v859_v22 = vld [vmem:[%s15497_s4 + $0x1e0] sm:$0xff] }
 0x1a5   :  { %v8684_v26 = vpop.eup %8683 }
 0x1a6   :  { %v8686_v27 = vpop.eup %8685  ;;  %v651_v28 = vmul.f32 %v8684_v26, %v8680_v23  ;;  %v6726_v23 = vpack.c.bf16 %v857_v15, %v849_v14  ;;  %v876_v26 = vld [vmem:[%s15497_s4 + $0x268] sm:$0xff]  ;;  %v929_v15 = vld [vmem:[%s15497_s4 + $0x410] sm:$0xff] }
 0x1a7   :  { %v8688_v24 = vpop.eup %8687  ;;  %v652_v29 = vmul.f32 %v8686_v27, %v8682_v25  ;;  %v868_v25 = vld [vmem:[%s15497_s4 + $0x228] sm:$0xff]  ;;  %v6728_v27 = vpack.c.bf16 %v874_v18, %v866_v17  ;;  %v946_v18 = vld [vmem:[%s15497_s4 + $0x498] sm:$0xff] }
 0x1a8   :  { %v8690_v30 = vpop.eup %8689  ;;  %v9943_v32 = vadd.f32 %v651_v28, %v649_v62  ;;  %v643_v33 = vadd.f32 1.0, %v8688_v24  ;;  %v819_v62 = vld [vmem:[%s15497_s4 + $0xa0] sm:$0xff]  ;;  %v865_v28 = vld [vmem:[%s15497_s4 + $0x210] sm:$0xff] }
 0x1a9   :  { %v9945_v34 = vadd.f32 %v652_v29, %v650_v0  ;;  %v644_v35 = vadd.f32 1.0, %v8690_v30  ;;  %v6718_v0 = vpack.c.bf16 %v825_v54, %v817_v53  ;;  %v6782_v7 = vpack.c.bf16 %v827_v63, %v819_v62  ;;  %v873_v24 = vld [vmem:[%s15497_s4 + $0x250] sm:$0xff]  ;;  %v882_v30 = vld [vmem:[%s15497_s4 + $0x298] sm:$0xff]  ;;  %v900_v53 = vld [vmem:[%s15497_s4 + $0x328] sm:$0xff] }
 0x1aa   :  { %8691 = vtanh.f32 %v9943_v32  ;;  %v6790_v29 = vpack.c.bf16 %v859_v22, %v851_v21  ;;  %v6730_v38 = vpack.c.bf16 %v873_v24, %v865_v28  ;;  %v908_v54 = vld [vmem:[%s15497_s4 + $0x368] sm:$0xff]  ;;  %v922_v62 = vld [vmem:[%s15497_s4 + $0x3d8] sm:$0xff]  ;;  %v931_v22 = vld [vmem:[%s15497_s4 + $0x420] sm:$0xff] }
 0x1ab   :  { %8693 = vrcp.f32 %v643_v33  ;;  %v890_v33 = vld [vmem:[%s15497_s4 + $0x2d8] sm:$0xff]  ;;  %v6800_v63 = vpack.c.bf16 %v908_v54, %v900_v53  ;;  %v945_v24 = vld [vmem:[%s15497_s4 + $0x490] sm:$0xff]  ;;  %v980_v54 = vld [vmem:[%s15497_s4 + $0x5a8] sm:$0xff] }
 0x1ac   :  { %8695 = vrcp.f32 %v644_v35  ;;  %v6792_v35 = vpack.c.bf16 %v876_v26, %v868_v25  ;;  %v948_v26 = vld [vmem:[%s15497_s4 + $0x4a8] sm:$0xff] }
 0x1ad   :  { %8697 = vtanh.f32 %v9945_v34 }
 0x1b4   :  { %v8692_v36 = vpop.eup %8691 }
 0x1b5   :  { %v8694_v37 = vpop.eup %8693 }
 0x1b6   :  { %v8696_v41 = vpop.eup %8695  ;;  %v657_v42 = vmul.f32 %v8694_v37, %v8692_v36  ;;  %v867_v36 = vld [vmem:[%s15497_s4 + $0x220] sm:$0xff] }
 0x1b7   :  { %v8698_v44 = vpop.eup %8697  ;;  %v875_v37 = vld [vmem:[%s15497_s4 + $0x260] sm:$0xff] }
 0x1b8   :  { %v658_v48 = vmul.f32 %v8698_v44, %v8696_v41  ;;  %v9991_v60 = vmul.f32 %v9973_v52, %v657_v42  ;;  %v892_v41 = vld [vmem:[%s15497_s4 + $0x2e8] sm:$0xff]  ;;  %v889_v44 = vld [vmem:[%s15497_s4 + $0x2d0] sm:$0xff]  ;;  %v6794_v45 = vpack.c.bf16 %v875_v37, %v867_v36  ;;  %v947_v37 = vld [vmem:[%s15497_s4 + $0x4a0] sm:$0xff] }
 0x1b9   :  { %v6734_v51 = vpack.c.bf16 %v889_v44, %v881_v43  ;;  %v961_v44 = vld [vmem:[%s15497_s4 + $0x510] sm:$0xff] }
 0x1ba   :  { %771 = vmatprep.mubr.f32.mxu0 %v658_v48  ;;  %v9982_v55 = vmul.f32 %v9973_v52, %v658_v48  ;;  %v6796_v48 = vpack.c.bf16 %v892_v41, %v884_v40  ;;  %v964_v41 = vld [vmem:[%s15497_s4 + $0x528] sm:$0xff] }
 0x1bb   :  { %772 = vmatmul.mubr.f32.vlgmr.msra.gmra.mrb[4].mxu0 %v657_v42  ;;  %v6732_v42 = vpack.c.bf16 %v890_v33, %v882_v30  ;;  %v962_v33 = vld [vmem:[%s15497_s4 + $0x518] sm:$0xff] }
 0x1bc   :  { %6715 = vmatpush1.bf16.msra.mxu0 %v6714_v49  ;;  %1119 = vmatprep.mubr.f32.mxu1 %v9982_v55  ;;  %v883_v49 = vld [vmem:[%s15497_s4 + $0x2a0] sm:$0xff] }
 0x1bd   :  { %1190 = vmatprep.mubr.f32.mxu0 %v9982_v55  ;;  %1120 = vmatmul.mubr.f32.vlgmr.msra.gmra.mrb[4].mxu1 %v9991_v60  ;;  %v6798_v59 = vpack.c.bf16 %v891_v50, %v883_v49  ;;  %v963_v50 = vld [vmem:[%s15497_s4 + $0x520] sm:$0xff] }
 0x1be   :  { %6779 = vmatpush1.bf16.msra.mxu1 %v6778_v56  ;;  %6717 = vmatprep.subr.bf16.mxu0 %v6716_v57  ;;  %v6736_v56 = vpack.c.bf16 %v906_v47, %v898_v46  ;;  %v897_v57 = vld [vmem:[%s15497_s4 + $0x310] sm:$0xff]  ;;  %v978_v47 = vld [vmem:[%s15497_s4 + $0x598] sm:$0xff] }
 0x1bf   :  { %1261 = vmatprep.mubr.f32.mxu1 %v9982_v55  ;;  %6781 = vmatprep.subr.bf16.mxu1 %v6780_v61  ;;  %v914_v61 = vld [vmem:[%s15497_s4 + $0x398] sm:$0xff]  ;;  %v6738_v2 = vpack.c.bf16 %v905_v58, %v897_v57  ;;  %v977_v58 = vld [vmem:[%s15497_s4 + $0x590] sm:$0xff] }
 0x1c0   :  { %6719 = vmatpush1.bf16.msra.mxu0 %v6718_v0  ;;  %v899_v0 = vld [vmem:[%s15497_s4 + $0x320] sm:$0xff]  ;;  %v6740_v5 = vpack.c.bf16 %v922_v62, %v914_v61  ;;  %v994_v62 = vld [vmem:[%s15497_s4 + $0x618] sm:$0xff] }
 0x1c1   :  { %6721 = vmatprep.subr.bf16.mxu0 %v6720_v3  ;;  %v916_v3 = vld [vmem:[%s15497_s4 + $0x3a8] sm:$0xff]  ;;  %v6802_v31 = vpack.c.bf16 %v907_v1, %v899_v0  ;;  %v979_v1 = vld [vmem:[%s15497_s4 + $0x5a0] sm:$0xff] }
 0x1c2   :  { %6783 = vmatpush1.bf16.msra.mxu1 %v6782_v7  ;;  %v921_v7 = vld [vmem:[%s15497_s4 + $0x3d0] sm:$0xff]  ;;  %v6804_v9 = vpack.c.bf16 %v924_v4, %v916_v3  ;;  %v996_v4 = vld [vmem:[%s15497_s4 + $0x628] sm:$0xff] }
 0x1c3   :  { %6785 = vmatprep.subr.bf16.mxu1 %v6784_v8  ;;  %v938_v8 = vld [vmem:[%s15497_s4 + $0x458] sm:$0xff]  ;;  %v6742_v12 = vpack.c.bf16 %v921_v7, %v913_v6  ;;  %v993_v7 = vld [vmem:[%s15497_s4 + $0x610] sm:$0xff] }
 0x1c4   :  { %6723 = vmatpush1.bf16.msra.mxu0 %v6722_v11  ;;  %v923_v11 = vld [vmem:[%s15497_s4 + $0x3e0] sm:$0xff]  ;;  %v6744_v14 = vpack.c.bf16 %v938_v8, %v930_v20  ;;  %v1010_v8 = vld [vmem:[%s15497_s4 + $0x698] sm:$0xff] }
 0x1c5   :  { %6725 = vmatprep.subr.bf16.mxu0 %v6724_v13  ;;  %v940_v13 = vld [vmem:[%s15497_s4 + $0x468] sm:$0xff]  ;;  %v6806_v17 = vpack.c.bf16 %v923_v11, %v915_v10  ;;  %v995_v11 = vld [vmem:[%s15497_s4 + $0x620] sm:$0xff] }
 0x1c6   :  { %6787 = vmatpush1.bf16.msra.mxu1 %v6786_v16  ;;  %v937_v16 = vld [vmem:[%s15497_s4 + $0x450] sm:$0xff]  ;;  %v6808_v21 = vpack.c.bf16 %v940_v13, %v932_v39  ;;  %v1012_v13 = vld [vmem:[%s15497_s4 + $0x6a8] sm:$0xff] }
 0x1c7   :  { %6789 = vmatprep.subr.bf16.mxu1 %v6788_v19  ;;  %v954_v19 = vld [vmem:[%s15497_s4 + $0x4d8] sm:$0xff]  ;;  %v6746_v25 = vpack.c.bf16 %v937_v16, %v929_v15  ;;  %v1009_v16 = vld [vmem:[%s15497_s4 + $0x690] sm:$0xff] }
 0x1c8   :  { %6727 = vmatpush1.bf16.msra.mxu0 %v6726_v23  ;;  %v939_v23 = vld [vmem:[%s15497_s4 + $0x460] sm:$0xff]  ;;  %v6748_v28 = vpack.c.bf16 %v954_v19, %v946_v18  ;;  %v1026_v19 = vld [vmem:[%s15497_s4 + $0x718] sm:$0xff] }
 0x1c9   :  { %6729 = vmatprep.subr.bf16.mxu0 %v6728_v27  ;;  %v956_v27 = vld [vmem:[%s15497_s4 + $0x4e8] sm:$0xff]  ;;  %v6810_v30 = vpack.c.bf16 %v939_v23, %v931_v22  ;;  %v1011_v23 = vld [vmem:[%s15497_s4 + $0x6a0] sm:$0xff] }
 0x1ca   :  { %6791 = vmatpush1.bf16.msra.mxu1 %v6790_v29  ;;  %v953_v29 = vld [vmem:[%s15497_s4 + $0x4d0] sm:$0xff]  ;;  %v6812_v36 = vpack.c.bf16 %v956_v27, %v948_v26  ;;  %v1028_v27 = vld [vmem:[%s15497_s4 + $0x728] sm:$0xff] }
 0x1cb   :  { %6793 = vmatprep.subr.bf16.mxu1 %v6792_v35  ;;  %v970_v35 = vld [vmem:[%s15497_s4 + $0x558] sm:$0xff]  ;;  %v6750_v40 = vpack.c.bf16 %v953_v29, %v945_v24  ;;  %v1025_v29 = vld [vmem:[%s15497_s4 + $0x710] sm:$0xff] }
 0x1cc   :  { %6731 = vmatpush1.bf16.msra.mxu0 %v6730_v38  ;;  %v955_v38 = vld [vmem:[%s15497_s4 + $0x4e0] sm:$0xff]  ;;  %v6752_v43 = vpack.c.bf16 %v970_v35, %v962_v33  ;;  %v1042_v35 = vld [vmem:[%s15497_s4 + $0x798] sm:$0xff] }
 0x1cd   :  { %6733 = vmatprep.subr.bf16.mxu0 %v6732_v42  ;;  %v972_v42 = vld [vmem:[%s15497_s4 + $0x568] sm:$0xff]  ;;  %v6814_v46 = vpack.c.bf16 %v955_v38, %v947_v37  ;;  %v1027_v38 = vld [vmem:[%s15497_s4 + $0x720] sm:$0xff] }
 0x1ce   :  { %6795 = vmatpush1.bf16.msra.mxu1 %v6794_v45  ;;  %v969_v45 = vld [vmem:[%s15497_s4 + $0x550] sm:$0xff]  ;;  %v6816_v49 = vpack.c.bf16 %v972_v42, %v964_v41  ;;  %v1044_v42 = vld [vmem:[%s15497_s4 + $0x7a8] sm:$0xff] }
 0x1cf   :  { %6797 = vmatprep.subr.bf16.mxu1 %v6796_v48  ;;  %v986_v48 = vld [vmem:[%s15497_s4 + $0x5d8] sm:$0xff]  ;;  %v6754_v53 = vpack.c.bf16 %v969_v45, %v961_v44  ;;  %v1041_v45 = vld [vmem:[%s15497_s4 + $0x790] sm:$0xff] }
 0x1d0   :  { %6735 = vmatpush1.bf16.msra.mxu0 %v6734_v51  ;;  %v971_v51 = vld [vmem:[%s15497_s4 + $0x560] sm:$0xff]  ;;  %v6756_v57 = vpack.c.bf16 %v986_v48, %v978_v47  ;;  %v806_v48 = vld [vmem:[%s15497_s4 + $0x38] sm:$0xff] }
 0x1d1   :  { %6737 = vmatprep.subr.bf16.mxu0 %v6736_v56  ;;  %v988_v56 = vld [vmem:[%s15497_s4 + $0x5e8] sm:$0xff]  ;;  %v6818_v61 = vpack.c.bf16 %v971_v51, %v963_v50  ;;  %v1043_v51 = vld [vmem:[%s15497_s4 + $0x7a0] sm:$0xff] }
 0x1d2   :  { %6799 = vmatpush1.bf16.msra.mxu1 %v6798_v59  ;;  %v985_v59 = vld [vmem:[%s15497_s4 + $0x5d0] sm:$0xff]  ;;  %v6820_v0 = vpack.c.bf16 %v988_v56, %v980_v54 }
 0x1d3   :  { %6801 = vmatprep.subr.bf16.mxu1 %v6800_v63  ;;  %v1002_v63 = vld [vmem:[%s15497_s4 + $0x658] sm:$0xff]  ;;  %v6758_v3 = vpack.c.bf16 %v985_v59, %v977_v58  ;;  %v813_v58 = vld [vmem:[%s15497_s4 + $0x70] sm:$0xff] }
 0x1d4   :  { %6739 = vmatpush1.bf16.msra.mxu0 %v6738_v2  ;;  %v987_v2 = vld [vmem:[%s15497_s4 + $0x5e0] sm:$0xff]  ;;  %v6760_v6 = vpack.c.bf16 %v1002_v63, %v994_v62  ;;  %v830_v62 = vld [vmem:[%s15497_s4 + $0xf8] sm:$0xff] }
 0x1d5   :  { %6741 = vmatprep.subr.bf16.mxu0 %v6740_v5  ;;  %v1004_v5 = vld [vmem:[%s15497_s4 + $0x668] sm:$0xff]  ;;  %v6822_v20 = vpack.c.bf16 %v987_v2, %v979_v1  ;;  %v821_v1 = vld [vmem:[%s15497_s4 + $0xb0] sm:$0xff] }
 0x1d6   :  { %6803 = vmatpush1.bf16.msra.mxu1 %v6802_v31  ;;  %v1001_v31 = vld [vmem:[%s15497_s4 + $0x650] sm:$0xff]  ;;  %v6824_v10 = vpack.c.bf16 %v1004_v5, %v996_v4  ;;  %v846_v4 = vld [vmem:[%s15497_s4 + $0x178] sm:$0xff] }
 0x1d7   :  { %6805 = vmatprep.subr.bf16.mxu1 %v6804_v9  ;;  %v1018_v9 = vld [vmem:[%s15497_s4 + $0x6d8] sm:$0xff]  ;;  %v6762_v39 = vpack.c.bf16 %v1001_v31, %v993_v7  ;;  %v829_v2 = vld [vmem:[%s15497_s4 + $0xf0] sm:$0xff] }
 0x1d8   :  { %6743 = vmatpush1.bf16.msra.mxu0 %v6742_v12  ;;  %v1003_v12 = vld [vmem:[%s15497_s4 + $0x660] sm:$0xff]  ;;  %v6764_v15 = vpack.c.bf16 %v1018_v9, %v1010_v8  ;;  %v6846_v5 = vpack.c.bf16 %v829_v2, %v821_v1  ;;  %v837_v7 = vld [vmem:[%s15497_s4 + $0x130] sm:$0xff] }
 0x1d9   :  { %6745 = vmatprep.subr.bf16.mxu0 %v6744_v14  ;;  %v1020_v14 = vld [vmem:[%s15497_s4 + $0x6e8] sm:$0xff]  ;;  %v6826_v18 = vpack.c.bf16 %v1003_v12, %v995_v11  ;;  %v845_v31 = vld [vmem:[%s15497_s4 + $0x170] sm:$0xff]  ;;  %v870_v12 = vld [vmem:[%s15497_s4 + $0x238] sm:$0xff] }
 0x1da   :  { %6807 = vmatpush1.bf16.msra.mxu1 %v6806_v17  ;;  %v1017_v17 = vld [vmem:[%s15497_s4 + $0x6d0] sm:$0xff]  ;;  %v6828_v22 = vpack.c.bf16 %v1020_v14, %v1012_v13  ;;  %v6850_v8 = vpack.c.bf16 %v845_v31, %v837_v7 }
 0x1db   :  { %6809 = vmatprep.subr.bf16.mxu1 %v6808_v21  ;;  %v1034_v21 = vld [vmem:[%s15497_s4 + $0x758] sm:$0xff]  ;;  %v6766_v26 = vpack.c.bf16 %v1017_v17, %v1009_v16  ;;  %v861_v11 = vld [vmem:[%s15497_s4 + $0x1f0] sm:$0xff] }
 0x1dc   :  { %6747 = vmatpush1.bf16.msra.mxu0 %v6746_v25  ;;  %v1019_v25 = vld [vmem:[%s15497_s4 + $0x6e0] sm:$0xff]  ;;  %v6768_v24 = vpack.c.bf16 %v1034_v21, %v1026_v19  ;;  %v877_v16 = vld [vmem:[%s15497_s4 + $0x270] sm:$0xff]  ;;  %v886_v17 = vld [vmem:[%s15497_s4 + $0x2b8] sm:$0xff] }
 0x1dd   :  { %6749 = vmatprep.subr.bf16.mxu0 %v6748_v28  ;;  %v1036_v28 = vld [vmem:[%s15497_s4 + $0x768] sm:$0xff]  ;;  %v6830_v33 = vpack.c.bf16 %v1019_v25, %v1011_v23  ;;  %v893_v23 = vld [vmem:[%s15497_s4 + $0x2f0] sm:$0xff]  ;;  %v902_v25 = vld [vmem:[%s15497_s4 + $0x338] sm:$0xff] }
 0x1de   :  { %6811 = vmatpush1.bf16.msra.mxu1 %v6810_v30  ;;  %v1033_v30 = vld [vmem:[%s15497_s4 + $0x750] sm:$0xff]  ;;  %v6832_v37 = vpack.c.bf16 %v1036_v28, %v1028_v27 }
 0x1df   :  { %6813 = vmatprep.subr.bf16.mxu1 %v6812_v36  ;;  %v1050_v36 = vld [vmem:[%s15497_s4 + $0x7d8] sm:$0xff]  ;;  %v6770_v41 = vpack.c.bf16 %v1033_v30, %v1025_v29  ;;  %v909_v29 = vld [vmem:[%s15497_s4 + $0x370] sm:$0xff] }
 0x1e0   :  { %6751 = vmatpush1.bf16.msra.mxu0 %v6750_v40  ;;  %v1035_v40 = vld [vmem:[%s15497_s4 + $0x760] sm:$0xff]  ;;  %v6772_v44 = vpack.c.bf16 %v1050_v36, %v1042_v35  ;;  %v918_v30 = vld [vmem:[%s15497_s4 + $0x3b8] sm:$0xff]  ;;  %v981_v1 = vld [vmem:[%s15497_s4 + $0x5b0] sm:$0xff] }
 0x1e1   :  { %6753 = vmatprep.subr.bf16.mxu0 %v6752_v43  ;;  %v1052_v43 = vld [vmem:[%s15497_s4 + $0x7e8] sm:$0xff]  ;;  %v6834_v47 = vpack.c.bf16 %v1035_v40, %v1027_v38  ;;  %v925_v38 = vld [vmem:[%s15497_s4 + $0x3f0] sm:$0xff]  ;;  %v934_v40 = vld [vmem:[%s15497_s4 + $0x438] sm:$0xff] }
 0x1e2   :  { %6815 = vmatpush1.bf16.msra.mxu1 %v6814_v46  ;;  %v1049_v46 = vld [vmem:[%s15497_s4 + $0x7d0] sm:$0xff]  ;;  %v6836_v50 = vpack.c.bf16 %v1052_v43, %v1044_v42 }
 0x1e3   :  { %6817 = vmatprep.subr.bf16.mxu1 %v6816_v49  ;;  %v814_v49 = vld [vmem:[%s15497_s4 + $0x78] sm:$0xff]  ;;  %v6774_v54 = vpack.c.bf16 %v1049_v46, %v1041_v45  ;;  %v941_v45 = vld [vmem:[%s15497_s4 + $0x470] sm:$0xff] }
 0x1e4   :  { %6755 = vmatpush1.bf16.msra.mxu0 %v6754_v53  ;;  %v1051_v53 = vld [vmem:[%s15497_s4 + $0x7e0] sm:$0xff]  ;;  %v6840_v56 = vpack.c.bf16 %v814_v49, %v806_v48  ;;  %v950_v46 = vld [vmem:[%s15497_s4 + $0x4b8] sm:$0xff]  ;;  %v989_v2 = vld [vmem:[%s15497_s4 + $0x5f0] sm:$0xff] }
 0x1e5   :  { %6757 = vmatprep.subr.bf16.mxu0 %v6756_v57  ;;  %v805_v57 = vld [vmem:[%s15497_s4 + $0x30] sm:$0xff]  ;;  %v6838_v59 = vpack.c.bf16 %v1051_v53, %v1043_v51  ;;  %v966_v53 = vld [vmem:[%s15497_s4 + $0x538] sm:$0xff] }
 0x1e6   :  { %6819 = vmatpush1.bf16.msra.mxu1 %v6818_v61  ;;  %v822_v61 = vld [vmem:[%s15497_s4 + $0xb8] sm:$0xff]  ;;  %v6842_v63 = vpack.c.bf16 %v813_v58, %v805_v57  ;;  %v957_v51 = vld [vmem:[%s15497_s4 + $0x4f0] sm:$0xff] }
 0x1e7   :  { %6821 = vmatprep.subr.bf16.mxu1 %v6820_v0  ;;  %v6844_v0 = vpack.c.bf16 %v830_v62, %v822_v61  ;;  %v965_v58 = vld [vmem:[%s15497_s4 + $0x530] sm:$0xff]  ;;  %v982_v61 = vld [vmem:[%s15497_s4 + $0x5b8] sm:$0xff] }
 0x1e8   :  { %6759 = vmatpush1.bf16.msra.mxu0 %v6758_v3  ;;  %v838_v3 = vld [vmem:[%s15497_s4 + $0x138] sm:$0xff]  ;;  %v997_v7 = vld [vmem:[%s15497_s4 + $0x630] sm:$0xff] }
 0x1e9   :  { %6761 = vmatprep.subr.bf16.mxu0 %v6760_v6  ;;  %v6848_v6 = vpack.c.bf16 %v846_v4, %v838_v3  ;;  %v990_v62 = vld [vmem:[%s15497_s4 + $0x5f8] sm:$0xff]  ;;  %v1005_v31 = vld [vmem:[%s15497_s4 + $0x670] sm:$0xff] }
 0x1ea   :  { %6823 = vmatpush1.bf16.msra.mxu1 %v6822_v20  ;;  %v854_v20 = vld [vmem:[%s15497_s4 + $0x1b8] sm:$0xff] }
 0x1eb   :  { %6825 = vmatprep.subr.bf16.mxu1 %v6824_v10  ;;  %v853_v10 = vld [vmem:[%s15497_s4 + $0x1b0] sm:$0xff]  ;;  %v998_v3 = vld [vmem:[%s15497_s4 + $0x638] sm:$0xff] }
 0x1ec   :  { %6763 = vmatpush1.bf16.msra.mxu0 %v6762_v39  ;;  %v878_v39 = vld [vmem:[%s15497_s4 + $0x278] sm:$0xff]  ;;  %v6854_v13 = vpack.c.bf16 %v861_v11, %v853_v10  ;;  %v1013_v10 = vld [vmem:[%s15497_s4 + $0x6b0] sm:$0xff] }
 0x1ed   :  { %6765 = vmatprep.subr.bf16.mxu0 %v6764_v15  ;;  %v6856_v14 = vpack.c.bf16 %v878_v39, %v870_v12  ;;  %v869_v15 = vld [vmem:[%s15497_s4 + $0x230] sm:$0xff]  ;;  %v1006_v4 = vld [vmem:[%s15497_s4 + $0x678] sm:$0xff] }
 0x1ee   :  { %6827 = vmatpush1.bf16.msra.mxu1 %v6826_v18  ;;  %v894_v18 = vld [vmem:[%s15497_s4 + $0x2f8] sm:$0xff]  ;;  %v6858_v19 = vpack.c.bf16 %v877_v16, %v869_v15  ;;  %v1021_v11 = vld [vmem:[%s15497_s4 + $0x6f0] sm:$0xff] }
 0x1ef   :  { %6829 = vmatprep.subr.bf16.mxu1 %v6828_v22  ;;  %v6860_v21 = vpack.c.bf16 %v894_v18, %v886_v17  ;;  %v885_v22 = vld [vmem:[%s15497_s4 + $0x2b0] sm:$0xff]  ;;  %v1030_v12 = vld [vmem:[%s15497_s4 + $0x738] sm:$0xff] }
 0x1f0   :  { %6767 = vmatpush1.bf16.msra.mxu0 %v6766_v26  ;;  %v910_v26 = vld [vmem:[%s15497_s4 + $0x378] sm:$0xff]  ;;  %v6862_v27 = vpack.c.bf16 %v893_v23, %v885_v22  ;;  %v1029_v15 = vld [vmem:[%s15497_s4 + $0x730] sm:$0xff] }
 0x1f1   :  { %6769 = vmatprep.subr.bf16.mxu0 %v6768_v24  ;;  %v6864_v28 = vpack.c.bf16 %v910_v26, %v902_v25  ;;  %v901_v24 = vld [vmem:[%s15497_s4 + $0x330] sm:$0xff]  ;;  %v1038_v39 = vld [vmem:[%s15497_s4 + $0x778] sm:$0xff] }
 0x1f2   :  { %6831 = vmatpush1.bf16.msra.mxu1 %v6830_v33  ;;  %v926_v33 = vld [vmem:[%s15497_s4 + $0x3f8] sm:$0xff]  ;;  %v6866_v35 = vpack.c.bf16 %v909_v29, %v901_v24  ;;  %v1037_v16 = vld [vmem:[%s15497_s4 + $0x770] sm:$0xff]  ;;  %v1536_v24 = vld [vmem:[%s15497_s4 + $0x8] sm:$0xff] }
 0x1f3   :  { %6833 = vmatprep.subr.bf16.mxu1 %v6832_v37  ;;  %v6868_v36 = vpack.c.bf16 %v926_v33, %v918_v30  ;;  %v917_v37 = vld [vmem:[%s15497_s4 + $0x3b0] sm:$0xff]  ;;  %v1046_v17 = vld [vmem:[%s15497_s4 + $0x7b8] sm:$0xff]  ;;  %v1535_v30 = vld [vmem:[%s15497_s4] sm:$0xff] }
 0x1f4   :  { %6771 = vmatpush1.bf16.msra.mxu0 %v6770_v41  ;;  %v942_v41 = vld [vmem:[%s15497_s4 + $0x478] sm:$0xff]  ;;  %v6870_v42 = vpack.c.bf16 %v925_v38, %v917_v37  ;;  %v1045_v22 = vld [vmem:[%s15497_s4 + $0x7b0] sm:$0xff]  ;;  %v1543_v33 = vld [vmem:[%s15497_s4 + $0x40] sm:$0xff] }
 0x1f5   :  { %6773 = vmatprep.subr.bf16.mxu0 %v6772_v44  ;;  %v6872_v43 = vpack.c.bf16 %v942_v41, %v934_v40  ;;  %v933_v44 = vld [vmem:[%s15497_s4 + $0x430] sm:$0xff]  ;;  %v1054_v18 = vld [vmem:[%s15497_s4 + $0x7f8] sm:$0xff]  ;;  %v1560_v37 = vld [vmem:[%s15497_s4 + $0xc8] sm:$0xff] }
 0x1f6   :  { %6835 = vmatpush1.bf16.msra.mxu1 %v6834_v47  ;;  %v958_v47 = vld [vmem:[%s15497_s4 + $0x4f8] sm:$0xff]  ;;  %v6874_v48 = vpack.c.bf16 %v941_v45, %v933_v44  ;;  %v1053_v23 = vld [vmem:[%s15497_s4 + $0x7f0] sm:$0xff]  ;;  %v1551_v38 = vld [vmem:[%s15497_s4 + $0x80] sm:$0xff] }
 0x1f7   :  { %6837 = vmatprep.subr.bf16.mxu1 %v6836_v50  ;;  %v6876_v49 = vpack.c.bf16 %v958_v47, %v950_v46  ;;  %v949_v50 = vld [vmem:[%s15497_s4 + $0x4b0] sm:$0xff]  ;;  %v6902_v25 = vpack.c.bf16 %v1053_v23, %v1045_v22  ;;  %v5995_v26 = vld [vmem:[%s15496_s1 + $0x18] sm:$0xff]  ;;  %v1559_v40 = vld [vmem:[%s15497_s4 + $0xc0] sm:$0xff] }
 0x1f8   :  { %6775 = vmatpush1.bf16.msra.mxu0 %v6774_v54  ;;  %v974_v54 = vld [vmem:[%s15497_s4 + $0x578] sm:$0xff]  ;;  %2255 = vperm.xlu1 %8666, %v5995_v26   ;;  %v6942_v44 = vpack.c.bf16 %v1559_v40, %v1551_v38  ;;  %v1567_v46 = vld [vmem:[%s15497_s4 + $0x100] sm:$0xff]  ;;  %v1672_v26 = vld [vmem:[%s15497_s4 + $0x448] sm:$0xff] }
 0x1f9   :  { %6841 = vmatprep.subr.bf16.mxu0 %v6840_v56  ;;  %v6878_v56 = vpack.c.bf16 %v957_v51, %v949_v50  ;;  %v6880_v57 = vpack.c.bf16 %v974_v54, %v966_v53  ;;  %v1575_v47 = vld [vmem:[%s15497_s4 + $0x140] sm:$0xff]  ;;  %v1406_v40 = vld [vmem:[%s15499_s5 + $0x10] sm:$0xff] }
 0x1fa   :  { %6839 = vmatpush1.bf16.msra.mxu1 %v6838_v59  ;;  %v973_v59 = vld [vmem:[%s15497_s4 + $0x570] sm:$0xff]  ;;  %v6946_v50 = vpack.c.bf16 %v1575_v47, %v1567_v46  ;;  %v1583_v53 = vld [vmem:[%s15497_s4 + $0x180] sm:$0xff] }
 0x1fb   :  { %1191 = vmatmul.mubr.f32.vlgmr.msra.gmra.mrb[6].mxu0 %v9991_v60  ;;  %v1591_v54 = vld [vmem:[%s15497_s4 + $0x1c0] sm:$0xff] }
 0x1fc   :  { %6843 = vmatpush1.bf16.msra.mxu0 %v6842_v63  ;;  %1332 = vmatprep.mubr.f32.mxu0 %v9982_v55  ;;  %v862_v55 = vld [vmem:[%s15497_s4 + $0x1f8] sm:$0xff]  ;;  %v6882_v63 = vpack.c.bf16 %v973_v59, %v965_v58  ;;  %v6950_v58 = vpack.c.bf16 %v1591_v54, %v1583_v53  ;;  %v1679_v46 = vld [vmem:[%s15497_s4 + $0x480] sm:$0xff]  ;;  %v1409_v54 = vld [vmem:[%s15499_s5 + $0x28] sm:$0xff] }
 0x1fd   :  { %1262 = vmatmul.mubr.f32.vlgmr.msra.gmra.mrb[6].mxu1 %v9991_v60  ;;  %6845 = vmatprep.subr.bf16.mxu0 %v6844_v0  ;;  %v6852_v9 = vpack.c.bf16 %v862_v55, %v854_v20  ;;  %v6884_v0 = vpack.c.bf16 %v990_v62, %v982_v61  ;;  %v1014_v20 = vld [vmem:[%s15497_s4 + $0x6b8] sm:$0xff]  ;;  %v1599_v61 = vld [vmem:[%s15497_s4 + $0x200] sm:$0xff] }
 0x1fe   :  { %v1022_v55 = vld [vmem:[%s15497_s4 + $0x6f8] sm:$0xff]  ;;  %v1607_v62 = vld [vmem:[%s15497_s4 + $0x240] sm:$0xff] }
 0x1ff   :  { %v1687_v47 = vld [vmem:[%s15497_s4 + $0x4c0] sm:$0xff] }
 0x200   :  { %6847 = vmatpush1.bf16.msra.mxu0 %v6846_v5  ;;  %v6886_v5 = vpack.c.bf16 %v989_v2, %v981_v1  ;;  %v6954_v1 = vpack.c.bf16 %v1607_v62, %v1599_v61  ;;  %v1408_v53 = vld [vmem:[%s15499_s5 + $0x20] sm:$0xff] }
 0x201   :  { %6849 = vmatprep.subr.bf16.mxu0 %v6848_v6  ;;  %v6888_v6 = vpack.c.bf16 %v1006_v4, %v998_v3  ;;  %v1615_v3 = vld [vmem:[%s15497_s4 + $0x280] sm:$0xff] }
 0x202   :  { %v1623_v4 = vld [vmem:[%s15497_s4 + $0x2c0] sm:$0xff] }
 0x203   :  { %v1695_v61 = vld [vmem:[%s15497_s4 + $0x500] sm:$0xff] }
 0x204   :  { %6851 = vmatpush1.bf16.msra.mxu0 %v6850_v8  ;;  %v6890_v8 = vpack.c.bf16 %v1005_v31, %v997_v7  ;;  %v6958_v7 = vpack.c.bf16 %v1623_v4, %v1615_v3  ;;  %v1703_v62 = vld [vmem:[%s15497_s4 + $0x540] sm:$0xff]  ;;  %v1410_v3 = vld [vmem:[%s15499_s5 + $0x30] sm:$0xff]  ;;  %v1411_v4 = vld [vmem:[%s15499_s5 + $0x38] sm:$0xff] }
 0x205   :  { %6853 = vmatprep.subr.bf16.mxu0 %v6852_v9  ;;  %v6892_v9 = vpack.c.bf16 %v1022_v55, %v1014_v20  ;;  %v1631_v20 = vld [vmem:[%s15497_s4 + $0x300] sm:$0xff] }
 0x206   :  { %v1639_v55 = vld [vmem:[%s15497_s4 + $0x340] sm:$0xff] }
 0x208   :  { %6855 = vmatpush1.bf16.msra.mxu0 %v6854_v13  ;;  %v6894_v13 = vpack.c.bf16 %v1021_v11, %v1013_v10  ;;  %v6962_v10 = vpack.c.bf16 %v1639_v55, %v1631_v20  ;;  %v1711_v20 = vld [vmem:[%s15497_s4 + $0x580] sm:$0xff] }
 0x209   :  { %6857 = vmatprep.subr.bf16.mxu0 %v6856_v14  ;;  %v6896_v14 = vpack.c.bf16 %v1038_v39, %v1030_v12  ;;  %v1647_v12 = vld [vmem:[%s15497_s4 + $0x380] sm:$0xff] }
 0x20a   :  { %v1655_v39 = vld [vmem:[%s15497_s4 + $0x3c0] sm:$0xff] }
 0x20b   :  { %v1719_v55 = vld [vmem:[%s15497_s4 + $0x5c0] sm:$0xff] }
 0x20c   :  { %6859 = vmatpush1.bf16.msra.mxu0 %v6858_v19  ;;  %v6898_v19 = vpack.c.bf16 %v1037_v16, %v1029_v15  ;;  %v1421_v15 = vld [vmem:[%s15499_s5 + $0x88] sm:$0xff] }
 0x20d   :  { %6861 = vmatprep.subr.bf16.mxu0 %v6860_v21  ;;  %v6900_v21 = vpack.c.bf16 %v1054_v18, %v1046_v17  ;;  %v1404_v18 = vld [vmem:[%s15499_s5] sm:$0xff] }
 0x210   :  { %6863 = vmatpush1.bf16.msra.mxu0 %v6862_v27  ;;  %v6029_v27 = vld [vmem:[%s15496_s1 + $0x28] sm:$0xff] }
 0x211   :  { %6865 = vmatprep.subr.bf16.mxu0 %v6864_v28  ;;  %3727 = vperm.xlu1 %8666, %v6029_v27   ;;  %v6063_v28 = vld [vmem:[%s15496_s1 + $0x38] sm:$0xff] }
 0x214   :  { %6867 = vmatpush1.bf16.msra.mxu0 %v6866_v35  ;;  %v1552_v35 = vld [vmem:[%s15497_s4 + $0x88] sm:$0xff] }
 0x215   :  { %6869 = vmatprep.subr.bf16.mxu0 %v6868_v36  ;;  %5199 = vperm.xlu1 %8666, %v6063_v28   ;;  %v6938_v36 = vpack.c.bf16 %v1543_v33, %v1535_v30  ;;  %v6940_v41 = vpack.c.bf16 %v1560_v37, %v1552_v35  ;;  %v1422_v35 = vld [vmem:[%s15499_s5 + $0x90] sm:$0xff] }
 0x218   :  { %6871 = vmatpush1.bf16.msra.mxu0 %v6870_v42  ;;  %v1568_v42 = vld [vmem:[%s15497_s4 + $0x108] sm:$0xff] }
 0x219   :  { %6873 = vmatprep.subr.bf16.mxu0 %v6872_v43  ;;  %v1576_v43 = vld [vmem:[%s15497_s4 + $0x148] sm:$0xff] }
 0x21a   :  { %v6944_v45 = vpack.c.bf16 %v1576_v43, %v1568_v42  ;;  %v1680_v43 = vld [vmem:[%s15497_s4 + $0x488] sm:$0xff] }
 0x21c   :  { %6875 = vmatpush1.bf16.msra.mxu0 %v6874_v48  ;;  %v1584_v48 = vld [vmem:[%s15497_s4 + $0x188] sm:$0xff] }
 0x21d   :  { %6877 = vmatprep.subr.bf16.mxu0 %v6876_v49  ;;  %v1592_v49 = vld [vmem:[%s15497_s4 + $0x1c8] sm:$0xff] }
 0x21e   :  { %v6948_v51 = vpack.c.bf16 %v1592_v49, %v1584_v48  ;;  %v6974_v48 = vpack.c.bf16 %v1687_v47, %v1679_v46  ;;  %v1424_v49 = vld [vmem:[%s15499_s5 + $0xa0] sm:$0xff] }
 0x21f   :  { %v1759_v46 = vld [vmem:[%s15497_s4 + $0x700] sm:$0xff] }
 0x220   :  { %6879 = vmatpush1.bf16.msra.mxu0 %v6878_v56  ;;  %v1600_v56 = vld [vmem:[%s15497_s4 + $0x208] sm:$0xff] }
 0x221   :  { %6881 = vmatprep.subr.bf16.mxu0 %v6880_v57  ;;  %v1608_v57 = vld [vmem:[%s15497_s4 + $0x248] sm:$0xff] }
 0x222   :  { %v6952_v59 = vpack.c.bf16 %v1608_v57, %v1600_v56  ;;  %v6914_v56 = vpack.c.bf16 %v1409_v54, %v1408_v53  ;;  %v1696_v57 = vld [vmem:[%s15497_s4 + $0x508] sm:$0xff]  ;;  %v1418_v54 = vld [vmem:[%s15499_s5 + $0x70] sm:$0xff] }
 0x224   :  { %6883 = vmatpush1.bf16.msra.mxu0 %v6882_v63  ;;  %v1616_v63 = vld [vmem:[%s15497_s4 + $0x288] sm:$0xff] }
 0x225   :  { %6885 = vmatprep.subr.bf16.mxu0 %v6884_v0  ;;  %v1624_v0 = vld [vmem:[%s15497_s4 + $0x2c8] sm:$0xff] }
 0x226   :  { %v6956_v2 = vpack.c.bf16 %v1624_v0, %v1616_v63  ;;  %v6978_v63 = vpack.c.bf16 %v1703_v62, %v1695_v61  ;;  %v1426_v0 = vld [vmem:[%s15499_s5 + $0xb0] sm:$0xff]  ;;  %v1783_v61 = vld [vmem:[%s15497_s4 + $0x7c0] sm:$0xff] }
 0x228   :  { %6887 = vmatpush1.bf16.msra.mxu0 %v6886_v5  ;;  %v1632_v5 = vld [vmem:[%s15497_s4 + $0x308] sm:$0xff] }
 0x229   :  { %6889 = vmatprep.subr.bf16.mxu0 %v6888_v6  ;;  %v1640_v6 = vld [vmem:[%s15497_s4 + $0x348] sm:$0xff] }
 0x22a   :  { %v6960_v31 = vpack.c.bf16 %v1640_v6, %v1632_v5  ;;  %v6918_v5 = vpack.c.bf16 %v1411_v4, %v1410_v3  ;;  %v1712_v6 = vld [vmem:[%s15497_s4 + $0x588] sm:$0xff] }
 0x22b   :  { %v1540_v4 = vld [vmem:[%s15497_s4 + $0x28] sm:$0xff] }
 0x22c   :  { %6891 = vmatpush1.bf16.msra.mxu0 %v6890_v8  ;;  %v1648_v8 = vld [vmem:[%s15497_s4 + $0x388] sm:$0xff] }
 0x22d   :  { %6893 = vmatprep.subr.bf16.mxu0 %v6892_v9  ;;  %v1656_v9 = vld [vmem:[%s15497_s4 + $0x3c8] sm:$0xff] }
 0x22e   :  { %v6964_v11 = vpack.c.bf16 %v1656_v9, %v1648_v8  ;;  %v6982_v8 = vpack.c.bf16 %v1719_v55, %v1711_v20  ;;  %v1428_v9 = vld [vmem:[%s15499_s5 + $0xc0] sm:$0xff] }
 0x230   :  { %6895 = vmatpush1.bf16.msra.mxu0 %v6894_v13  ;;  %v6966_v13 = vpack.c.bf16 %v1655_v39, %v1647_v12  ;;  %v1412_v12 = vld [vmem:[%s15499_s5 + $0x40] sm:$0xff]  ;;  %v1413_v39 = vld [vmem:[%s15499_s5 + $0x48] sm:$0xff] }
 0x231   :  { %6897 = vmatprep.subr.bf16.mxu0 %v6896_v14  ;;  %v1420_v14 = vld [vmem:[%s15499_s5 + $0x80] sm:$0xff] }
 0x232   :  { %v6904_v17 = vpack.c.bf16 %v1421_v15, %v1420_v14  ;;  %v1728_v14 = vld [vmem:[%s15497_s4 + $0x608] sm:$0xff] }
 0x233   :  { %v1736_v15 = vld [vmem:[%s15497_s4 + $0x648] sm:$0xff] }
 0x234   :  { %6899 = vmatpush1.bf16.msra.mxu0 %v6898_v19  ;;  %v1405_v19 = vld [vmem:[%s15499_s5 + $0x8] sm:$0xff]  ;;  %6905 = vmatprep.subr.bf16.mxu1 %v6904_v17  ;;  %v1727_v17 = vld [vmem:[%s15497_s4 + $0x600] sm:$0xff] }
 0x235   :  { %6901 = vmatprep.subr.bf16.mxu0 %v6900_v21  ;;  %v5960_v21 = vld [vmem:[%s15502_s6] ss:$0 sm:$0xff]  ;;  %v6906_v23 = vpack.c.bf16 %v1405_v19, %v1404_v18 }
 0x236   :  { %v1735_v18 = vld [vmem:[%s15497_s4 + $0x640] sm:$0xff] }
 0x237   :  { %6907 = vmatpush3.bf16.msra.mxu1 %v6906_v23  ;;  %v6986_v19 = vpack.c.bf16 %v1735_v18, %v1727_v17  ;;  %v1414_v23 = vld [vmem:[%s15499_s5 + $0x50] sm:$0xff]  ;;  %v5967_v17 = vld [vmem:[%s15500_s0 + $0x68] sm:$0xff] }
 0x238   :  { %6903 = vmatpush1.bf16.msra.mxu0 %v6902_v25  ;;  %v1664_v25 = vld [vmem:[%s15497_s4 + $0x408] sm:$0xff] }
 0x23b   :  { %1333 = vmatmul.mubr.f32.vlgmr.msra.gmra.mrb[8].mxu0 %v9991_v60  ;;  %v1544_v60 = vld [vmem:[%s15497_s4 + $0x48] sm:$0xff] }
 0x23c   :  { %v6936_v29 = vpack.c.bf16 %v1544_v60, %v1536_v24  ;;  %v6968_v24 = vpack.c.bf16 %v1672_v26, %v1664_v25  ;;  %v1663_v60 = vld [vmem:[%s15497_s4 + $0x400] sm:$0xff]  ;;  %v1415_v26 = vld [vmem:[%s15499_s5 + $0x58] sm:$0xff] }
 0x23e   :  { %6937 = vmatprep.subr.bf16.mxu0 %v6936_v29  ;;  %v1671_v29 = vld [vmem:[%s15497_s4 + $0x440] sm:$0xff] }
 0x23f   :  { %6939 = vmatpush1.bf16.msra.mxu0 %v6938_v36  ;;  %v6970_v33 = vpack.c.bf16 %v1671_v29, %v1663_v60  ;;  %v1423_v36 = vld [vmem:[%s15499_s5 + $0x98] sm:$0xff]  ;;  %v6926_v60 = vpack.c.bf16 %v1415_v26, %v1414_v23 }
 0x240   :  { %6941 = vmatprep.subr.bf16.mxu0 %v6940_v41  ;;  %v6908_v38 = vpack.c.bf16 %v1423_v36, %v1422_v35  ;;  %v1407_v41 = vld [vmem:[%s15499_s5 + $0x18] sm:$0xff]  ;;  %v1751_v35 = vld [vmem:[%s15497_s4 + $0x6c0] sm:$0xff] }
 0x241   :  { %v6910_v42 = vpack.c.bf16 %v1407_v41, %v1406_v40  ;;  %v1432_v36 = vld [vmem:[%s15499_s5 + $0xe0] sm:$0xff]  ;;  %v1417_v41 = vld [vmem:[%s15499_s5 + $0x68] sm:$0xff] }
 0x242   :  { %6909 = vmatprep.subr.bf16.mxu1 %v6908_v38  ;;  %v1433_v38 = vld [vmem:[%s15499_s5 + $0xe8] sm:$0xff]  ;;  %v1416_v40 = vld [vmem:[%s15499_s5 + $0x60] sm:$0xff] }
 0x243   :  { %6943 = vmatpush1.bf16.msra.mxu0 %v6942_v44  ;;  %v1688_v44 = vld [vmem:[%s15497_s4 + $0x4c8] sm:$0xff]  ;;  %6911 = vmatpush3.bf16.msra.mxu1 %v6910_v42  ;;  %v6928_v42 = vpack.c.bf16 %v1433_v38, %v1432_v36 }
 0x244   :  { %6945 = vmatprep.subr.bf16.mxu0 %v6944_v45  ;;  %v6972_v45 = vpack.c.bf16 %v1688_v44, %v1680_v43  ;;  %v6930_v43 = vpack.c.bf16 %v1417_v41, %v1416_v40  ;;  %v1760_v44 = vld [vmem:[%s15497_s4 + $0x708] sm:$0xff]  ;;  %v788_v41 = vmul.f32 %v9973_v52, %v9943_v32 }
 0x247   :  { %6947 = vmatpush1.bf16.msra.mxu0 %v6946_v50  ;;  %v1425_v50 = vld [vmem:[%s15499_s5 + $0xa8] sm:$0xff] }
 0x248   :  { %6949 = vmatprep.subr.bf16.mxu0 %v6948_v51  ;;  %v6912_v51 = vpack.c.bf16 %v1425_v50, %v1424_v49  ;;  %v1434_v49 = vld [vmem:[%s15499_s5 + $0xf0] sm:$0xff]  ;;  %v1435_v50 = vld [vmem:[%s15499_s5 + $0xf8] sm:$0xff] }
 0x249   :  { %v6932_v53 = vpack.c.bf16 %v1435_v50, %v1434_v49  ;;  %v5968_v49 = vld [vmem:[%s15500_s0 + $0x70] sm:$0xff]  ;;  %v5969_v50 = vld [vmem:[%s15500_s0 + $0x78] sm:$0xff] }
 0x24a   :  { %6913 = vmatprep.subr.bf16.mxu1 %v6912_v51 }
 0x24b   :  { %6951 = vmatpush1.bf16.msra.mxu0 %v6950_v58  ;;  %v1704_v58 = vld [vmem:[%s15497_s4 + $0x548] sm:$0xff]  ;;  %6915 = vmatpush3.bf16.msra.mxu1 %v6914_v56  ;;  %v1419_v56 = vld [vmem:[%s15499_s5 + $0x78] sm:$0xff] }
 0x24c   :  { %6953 = vmatprep.subr.bf16.mxu0 %v6952_v59  ;;  %v6976_v59 = vpack.c.bf16 %v1704_v58, %v1696_v57  ;;  %v1776_v57 = vld [vmem:[%s15497_s4 + $0x788] sm:$0xff]  ;;  %v6934_v62 = vpack.c.bf16 %v1419_v56, %v1418_v54 }
 0x24d   :  { %v1784_v58 = vld [vmem:[%s15497_s4 + $0x7c8] sm:$0xff] }
 0x24f   :  { %6955 = vmatpush1.bf16.msra.mxu0 %v6954_v1  ;;  %v1427_v1 = vld [vmem:[%s15499_s5 + $0xb8] sm:$0xff] }
 0x250   :  { %6957 = vmatprep.subr.bf16.mxu0 %v6956_v2  ;;  %v6916_v2 = vpack.c.bf16 %v1427_v1, %v1426_v0  ;;  %v1538_v1 = vld [vmem:[%s15497_s4 + $0x18] sm:$0xff] }
 0x252   :  { %6917 = vmatprep.subr.bf16.mxu1 %v6916_v2  ;;  %v1546_v2 = vld [vmem:[%s15497_s4 + $0x58] sm:$0xff] }
 0x253   :  { %6959 = vmatpush1.bf16.msra.mxu0 %v6958_v7  ;;  %v1720_v7 = vld [vmem:[%s15497_s4 + $0x5c8] sm:$0xff]  ;;  %6919 = vmatpush3.bf16.msra.mxu1 %v6918_v5  ;;  %v7000_v3 = vpack.c.bf16 %v1546_v2, %v1538_v1  ;;  %v1539_v2 = vld [vmem:[%s15497_s4 + $0x20] sm:$0xff] }
 0x254   :  { %6961 = vmatprep.subr.bf16.mxu0 %v6960_v31  ;;  %v6980_v31 = vpack.c.bf16 %v1720_v7, %v1712_v6  ;;  %v1548_v5 = vld [vmem:[%s15497_s4 + $0x68] sm:$0xff]  ;;  %v5962_v7 = vld [vmem:[%s15500_s0 + $0x40] sm:$0xff] }
 0x255   :  { %v7064_v6 = vpack.c.bf16 %v1548_v5, %v1540_v4  ;;  %v1547_v5 = vld [vmem:[%s15497_s4 + $0x60] sm:$0xff] }
 0x257   :  { %6963 = vmatpush1.bf16.msra.mxu0 %v6962_v10  ;;  %v1429_v10 = vld [vmem:[%s15499_s5 + $0xc8] sm:$0xff] }
 0x258   :  { %6965 = vmatprep.subr.bf16.mxu0 %v6964_v11  ;;  %v6920_v11 = vpack.c.bf16 %v1429_v10, %v1428_v9 }
 0x25a   :  { %6921 = vmatprep.subr.bf16.mxu1 %v6920_v11 }
 0x25b   :  { %6967 = vmatpush1.bf16.msra.mxu0 %v6966_v13  ;;  %v6922_v13 = vpack.c.bf16 %v1413_v39, %v1412_v12  ;;  %v5964_v12 = vld [vmem:[%s15500_s0 + $0x50] sm:$0xff] }
 0x25c   :  { %6969 = vmatprep.subr.bf16.mxu0 %v6968_v24  ;;  %v1752_v24 = vld [vmem:[%s15497_s4 + $0x6c8] sm:$0xff] }
 0x25d   :  { %6923 = vmatpush3.bf16.msra.mxu1 %v6922_v13  ;;  %v5965_v13 = vld [vmem:[%s15500_s0 + $0x58] sm:$0xff] }
 0x25f   :  { %6971 = vmatpush1.bf16.msra.mxu0 %v6970_v33  ;;  %v1743_v33 = vld [vmem:[%s15497_s4 + $0x680] sm:$0xff] }
 0x260   :  { %6973 = vmatprep.subr.bf16.mxu0 %v6972_v45  ;;  %v1768_v45 = vld [vmem:[%s15497_s4 + $0x748] sm:$0xff] }
 0x261   :  { %v6992_v47 = vpack.c.bf16 %v1768_v45, %v1760_v44 }
 0x263   :  { %6975 = vmatpush1.bf16.msra.mxu0 %v6974_v48  ;;  %v1767_v48 = vld [vmem:[%s15497_s4 + $0x740] sm:$0xff] }
 0x264   :  { %6977 = vmatprep.subr.bf16.mxu0 %v6976_v59  ;;  %v6994_v51 = vpack.c.bf16 %v1767_v48, %v1759_v46  ;;  %v1775_v59 = vld [vmem:[%s15497_s4 + $0x780] sm:$0xff] }
 0x265   :  { %v6998_v0 = vpack.c.bf16 %v1783_v61, %v1775_v59 }
 0x267   :  { %6979 = vmatpush1.bf16.msra.mxu0 %v6978_v63  ;;  %v6996_v63 = vpack.c.bf16 %v1784_v58, %v1776_v57 }
 0x268   :  { %6981 = vmatprep.subr.bf16.mxu0 %v6980_v31  ;;  %v5963_v31 = vld [vmem:[%s15500_s0 + $0x48] sm:$0xff] }
 0x26b   :  { %6983 = vmatpush1.bf16.msra.mxu0 %v6982_v8 }
 0x28e   :  { %v6112_v16 = vpop.f32.mrb[4].mxu0 }
 0x28f   :  { %v6113_v22 = vpop.f32.mrb[5].mxu0 }
 0x290   :  { %v6114_v27 = vadd.f32 %v6113_v22, %v6112_v16  ;;  %v10658_v28 = vpop.f32.mrb[4].mxu1  ;;  %v6984_v16 = vpack.c.bf16 %v1736_v15, %v1728_v14  ;;  %v1431_v22 = vld [vmem:[%s15499_s5 + $0xd8] sm:$0xff] }
 0x291   :  { %v10666_v30 = vpop.f32.mrb[5].mxu1  ;;  %v1339_v20 = vadd.f32 %v5962_v7, %v10658_v28  ;;  %v5966_v28 = vld [vmem:[%s15500_s0 + $0x60] sm:$0xff]  ;;  %v1562_v7 = vld [vmem:[%s15497_s4 + $0xd8] sm:$0xff] }
 0x292   :  { %v774_v37 = vadd.f32 %v6114_v27, %v5960_v21  ;;  %v1430_v21 = vld [vmem:[%s15499_s5 + $0xd0] sm:$0xff]  ;;  %6985 = vmatprep.subr.bf16.mxu0 %v6984_v16  ;;  %v1744_v27 = vld [vmem:[%s15497_s4 + $0x688] sm:$0xff]  ;;  %v1340_v55 = vadd.f32 %v5963_v31, %v10666_v30 }
 0x293   :  { %v6924_v25 = vpack.c.bf16 %v1431_v22, %v1430_v21  ;;  %6987 = vmatpush1.bf16.msra.mxu0 %v6986_v19  ;;  %v6988_v29 = vpack.c.bf16 %v1752_v24, %v1744_v27  ;;  %v5970_v8 = vmul.f32 -1.442695, %v1339_v20 }
 0x294   :  { %778 = vst.msk [vmem:[%s15503_s7] sm:$0xff] %vm777_vm0, %v774_v37  ;;  %v6990_v37 = vpack.c.bf16 %v1751_v35, %v1743_v33  ;;  %v5971_v9 = vmul.f32 -1.442695, %v1340_v55  ;;  %v1556_v55 = vld [vmem:[%s15497_s4 + $0xa8] sm:$0xff] }
 0x295   :  { %6925 = vmatprep.subr.bf16.mxu1 %v6924_v25  ;;  %6989 = vmatprep.subr.bf16.mxu0 %v6988_v29  ;;  %8699 = vpow2.f32 %v5970_v8  ;;  %v1564_v8 = vld [vmem:[%s15497_s4 + $0xe8] sm:$0xff] }
 0x296   :  { %6927 = vmatpush3.bf16.msra.mxu1 %v6926_v60  ;;  %8701 = vpow2.f32 %v5971_v9  ;;  %v10912_v9 = vpop.permute.xlu1 %1519 }
 0x297   :  { %6991 = vmatpush1.bf16.msra.mxu0 %v6990_v37  ;;  %6929 = vmatprep.subr.bf16.mxu1 %v6928_v42 }
 0x298   :  { %6993 = vmatprep.subr.bf16.mxu0 %v6992_v47 }
 0x29a   :  { %6931 = vmatpush3.bf16.msra.mxu1 %v6930_v43  ;;  %v789_v43 = vmul.f32 %v9973_v52, %v9945_v34 }
 0x29b   :  { %6933 = vmatprep.subr.bf16.mxu1 %v6932_v53  ;;  %6995 = vmatpush1.bf16.msra.mxu0 %v6994_v51 }
 0x29c   :  { %6997 = vmatprep.subr.bf16.mxu0 %v6996_v63  ;;  %v1537_v63 = vld [vmem:[%s15497_s4 + $0x10] sm:$0xff] }
 0x29e   :  { %6935 = vmatpush3.bf16.msra.mxu1 %v6934_v62 }
 0x29f   :  { %6999 = vmatpush1.bf16.msra.mxu0 %v6998_v0  ;;  %7001 = vmatprep.subr.bf16.mxu1 %v7000_v3  ;;  %v8700_v10 = vpop.eup %8699  ;;  %v1545_v0 = vld [vmem:[%s15497_s4 + $0x50] sm:$0xff] }
 0x2a0   :  { %7065 = vmatprep.subr.bf16.mxu0 %v7064_v6  ;;  %v8702_v11 = vpop.eup %8701  ;;  %v1353_v39 = vadd.f32 1.0, %v8700_v10  ;;  %v1554_v6 = vld [vmem:[%s15497_s4 + $0x98] sm:$0xff]  ;;  %v7002_v20 = vpack.c.bf16 %v1545_v0, %v1537_v63  ;;  %v1553_v10 = vld [vmem:[%s15497_s4 + $0x90] sm:$0xff]  ;;  %v1620_v63 = vld [vmem:[%s15497_s4 + $0x2a8] sm:$0xff] }
 0x2a1   :  { %v1354_v14 = vadd.f32 1.0, %v8702_v11  ;;  %v1561_v11 = vld [vmem:[%s15497_s4 + $0xd0] sm:$0xff]  ;;  %v1628_v0 = vld [vmem:[%s15497_s4 + $0x2e8] sm:$0xff] }
 0x2a2   :  { %8703 = vrcp.f32 %v1353_v39  ;;  %v7066_v39 = vpack.c.bf16 %v1547_v5, %v1539_v2  ;;  %v1617_v2 = vld [vmem:[%s15497_s4 + $0x290] sm:$0xff]  ;;  %v1634_v5 = vld [vmem:[%s15497_s4 + $0x318] sm:$0xff] }
 0x2a3   :  { %8705 = vrcp.f32 %v1354_v14  ;;  %v1570_v14 = vld [vmem:[%s15497_s4 + $0x118] sm:$0xff] }
 0x2ac   :  { %v8704_v27 = vpop.eup %8703 }
 0x2ad   :  { %v8706_v24 = vpop.eup %8705 }
 0x2ce   :  { %v1192_v15 = vpop.f32.mrb[6].mxu0 }
 0x2cf   :  { %v1341_v30 = vadd.f32 %v5964_v12, %v1192_v15  ;;  %v1194_v16 = vpop.f32.mrb[7].mxu0  ;;  %v1578_v15 = vld [vmem:[%s15497_s4 + $0x158] sm:$0xff] }
 0x2d0   :  { %v1342_v18 = vadd.f32 %v5965_v13, %v1194_v16  ;;  %v1263_v19 = vpop.f32.mrb[6].mxu1  ;;  %v7004_v13 = vpack.c.bf16 %v1562_v7, %v1554_v6  ;;  %v1555_v16 = vld [vmem:[%s15497_s4 + $0xa0] sm:$0xff]  ;;  %v1642_v6 = vld [vmem:[%s15497_s4 + $0x358] sm:$0xff]  ;;  %v7084_v7 = vpack.c.bf16 %v1628_v0, %v1620_v63  ;;  %v1700_v0 = vld [vmem:[%s15497_s4 + $0x528] sm:$0xff] }
 0x2d1   :  { %v5972_v21 = vmul.f32 -1.442695, %v1341_v30  ;;  %v1343_v22 = vadd.f32 %v5966_v28, %v1263_v19  ;;  %v1265_v23 = vpop.f32.mrb[7].mxu1  ;;  %v7068_v30 = vpack.c.bf16 %v1564_v8, %v1556_v55  ;;  %v1572_v19 = vld [vmem:[%s15497_s4 + $0x128] sm:$0xff] }
 0x2d2   :  { %v5973_v25 = vmul.f32 -1.442695, %v1342_v18  ;;  %v1344_v26 = vadd.f32 %v5967_v17, %v1265_v23  ;;  %v1563_v17 = vld [vmem:[%s15497_s4 + $0xe0] sm:$0xff]  ;;  %v7006_v18 = vpack.c.bf16 %v1561_v11, %v1553_v10  ;;  %v1569_v23 = vld [vmem:[%s15497_s4 + $0x110] sm:$0xff]  ;;  %v1636_v8 = vld [vmem:[%s15497_s4 + $0x328] sm:$0xff]  ;;  %v7024_v11 = vpack.c.bf16 %v1642_v6, %v1634_v5 }
 0x2d3   :  { %8707 = vpow2.f32 %v5972_v21  ;;  %v1580_v21 = vld [vmem:[%s15497_s4 + $0x168] sm:$0xff]  ;;  %v1714_v6 = vld [vmem:[%s15497_s4 + $0x598] sm:$0xff] }
 0x2d4   :  { %8709 = vpow2.f32 %v5973_v25  ;;  %v1577_v25 = vld [vmem:[%s15497_s4 + $0x150] sm:$0xff]  ;;  %v1644_v10 = vld [vmem:[%s15497_s4 + $0x368] sm:$0xff] }
 0x2d5   :  { %8711 = vtanh.f32 %v1343_v22  ;;  %v7008_v22 = vpack.c.bf16 %v1578_v15, %v1570_v14  ;;  %v1650_v15 = vld [vmem:[%s15497_s4 + $0x398] sm:$0xff] }
 0x2d6   :  { %8713 = vtanh.f32 %v1344_v26  ;;  %v7070_v26 = vpack.c.bf16 %v1563_v17, %v1555_v16  ;;  %v7088_v16 = vpack.c.bf16 %v1644_v10, %v1636_v8  ;;  %v1635_v17 = vld [vmem:[%s15497_s4 + $0x320] sm:$0xff]  ;;  %v1716_v10 = vld [vmem:[%s15497_s4 + $0x5a8] sm:$0xff] }
 0x2dd   :  { %v8708_v60 = vpop.eup %8707 }
 0x2de   :  { %v8710_v29 = vpop.eup %8709  ;;  %v1365_v33 = vadd.f32 1.0, %v8708_v60  ;;  %v7072_v60 = vpack.c.bf16 %v1580_v21, %v1572_v19  ;;  %v1652_v21 = vld [vmem:[%s15497_s4 + $0x3a8] sm:$0xff] }
 0x2df   :  { %v8712_v35 = vpop.eup %8711  ;;  %v1366_v36 = vadd.f32 1.0, %v8710_v29  ;;  %v1571_v29 = vld [vmem:[%s15497_s4 + $0x120] sm:$0xff] }
 0x2e0   :  { %v8714_v37 = vpop.eup %8713  ;;  %8715 = vrcp.f32 %v1365_v33  ;;  %v1387_v38 = vmul.f32 %v8712_v35, %v8704_v27  ;;  %v1586_v27 = vld [vmem:[%s15497_s4 + $0x198] sm:$0xff]  ;;  %v1579_v33 = vld [vmem:[%s15497_s4 + $0x160] sm:$0xff]  ;;  %v7010_v35 = vpack.c.bf16 %v1577_v25, %v1569_v23  ;;  %v1649_v25 = vld [vmem:[%s15497_s4 + $0x390] sm:$0xff] }
 0x2e1   :  { %8717 = vrcp.f32 %v1366_v36  ;;  %v1388_v40 = vmul.f32 %v8714_v37, %v8706_v24  ;;  %v1594_v24 = vld [vmem:[%s15497_s4 + $0x1d8] sm:$0xff]  ;;  %v1588_v36 = vld [vmem:[%s15497_s4 + $0x1a8] sm:$0xff] }
 0x2e2   :  { %v1596_v37 = vld [vmem:[%s15497_s4 + $0x1e8] sm:$0xff] }
 0x2ea   :  { %v8716_v42 = vpop.eup %8715 }
 0x2eb   :  { %v8718_v44 = vpop.eup %8717  ;;  %v1385_v45 = vmul.f32 %v8716_v42, %v788_v41  ;;  %v1593_v41 = vld [vmem:[%s15497_s4 + $0x1d0] sm:$0xff]  ;;  %v7074_v42 = vpack.c.bf16 %v1579_v33, %v1571_v29  ;;  %v1651_v33 = vld [vmem:[%s15497_s4 + $0x3a0] sm:$0xff] }
 0x2ec   :  { %v1386_v46 = vmul.f32 %v8718_v44, %v789_v43  ;;  %v1602_v43 = vld [vmem:[%s15497_s4 + $0x218] sm:$0xff] }
 0x2ed   :  { %v10876_v47 = vadd.f32 %v1387_v38, %v1385_v45  ;;  %v7012_v38 = vpack.c.bf16 %v1594_v24, %v1586_v27  ;;  %v1610_v44 = vld [vmem:[%s15497_s4 + $0x258] sm:$0xff]  ;;  %v7076_v45 = vpack.c.bf16 %v1596_v37, %v1588_v36  ;;  %v1668_v37 = vld [vmem:[%s15497_s4 + $0x428] sm:$0xff] }
 0x2ee   :  { %v10878_v48 = vadd.f32 %v1388_v40, %v1386_v46  ;;  %v1585_v40 = vld [vmem:[%s15497_s4 + $0x190] sm:$0xff]  ;;  %v1587_v46 = vld [vmem:[%s15497_s4 + $0x1a0] sm:$0xff]  ;;  %v1666_v24 = vld [vmem:[%s15497_s4 + $0x418] sm:$0xff] }
 0x30e   :  { %v1334_v32 = vpop.f32.mrb[8].mxu0 }
 0x30f   :  { %v1345_v51 = vadd.f32 %v5968_v49, %v1334_v32  ;;  %v1336_v53 = vpop.f32.mrb[9].mxu0  ;;  %v1595_v49 = vld [vmem:[%s15497_s4 + $0x1e0] sm:$0xff]  ;;  %v1604_v32 = vld [vmem:[%s15497_s4 + $0x228] sm:$0xff] }
 0x310   :  { %v1346_v54 = vadd.f32 %v5969_v50, %v1336_v53  ;;  %v7014_v50 = vpack.c.bf16 %v1593_v41, %v1585_v40  ;;  %v7016_v53 = vpack.c.bf16 %v1610_v44, %v1602_v43  ;;  %v1665_v41 = vld [vmem:[%s15497_s4 + $0x410] sm:$0xff]  ;;  %v1682_v44 = vld [vmem:[%s15497_s4 + $0x498] sm:$0xff] }
 0x311   :  { %v5974_v34 = vmul.f32 -1.442695, %v1345_v51  ;;  %v1612_v51 = vld [vmem:[%s15497_s4 + $0x268] sm:$0xff] }
 0x312   :  { %v5975_v52 = vmul.f32 -1.442695, %v1346_v54  ;;  %v1601_v54 = vld [vmem:[%s15497_s4 + $0x210] sm:$0xff] }
 0x313   :  { %8719 = vpow2.f32 %v5974_v34  ;;  %v1609_v34 = vld [vmem:[%s15497_s4 + $0x250] sm:$0xff] }
 0x314   :  { %8721 = vpow2.f32 %v5975_v52  ;;  %v7078_v52 = vpack.c.bf16 %v1595_v49, %v1587_v46  ;;  %v1667_v49 = vld [vmem:[%s15497_s4 + $0x420] sm:$0xff] }
 0x315   :  { %8723 = vtanh.f32 %v10876_v47 }
 0x316   :  { %8725 = vtanh.f32 %v10878_v48 }
 0x31d   :  { %v8720_v56 = vpop.eup %8719 }
 0x31e   :  { %v8722_v57 = vpop.eup %8721  ;;  %v1379_v58 = vadd.f32 1.0, %v8720_v56  ;;  %v1618_v56 = vld [vmem:[%s15497_s4 + $0x298] sm:$0xff] }
 0x31f   :  { %v1380_v59 = vadd.f32 1.0, %v8722_v57  ;;  %v8724_v61 = vpop.eup %8723  ;;  %v1626_v57 = vld [vmem:[%s15497_s4 + $0x2d8] sm:$0xff] }
 0x320   :  { %8727 = vrcp.f32 %v1379_v58  ;;  %v8726_v62 = vpop.eup %8725  ;;  %v7080_v58 = vpack.c.bf16 %v1612_v51, %v1604_v32  ;;  %v1684_v51 = vld [vmem:[%s15497_s4 + $0x4a8] sm:$0xff] }
 0x321   :  { %8729 = vrcp.f32 %v1380_v59  ;;  %v1603_v59 = vld [vmem:[%s15497_s4 + $0x220] sm:$0xff] }
 0x32a   :  { %v8728_v1 = vpop.eup %8727 }
 0x32b   :  { %v8730_v3 = vpop.eup %8729  ;;  %v1393_v4 = vmul.f32 %v8728_v1, %v8724_v61  ;;  %v1611_v61 = vld [vmem:[%s15497_s4 + $0x260] sm:$0xff]  ;;  %v7020_v1 = vpack.c.bf16 %v1626_v57, %v1618_v56  ;;  %v1698_v57 = vld [vmem:[%s15497_s4 + $0x518] sm:$0xff] }
 0x32c   :  { %v1394_v31 = vmul.f32 %v8730_v3, %v8726_v62  ;;  %v7018_v62 = vpack.c.bf16 %v1609_v34, %v1601_v54  ;;  %v1625_v3 = vld [vmem:[%s15497_s4 + $0x2d0] sm:$0xff] }
 0x32d   :  { %v10930_v28 = vmul.f32 %v10912_v9, %v1393_v4  ;;  %v7022_v55 = vpack.c.bf16 %v1625_v3, %v1617_v2  ;;  %v1681_v34 = vld [vmem:[%s15497_s4 + $0x490] sm:$0xff] }
 0x32e   :  { %1507 = vmatprep.mubr.f32.mxu1 %v1394_v31  ;;  %v10921_v12 = vmul.f32 %v10912_v9, %v1394_v31  ;;  %v1619_v31 = vld [vmem:[%s15497_s4 + $0x2a0] sm:$0xff]  ;;  %v1697_v3 = vld [vmem:[%s15497_s4 + $0x510] sm:$0xff] }
 0x32f   :  { %1508 = vmatmul.mubr.f32.vlgmr.msra.gmra.mrb[8].mxu1 %v1393_v4  ;;  %v7082_v4 = vpack.c.bf16 %v1611_v61, %v1603_v59  ;;  %v1683_v61 = vld [vmem:[%s15497_s4 + $0x4a0] sm:$0xff] }
 0x330   :  { %7003 = vmatpush1.bf16.msra.mxu1 %v7002_v20  ;;  %1855 = vmatprep.mubr.f32.mxu0 %v10921_v12  ;;  %v1627_v20 = vld [vmem:[%s15497_s4 + $0x2e0] sm:$0xff] }
 0x331   :  { %1926 = vmatprep.mubr.f32.mxu1 %v10921_v12  ;;  %1856 = vmatmul.mubr.f32.vlgmr.msra.gmra.mrb[10].mxu0 %v10930_v28  ;;  %v7086_v14 = vpack.c.bf16 %v1627_v20, %v1619_v31  ;;  %v1699_v20 = vld [vmem:[%s15497_s4 + $0x520] sm:$0xff] }
 0x332   :  { %7067 = vmatpush1.bf16.msra.mxu0 %v7066_v39  ;;  %7005 = vmatprep.subr.bf16.mxu1 %v7004_v13  ;;  %v1633_v39 = vld [vmem:[%s15497_s4 + $0x310] sm:$0xff] }
 0x333   :  { %1997 = vmatprep.mubr.f32.mxu0 %v10921_v12  ;;  %7069 = vmatprep.subr.bf16.mxu0 %v7068_v30  ;;  %v1641_v13 = vld [vmem:[%s15497_s4 + $0x350] sm:$0xff]  ;;  %v1658_v30 = vld [vmem:[%s15497_s4 + $0x3d8] sm:$0xff] }
 0x334   :  { %7007 = vmatpush1.bf16.msra.mxu1 %v7006_v18  ;;  %v1643_v18 = vld [vmem:[%s15497_s4 + $0x360] sm:$0xff]  ;;  %v7026_v19 = vpack.c.bf16 %v1641_v13, %v1633_v39  ;;  %v7028_v23 = vpack.c.bf16 %v1658_v30, %v1650_v15  ;;  %v1713_v13 = vld [vmem:[%s15497_s4 + $0x590] sm:$0xff]  ;;  %v1730_v30 = vld [vmem:[%s15497_s4 + $0x618] sm:$0xff] }
 0x335   :  { %7009 = vmatprep.subr.bf16.mxu1 %v7008_v22  ;;  %v1660_v22 = vld [vmem:[%s15497_s4 + $0x3e8] sm:$0xff]  ;;  %v7090_v27 = vpack.c.bf16 %v1643_v18, %v1635_v17  ;;  %v1715_v18 = vld [vmem:[%s15497_s4 + $0x5a0] sm:$0xff] }
 0x336   :  { %7071 = vmatpush1.bf16.msra.mxu0 %v7070_v26  ;;  %v1657_v26 = vld [vmem:[%s15497_s4 + $0x3d0] sm:$0xff]  ;;  %v7092_v29 = vpack.c.bf16 %v1660_v22, %v1652_v21  ;;  %v1732_v22 = vld [vmem:[%s15497_s4 + $0x628] sm:$0xff] }
 0x337   :  { %7073 = vmatprep.subr.bf16.mxu0 %v7072_v60  ;;  %v1674_v60 = vld [vmem:[%s15497_s4 + $0x458] sm:$0xff]  ;;  %v7030_v36 = vpack.c.bf16 %v1657_v26, %v1649_v25  ;;  %v1729_v26 = vld [vmem:[%s15497_s4 + $0x610] sm:$0xff] }
 0x338   :  { %7011 = vmatpush1.bf16.msra.mxu1 %v7010_v35  ;;  %v1659_v35 = vld [vmem:[%s15497_s4 + $0x3e0] sm:$0xff]  ;;  %v7032_v40 = vpack.c.bf16 %v1674_v60, %v1666_v24  ;;  %v1746_v60 = vld [vmem:[%s15497_s4 + $0x698] sm:$0xff] }
 0x339   :  { %7013 = vmatprep.subr.bf16.mxu1 %v7012_v38  ;;  %v1676_v38 = vld [vmem:[%s15497_s4 + $0x468] sm:$0xff]  ;;  %v7094_v43 = vpack.c.bf16 %v1659_v35, %v1651_v33  ;;  %v1731_v35 = vld [vmem:[%s15497_s4 + $0x620] sm:$0xff] }
 0x33a   :  { %7075 = vmatpush1.bf16.msra.mxu0 %v7074_v42  ;;  %v1673_v42 = vld [vmem:[%s15497_s4 + $0x450] sm:$0xff]  ;;  %v7096_v46 = vpack.c.bf16 %v1676_v38, %v1668_v37  ;;  %v1748_v38 = vld [vmem:[%s15497_s4 + $0x6a8] sm:$0xff] }
 0x33b   :  { %7077 = vmatprep.subr.bf16.mxu0 %v7076_v45  ;;  %v1690_v45 = vld [vmem:[%s15497_s4 + $0x4d8] sm:$0xff]  ;;  %v7034_v32 = vpack.c.bf16 %v1673_v42, %v1665_v41  ;;  %v1745_v42 = vld [vmem:[%s15497_s4 + $0x690] sm:$0xff] }
 0x33c   :  { %7015 = vmatpush1.bf16.msra.mxu1 %v7014_v50  ;;  %v1675_v50 = vld [vmem:[%s15497_s4 + $0x460] sm:$0xff]  ;;  %v7036_v54 = vpack.c.bf16 %v1690_v45, %v1682_v44  ;;  %v1762_v45 = vld [vmem:[%s15497_s4 + $0x718] sm:$0xff] }
 0x33d   :  { %7017 = vmatprep.subr.bf16.mxu1 %v7016_v53  ;;  %v1692_v53 = vld [vmem:[%s15497_s4 + $0x4e8] sm:$0xff]  ;;  %v7098_v56 = vpack.c.bf16 %v1675_v50, %v1667_v49  ;;  %v1747_v50 = vld [vmem:[%s15497_s4 + $0x6a0] sm:$0xff] }
 0x33e   :  { %7079 = vmatpush1.bf16.msra.mxu0 %v7078_v52  ;;  %v1689_v52 = vld [vmem:[%s15497_s4 + $0x4d0] sm:$0xff]  ;;  %v7100_v59 = vpack.c.bf16 %v1692_v53, %v1684_v51  ;;  %v1764_v53 = vld [vmem:[%s15497_s4 + $0x728] sm:$0xff] }
 0x33f   :  { %7081 = vmatprep.subr.bf16.mxu0 %v7080_v58  ;;  %v1706_v58 = vld [vmem:[%s15497_s4 + $0x558] sm:$0xff]  ;;  %v7038_v63 = vpack.c.bf16 %v1689_v52, %v1681_v34  ;;  %v1761_v52 = vld [vmem:[%s15497_s4 + $0x710] sm:$0xff] }
 0x340   :  { %7019 = vmatpush1.bf16.msra.mxu1 %v7018_v62  ;;  %v1691_v62 = vld [vmem:[%s15497_s4 + $0x4e0] sm:$0xff]  ;;  %v7040_v2 = vpack.c.bf16 %v1706_v58, %v1698_v57  ;;  %v1778_v58 = vld [vmem:[%s15497_s4 + $0x798] sm:$0xff] }
 0x341   :  { %7021 = vmatprep.subr.bf16.mxu1 %v7020_v1  ;;  %v1708_v1 = vld [vmem:[%s15497_s4 + $0x568] sm:$0xff]  ;;  %v7102_v5 = vpack.c.bf16 %v1691_v62, %v1683_v61  ;;  %v1763_v62 = vld [vmem:[%s15497_s4 + $0x720] sm:$0xff] }
 0x342   :  { %7083 = vmatpush1.bf16.msra.mxu0 %v7082_v4  ;;  %v1705_v4 = vld [vmem:[%s15497_s4 + $0x550] sm:$0xff]  ;;  %v7104_v31 = vpack.c.bf16 %v1708_v1, %v1700_v0  ;;  %v1780_v1 = vld [vmem:[%s15497_s4 + $0x7a8] sm:$0xff] }
 0x343   :  { %7085 = vmatprep.subr.bf16.mxu0 %v7084_v7  ;;  %v1722_v7 = vld [vmem:[%s15497_s4 + $0x5d8] sm:$0xff]  ;;  %v7042_v8 = vpack.c.bf16 %v1705_v4, %v1697_v3  ;;  %v1777_v4 = vld [vmem:[%s15497_s4 + $0x790] sm:$0xff] }
 0x344   :  { %7023 = vmatpush1.bf16.msra.mxu1 %v7022_v55  ;;  %v1707_v55 = vld [vmem:[%s15497_s4 + $0x560] sm:$0xff]  ;;  %v7044_v39 = vpack.c.bf16 %v1722_v7, %v1714_v6  ;;  %v1542_v7 = vld [vmem:[%s15497_s4 + $0x38] sm:$0xff] }
 0x345   :  { %7025 = vmatprep.subr.bf16.mxu1 %v7024_v11  ;;  %v1724_v11 = vld [vmem:[%s15497_s4 + $0x5e8] sm:$0xff]  ;;  %v7106_v15 = vpack.c.bf16 %v1707_v55, %v1699_v20  ;;  %v1779_v55 = vld [vmem:[%s15497_s4 + $0x7a0] sm:$0xff] }
 0x346   :  { %7087 = vmatpush1.bf16.msra.mxu0 %v7086_v14  ;;  %v1721_v14 = vld [vmem:[%s15497_s4 + $0x5d0] sm:$0xff]  ;;  %v7108_v17 = vpack.c.bf16 %v1724_v11, %v1716_v10 }
 0x347   :  { %7089 = vmatprep.subr.bf16.mxu0 %v7088_v16  ;;  %v1738_v16 = vld [vmem:[%s15497_s4 + $0x658] sm:$0xff]  ;;  %v7046_v21 = vpack.c.bf16 %v1721_v14, %v1713_v13  ;;  %v1549_v13 = vld [vmem:[%s15497_s4 + $0x70] sm:$0xff] }
 0x348   :  { %7027 = vmatpush1.bf16.msra.mxu1 %v7026_v19  ;;  %v1723_v19 = vld [vmem:[%s15497_s4 + $0x5e0] sm:$0xff]  ;;  %v7048_v25 = vpack.c.bf16 %v1738_v16, %v1730_v30  ;;  %v1566_v30 = vld [vmem:[%s15497_s4 + $0xf8] sm:$0xff] }
 0x349   :  { %7029 = vmatprep.subr.bf16.mxu1 %v7028_v23  ;;  %v1740_v23 = vld [vmem:[%s15497_s4 + $0x668] sm:$0xff]  ;;  %v7110_v24 = vpack.c.bf16 %v1723_v19, %v1715_v18  ;;  %v1557_v18 = vld [vmem:[%s15497_s4 + $0xb0] sm:$0xff] }
 0x34a   :  { %7091 = vmatpush1.bf16.msra.mxu0 %v7090_v27  ;;  %v1737_v27 = vld [vmem:[%s15497_s4 + $0x650] sm:$0xff]  ;;  %v7112_v33 = vpack.c.bf16 %v1740_v23, %v1732_v22  ;;  %v1582_v22 = vld [vmem:[%s15497_s4 + $0x178] sm:$0xff] }
 0x34b   :  { %7093 = vmatprep.subr.bf16.mxu0 %v7092_v29  ;;  %v1754_v29 = vld [vmem:[%s15497_s4 + $0x6d8] sm:$0xff]  ;;  %v7050_v37 = vpack.c.bf16 %v1737_v27, %v1729_v26  ;;  %v1565_v19 = vld [vmem:[%s15497_s4 + $0xf0] sm:$0xff] }
 0x34c   :  { %7031 = vmatpush1.bf16.msra.mxu1 %v7030_v36  ;;  %v1739_v36 = vld [vmem:[%s15497_s4 + $0x660] sm:$0xff]  ;;  %v7052_v41 = vpack.c.bf16 %v1754_v29, %v1746_v60  ;;  %v7134_v23 = vpack.c.bf16 %v1565_v19, %v1557_v18  ;;  %v1573_v26 = vld [vmem:[%s15497_s4 + $0x130] sm:$0xff] }
 0x34d   :  { %7033 = vmatprep.subr.bf16.mxu1 %v7032_v40  ;;  %v1756_v40 = vld [vmem:[%s15497_s4 + $0x6e8] sm:$0xff]  ;;  %v7114_v44 = vpack.c.bf16 %v1739_v36, %v1731_v35  ;;  %v1581_v27 = vld [vmem:[%s15497_s4 + $0x170] sm:$0xff]  ;;  %v1606_v36 = vld [vmem:[%s15497_s4 + $0x238] sm:$0xff] }
 0x34e   :  { %7095 = vmatpush1.bf16.msra.mxu0 %v7094_v43  ;;  %v1753_v43 = vld [vmem:[%s15497_s4 + $0x6d0] sm:$0xff]  ;;  %v7116_v49 = vpack.c.bf16 %v1756_v40, %v1748_v38  ;;  %v7138_v60 = vpack.c.bf16 %v1581_v27, %v1573_v26 }
 0x34f   :  { %7097 = vmatprep.subr.bf16.mxu0 %v7096_v46  ;;  %v1770_v46 = vld [vmem:[%s15497_s4 + $0x758] sm:$0xff]  ;;  %v7054_v51 = vpack.c.bf16 %v1753_v43, %v1745_v42  ;;  %v1597_v35 = vld [vmem:[%s15497_s4 + $0x1f0] sm:$0xff] }
 0x350   :  { %7035 = vmatpush1.bf16.msra.mxu1 %v7034_v32  ;;  %v1755_v32 = vld [vmem:[%s15497_s4 + $0x6e0] sm:$0xff]  ;;  %v7056_v34 = vpack.c.bf16 %v1770_v46, %v1762_v45  ;;  %v1613_v42 = vld [vmem:[%s15497_s4 + $0x270] sm:$0xff]  ;;  %v1622_v43 = vld [vmem:[%s15497_s4 + $0x2b8] sm:$0xff] }
 0x351   :  { %7037 = vmatprep.subr.bf16.mxu1 %v7036_v54  ;;  %v1772_v54 = vld [vmem:[%s15497_s4 + $0x768] sm:$0xff]  ;;  %v7118_v57 = vpack.c.bf16 %v1755_v32, %v1747_v50  ;;  %v1629_v50 = vld [vmem:[%s15497_s4 + $0x2f0] sm:$0xff]  ;;  %v1638_v32 = vld [vmem:[%s15497_s4 + $0x338] sm:$0xff] }
 0x352   :  { %7099 = vmatpush1.bf16.msra.mxu0 %v7098_v56  ;;  %v1769_v56 = vld [vmem:[%s15497_s4 + $0x750] sm:$0xff]  ;;  %v7120_v61 = vpack.c.bf16 %v1772_v54, %v1764_v53 }
 0x353   :  { %7101 = vmatprep.subr.bf16.mxu0 %v7100_v59  ;;  %v1786_v59 = vld [vmem:[%s15497_s4 + $0x7d8] sm:$0xff]  ;;  %v7058_v0 = vpack.c.bf16 %v1769_v56, %v1761_v52  ;;  %v1645_v52 = vld [vmem:[%s15497_s4 + $0x370] sm:$0xff] }
 0x354   :  { %7039 = vmatpush1.bf16.msra.mxu1 %v7038_v63  ;;  %v1771_v63 = vld [vmem:[%s15497_s4 + $0x760] sm:$0xff]  ;;  %v7060_v3 = vpack.c.bf16 %v1786_v59, %v1778_v58  ;;  %v1654_v56 = vld [vmem:[%s15497_s4 + $0x3b8] sm:$0xff]  ;;  %v1717_v18 = vld [vmem:[%s15497_s4 + $0x5b0] sm:$0xff] }
 0x355   :  { %7041 = vmatprep.subr.bf16.mxu1 %v7040_v2  ;;  %v1788_v2 = vld [vmem:[%s15497_s4 + $0x7e8] sm:$0xff]  ;;  %v7122_v6 = vpack.c.bf16 %v1771_v63, %v1763_v62  ;;  %v1661_v62 = vld [vmem:[%s15497_s4 + $0x3f0] sm:$0xff]  ;;  %v1670_v63 = vld [vmem:[%s15497_s4 + $0x438] sm:$0xff] }
 0x356   :  { %7103 = vmatpush1.bf16.msra.mxu0 %v7102_v5  ;;  %v1785_v5 = vld [vmem:[%s15497_s4 + $0x7d0] sm:$0xff]  ;;  %v7124_v20 = vpack.c.bf16 %v1788_v2, %v1780_v1 }
 0x357   :  { %7105 = vmatprep.subr.bf16.mxu0 %v7104_v31  ;;  %v1550_v31 = vld [vmem:[%s15497_s4 + $0x78] sm:$0xff]  ;;  %v7062_v10 = vpack.c.bf16 %v1785_v5, %v1777_v4  ;;  %v1677_v4 = vld [vmem:[%s15497_s4 + $0x470] sm:$0xff] }
 0x358   :  { %7043 = vmatpush1.bf16.msra.mxu1 %v7042_v8  ;;  %v1787_v8 = vld [vmem:[%s15497_s4 + $0x7e0] sm:$0xff]  ;;  %v7128_v11 = vpack.c.bf16 %v1550_v31, %v1542_v7  ;;  %v1686_v5 = vld [vmem:[%s15497_s4 + $0x4b8] sm:$0xff]  ;;  %v1725_v19 = vld [vmem:[%s15497_s4 + $0x5f0] sm:$0xff] }
 0x359   :  { %7045 = vmatprep.subr.bf16.mxu1 %v7044_v39  ;;  %v1541_v39 = vld [vmem:[%s15497_s4 + $0x30] sm:$0xff]  ;;  %v7126_v14 = vpack.c.bf16 %v1787_v8, %v1779_v55  ;;  %v1702_v8 = vld [vmem:[%s15497_s4 + $0x538] sm:$0xff] }
 0x35a   :  { %7107 = vmatpush1.bf16.msra.mxu0 %v7106_v15  ;;  %v1558_v15 = vld [vmem:[%s15497_s4 + $0xb8] sm:$0xff]  ;;  %v7130_v16 = vpack.c.bf16 %v1549_v13, %v1541_v39  ;;  %v1693_v55 = vld [vmem:[%s15497_s4 + $0x4f0] sm:$0xff] }
 0x35b   :  { %7109 = vmatprep.subr.bf16.mxu0 %v7108_v17  ;;  %v7132_v17 = vpack.c.bf16 %v1566_v30, %v1558_v15  ;;  %v1701_v13 = vld [vmem:[%s15497_s4 + $0x530] sm:$0xff]  ;;  %v1718_v15 = vld [vmem:[%s15497_s4 + $0x5b8] sm:$0xff] }
 0x35c   :  { %7047 = vmatpush1.bf16.msra.mxu1 %v7046_v21  ;;  %v1574_v21 = vld [vmem:[%s15497_s4 + $0x138] sm:$0xff]  ;;  %v1733_v26 = vld [vmem:[%s15497_s4 + $0x630] sm:$0xff] }
 0x35d   :  { %7049 = vmatprep.subr.bf16.mxu1 %v7048_v25  ;;  %v7136_v25 = vpack.c.bf16 %v1582_v22, %v1574_v21  ;;  %v1726_v30 = vld [vmem:[%s15497_s4 + $0x5f8] sm:$0xff]  ;;  %v1741_v27 = vld [vmem:[%s15497_s4 + $0x670] sm:$0xff] }
 0x35e   :  { %7111 = vmatpush1.bf16.msra.mxu0 %v7110_v24  ;;  %v1590_v24 = vld [vmem:[%s15497_s4 + $0x1b8] sm:$0xff] }
 0x35f   :  { %7113 = vmatprep.subr.bf16.mxu0 %v7112_v33  ;;  %v1589_v33 = vld [vmem:[%s15497_s4 + $0x1b0] sm:$0xff]  ;;  %v1734_v21 = vld [vmem:[%s15497_s4 + $0x638] sm:$0xff] }
 0x360   :  { %7051 = vmatpush1.bf16.msra.mxu1 %v7050_v37  ;;  %v1614_v37 = vld [vmem:[%s15497_s4 + $0x278] sm:$0xff]  ;;  %v7142_v38 = vpack.c.bf16 %v1597_v35, %v1589_v33  ;;  %v1749_v33 = vld [vmem:[%s15497_s4 + $0x6b0] sm:$0xff] }
 0x361   :  { %7053 = vmatprep.subr.bf16.mxu1 %v7052_v41  ;;  %v7144_v40 = vpack.c.bf16 %v1614_v37, %v1606_v36  ;;  %v1605_v41 = vld [vmem:[%s15497_s4 + $0x230] sm:$0xff]  ;;  %v1742_v22 = vld [vmem:[%s15497_s4 + $0x678] sm:$0xff] }
 0x362   :  { %7115 = vmatpush1.bf16.msra.mxu0 %v7114_v44  ;;  %v1630_v44 = vld [vmem:[%s15497_s4 + $0x2f8] sm:$0xff]  ;;  %v7146_v45 = vpack.c.bf16 %v1613_v42, %v1605_v41  ;;  %v1757_v35 = vld [vmem:[%s15497_s4 + $0x6f0] sm:$0xff] }
 0x363   :  { %7117 = vmatprep.subr.bf16.mxu0 %v7116_v49  ;;  %v7148_v46 = vpack.c.bf16 %v1630_v44, %v1622_v43  ;;  %v1621_v49 = vld [vmem:[%s15497_s4 + $0x2b0] sm:$0xff]  ;;  %v1766_v36 = vld [vmem:[%s15497_s4 + $0x738] sm:$0xff] }
 0x364   :  { %7055 = vmatpush1.bf16.msra.mxu1 %v7054_v51  ;;  %v1646_v51 = vld [vmem:[%s15497_s4 + $0x378] sm:$0xff]  ;;  %v7150_v53 = vpack.c.bf16 %v1629_v50, %v1621_v49  ;;  %v1765_v41 = vld [vmem:[%s15497_s4 + $0x730] sm:$0xff] }
 0x365   :  { %7057 = vmatprep.subr.bf16.mxu1 %v7056_v34  ;;  %v7152_v54 = vpack.c.bf16 %v1646_v51, %v1638_v32  ;;  %v1637_v34 = vld [vmem:[%s15497_s4 + $0x330] sm:$0xff]  ;;  %v1774_v37 = vld [vmem:[%s15497_s4 + $0x778] sm:$0xff]  ;;  %v2272_v51 = vld [vmem:[%s15497_s4 + $0x8] sm:$0xff] }
 0x366   :  { %7119 = vmatpush1.bf16.msra.mxu0 %v7118_v57  ;;  %v1662_v57 = vld [vmem:[%s15497_s4 + $0x3f8] sm:$0xff]  ;;  %v7154_v58 = vpack.c.bf16 %v1645_v52, %v1637_v34  ;;  %v1773_v42 = vld [vmem:[%s15497_s4 + $0x770] sm:$0xff]  ;;  %v2271_v34 = vld [vmem:[%s15497_s4] sm:$0xff] }
 0x367   :  { %7121 = vmatprep.subr.bf16.mxu0 %v7120_v61  ;;  %v7156_v59 = vpack.c.bf16 %v1662_v57, %v1654_v56  ;;  %v1653_v61 = vld [vmem:[%s15497_s4 + $0x3b0] sm:$0xff]  ;;  %v1782_v43 = vld [vmem:[%s15497_s4 + $0x7b8] sm:$0xff]  ;;  %v2279_v52 = vld [vmem:[%s15497_s4 + $0x40] sm:$0xff] }
 0x368   :  { %7059 = vmatpush1.bf16.msra.mxu1 %v7058_v0  ;;  %v1678_v0 = vld [vmem:[%s15497_s4 + $0x478] sm:$0xff]  ;;  %v7158_v1 = vpack.c.bf16 %v1661_v62, %v1653_v61  ;;  %v1781_v49 = vld [vmem:[%s15497_s4 + $0x7b0] sm:$0xff]  ;;  %v7226_v56 = vpack.c.bf16 %v2279_v52, %v2271_v34  ;;  %v2296_v57 = vld [vmem:[%s15497_s4 + $0xc8] sm:$0xff] }
 0x369   :  { %7061 = vmatprep.subr.bf16.mxu1 %v7060_v3  ;;  %v7160_v2 = vpack.c.bf16 %v1678_v0, %v1670_v63  ;;  %v1669_v3 = vld [vmem:[%s15497_s4 + $0x430] sm:$0xff]  ;;  %v1790_v44 = vld [vmem:[%s15497_s4 + $0x7f8] sm:$0xff]  ;;  %v2304_v62 = vld [vmem:[%s15497_s4 + $0x108] sm:$0xff] }
 0x36a   :  { %7123 = vmatpush1.bf16.msra.mxu0 %v7122_v6  ;;  %v1694_v6 = vld [vmem:[%s15497_s4 + $0x4f8] sm:$0xff]  ;;  %v7162_v7 = vpack.c.bf16 %v1677_v4, %v1669_v3  ;;  %v1789_v50 = vld [vmem:[%s15497_s4 + $0x7f0] sm:$0xff]  ;;  %v2312_v63 = vld [vmem:[%s15497_s4 + $0x148] sm:$0xff] }
 0x36b   :  { %7125 = vmatprep.subr.bf16.mxu0 %v7124_v20  ;;  %v7164_v31 = vpack.c.bf16 %v1694_v6, %v1686_v5  ;;  %v1685_v20 = vld [vmem:[%s15497_s4 + $0x4b0] sm:$0xff]  ;;  %v7190_v32 = vpack.c.bf16 %v1789_v50, %v1781_v49  ;;  %v2311_v3 = vld [vmem:[%s15497_s4 + $0x140] sm:$0xff]  ;;  %v2320_v4 = vld [vmem:[%s15497_s4 + $0x188] sm:$0xff] }
 0x36c   :  { %7063 = vmatpush1.bf16.msra.mxu1 %v7062_v10  ;;  %v1710_v10 = vld [vmem:[%s15497_s4 + $0x578] sm:$0xff]  ;;  %v2328_v5 = vld [vmem:[%s15497_s4 + $0x1c8] sm:$0xff] }
 0x36d   :  { %7129 = vmatprep.subr.bf16.mxu1 %v7128_v11  ;;  %v7166_v11 = vpack.c.bf16 %v1693_v55, %v1685_v20  ;;  %v7168_v39 = vpack.c.bf16 %v1710_v10, %v1702_v8  ;;  %v2327_v20 = vld [vmem:[%s15497_s4 + $0x1c0] sm:$0xff]  ;;  %v2336_v55 = vld [vmem:[%s15497_s4 + $0x208] sm:$0xff] }
 0x36e   :  { %7127 = vmatpush1.bf16.msra.mxu0 %v7126_v14  ;;  %v1709_v14 = vld [vmem:[%s15497_s4 + $0x570] sm:$0xff]  ;;  %v2344_v8 = vld [vmem:[%s15497_s4 + $0x248] sm:$0xff] }
 0x36f   :  { %1927 = vmatmul.mubr.f32.vlgmr.msra.gmra.mrb[10].mxu1 %v10930_v28  ;;  %v2408_v49 = vld [vmem:[%s15497_s4 + $0x448] sm:$0xff] }
 0x370   :  { %7131 = vmatpush1.bf16.msra.mxu1 %v7130_v16  ;;  %2068 = vmatprep.mubr.f32.mxu1 %v10921_v12  ;;  %v1598_v12 = vld [vmem:[%s15497_s4 + $0x1f8] sm:$0xff]  ;;  %v7170_v16 = vpack.c.bf16 %v1709_v14, %v1701_v13  ;;  %v2343_v13 = vld [vmem:[%s15497_s4 + $0x240] sm:$0xff]  ;;  %v2352_v14 = vld [vmem:[%s15497_s4 + $0x288] sm:$0xff] }
 0x371   :  { %1998 = vmatmul.mubr.f32.vlgmr.msra.gmra.mrb[12].mxu0 %v10930_v28  ;;  %7133 = vmatprep.subr.bf16.mxu1 %v7132_v17  ;;  %v7140_v29 = vpack.c.bf16 %v1598_v12, %v1590_v24  ;;  %v7172_v17 = vpack.c.bf16 %v1726_v30, %v1718_v15  ;;  %v1750_v24 = vld [vmem:[%s15497_s4 + $0x6b8] sm:$0xff]  ;;  %v2360_v15 = vld [vmem:[%s15497_s4 + $0x2c8] sm:$0xff] }
 0x372   :  { %v1758_v12 = vld [vmem:[%s15497_s4 + $0x6f8] sm:$0xff] }
 0x374   :  { %7135 = vmatpush1.bf16.msra.mxu1 %v7134_v23  ;;  %v7174_v23 = vpack.c.bf16 %v1725_v19, %v1717_v18  ;;  %v2359_v18 = vld [vmem:[%s15497_s4 + $0x2c0] sm:$0xff]  ;;  %v2368_v19 = vld [vmem:[%s15497_s4 + $0x308] sm:$0xff] }
 0x375   :  { %7137 = vmatprep.subr.bf16.mxu1 %v7136_v25  ;;  %v7176_v25 = vpack.c.bf16 %v1742_v22, %v1734_v21  ;;  %v2376_v21 = vld [vmem:[%s15497_s4 + $0x348] sm:$0xff] }
 0x378   :  { %7139 = vmatpush1.bf16.msra.mxu1 %v7138_v60  ;;  %v7178_v60 = vpack.c.bf16 %v1741_v27, %v1733_v26  ;;  %v2375_v26 = vld [vmem:[%s15497_s4 + $0x340] sm:$0xff]  ;;  %v2384_v27 = vld [vmem:[%s15497_s4 + $0x388] sm:$0xff] }
 0x379   :  { %7141 = vmatprep.subr.bf16.mxu1 %v7140_v29  ;;  %v7180_v29 = vpack.c.bf16 %v1758_v12, %v1750_v24  ;;  %v2392_v24 = vld [vmem:[%s15497_s4 + $0x3c8] sm:$0xff] }
 0x37c   :  { %7143 = vmatpush1.bf16.msra.mxu1 %v7142_v38  ;;  %v7182_v38 = vpack.c.bf16 %v1757_v35, %v1749_v33  ;;  %v2391_v33 = vld [vmem:[%s15497_s4 + $0x3c0] sm:$0xff] }
 0x37d   :  { %7145 = vmatprep.subr.bf16.mxu1 %v7144_v40  ;;  %v7184_v40 = vpack.c.bf16 %v1774_v37, %v1766_v36  ;;  %v2156_v36 = vld [vmem:[%s15499_s5 + $0x80] sm:$0xff]  ;;  %v2157_v37 = vld [vmem:[%s15499_s5 + $0x88] sm:$0xff] }
 0x380   :  { %7147 = vmatpush1.bf16.msra.mxu1 %v7146_v45  ;;  %v7186_v45 = vpack.c.bf16 %v1773_v42, %v1765_v41  ;;  %v2140_v41 = vld [vmem:[%s15499_s5] sm:$0xff]  ;;  %v2141_v42 = vld [vmem:[%s15499_s5 + $0x8] sm:$0xff] }
 0x381   :  { %7149 = vmatprep.subr.bf16.mxu1 %v7148_v46  ;;  %v7188_v46 = vpack.c.bf16 %v1790_v44, %v1782_v43  ;;  %v5976_v43 = vld [vmem:[%s15502_s6] ss:$0 sm:$0xff] }
 0x384   :  { %7151 = vmatpush1.bf16.msra.mxu1 %v7150_v53  ;;  %v2280_v53 = vld [vmem:[%s15497_s4 + $0x48] sm:$0xff] }
 0x385   :  { %7153 = vmatprep.subr.bf16.mxu1 %v7152_v54  ;;  %v7224_v54 = vpack.c.bf16 %v2280_v53, %v2272_v51  ;;  %v2399_v53 = vld [vmem:[%s15497_s4 + $0x400] sm:$0xff] }
 0x388   :  { %7155 = vmatpush1.bf16.msra.mxu1 %v7154_v58  ;;  %v2287_v58 = vld [vmem:[%s15497_s4 + $0x80] sm:$0xff] }
 0x389   :  { %7157 = vmatprep.subr.bf16.mxu1 %v7156_v59  ;;  %v2295_v59 = vld [vmem:[%s15497_s4 + $0xc0] sm:$0xff] }
 0x38a   :  { %v7230_v0 = vpack.c.bf16 %v2295_v59, %v2287_v58  ;;  %v2142_v59 = vld [vmem:[%s15499_s5 + $0x10] sm:$0xff] }
 0x38c   :  { %7159 = vmatpush1.bf16.msra.mxu1 %v7158_v1  ;;  %v7232_v1 = vpack.c.bf16 %v2312_v63, %v2304_v62  ;;  %v2416_v63 = vld [vmem:[%s15497_s4 + $0x488] sm:$0xff] }
 0x38d   :  { %7161 = vmatprep.subr.bf16.mxu1 %v7160_v2  ;;  %v2303_v2 = vld [vmem:[%s15497_s4 + $0x100] sm:$0xff] }
 0x38e   :  { %v7234_v6 = vpack.c.bf16 %v2311_v3, %v2303_v2  ;;  %v2415_v2 = vld [vmem:[%s15497_s4 + $0x480] sm:$0xff] }
 0x38f   :  { %v2423_v3 = vld [vmem:[%s15497_s4 + $0x4c0] sm:$0xff] }
 0x390   :  { %7163 = vmatpush1.bf16.msra.mxu1 %v7162_v7  ;;  %v7236_v7 = vpack.c.bf16 %v2328_v5, %v2320_v4  ;;  %v7262_v4 = vpack.c.bf16 %v2423_v3, %v2415_v2  ;;  %v2160_v5 = vld [vmem:[%s15499_s5 + $0xa0] sm:$0xff]  ;;  %v2153_v2 = vld [vmem:[%s15499_s5 + $0x68] sm:$0xff] }
 0x391   :  { %7165 = vmatprep.subr.bf16.mxu1 %v7164_v31  ;;  %v2319_v31 = vld [vmem:[%s15497_s4 + $0x180] sm:$0xff] }
 0x392   :  { %v7238_v10 = vpack.c.bf16 %v2327_v20, %v2319_v31  ;;  %v2144_v31 = vld [vmem:[%s15499_s5 + $0x20] sm:$0xff]  ;;  %v2145_v20 = vld [vmem:[%s15499_s5 + $0x28] sm:$0xff] }
 0x394   :  { %7167 = vmatpush1.bf16.msra.mxu1 %v7166_v11  ;;  %v7240_v11 = vpack.c.bf16 %v2344_v8, %v2336_v55  ;;  %v11649_v55 = vpack.c.bf16 %v2145_v20, %v2144_v31  ;;  %v2432_v8 = vld [vmem:[%s15497_s4 + $0x508] sm:$0xff]  ;;  %v2495_v31 = vld [vmem:[%s15497_s4 + $0x700] sm:$0xff] }
 0x395   :  { %7169 = vmatprep.subr.bf16.mxu1 %v7168_v39  ;;  %v2335_v39 = vld [vmem:[%s15497_s4 + $0x200] sm:$0xff] }
 0x396   :  { %v7242_v30 = vpack.c.bf16 %v2343_v13, %v2335_v39  ;;  %v2431_v39 = vld [vmem:[%s15497_s4 + $0x500] sm:$0xff] }
 0x397   :  { %v2439_v13 = vld [vmem:[%s15497_s4 + $0x540] sm:$0xff] }
 0x398   :  { %7171 = vmatpush1.bf16.msra.mxu1 %v7170_v16  ;;  %v7244_v16 = vpack.c.bf16 %v2360_v15, %v2352_v14  ;;  %v7266_v14 = vpack.c.bf16 %v2439_v13, %v2431_v39  ;;  %v2162_v15 = vld [vmem:[%s15499_s5 + $0xb0] sm:$0xff]  ;;  %v2503_v20 = vld [vmem:[%s15497_s4 + $0x740] sm:$0xff] }
 0x399   :  { %7173 = vmatprep.subr.bf16.mxu1 %v7172_v17  ;;  %v2351_v17 = vld [vmem:[%s15497_s4 + $0x280] sm:$0xff]  ;;  %v2154_v13 = vld [vmem:[%s15499_s5 + $0x70] sm:$0xff] }
 0x39a   :  { %v7246_v22 = vpack.c.bf16 %v2359_v18, %v2351_v17  ;;  %v2146_v17 = vld [vmem:[%s15499_s5 + $0x30] sm:$0xff]  ;;  %v2147_v18 = vld [vmem:[%s15499_s5 + $0x38] sm:$0xff] }
 0x39c   :  { %7175 = vmatpush1.bf16.msra.mxu1 %v7174_v23  ;;  %v7248_v23 = vpack.c.bf16 %v2376_v21, %v2368_v19  ;;  %v11679_v19 = vpack.c.bf16 %v2147_v18, %v2146_v17  ;;  %v2448_v21 = vld [vmem:[%s15497_s4 + $0x588] sm:$0xff] }
 0x39d   :  { %7177 = vmatprep.subr.bf16.mxu1 %v7176_v25  ;;  %v2367_v25 = vld [vmem:[%s15497_s4 + $0x300] sm:$0xff]  ;;  %v2520_v17 = vld [vmem:[%s15497_s4 + $0x7c8] sm:$0xff] }
 0x39e   :  { %v7250_v12 = vpack.c.bf16 %v2375_v26, %v2367_v25  ;;  %v2447_v25 = vld [vmem:[%s15497_s4 + $0x580] sm:$0xff] }
 0x39f   :  { %v2455_v26 = vld [vmem:[%s15497_s4 + $0x5c0] sm:$0xff] }
 0x3a0   :  { %7179 = vmatpush1.bf16.msra.mxu1 %v7178_v60  ;;  %v7252_v60 = vpack.c.bf16 %v2392_v24, %v2384_v27  ;;  %v7270_v27 = vpack.c.bf16 %v2455_v26, %v2447_v25  ;;  %v2164_v24 = vld [vmem:[%s15499_s5 + $0xc0] sm:$0xff]  ;;  %v2274_v25 = vld [vmem:[%s15497_s4 + $0x18] sm:$0xff] }
 0x3a1   :  { %7181 = vmatprep.subr.bf16.mxu1 %v7180_v29  ;;  %v2383_v29 = vld [vmem:[%s15497_s4 + $0x380] sm:$0xff]  ;;  %v2282_v26 = vld [vmem:[%s15497_s4 + $0x58] sm:$0xff] }
 0x3a2   :  { %v7254_v35 = vpack.c.bf16 %v2391_v33, %v2383_v29  ;;  %v2148_v29 = vld [vmem:[%s15499_s5 + $0x40] sm:$0xff]  ;;  %v2149_v33 = vld [vmem:[%s15499_s5 + $0x48] sm:$0xff] }
 0x3a4   :  { %7183 = vmatpush1.bf16.msra.mxu1 %v7182_v38 }
 0x3a5   :  { %7185 = vmatprep.subr.bf16.mxu1 %v7184_v40  ;;  %v11570_v40 = vpack.c.bf16 %v2157_v37, %v2156_v36  ;;  %v2464_v36 = vld [vmem:[%s15497_s4 + $0x608] sm:$0xff] }
 0x3a6   :  { %v2472_v37 = vld [vmem:[%s15497_s4 + $0x648] sm:$0xff] }
 0x3a7   :  { %7193 = vmatprep.subr.bf16.mxu0 %v11570_v40 }
 0x3a8   :  { %7187 = vmatpush1.bf16.msra.mxu1 %v7186_v45  ;;  %v11581_v45 = vpack.c.bf16 %v2141_v42, %v2140_v41  ;;  %v2463_v41 = vld [vmem:[%s15497_s4 + $0x600] sm:$0xff] }
 0x3a9   :  { %7189 = vmatprep.subr.bf16.mxu1 %v7188_v46  ;;  %v2400_v46 = vld [vmem:[%s15497_s4 + $0x408] sm:$0xff]  ;;  %v2471_v42 = vld [vmem:[%s15497_s4 + $0x640] sm:$0xff] }
 0x3aa   :  { %v7256_v51 = vpack.c.bf16 %v2408_v49, %v2400_v46  ;;  %7195 = vmatpush3.bf16.msra.mxu0 %v11581_v45  ;;  %v2167_v46 = vld [vmem:[%s15499_s5 + $0xd8] sm:$0xff] }
 0x3ac   :  { %7191 = vmatpush1.bf16.msra.mxu1 %v7190_v32 }
 0x3ad   :  { %7225 = vmatprep.subr.bf16.mxu1 %v7224_v54  ;;  %v2407_v54 = vld [vmem:[%s15497_s4 + $0x440] sm:$0xff] }
 0x3ae   :  { %v7258_v52 = vpack.c.bf16 %v2407_v54, %v2399_v53  ;;  %v2480_v54 = vld [vmem:[%s15497_s4 + $0x688] sm:$0xff] }
 0x3af   :  { %2069 = vmatmul.mubr.f32.vlgmr.msra.gmra.mrb[12].mxu1 %v10930_v28  ;;  %v2288_v28 = vld [vmem:[%s15497_s4 + $0x88] sm:$0xff] }
 0x3b0   :  { %v7228_v61 = vpack.c.bf16 %v2296_v57, %v2288_v28  ;;  %7227 = vmatpush1.bf16.msra.mxu1 %v7226_v56  ;;  %v2158_v28 = vld [vmem:[%s15499_s5 + $0x90] sm:$0xff]  ;;  %v2159_v56 = vld [vmem:[%s15499_s5 + $0x98] sm:$0xff] }
 0x3b1   :  { %v11607_v58 = vpack.c.bf16 %v2159_v56, %v2158_v28  ;;  %v2479_v56 = vld [vmem:[%s15497_s4 + $0x680] sm:$0xff] }
 0x3b2   :  { %7229 = vmatprep.subr.bf16.mxu1 %v7228_v61  ;;  %v2143_v61 = vld [vmem:[%s15499_s5 + $0x18] sm:$0xff] }
 0x3b3   :  { %v11615_v62 = vpack.c.bf16 %v2143_v61, %v2142_v59  ;;  %7197 = vmatprep.subr.bf16.mxu0 %v11607_v58  ;;  %v2168_v61 = vld [vmem:[%s15499_s5 + $0xe0] sm:$0xff] }
 0x3b4   :  { %7231 = vmatpush1.bf16.msra.mxu1 %v7230_v0  ;;  %v2424_v0 = vld [vmem:[%s15497_s4 + $0x4c8] sm:$0xff] }
 0x3b5   :  { %7233 = vmatprep.subr.bf16.mxu1 %v7232_v1  ;;  %v7260_v1 = vpack.c.bf16 %v2424_v0, %v2416_v63  ;;  %7199 = vmatpush3.bf16.msra.mxu0 %v11615_v62  ;;  %v2169_v63 = vld [vmem:[%s15499_s5 + $0xe8] sm:$0xff] }
 0x3b6   :  { %v11761_v0 = vpack.c.bf16 %v2169_v63, %v2168_v61 }
 0x3b8   :  { %7235 = vmatpush1.bf16.msra.mxu1 %v7234_v6  ;;  %v2161_v6 = vld [vmem:[%s15499_s5 + $0xa8] sm:$0xff] }
 0x3b9   :  { %7237 = vmatprep.subr.bf16.mxu1 %v7236_v7  ;;  %v11641_v7 = vpack.c.bf16 %v2161_v6, %v2160_v5  ;;  %v2504_v5 = vld [vmem:[%s15497_s4 + $0x748] sm:$0xff] }
 0x3bb   :  { %7201 = vmatprep.subr.bf16.mxu0 %v11641_v7 }
 0x3bc   :  { %7239 = vmatpush1.bf16.msra.mxu1 %v7238_v10  ;;  %v2440_v10 = vld [vmem:[%s15497_s4 + $0x548] sm:$0xff]  ;;  %7203 = vmatpush3.bf16.msra.mxu0 %v11649_v55 }
 0x3bd   :  { %7241 = vmatprep.subr.bf16.mxu1 %v7240_v11  ;;  %v7264_v11 = vpack.c.bf16 %v2440_v10, %v2432_v8  ;;  %v7282_v8 = vpack.c.bf16 %v2503_v20, %v2495_v31  ;;  %v2170_v10 = vld [vmem:[%s15499_s5 + $0xf0] sm:$0xff] }
 0x3c0   :  { %7243 = vmatpush1.bf16.msra.mxu1 %v7242_v30  ;;  %v2163_v30 = vld [vmem:[%s15499_s5 + $0xb8] sm:$0xff] }
 0x3c1   :  { %7245 = vmatprep.subr.bf16.mxu1 %v7244_v16  ;;  %v11671_v16 = vpack.c.bf16 %v2163_v30, %v2162_v15  ;;  %v2512_v30 = vld [vmem:[%s15497_s4 + $0x788] sm:$0xff] }
 0x3c2   :  { %v7284_v18 = vpack.c.bf16 %v2520_v17, %v2512_v30  ;;  %v1524_v17 = vmul.f32 %v10912_v9, %v10876_v47  ;;  %v5985_v47 = vld [vmem:[%s15500_s0 + $0xb0] sm:$0xff] }
 0x3c3   :  { %7205 = vmatprep.subr.bf16.mxu0 %v11671_v16 }
 0x3c4   :  { %7247 = vmatpush1.bf16.msra.mxu1 %v7246_v22  ;;  %v2456_v22 = vld [vmem:[%s15497_s4 + $0x5c8] sm:$0xff]  ;;  %7207 = vmatpush3.bf16.msra.mxu0 %v11679_v19 }
 0x3c5   :  { %7249 = vmatprep.subr.bf16.mxu1 %v7248_v23  ;;  %v7268_v23 = vpack.c.bf16 %v2456_v22, %v2448_v21  ;;  %v2511_v21 = vld [vmem:[%s15497_s4 + $0x780] sm:$0xff] }
 0x3c6   :  { %v2519_v22 = vld [vmem:[%s15497_s4 + $0x7c0] sm:$0xff] }
 0x3c8   :  { %7251 = vmatpush1.bf16.msra.mxu1 %v7250_v12  ;;  %v2165_v12 = vld [vmem:[%s15499_s5 + $0xc8] sm:$0xff] }
 0x3c9   :  { %7253 = vmatprep.subr.bf16.mxu1 %v7252_v60  ;;  %v11701_v60 = vpack.c.bf16 %v2165_v12, %v2164_v24  ;;  %v2276_v24 = vld [vmem:[%s15497_s4 + $0x28] sm:$0xff] }
 0x3ca   :  { %v2284_v12 = vld [vmem:[%s15497_s4 + $0x68] sm:$0xff] }
 0x3cb   :  { %7209 = vmatprep.subr.bf16.mxu0 %v11701_v60 }
 0x3cc   :  { %7255 = vmatpush1.bf16.msra.mxu1 %v7254_v35  ;;  %v11709_v35 = vpack.c.bf16 %v2149_v33, %v2148_v29  ;;  %v7352_v29 = vpack.c.bf16 %v2284_v12, %v2276_v24  ;;  %v5979_v33 = vld [vmem:[%s15500_s0 + $0x80] sm:$0xff] }
 0x3cd   :  { %7257 = vmatprep.subr.bf16.mxu1 %v7256_v51  ;;  %v2151_v51 = vld [vmem:[%s15499_s5 + $0x58] sm:$0xff] }
 0x3ce   :  { %7211 = vmatpush3.bf16.msra.mxu0 %v11709_v35 }
 0x3d0   :  { %7259 = vmatpush1.bf16.msra.mxu1 %v7258_v52  ;;  %v2488_v52 = vld [vmem:[%s15497_s4 + $0x6c8] sm:$0xff] }
 0x3d1   :  { %7261 = vmatprep.subr.bf16.mxu1 %v7260_v1  ;;  %v7276_v28 = vpack.c.bf16 %v2488_v52, %v2480_v54  ;;  %v2152_v1 = vld [vmem:[%s15499_s5 + $0x60] sm:$0xff] }
 0x3d2   :  { %v11769_v3 = vpack.c.bf16 %v2153_v2, %v2152_v1 }
 0x3d4   :  { %7263 = vmatpush1.bf16.msra.mxu1 %v7262_v4  ;;  %v2496_v4 = vld [vmem:[%s15497_s4 + $0x708] sm:$0xff] }
 0x3d5   :  { %7265 = vmatprep.subr.bf16.mxu1 %v7264_v11  ;;  %v7280_v6 = vpack.c.bf16 %v2504_v5, %v2496_v4  ;;  %v2171_v11 = vld [vmem:[%s15499_s5 + $0xf8] sm:$0xff] }
 0x3d6   :  { %v11791_v39 = vpack.c.bf16 %v2171_v11, %v2170_v10 }
 0x3d8   :  { %7267 = vmatpush1.bf16.msra.mxu1 %v7266_v14  ;;  %v2155_v14 = vld [vmem:[%s15499_s5 + $0x78] sm:$0xff] }
 0x3d9   :  { %7269 = vmatprep.subr.bf16.mxu1 %v7268_v23  ;;  %v11799_v15 = vpack.c.bf16 %v2155_v14, %v2154_v13  ;;  %v7286_v23 = vpack.c.bf16 %v2519_v22, %v2511_v21  ;;  %v1525_v21 = vmul.f32 %v10912_v9, %v10878_v48  ;;  %v5986_v48 = vld [vmem:[%s15500_s0 + $0xb8] sm:$0xff] }
 0x3dc   :  { %7271 = vmatpush1.bf16.msra.mxu1 %v7270_v27  ;;  %v11821_v27 = vpack.c.bf16 %v2282_v26, %v2274_v25 }
 0x402   :  { %v6147_v38 = vpop.f32.mrb[8].mxu1 }
 0x403   :  { %v6148_v44 = vpop.f32.mrb[9].mxu1 }
 0x404   :  { %v6149_v50 = vadd.f32 %v6148_v44, %v6147_v38  ;;  %v11589_v32 = vpop.f32.mrb[10].mxu0  ;;  %v7272_v38 = vpack.c.bf16 %v2472_v37, %v2464_v36  ;;  %v2166_v44 = vld [vmem:[%s15499_s5 + $0xd0] sm:$0xff]  ;;  %v5980_v36 = vld [vmem:[%s15500_s0 + $0x88] sm:$0xff] }
 0x405   :  { %v11598_v34 = vpop.f32.mrb[11].mxu0  ;;  %v11731_v49 = vpack.c.bf16 %v2167_v46, %v2166_v44  ;;  %v2075_v37 = vadd.f32 %v5979_v33, %v11589_v32  ;;  %v5981_v46 = vld [vmem:[%s15500_s0 + $0x90] sm:$0xff]  ;;  %v5983_v32 = vld [vmem:[%s15500_s0 + $0xa0] sm:$0xff] }
 0x406   :  { %v1510_v57 = vadd.f32 %v6149_v50, %v5976_v43  ;;  %v7274_v43 = vpack.c.bf16 %v2471_v42, %v2463_v41  ;;  %7273 = vmatprep.subr.bf16.mxu1 %v7272_v38  ;;  %v2150_v50 = vld [vmem:[%s15499_s5 + $0x50] sm:$0xff]  ;;  %v2076_v38 = vadd.f32 %v5980_v36, %v11598_v34 }
 0x407   :  { %v11739_v53 = vpack.c.bf16 %v2151_v51, %v2150_v50  ;;  %7213 = vmatprep.subr.bf16.mxu0 %v11731_v49  ;;  %v5987_v41 = vmul.f32 -1.442695, %v2075_v37  ;;  %v5982_v51 = vld [vmem:[%s15500_s0 + $0x98] sm:$0xff] }
 0x408   :  { %5977 = vst.msk [vmem:[%s15503_s7 + $0x8] sm:$0xff] %vm777_vm0, %v1510_v57  ;;  %7275 = vmatpush1.bf16.msra.mxu1 %v7274_v43  ;;  %v2487_v57 = vld [vmem:[%s15497_s4 + $0x6c0] sm:$0xff]  ;;  %v5988_v42 = vmul.f32 -1.442695, %v2076_v38 }
 0x409   :  { %7215 = vmatpush3.bf16.msra.mxu0 %v11739_v53  ;;  %v7278_v59 = vpack.c.bf16 %v2487_v57, %v2479_v56  ;;  %7277 = vmatprep.subr.bf16.mxu1 %v7276_v28  ;;  %8731 = vpow2.f32 %v5987_v41  ;;  %v5984_v56 = vld [vmem:[%s15500_s0 + $0xa8] sm:$0xff] }
 0x40a   :  { %7217 = vmatprep.subr.bf16.mxu0 %v11761_v0  ;;  %8733 = vpow2.f32 %v5988_v42 }
 0x40c   :  { %7279 = vmatpush1.bf16.msra.mxu1 %v7278_v59 }
 0x40d   :  { %7219 = vmatpush3.bf16.msra.mxu0 %v11769_v3  ;;  %7281 = vmatprep.subr.bf16.mxu1 %v7280_v6 }
 0x40e   :  { %7221 = vmatprep.subr.bf16.mxu0 %v11791_v39 }
 0x410   :  { %7283 = vmatpush1.bf16.msra.mxu1 %v7282_v8 }
 0x411   :  { %7223 = vmatpush3.bf16.msra.mxu0 %v11799_v15  ;;  %7285 = vmatprep.subr.bf16.mxu1 %v7284_v18 }
 0x412   :  { %7289 = vmatprep.subr.bf16.mxu0 %v11821_v27 }
 0x413   :  { %v8732_v43 = vpop.eup %8731 }
 0x414   :  { %7287 = vmatpush1.bf16.msra.mxu1 %v7286_v23  ;;  %v8734_v44 = vpop.eup %8733  ;;  %v2089_v50 = vadd.f32 1.0, %v8732_v43 }
 0x415   :  { %7353 = vmatprep.subr.bf16.mxu1 %v7352_v29  ;;  %v2090_v54 = vadd.f32 1.0, %v8734_v44 }
 0x416   :  { %8735 = vrcp.f32 %v2089_v50  ;;  %v2273_v50 = vld [vmem:[%s15497_s4 + $0x10] sm:$0xff] }
 0x417   :  { %8737 = vrcp.f32 %v2090_v54 }
 0x420   :  { %v8736_v5 = vpop.eup %8735 }
 0x421   :  { %v8738_v6 = vpop.eup %8737 }
 0x442   :  { %v1928_v52 = vpop.f32.mrb[10].mxu1 }
 0x443   :  { %v2077_v34 = vadd.f32 %v5981_v46, %v1928_v52  ;;  %v1930_v28 = vpop.f32.mrb[11].mxu1  ;;  %v2275_v52 = vld [vmem:[%s15497_s4 + $0x20] sm:$0xff] }
 0x444   :  { %v2078_v57 = vadd.f32 %v5982_v51, %v1930_v28  ;;  %v1999_v59 = vpop.f32.mrb[12].mxu0  ;;  %v2281_v51 = vld [vmem:[%s15497_s4 + $0x50] sm:$0xff]  ;;  %v2283_v28 = vld [vmem:[%s15497_s4 + $0x60] sm:$0xff] }
 0x445   :  { %v5989_v61 = vmul.f32 -1.442695, %v2077_v34  ;;  %v2079_v63 = vadd.f32 %v5983_v32, %v1999_v59  ;;  %v2001_v1 = vpop.f32.mrb[13].mxu0 }
 0x446   :  { %v5990_v2 = vmul.f32 -1.442695, %v2078_v57  ;;  %v2080_v4 = vadd.f32 %v5984_v56, %v2001_v1  ;;  %v2290_v56 = vld [vmem:[%s15497_s4 + $0x98] sm:$0xff]  ;;  %v2300_v1 = vld [vmem:[%s15497_s4 + $0xe8] sm:$0xff] }
 0x447   :  { %8739 = vpow2.f32 %v5989_v61  ;;  %v2298_v57 = vld [vmem:[%s15497_s4 + $0xd8] sm:$0xff]  ;;  %v11888_v61 = vpack.c.bf16 %v2281_v51, %v2273_v50  ;;  %v2323_v50 = vld [vmem:[%s15497_s4 + $0x1a0] sm:$0xff] }
 0x448   :  { %8741 = vpow2.f32 %v5990_v2  ;;  %v2256_v2 = vpop.permute.xlu1 %2255  ;;  %v2331_v51 = vld [vmem:[%s15497_s4 + $0x1e0] sm:$0xff] }
 0x449   :  { %8743 = vtanh.f32 %v2079_v63  ;;  %v2292_v63 = vld [vmem:[%s15497_s4 + $0xa8] sm:$0xff] }
 0x44a   :  { %8745 = vtanh.f32 %v2080_v4  ;;  %v2289_v4 = vld [vmem:[%s15497_s4 + $0x90] sm:$0xff] }
 0x451   :  { %v8740_v31 = vpop.eup %8739 }
 0x452   :  { %v8742_v20 = vpop.eup %8741  ;;  %v2101_v8 = vadd.f32 1.0, %v8740_v31  ;;  %v7354_v31 = vpack.c.bf16 %v2283_v28, %v2275_v52  ;;  %v2340_v52 = vld [vmem:[%s15497_s4 + $0x228] sm:$0xff] }
 0x453   :  { %v8744_v10 = vpop.eup %8743  ;;  %v2102_v11 = vadd.f32 1.0, %v8742_v20  ;;  %v11914_v20 = vpack.c.bf16 %v2298_v57, %v2290_v56  ;;  %v2337_v56 = vld [vmem:[%s15497_s4 + $0x210] sm:$0xff] }
 0x454   :  { %v8746_v13 = vpop.eup %8745  ;;  %8747 = vrcp.f32 %v2101_v8  ;;  %v2123_v14 = vmul.f32 %v8744_v10, %v8736_v5  ;;  %v2297_v5 = vld [vmem:[%s15497_s4 + $0xd0] sm:$0xff]  ;;  %v2306_v8 = vld [vmem:[%s15497_s4 + $0x118] sm:$0xff] }
 0x455   :  { %8749 = vrcp.f32 %v2102_v11  ;;  %v2124_v30 = vmul.f32 %v8746_v13, %v8738_v6  ;;  %v2314_v10 = vld [vmem:[%s15497_s4 + $0x158] sm:$0xff]  ;;  %v7356_v13 = vpack.c.bf16 %v2300_v1, %v2292_v63  ;;  %v2345_v57 = vld [vmem:[%s15497_s4 + $0x250] sm:$0xff]  ;;  %v7366_v63 = vpack.c.bf16 %v2331_v51, %v2323_v50  ;;  %v2379_v50 = vld [vmem:[%s15497_s4 + $0x360] sm:$0xff] }
 0x456   :  { %v2354_v1 = vld [vmem:[%s15497_s4 + $0x298] sm:$0xff] }
 0x45e   :  { %v8748_v18 = vpop.eup %8747 }
 0x45f   :  { %v8750_v22 = vpop.eup %8749  ;;  %v2121_v23 = vmul.f32 %v8748_v18, %v1524_v17  ;;  %v11934_v17 = vpack.c.bf16 %v2297_v5, %v2289_v4  ;;  %v2308_v18 = vld [vmem:[%s15497_s4 + $0x128] sm:$0xff]  ;;  %v2339_v5 = vld [vmem:[%s15497_s4 + $0x220] sm:$0xff] }
 0x460   :  { %v2122_v25 = vmul.f32 %v8750_v22, %v1525_v21  ;;  %v2316_v21 = vld [vmem:[%s15497_s4 + $0x168] sm:$0xff]  ;;  %v11944_v22 = vpack.c.bf16 %v2314_v10, %v2306_v8  ;;  %v12027_v8 = vpack.c.bf16 %v2345_v57, %v2337_v56  ;;  %v2385_v57 = vld [vmem:[%s15497_s4 + $0x390] sm:$0xff] }
 0x461   :  { %v2125_v26 = vadd.f32 %v2123_v14, %v2121_v23  ;;  %v2291_v14 = vld [vmem:[%s15497_s4 + $0xa0] sm:$0xff]  ;;  %v2305_v23 = vld [vmem:[%s15497_s4 + $0x110] sm:$0xff]  ;;  %v2356_v10 = vld [vmem:[%s15497_s4 + $0x2a8] sm:$0xff] }
 0x462   :  { %v2126_v24 = vadd.f32 %v2124_v30, %v2122_v25  ;;  %v2299_v30 = vld [vmem:[%s15497_s4 + $0xe0] sm:$0xff]  ;;  %v2313_v25 = vld [vmem:[%s15497_s4 + $0x150] sm:$0xff] }
 0x463   :  { %5940 = vst [vmem:[%s15504_s9] sm:$0xff] %v2125_v26 }
 0x464   :  { %5941 = vst [vmem:[%s15504_s9 + $0x8] sm:$0xff] %v2126_v24 }
 0x482   :  { %v2070_v9 = vpop.f32.mrb[12].mxu1 }
 0x483   :  { %v2081_v12 = vadd.f32 %v5985_v47, %v2070_v9  ;;  %v2072_v29 = vpop.f32.mrb[13].mxu1  ;;  %v2330_v47 = vld [vmem:[%s15497_s4 + $0x1d8] sm:$0xff]  ;;  %v2307_v9 = vld [vmem:[%s15497_s4 + $0x120] sm:$0xff] }
 0x484   :  { %v2082_v33 = vadd.f32 %v5986_v48, %v2072_v29  ;;  %v7360_v48 = vpack.c.bf16 %v2316_v21, %v2308_v18  ;;  %v11967_v29 = vpack.c.bf16 %v2313_v25, %v2305_v23  ;;  %v2361_v18 = vld [vmem:[%s15497_s4 + $0x2d0] sm:$0xff]  ;;  %v2370_v23 = vld [vmem:[%s15497_s4 + $0x318] sm:$0xff] }
 0x485   :  { %v5991_v36 = vmul.f32 -1.442695, %v2081_v12  ;;  %v2315_v12 = vld [vmem:[%s15497_s4 + $0x160] sm:$0xff]  ;;  %v2378_v25 = vld [vmem:[%s15497_s4 + $0x358] sm:$0xff] }
 0x486   :  { %v5992_v37 = vmul.f32 -1.442695, %v2082_v33  ;;  %v2324_v33 = vld [vmem:[%s15497_s4 + $0x1a8] sm:$0xff] }
 0x487   :  { %8751 = vpow2.f32 %v5991_v36  ;;  %v2332_v36 = vld [vmem:[%s15497_s4 + $0x1e8] sm:$0xff] }
 0x488   :  { %8753 = vpow2.f32 %v5992_v37 }
 0x489   :  { %8755 = vtanh.f32 %v2125_v26  ;;  %v7358_v26 = vpack.c.bf16 %v2299_v30, %v2291_v14  ;;  %v2353_v30 = vld [vmem:[%s15497_s4 + $0x290] sm:$0xff] }
 0x48a   :  { %8757 = vtanh.f32 %v2126_v24  ;;  %v2322_v24 = vld [vmem:[%s15497_s4 + $0x198] sm:$0xff] }
 0x48b   :  { %v11976_v37 = vpack.c.bf16 %v2330_v47, %v2322_v24  ;;  %v2355_v24 = vld [vmem:[%s15497_s4 + $0x2a0] sm:$0xff] }
 0x48c   :  { %v2363_v47 = vld [vmem:[%s15497_s4 + $0x2e0] sm:$0xff] }
 0x491   :  { %v8752_v38 = vpop.eup %8751 }
 0x492   :  { %v8754_v41 = vpop.eup %8753  ;;  %v2115_v42 = vadd.f32 1.0, %v8752_v38  ;;  %v2321_v38 = vld [vmem:[%s15497_s4 + $0x190] sm:$0xff] }
 0x493   :  { %v2116_v43 = vadd.f32 1.0, %v8754_v41  ;;  %v8756_v44 = vpop.eup %8755  ;;  %v2329_v41 = vld [vmem:[%s15497_s4 + $0x1d0] sm:$0xff] }
 0x494   :  { %8759 = vrcp.f32 %v2115_v42  ;;  %v8758_v46 = vpop.eup %8757  ;;  %v7362_v42 = vpack.c.bf16 %v2315_v12, %v2307_v9  ;;  %v2372_v9 = vld [vmem:[%s15497_s4 + $0x328] sm:$0xff] }
 0x495   :  { %8761 = vrcp.f32 %v2116_v43  ;;  %v2338_v43 = vld [vmem:[%s15497_s4 + $0x218] sm:$0xff]  ;;  %v2380_v12 = vld [vmem:[%s15497_s4 + $0x368] sm:$0xff] }
 0x49e   :  { %v8760_v54 = vpop.eup %8759 }
 0x49f   :  { %v8762_v32 = vpop.eup %8761  ;;  %v11875_v34 = vmul.f32 %v8760_v54, %v8756_v44  ;;  %v2346_v44 = vld [vmem:[%s15497_s4 + $0x258] sm:$0xff]  ;;  %v11997_v54 = vpack.c.bf16 %v2329_v41, %v2321_v38  ;;  %v2377_v38 = vld [vmem:[%s15497_s4 + $0x350] sm:$0xff]  ;;  %v7374_v41 = vpack.c.bf16 %v2363_v47, %v2355_v24 }
 0x4a0   :  { %v11886_v59 = vmul.f32 %v8762_v32, %v8758_v46  ;;  %v7364_v46 = vpack.c.bf16 %v2332_v36, %v2324_v33  ;;  %v2348_v32 = vld [vmem:[%s15497_s4 + $0x268] sm:$0xff]  ;;  %v12006_v28 = vpack.c.bf16 %v2346_v44, %v2338_v43  ;;  %v12066_v33 = vpack.c.bf16 %v2378_v25, %v2370_v23  ;;  %v2369_v36 = vld [vmem:[%s15497_s4 + $0x310] sm:$0xff]  ;;  %v2394_v43 = vld [vmem:[%s15497_s4 + $0x3d8] sm:$0xff] }
 0x4a1   :  { %5938 = vst [vmem:[%s15505_s8] sm:$0xff] %v11875_v34  ;;  %v11924_v11 = vmul.f32 %v2256_v2, %v11875_v34  ;;  %v7368_v4 = vpack.c.bf16 %v2348_v32, %v2340_v52  ;;  %v7376_v44 = vpack.c.bf16 %v2380_v12, %v2372_v9  ;;  %v12087_v51 = vpack.c.bf16 %v2377_v38, %v2369_v36  ;;  %v2388_v52 = vld [vmem:[%s15497_s4 + $0x3a8] sm:$0xff]  ;;  %v2401_v23 = vld [vmem:[%s15497_s4 + $0x410] sm:$0xff]  ;;  %v2418_v24 = vld [vmem:[%s15497_s4 + $0x498] sm:$0xff] }
 0x4a2   :  { %5939 = vst [vmem:[%s15505_s8 + $0x8] sm:$0xff] %v11886_v59  ;;  %2243 = vmatprep.mubr.f32.mxu0 %v11886_v59  ;;  %v11912_v6 = vmul.f32 %v2256_v2, %v11886_v59  ;;  %v2362_v2 = vld [vmem:[%s15497_s4 + $0x2d8] sm:$0xff]  ;;  %v2396_v32 = vld [vmem:[%s15497_s4 + $0x3e8] sm:$0xff]  ;;  %v2409_v25 = vld [vmem:[%s15497_s4 + $0x450] sm:$0xff] }
 0x4a3   :  { %2244 = vmatmul.mubr.f32.vlgmr.msra.gmra.mrb[14].mxu0 %v11875_v34  ;;  %v12036_v14 = vpack.c.bf16 %v2362_v2, %v2354_v1  ;;  %v2402_v2 = vld [vmem:[%s15497_s4 + $0x418] sm:$0xff]  ;;  %v2403_v12 = vld [vmem:[%s15497_s4 + $0x420] sm:$0xff]  ;;  %v12147_v38 = vpack.c.bf16 %v2409_v25, %v2401_v23 }
 0x4a4   :  { %7291 = vmatpush1.bf16.msra.mxu0 %v11888_v61  ;;  %2591 = vmatprep.mubr.f32.mxu1 %v11912_v6  ;;  %v2426_v47 = vld [vmem:[%s15497_s4 + $0x4d8] sm:$0xff]  ;;  %v2411_v36 = vld [vmem:[%s15497_s4 + $0x460] sm:$0xff] }
 0x4a5   :  { %2662 = vmatprep.mubr.f32.mxu0 %v11912_v6  ;;  %2592 = vmatmul.mubr.f32.vlgmr.msra.gmra.mrb[14].mxu1 %v11924_v11  ;;  %v2450_v23 = vld [vmem:[%s15497_s4 + $0x598] sm:$0xff] }
 0x4a6   :  { %7355 = vmatpush1.bf16.msra.mxu1 %v7354_v31  ;;  %7293 = vmatprep.subr.bf16.mxu0 %v11914_v20  ;;  %v2347_v31 = vld [vmem:[%s15497_s4 + $0x260] sm:$0xff]  ;;  %v2458_v25 = vld [vmem:[%s15497_s4 + $0x5d8] sm:$0xff] }
 0x4a7   :  { %2733 = vmatprep.mubr.f32.mxu1 %v11912_v6  ;;  %7357 = vmatprep.subr.bf16.mxu1 %v7356_v13  ;;  %v2364_v13 = vld [vmem:[%s15497_s4 + $0x2e8] sm:$0xff]  ;;  %v7370_v21 = vpack.c.bf16 %v2347_v31, %v2339_v5  ;;  %v7380_v5 = vpack.c.bf16 %v2396_v32, %v2388_v52  ;;  %v2387_v31 = vld [vmem:[%s15497_s4 + $0x3a0] sm:$0xff]  ;;  %v2434_v52 = vld [vmem:[%s15497_s4 + $0x518] sm:$0xff] }
 0x4a8   :  { %7295 = vmatpush1.bf16.msra.mxu0 %v11934_v17  ;;  %v2442_v32 = vld [vmem:[%s15497_s4 + $0x558] sm:$0xff] }
 0x4a9   :  { %7297 = vmatprep.subr.bf16.mxu0 %v11944_v22 }
 0x4aa   :  { %7359 = vmatpush1.bf16.msra.mxu1 %v7358_v26  ;;  %v7372_v26 = vpack.c.bf16 %v2364_v13, %v2356_v10  ;;  %v2395_v10 = vld [vmem:[%s15497_s4 + $0x3e0] sm:$0xff] }
 0x4ab   :  { %7361 = vmatprep.subr.bf16.mxu1 %v7360_v48  ;;  %v12057_v48 = vpack.c.bf16 %v2361_v18, %v2353_v30  ;;  %v2404_v30 = vld [vmem:[%s15497_s4 + $0x428] sm:$0xff] }
 0x4ac   :  { %7299 = vmatpush1.bf16.msra.mxu0 %v11967_v29  ;;  %v2412_v18 = vld [vmem:[%s15497_s4 + $0x468] sm:$0xff] }
 0x4ad   :  { %7301 = vmatprep.subr.bf16.mxu0 %v11976_v37  ;;  %v7384_v9 = vpack.c.bf16 %v2412_v18, %v2404_v30  ;;  %v2441_v30 = vld [vmem:[%s15497_s4 + $0x550] sm:$0xff] }
 0x4ae   :  { %7363 = vmatpush1.bf16.msra.mxu1 %v7362_v42  ;;  %v2386_v42 = vld [vmem:[%s15497_s4 + $0x398] sm:$0xff] }
 0x4af   :  { %7365 = vmatprep.subr.bf16.mxu1 %v7364_v46  ;;  %v2371_v46 = vld [vmem:[%s15497_s4 + $0x320] sm:$0xff]  ;;  %v12096_v56 = vpack.c.bf16 %v2394_v43, %v2386_v42  ;;  %v2428_v42 = vld [vmem:[%s15497_s4 + $0x4e8] sm:$0xff]  ;;  %v12156_v43 = vpack.c.bf16 %v2426_v47, %v2418_v24 }
 0x4b0   :  { %7303 = vmatpush1.bf16.msra.mxu0 %v11997_v54  ;;  %v7378_v1 = vpack.c.bf16 %v2379_v50, %v2371_v46  ;;  %v2425_v46 = vld [vmem:[%s15497_s4 + $0x4d0] sm:$0xff]  ;;  %v7386_v50 = vpack.c.bf16 %v2411_v36, %v2403_v12  ;;  %v2435_v24 = vld [vmem:[%s15497_s4 + $0x520] sm:$0xff]  ;;  %v2452_v12 = vld [vmem:[%s15497_s4 + $0x5a8] sm:$0xff] }
 0x4b1   :  { %7305 = vmatprep.subr.bf16.mxu0 %v12006_v28  ;;  %v2443_v47 = vld [vmem:[%s15497_s4 + $0x560] sm:$0xff]  ;;  %v2460_v36 = vld [vmem:[%s15497_s4 + $0x5e8] sm:$0xff] }
 0x4b2   :  { %7367 = vmatpush1.bf16.msra.mxu1 %v7366_v63  ;;  %v2393_v63 = vld [vmem:[%s15497_s4 + $0x3d0] sm:$0xff] }
 0x4b3   :  { %7369 = vmatprep.subr.bf16.mxu1 %v7368_v4  ;;  %v2410_v4 = vld [vmem:[%s15497_s4 + $0x458] sm:$0xff]  ;;  %v12117_v13 = vpack.c.bf16 %v2393_v63, %v2385_v57  ;;  %v2419_v63 = vld [vmem:[%s15497_s4 + $0x4a0] sm:$0xff] }
 0x4b4   :  { %7307 = vmatpush1.bf16.msra.mxu0 %v12027_v8 }
 0x4b5   :  { %7309 = vmatprep.subr.bf16.mxu0 %v12036_v14 }
 0x4b6   :  { %7371 = vmatpush1.bf16.msra.mxu1 %v7370_v21  ;;  %v12126_v21 = vpack.c.bf16 %v2410_v4, %v2402_v2  ;;  %v2436_v4 = vld [vmem:[%s15497_s4 + $0x528] sm:$0xff] }
 0x4b7   :  { %7373 = vmatprep.subr.bf16.mxu1 %v7372_v26  ;;  %v7382_v26 = vpack.c.bf16 %v2395_v10, %v2387_v31  ;;  %v12186_v31 = vpack.c.bf16 %v2442_v32, %v2434_v52  ;;  %v2433_v10 = vld [vmem:[%s15497_s4 + $0x510] sm:$0xff]  ;;  %v2474_v52 = vld [vmem:[%s15497_s4 + $0x658] sm:$0xff]  ;;  %v7396_v32 = vpack.c.bf16 %v2460_v36, %v2452_v12  ;;  %v2475_v12 = vld [vmem:[%s15497_s4 + $0x660] sm:$0xff] }
 0x4b8   :  { %7311 = vmatpush1.bf16.msra.mxu0 %v12057_v48 }
 0x4b9   :  { %7313 = vmatprep.subr.bf16.mxu0 %v12066_v33 }
 0x4ba   :  { %7375 = vmatpush1.bf16.msra.mxu1 %v7374_v41  ;;  %v2420_v41 = vld [vmem:[%s15497_s4 + $0x4a8] sm:$0xff] }
 0x4bb   :  { %7377 = vmatprep.subr.bf16.mxu1 %v7376_v44  ;;  %v2417_v44 = vld [vmem:[%s15497_s4 + $0x490] sm:$0xff]  ;;  %v7388_v57 = vpack.c.bf16 %v2428_v42, %v2420_v41  ;;  %v12216_v41 = vpack.c.bf16 %v2458_v25, %v2450_v23  ;;  %v2482_v25 = vld [vmem:[%s15497_s4 + $0x698] sm:$0xff] }
 0x4bc   :  { %7315 = vmatpush1.bf16.msra.mxu0 %v12087_v51  ;;  %v12177_v2 = vpack.c.bf16 %v2425_v46, %v2417_v44  ;;  %v2449_v42 = vld [vmem:[%s15497_s4 + $0x590] sm:$0xff]  ;;  %v7394_v46 = vpack.c.bf16 %v2443_v47, %v2435_v24  ;;  %v2467_v47 = vld [vmem:[%s15497_s4 + $0x620] sm:$0xff] }
 0x4bd   :  { %7317 = vmatprep.subr.bf16.mxu0 %v12096_v56  ;;  %v2457_v44 = vld [vmem:[%s15497_s4 + $0x5d0] sm:$0xff] }
 0x4be   :  { %7379 = vmatpush1.bf16.msra.mxu1 %v7378_v1  ;;  %v2427_v1 = vld [vmem:[%s15497_s4 + $0x4e0] sm:$0xff] }
 0x4bf   :  { %7381 = vmatprep.subr.bf16.mxu1 %v7380_v5  ;;  %v2444_v5 = vld [vmem:[%s15497_s4 + $0x568] sm:$0xff]  ;;  %v7390_v18 = vpack.c.bf16 %v2427_v1, %v2419_v63  ;;  %v2459_v63 = vld [vmem:[%s15497_s4 + $0x5e0] sm:$0xff]  ;;  %v12237_v1 = vpack.c.bf16 %v2457_v44, %v2449_v42 }
 0x4c0   :  { %7319 = vmatpush1.bf16.msra.mxu0 %v12117_v13  ;;  %v2484_v42 = vld [vmem:[%s15497_s4 + $0x6a8] sm:$0xff] }
 0x4c1   :  { %7321 = vmatprep.subr.bf16.mxu0 %v12126_v21  ;;  %v2492_v44 = vld [vmem:[%s15497_s4 + $0x6e8] sm:$0xff] }
 0x4c2   :  { %7383 = vmatpush1.bf16.msra.mxu1 %v7382_v26  ;;  %v7392_v26 = vpack.c.bf16 %v2444_v5, %v2436_v4  ;;  %v2468_v4 = vld [vmem:[%s15497_s4 + $0x628] sm:$0xff] }
 0x4c3   :  { %7385 = vmatprep.subr.bf16.mxu1 %v7384_v9  ;;  %v12207_v9 = vpack.c.bf16 %v2441_v30, %v2433_v10  ;;  %v2476_v5 = vld [vmem:[%s15497_s4 + $0x668] sm:$0xff]  ;;  %v2465_v30 = vld [vmem:[%s15497_s4 + $0x610] sm:$0xff] }
 0x4c4   :  { %7323 = vmatpush1.bf16.msra.mxu0 %v12147_v38  ;;  %v7400_v24 = vpack.c.bf16 %v2476_v5, %v2468_v4  ;;  %v7404_v4 = vpack.c.bf16 %v2492_v44, %v2484_v42  ;;  %v2483_v5 = vld [vmem:[%s15497_s4 + $0x6a0] sm:$0xff]  ;;  %v2514_v42 = vld [vmem:[%s15497_s4 + $0x798] sm:$0xff] }
 0x4c5   :  { %7325 = vmatprep.subr.bf16.mxu0 %v12156_v43  ;;  %v2522_v44 = vld [vmem:[%s15497_s4 + $0x7d8] sm:$0xff] }
 0x4c6   :  { %7387 = vmatpush1.bf16.msra.mxu1 %v7386_v50  ;;  %v2466_v50 = vld [vmem:[%s15497_s4 + $0x618] sm:$0xff] }
 0x4c7   :  { %7389 = vmatprep.subr.bf16.mxu1 %v7388_v57  ;;  %v2451_v57 = vld [vmem:[%s15497_s4 + $0x5a0] sm:$0xff]  ;;  %v12246_v10 = vpack.c.bf16 %v2474_v52, %v2466_v50  ;;  %v2481_v50 = vld [vmem:[%s15497_s4 + $0x690] sm:$0xff] }
 0x4c8   :  { %7327 = vmatpush1.bf16.msra.mxu0 %v12177_v2  ;;  %v7398_v23 = vpack.c.bf16 %v2459_v63, %v2451_v57  ;;  %v2489_v52 = vld [vmem:[%s15497_s4 + $0x6d0] sm:$0xff]  ;;  %v2498_v57 = vld [vmem:[%s15497_s4 + $0x718] sm:$0xff] }
 0x4c9   :  { %7329 = vmatprep.subr.bf16.mxu0 %v12186_v31  ;;  %v2506_v63 = vld [vmem:[%s15497_s4 + $0x758] sm:$0xff] }
 0x4ca   :  { %7391 = vmatpush1.bf16.msra.mxu1 %v7390_v18  ;;  %v2473_v18 = vld [vmem:[%s15497_s4 + $0x650] sm:$0xff] }
 0x4cb   :  { %7393 = vmatprep.subr.bf16.mxu1 %v7392_v26  ;;  %v2490_v26 = vld [vmem:[%s15497_s4 + $0x6d8] sm:$0xff]  ;;  %v12267_v36 = vpack.c.bf16 %v2473_v18, %v2465_v30  ;;  %v2491_v30 = vld [vmem:[%s15497_s4 + $0x6e0] sm:$0xff]  ;;  %v12297_v18 = vpack.c.bf16 %v2489_v52, %v2481_v50 }
 0x4cc   :  { %7331 = vmatpush1.bf16.msra.mxu0 %v12207_v9  ;;  %v2499_v52 = vld [vmem:[%s15497_s4 + $0x720] sm:$0xff] }
 0x4cd   :  { %7333 = vmatprep.subr.bf16.mxu0 %v12216_v41 }
 0x4ce   :  { %7395 = vmatpush1.bf16.msra.mxu1 %v7394_v46  ;;  %v12276_v46 = vpack.c.bf16 %v2490_v26, %v2482_v25  ;;  %v2508_v25 = vld [vmem:[%s15497_s4 + $0x768] sm:$0xff]  ;;  %v12306_v26 = vpack.c.bf16 %v2506_v63, %v2498_v57  ;;  %v2507_v57 = vld [vmem:[%s15497_s4 + $0x760] sm:$0xff] }
 0x4cf   :  { %7397 = vmatprep.subr.bf16.mxu1 %v7396_v32  ;;  %v7402_v32 = vpack.c.bf16 %v2475_v12, %v2467_v47  ;;  %v2505_v47 = vld [vmem:[%s15497_s4 + $0x750] sm:$0xff]  ;;  %v7406_v12 = vpack.c.bf16 %v2491_v30, %v2483_v5  ;;  %v2516_v63 = vld [vmem:[%s15497_s4 + $0x7a8] sm:$0xff]  ;;  %v12336_v5 = vpack.c.bf16 %v2522_v44, %v2514_v42  ;;  %v2515_v44 = vld [vmem:[%s15497_s4 + $0x7a0] sm:$0xff] }
 0x4d0   :  { %7335 = vmatpush1.bf16.msra.mxu0 %v12237_v1  ;;  %15515 = vst [vmem:[#allocation4_spill] sm:$0xff] %v12306_v26  ;;  %v2513_v30 = vld [vmem:[%s15497_s4 + $0x790] sm:$0xff] }
 0x4d1   :  { %7337 = vmatprep.subr.bf16.mxu0 %v12246_v10 }
 0x4d2   :  { %7399 = vmatpush1.bf16.msra.mxu1 %v7398_v23  ;;  %v2500_v23 = vld [vmem:[%s15497_s4 + $0x728] sm:$0xff] }
 0x4d3   :  { %7401 = vmatprep.subr.bf16.mxu1 %v7400_v24  ;;  %v2497_v24 = vld [vmem:[%s15497_s4 + $0x710] sm:$0xff]  ;;  %v7408_v50 = vpack.c.bf16 %v2508_v25, %v2500_v23  ;;  %v7410_v25 = vpack.c.bf16 %v2507_v57, %v2499_v52 }
 0x4d4   :  { %7339 = vmatpush1.bf16.msra.mxu0 %v12267_v36  ;;  %v2521_v23 = vld [vmem:[%s15497_s4 + $0x7d0] sm:$0xff] }
 0x4d5   :  { %7341 = vmatprep.subr.bf16.mxu0 %v12276_v46  ;;  %v2285_v57 = vld [vmem:[%s15497_s4 + $0x70] sm:$0xff] }
 0x4d6   :  { %7403 = vmatpush1.bf16.msra.mxu1 %v7402_v32  ;;  %v12327_v32 = vpack.c.bf16 %v2505_v47, %v2497_v24  ;;  %v2278_v24 = vld [vmem:[%s15497_s4 + $0x38] sm:$0xff] }
 0x4d7   :  { %7405 = vmatprep.subr.bf16.mxu1 %v7404_v4  ;;  %v2524_v4 = vld [vmem:[%s15497_s4 + $0x7e8] sm:$0xff]  ;;  %v2286_v47 = vld [vmem:[%s15497_s4 + $0x78] sm:$0xff] }
 0x4d8   :  { %7343 = vmatpush1.bf16.msra.mxu0 %v12297_v18  ;;  %v7412_v42 = vpack.c.bf16 %v2524_v4, %v2516_v63  ;;  %v12360_v52 = vpack.c.bf16 %v2286_v47, %v2278_v24  ;;  %v2294_v4 = vld [vmem:[%s15497_s4 + $0xb8] sm:$0xff] }
 0x4d9   :  { %7345 = vmatprep.subr.bf16.mxu0 %v12306_v26  ;;  %v2523_v26 = vld [vmem:[%s15497_s4 + $0x7e0] sm:$0xff]  ;;  %v2310_v47 = vld [vmem:[%s15497_s4 + $0x138] sm:$0xff] }
 0x4da   :  { %7407 = vmatpush1.bf16.msra.mxu1 %v7406_v12  ;;  %v12357_v12 = vpack.c.bf16 %v2521_v23, %v2513_v30  ;;  %v7414_v63 = vpack.c.bf16 %v2523_v26, %v2515_v44  ;;  %v2302_v30 = vld [vmem:[%s15497_s4 + $0xf8] sm:$0xff]  ;;  %v2293_v26 = vld [vmem:[%s15497_s4 + $0xb0] sm:$0xff] }
 0x4db   :  { %7409 = vmatprep.subr.bf16.mxu1 %v7408_v50  ;;  %v2277_v50 = vld [vmem:[%s15497_s4 + $0x30] sm:$0xff]  ;;  %v12378_v24 = vpack.c.bf16 %v2302_v30, %v2294_v4 }
 0x4dc   :  { %7347 = vmatpush1.bf16.msra.mxu0 %v12327_v32  ;;  %v12375_v23 = vpack.c.bf16 %v2285_v57, %v2277_v50  ;;  %v2309_v57 = vld [vmem:[%s15497_s4 + $0x130] sm:$0xff] }
 0x4dd   :  { %7349 = vmatprep.subr.bf16.mxu0 %v12336_v5 }
 0x4de   :  { %7411 = vmatpush1.bf16.msra.mxu1 %v7410_v25  ;;  %v2301_v25 = vld [vmem:[%s15497_s4 + $0xf0] sm:$0xff] }
 0x4df   :  { %7413 = vmatprep.subr.bf16.mxu1 %v7412_v42  ;;  %v2318_v42 = vld [vmem:[%s15497_s4 + $0x178] sm:$0xff]  ;;  %v12396_v44 = vpack.c.bf16 %v2301_v25, %v2293_v26  ;;  %v2333_v26 = vld [vmem:[%s15497_s4 + $0x1f0] sm:$0xff] }
 0x4e0   :  { %7351 = vmatpush1.bf16.msra.mxu0 %v12357_v12  ;;  %v12400_v50 = vpack.c.bf16 %v2318_v42, %v2310_v47  ;;  %v2350_v25 = vld [vmem:[%s15497_s4 + $0x278] sm:$0xff] }
 0x4e1   :  { %7417 = vmatprep.subr.bf16.mxu0 %v12360_v52 }
 0x4e2   :  { %7415 = vmatpush1.bf16.msra.mxu1 %v7414_v63  ;;  %v2334_v63 = vld [vmem:[%s15497_s4 + $0x1f8] sm:$0xff] }
 0x4e3   :  { %2663 = vmatmul.mubr.f32.vlgmr.msra.gmra.mrb[16].mxu0 %v11924_v11  ;;  %7481 = vmatprep.subr.bf16.mxu1 %v11570_v40  ;;  %v2317_v40 = vld [vmem:[%s15497_s4 + $0x170] sm:$0xff] }
 0x4e4   :  { %7419 = vmatpush1.bf16.msra.mxu0 %v12375_v23  ;;  %2804 = vmatprep.mubr.f32.mxu0 %v11912_v6  ;;  %v2326_v6 = vld [vmem:[%s15497_s4 + $0x1b8] sm:$0xff]  ;;  %v12418_v4 = vpack.c.bf16 %v2317_v40, %v2309_v57  ;;  %v2349_v57 = vld [vmem:[%s15497_s4 + $0x270] sm:$0xff] }
 0x4e5   :  { %2734 = vmatmul.mubr.f32.vlgmr.msra.gmra.mrb[16].mxu1 %v11924_v11  ;;  %7421 = vmatprep.subr.bf16.mxu0 %v12378_v24  ;;  %v12421_v30 = vpack.c.bf16 %v2334_v63, %v2326_v6  ;;  %v2366_v40 = vld [vmem:[%s15497_s4 + $0x2f8] sm:$0xff] }
 0x4e6   :  { %7483 = vmatpush3.bf16.msra.mxu1 %v11581_v45  ;;  %2979 = vmatprep.mubr.f32.mxu1 %v11886_v59  ;;  %v2325_v45 = vld [vmem:[%s15497_s4 + $0x1b0] sm:$0xff] }
 0x4e7   :  { %7485 = vmatprep.subr.bf16.mxu1 %v11607_v58  ;;  %v2342_v58 = vld [vmem:[%s15497_s4 + $0x238] sm:$0xff]  ;;  %v12438_v47 = vpack.c.bf16 %v2333_v26, %v2325_v45  ;;  %v2365_v45 = vld [vmem:[%s15497_s4 + $0x2f0] sm:$0xff] }
 0x4e8   :  { %7423 = vmatpush1.bf16.msra.mxu0 %v12396_v44  ;;  %v12441_v42 = vpack.c.bf16 %v2350_v25, %v2342_v58  ;;  %v2382_v26 = vld [vmem:[%s15497_s4 + $0x378] sm:$0xff] }
 0x4e9   :  { %7425 = vmatprep.subr.bf16.mxu0 %v12400_v50 }
 0x4ea   :  { %7487 = vmatpush3.bf16.msra.mxu1 %v11615_v62  ;;  %v2341_v62 = vld [vmem:[%s15497_s4 + $0x230] sm:$0xff] }
 0x4eb   :  { %7489 = vmatprep.subr.bf16.mxu1 %v11641_v7  ;;  %v2358_v7 = vld [vmem:[%s15497_s4 + $0x2b8] sm:$0xff]  ;;  %v12458_v6 = vpack.c.bf16 %v2349_v57, %v2341_v62  ;;  %v2381_v62 = vld [vmem:[%s15497_s4 + $0x370] sm:$0xff] }
 0x4ec   :  { %7427 = vmatpush1.bf16.msra.mxu0 %v12418_v4  ;;  %v12461_v63 = vpack.c.bf16 %v2366_v40, %v2358_v7  ;;  %v2398_v57 = vld [vmem:[%s15497_s4 + $0x3f8] sm:$0xff] }
 0x4ed   :  { %7429 = vmatprep.subr.bf16.mxu0 %v12421_v30 }
 0x4ee   :  { %7491 = vmatpush3.bf16.msra.mxu1 %v11649_v55  ;;  %v2357_v55 = vld [vmem:[%s15497_s4 + $0x2b0] sm:$0xff] }
 0x4ef   :  { %7493 = vmatprep.subr.bf16.mxu1 %v11671_v16  ;;  %v2374_v16 = vld [vmem:[%s15497_s4 + $0x338] sm:$0xff]  ;;  %v12478_v58 = vpack.c.bf16 %v2365_v45, %v2357_v55  ;;  %v2397_v55 = vld [vmem:[%s15497_s4 + $0x3f0] sm:$0xff] }
 0x4f0   :  { %7431 = vmatpush1.bf16.msra.mxu0 %v12438_v47  ;;  %v12481_v25 = vpack.c.bf16 %v2382_v26, %v2374_v16  ;;  %v2414_v45 = vld [vmem:[%s15497_s4 + $0x478] sm:$0xff] }
 0x4f1   :  { %7433 = vmatprep.subr.bf16.mxu0 %v12441_v42 }
 0x4f2   :  { %7495 = vmatpush3.bf16.msra.mxu1 %v11679_v19  ;;  %v2373_v19 = vld [vmem:[%s15497_s4 + $0x330] sm:$0xff] }
 0x4f3   :  { %7497 = vmatprep.subr.bf16.mxu1 %v11701_v60  ;;  %v2390_v60 = vld [vmem:[%s15497_s4 + $0x3b8] sm:$0xff]  ;;  %v12498_v7 = vpack.c.bf16 %v2381_v62, %v2373_v19  ;;  %v2413_v19 = vld [vmem:[%s15497_s4 + $0x470] sm:$0xff] }
 0x4f4   :  { %7435 = vmatpush1.bf16.msra.mxu0 %v12458_v6  ;;  %v12501_v40 = vpack.c.bf16 %v2398_v57, %v2390_v60  ;;  %v2430_v62 = vld [vmem:[%s15497_s4 + $0x4f8] sm:$0xff] }
 0x4f5   :  { %7437 = vmatprep.subr.bf16.mxu0 %v12461_v63 }
 0x4f6   :  { %7499 = vmatpush3.bf16.msra.mxu1 %v11709_v35  ;;  %v2389_v35 = vld [vmem:[%s15497_s4 + $0x3b0] sm:$0xff] }
 0x4f7   :  { %7501 = vmatprep.subr.bf16.mxu1 %v11731_v49  ;;  %v2406_v49 = vld [vmem:[%s15497_s4 + $0x438] sm:$0xff]  ;;  %v12518_v16 = vpack.c.bf16 %v2397_v55, %v2389_v35  ;;  %v2429_v35 = vld [vmem:[%s15497_s4 + $0x4f0] sm:$0xff] }
 0x4f8   :  { %7439 = vmatpush1.bf16.msra.mxu0 %v12478_v58  ;;  %v12521_v26 = vpack.c.bf16 %v2414_v45, %v2406_v49  ;;  %v2446_v55 = vld [vmem:[%s15497_s4 + $0x578] sm:$0xff]  ;;  %v12556_v49 = vpop.permute.xlu0 %2991 }
 0x4f9   :  { %7441 = vmatprep.subr.bf16.mxu0 %v12481_v25  ;;  %v12562_v45 = vmul.f32 %v12556_v49, %v11886_v59  ;;  %v2462_v59 = vld [vmem:[%s15497_s4 + $0x5f8] sm:$0xff] }
 0x4fa   :  { %7503 = vmatpush3.bf16.msra.mxu1 %v11739_v53  ;;  %v2405_v53 = vld [vmem:[%s15497_s4 + $0x430] sm:$0xff] }
 0x4fb   :  { %7505 = vmatprep.subr.bf16.mxu1 %v11761_v0  ;;  %v2422_v0 = vld [vmem:[%s15497_s4 + $0x4b8] sm:$0xff]  ;;  %v12538_v60 = vpack.c.bf16 %v2413_v19, %v2405_v53  ;;  %v2437_v19 = vld [vmem:[%s15497_s4 + $0x530] sm:$0xff] }
 0x4fc   :  { %7443 = vmatpush1.bf16.msra.mxu0 %v12498_v7  ;;  %v12541_v57 = vpack.c.bf16 %v2430_v62, %v2422_v0 }
 0x4fd   :  { %7445 = vmatprep.subr.bf16.mxu0 %v12501_v40 }
 0x4fe   :  { %7507 = vmatpush3.bf16.msra.mxu1 %v11769_v3  ;;  %v2421_v3 = vld [vmem:[%s15497_s4 + $0x4b0] sm:$0xff] }
 0x4ff   :  { %7509 = vmatprep.subr.bf16.mxu1 %v11791_v39  ;;  %v2438_v39 = vld [vmem:[%s15497_s4 + $0x538] sm:$0xff]  ;;  %v12564_v53 = vpack.c.bf16 %v2429_v35, %v2421_v3  ;;  %v2461_v3 = vld [vmem:[%s15497_s4 + $0x5f0] sm:$0xff] }
 0x500   :  { %7447 = vmatpush1.bf16.msra.mxu0 %v12518_v16  ;;  %v2478_v35 = vld [vmem:[%s15497_s4 + $0x678] sm:$0xff] }
 0x501   :  { %7449 = vmatprep.subr.bf16.mxu0 %v12521_v26 }
 0x502   :  { %7511 = vmatpush3.bf16.msra.mxu1 %v11799_v15  ;;  %v12568_v15 = vpack.c.bf16 %v2446_v55, %v2438_v39 }
 0x503   :  { %7577 = vmatprep.subr.bf16.mxu1 %v11821_v27  ;;  %v2445_v27 = vld [vmem:[%s15497_s4 + $0x570] sm:$0xff] }
 0x504   :  { %7451 = vmatpush1.bf16.msra.mxu0 %v12538_v60  ;;  %v12586_v0 = vpack.c.bf16 %v2445_v27, %v2437_v19  ;;  %v2477_v19 = vld [vmem:[%s15497_s4 + $0x670] sm:$0xff]  ;;  %v2494_v27 = vld [vmem:[%s15497_s4 + $0x6f8] sm:$0xff] }
 0x505   :  { %2980 = vmatmul.mubr.f32.vlgmr.msra.gmra.mrb[18].mxu1 %v11875_v34  ;;  %7453 = vmatprep.subr.bf16.mxu0 %v12541_v57  ;;  %v2454_v34 = vld [vmem:[%s15497_s4 + $0x5b8] sm:$0xff] }
 0x506   :  { %7579 = vmatpush1.bf16.msra.mxu1 %v11888_v61  ;;  %3398 = vmatprep.mubr.f32.mxu1 %v12562_v45  ;;  %v12589_v62 = vpack.c.bf16 %v2462_v59, %v2454_v34  ;;  %v2453_v61 = vld [vmem:[%s15497_s4 + $0x5b0] sm:$0xff] }
 0x507   :  { %7581 = vmatprep.subr.bf16.mxu1 %v11914_v20  ;;  %v2470_v20 = vld [vmem:[%s15497_s4 + $0x638] sm:$0xff]  ;;  %v12606_v39 = vpack.c.bf16 %v2461_v3, %v2453_v61  ;;  %v2493_v61 = vld [vmem:[%s15497_s4 + $0x6f0] sm:$0xff] }
 0x508   :  { %7455 = vmatpush1.bf16.msra.mxu0 %v12564_v53  ;;  %v12609_v55 = vpack.c.bf16 %v2478_v35, %v2470_v20  ;;  %v2510_v3 = vld [vmem:[%s15497_s4 + $0x778] sm:$0xff] }
 0x509   :  { %7457 = vmatprep.subr.bf16.mxu0 %v12568_v15 }
 0x50a   :  { %7583 = vmatpush1.bf16.msra.mxu1 %v11934_v17  ;;  %v2469_v17 = vld [vmem:[%s15497_s4 + $0x630] sm:$0xff] }
 0x50b   :  { %7585 = vmatprep.subr.bf16.mxu1 %v11944_v22  ;;  %v2486_v22 = vld [vmem:[%s15497_s4 + $0x6b8] sm:$0xff]  ;;  %v12626_v34 = vpack.c.bf16 %v2477_v19, %v2469_v17  ;;  %v2509_v17 = vld [vmem:[%s15497_s4 + $0x770] sm:$0xff] }
 0x50c   :  { %7459 = vmatpush1.bf16.msra.mxu0 %v12586_v0  ;;  %v12629_v59 = vpack.c.bf16 %v2494_v27, %v2486_v22  ;;  %v2526_v19 = vld [vmem:[%s15497_s4 + $0x7f8] sm:$0xff] }
 0x50d   :  { %7461 = vmatprep.subr.bf16.mxu0 %v12589_v62 }
 0x50e   :  { %7587 = vmatpush1.bf16.msra.mxu1 %v11967_v29  ;;  %v2485_v29 = vld [vmem:[%s15497_s4 + $0x6b0] sm:$0xff] }
 0x50f   :  { %7589 = vmatprep.subr.bf16.mxu1 %v11976_v37  ;;  %v2502_v37 = vld [vmem:[%s15497_s4 + $0x738] sm:$0xff]  ;;  %v12646_v20 = vpack.c.bf16 %v2493_v61, %v2485_v29  ;;  %v2525_v29 = vld [vmem:[%s15497_s4 + $0x7f0] sm:$0xff]  ;;  %v3016_v61 = vld [vmem:[%s15497_s4 + $0x48] sm:$0xff] }
 0x510   :  { %7463 = vmatpush1.bf16.msra.mxu0 %v12606_v39  ;;  %v12649_v35 = vpack.c.bf16 %v2510_v3, %v2502_v37 }
 0x511   :  { %7465 = vmatprep.subr.bf16.mxu0 %v12609_v55 }
 0x512   :  { %7591 = vmatpush1.bf16.msra.mxu1 %v11997_v54  ;;  %v2501_v54 = vld [vmem:[%s15497_s4 + $0x730] sm:$0xff] }
 0x513   :  { %7593 = vmatprep.subr.bf16.mxu1 %v12006_v28  ;;  %v2518_v28 = vld [vmem:[%s15497_s4 + $0x7b8] sm:$0xff]  ;;  %v12666_v22 = vpack.c.bf16 %v2509_v17, %v2501_v54  ;;  %v3015_v54 = vld [vmem:[%s15497_s4 + $0x40] sm:$0xff]  ;;  %v3032_v17 = vld [vmem:[%s15497_s4 + $0xc8] sm:$0xff] }
 0x514   :  { %7467 = vmatpush1.bf16.msra.mxu0 %v12626_v34  ;;  %v12669_v27 = vpack.c.bf16 %v2526_v19, %v2518_v28 }
 0x515   :  { %7469 = vmatprep.subr.bf16.mxu0 %v12629_v59 }
 0x516   :  { %7595 = vmatpush1.bf16.msra.mxu1 %v12027_v8  ;;  %v2517_v8 = vld [vmem:[%s15497_s4 + $0x7b0] sm:$0xff] }
 0x517   :  { %7597 = vmatprep.subr.bf16.mxu1 %v12036_v14  ;;  %v3008_v14 = vld [vmem:[%s15497_s4 + $0x8] sm:$0xff]  ;;  %v12686_v37 = vpack.c.bf16 %v2525_v29, %v2517_v8  ;;  %v3031_v8 = vld [vmem:[%s15497_s4 + $0xc0] sm:$0xff] }
 0x518   :  { %7471 = vmatpush1.bf16.msra.mxu0 %v12646_v20  ;;  %v12689_v3 = vpack.c.bf16 %v3016_v61, %v3008_v14  ;;  %v3048_v29 = vld [vmem:[%s15497_s4 + $0x148] sm:$0xff]  ;;  %v3039_v61 = vld [vmem:[%s15497_s4 + $0x100] sm:$0xff] }
 0x519   :  { %7473 = vmatprep.subr.bf16.mxu0 %v12649_v35 }
 0x51a   :  { %7599 = vmatpush1.bf16.msra.mxu1 %v12057_v48  ;;  %v3007_v48 = vld [vmem:[%s15497_s4] sm:$0xff] }
 0x51b   :  { %7601 = vmatprep.subr.bf16.mxu1 %v12066_v33  ;;  %v3024_v33 = vld [vmem:[%s15497_s4 + $0x88] sm:$0xff]  ;;  %v12706_v28 = vpack.c.bf16 %v3015_v54, %v3007_v48 }
 0x51c   :  { %7475 = vmatpush1.bf16.msra.mxu0 %v12666_v22  ;;  %v12709_v19 = vpack.c.bf16 %v3032_v17, %v3024_v33  ;;  %v3064_v48 = vld [vmem:[%s15497_s4 + $0x1c8] sm:$0xff]  ;;  %v3063_v17 = vld [vmem:[%s15497_s4 + $0x1c0] sm:$0xff] }
 0x51d   :  { %7477 = vmatprep.subr.bf16.mxu0 %v12669_v27 }
 0x51e   :  { %7603 = vmatpush1.bf16.msra.mxu1 %v12087_v51  ;;  %v3023_v51 = vld [vmem:[%s15497_s4 + $0x80] sm:$0xff] }
 0x51f   :  { %7605 = vmatprep.subr.bf16.mxu1 %v12096_v56  ;;  %v3040_v56 = vld [vmem:[%s15497_s4 + $0x108] sm:$0xff]  ;;  %v12728_v14 = vpack.c.bf16 %v3031_v8, %v3023_v51 }
 0x520   :  { %7479 = vmatpush1.bf16.msra.mxu0 %v12686_v37  ;;  %v3080_v51 = vld [vmem:[%s15497_s4 + $0x248] sm:$0xff] }
 0x521   :  { %7513 = vmatprep.subr.bf16.mxu0 %v12689_v3 }
 0x522   :  { %7607 = vmatpush1.bf16.msra.mxu1 %v12117_v13  ;;  %v12731_v13 = vpack.c.bf16 %v3048_v29, %v3040_v56  ;;  %v3079_v29 = vld [vmem:[%s15497_s4 + $0x240] sm:$0xff] }
 0x523   :  { %2805 = vmatmul.mubr.f32.vlgmr.msra.gmra.mrb[18].mxu0 %v11924_v11  ;;  %7609 = vmatprep.subr.bf16.mxu1 %v12126_v21  ;;  %v3047_v11 = vld [vmem:[%s15497_s4 + $0x140] sm:$0xff]  ;;  %v3056_v21 = vld [vmem:[%s15497_s4 + $0x188] sm:$0xff] }
 0x524   :  { %7515 = vmatpush1.bf16.msra.mxu0 %v12706_v28  ;;  %3327 = vmatprep.mubr.f32.mxu0 %v12562_v45  ;;  %v12748_v54 = vpack.c.bf16 %v3047_v11, %v3039_v61  ;;  %v12751_v33 = vpack.c.bf16 %v3064_v48, %v3056_v21  ;;  %v3096_v61 = vld [vmem:[%s15497_s4 + $0x2c8] sm:$0xff]  ;;  %v3095_v48 = vld [vmem:[%s15497_s4 + $0x2c0] sm:$0xff] }
 0x525   :  { %7517 = vmatprep.subr.bf16.mxu0 %v12709_v19 }
 0x526   :  { %7611 = vmatpush1.bf16.msra.mxu1 %v12147_v38  ;;  %v3055_v38 = vld [vmem:[%s15497_s4 + $0x180] sm:$0xff] }
 0x527   :  { %7613 = vmatprep.subr.bf16.mxu1 %v12156_v43  ;;  %v3072_v43 = vld [vmem:[%s15497_s4 + $0x208] sm:$0xff]  ;;  %v12768_v8 = vpack.c.bf16 %v3063_v17, %v3055_v38 }
 0x528   :  { %7519 = vmatpush1.bf16.msra.mxu0 %v12728_v14  ;;  %v12771_v56 = vpack.c.bf16 %v3080_v51, %v3072_v43  ;;  %v3112_v38 = vld [vmem:[%s15497_s4 + $0x348] sm:$0xff]  ;;  %v3111_v51 = vld [vmem:[%s15497_s4 + $0x340] sm:$0xff] }
 0x529   :  { %7521 = vmatprep.subr.bf16.mxu0 %v12731_v13 }
 0x52a   :  { %7615 = vmatpush1.bf16.msra.mxu1 %v12177_v2  ;;  %v3071_v2 = vld [vmem:[%s15497_s4 + $0x200] sm:$0xff] }
 0x52b   :  { %7617 = vmatprep.subr.bf16.mxu1 %v12186_v31  ;;  %v3088_v31 = vld [vmem:[%s15497_s4 + $0x288] sm:$0xff]  ;;  %v12788_v11 = vpack.c.bf16 %v3079_v29, %v3071_v2 }
 0x52c   :  { %7523 = vmatpush1.bf16.msra.mxu0 %v12748_v54  ;;  %v12791_v21 = vpack.c.bf16 %v3096_v61, %v3088_v31  ;;  %v3128_v2 = vld [vmem:[%s15497_s4 + $0x3c8] sm:$0xff]  ;;  %v3127_v61 = vld [vmem:[%s15497_s4 + $0x3c0] sm:$0xff] }
 0x52d   :  { %7525 = vmatprep.subr.bf16.mxu0 %v12751_v33 }
 0x52e   :  { %7619 = vmatpush1.bf16.msra.mxu1 %v12207_v9  ;;  %v3087_v9 = vld [vmem:[%s15497_s4 + $0x280] sm:$0xff] }
 0x52f   :  { %7621 = vmatprep.subr.bf16.mxu1 %v12216_v41  ;;  %v3104_v41 = vld [vmem:[%s15497_s4 + $0x308] sm:$0xff]  ;;  %v12808_v17 = vpack.c.bf16 %v3095_v48, %v3087_v9  ;;  %v15516_v48 = vld [vmem:[#allocation4_spill] sm:$0xff] }
 0x530   :  { %7527 = vmatpush1.bf16.msra.mxu0 %v12768_v8  ;;  %v12811_v43 = vpack.c.bf16 %v3112_v38, %v3104_v41  ;;  %v3144_v9 = vld [vmem:[%s15497_s4 + $0x448] sm:$0xff] }
 0x531   :  { %7529 = vmatprep.subr.bf16.mxu0 %v12771_v56 }
 0x532   :  { %7623 = vmatpush1.bf16.msra.mxu1 %v12237_v1  ;;  %v3103_v1 = vld [vmem:[%s15497_s4 + $0x300] sm:$0xff] }
 0x533   :  { %7625 = vmatprep.subr.bf16.mxu1 %v12246_v10  ;;  %v3120_v10 = vld [vmem:[%s15497_s4 + $0x388] sm:$0xff]  ;;  %v12828_v29 = vpack.c.bf16 %v3111_v51, %v3103_v1  ;;  %v3143_v1 = vld [vmem:[%s15497_s4 + $0x440] sm:$0xff] }
 0x534   :  { %7531 = vmatpush1.bf16.msra.mxu0 %v12788_v11  ;;  %v12831_v31 = vpack.c.bf16 %v3128_v2, %v3120_v10  ;;  %v3152_v51 = vld [vmem:[%s15497_s4 + $0x488] sm:$0xff] }
 0x535   :  { %7533 = vmatprep.subr.bf16.mxu0 %v12791_v21  ;;  %v3160_v10 = vld [vmem:[%s15497_s4 + $0x4c8] sm:$0xff] }
 0x536   :  { %7627 = vmatpush1.bf16.msra.mxu1 %v12267_v36  ;;  %v3119_v36 = vld [vmem:[%s15497_s4 + $0x380] sm:$0xff] }
 0x537   :  { %7629 = vmatprep.subr.bf16.mxu1 %v12276_v46  ;;  %v3136_v46 = vld [vmem:[%s15497_s4 + $0x408] sm:$0xff]  ;;  %v12848_v41 = vpack.c.bf16 %v3127_v61, %v3119_v36  ;;  %v12871_v36 = vpack.c.bf16 %v3160_v10, %v3152_v51  ;;  %v3159_v61 = vld [vmem:[%s15497_s4 + $0x4c0] sm:$0xff] }
 0x538   :  { %7535 = vmatpush1.bf16.msra.mxu0 %v12808_v17  ;;  %v12851_v38 = vpack.c.bf16 %v3144_v9, %v3136_v46  ;;  %v3176_v46 = vld [vmem:[%s15497_s4 + $0x548] sm:$0xff]  ;;  %v12889_v9 = vld [vmem:[%s15505_s8] sm:$0xff] }
 0x539   :  { %7537 = vmatprep.subr.bf16.mxu0 %v12811_v43  ;;  %v3192_v51 = vld [vmem:[%s15497_s4 + $0x5c8] sm:$0xff] }
 0x53a   :  { %7631 = vmatpush1.bf16.msra.mxu1 %v12297_v18  ;;  %v3135_v18 = vld [vmem:[%s15497_s4 + $0x400] sm:$0xff] }
 0x53b   :  { %7633 = vmatprep.subr.bf16.mxu1 %v15516_v48  ;;  %v12868_v2 = vpack.c.bf16 %v3143_v1, %v3135_v18  ;;  %v12893_v48 = vmul.f32 %v12889_v9, %v12556_v49  ;;  %v3167_v1 = vld [vmem:[%s15497_s4 + $0x500] sm:$0xff] }
 0x53c   :  { %7539 = vmatpush1.bf16.msra.mxu0 %v12828_v29  ;;  %v3175_v49 = vld [vmem:[%s15497_s4 + $0x540] sm:$0xff] }
 0x53d   :  { %7541 = vmatprep.subr.bf16.mxu0 %v12831_v31  ;;  %v12919_v10 = vpack.c.bf16 %v3175_v49, %v3167_v1  ;;  %v3207_v49 = vld [vmem:[%s15497_s4 + $0x640] sm:$0xff] }
 0x53e   :  { %7635 = vmatpush1.bf16.msra.mxu1 %v12327_v32  ;;  %v3151_v32 = vld [vmem:[%s15497_s4 + $0x480] sm:$0xff] }
 0x53f   :  { %7637 = vmatprep.subr.bf16.mxu1 %v12336_v5  ;;  %v3168_v5 = vld [vmem:[%s15497_s4 + $0x508] sm:$0xff] }
 0x540   :  { %7543 = vmatpush1.bf16.msra.mxu0 %v12848_v41  ;;  %v12901_v18 = vpack.c.bf16 %v3176_v46, %v3168_v5  ;;  %v3208_v5 = vld [vmem:[%s15497_s4 + $0x648] sm:$0xff] }
 0x541   :  { %7545 = vmatprep.subr.bf16.mxu0 %v12851_v38 }
 0x542   :  { %7639 = vmatpush1.bf16.msra.mxu1 %v12357_v12  ;;  %v12897_v12 = vpack.c.bf16 %v3159_v61, %v3151_v32  ;;  %v3191_v61 = vld [vmem:[%s15497_s4 + $0x5c0] sm:$0xff] }
 0x543   :  { %7705 = vmatprep.subr.bf16.mxu1 %v12360_v52  ;;  %v3184_v52 = vld [vmem:[%s15497_s4 + $0x588] sm:$0xff] }
 0x544   :  { %7547 = vmatpush1.bf16.msra.mxu0 %v12868_v2  ;;  %v12922_v32 = vpack.c.bf16 %v3192_v51, %v3184_v52  ;;  %v3224_v52 = vld [vmem:[%s15497_s4 + $0x6c8] sm:$0xff] }
 0x545   :  { %3399 = vmatmul.mubr.f32.vlgmr.msra.gmra.mrb[20].mxu1 %v12893_v48  ;;  %7549 = vmatprep.subr.bf16.mxu0 %v12871_v36 }
 0x546   :  { %7707 = vmatpush1.bf16.msra.mxu1 %v12375_v23  ;;  %3540 = vmatprep.mubr.f32.mxu1 %v12562_v45  ;;  %v3183_v23 = vld [vmem:[%s15497_s4 + $0x580] sm:$0xff] }
 0x547   :  { %7709 = vmatprep.subr.bf16.mxu1 %v12378_v24  ;;  %v3200_v24 = vld [vmem:[%s15497_s4 + $0x608] sm:$0xff]  ;;  %v12939_v46 = vpack.c.bf16 %v3191_v61, %v3183_v23  ;;  %v3223_v61 = vld [vmem:[%s15497_s4 + $0x6c0] sm:$0xff] }
 0x548   :  { %7551 = vmatpush1.bf16.msra.mxu0 %v12897_v12  ;;  %v12942_v1 = vpack.c.bf16 %v3208_v5, %v3200_v24  ;;  %v3240_v24 = vld [vmem:[%s15497_s4 + $0x748] sm:$0xff] }
 0x549   :  { %7553 = vmatprep.subr.bf16.mxu0 %v12901_v18 }
 0x54a   :  { %7711 = vmatpush1.bf16.msra.mxu1 %v12396_v44  ;;  %v3199_v44 = vld [vmem:[%s15497_s4 + $0x600] sm:$0xff] }
 0x54b   :  { %7713 = vmatprep.subr.bf16.mxu1 %v12400_v50  ;;  %v3216_v50 = vld [vmem:[%s15497_s4 + $0x688] sm:$0xff]  ;;  %v12959_v51 = vpack.c.bf16 %v3207_v49, %v3199_v44  ;;  %v3239_v49 = vld [vmem:[%s15497_s4 + $0x740] sm:$0xff] }
 0x54c   :  { %7555 = vmatpush1.bf16.msra.mxu0 %v12919_v10  ;;  %v12962_v23 = vpack.c.bf16 %v3224_v52, %v3216_v50  ;;  %v3256_v50 = vld [vmem:[%s15497_s4 + $0x7c8] sm:$0xff] }
 0x54d   :  { %7557 = vmatprep.subr.bf16.mxu0 %v12922_v32 }
 0x54e   :  { %7715 = vmatpush1.bf16.msra.mxu1 %v12418_v4  ;;  %v3215_v4 = vld [vmem:[%s15497_s4 + $0x680] sm:$0xff] }
 0x54f   :  { %7717 = vmatprep.subr.bf16.mxu1 %v12421_v30  ;;  %v3232_v30 = vld [vmem:[%s15497_s4 + $0x708] sm:$0xff]  ;;  %v12979_v5 = vpack.c.bf16 %v3223_v61, %v3215_v4  ;;  %v3255_v61 = vld [vmem:[%s15497_s4 + $0x7c0] sm:$0xff] }
 0x550   :  { %7559 = vmatpush1.bf16.msra.mxu0 %v12939_v46  ;;  %v12982_v44 = vpack.c.bf16 %v3240_v24, %v3232_v30  ;;  %v3020_v30 = vld [vmem:[%s15497_s4 + $0x68] sm:$0xff] }
 0x551   :  { %7561 = vmatprep.subr.bf16.mxu0 %v12942_v1 }
 0x552   :  { %7719 = vmatpush1.bf16.msra.mxu1 %v12438_v47  ;;  %v3231_v47 = vld [vmem:[%s15497_s4 + $0x700] sm:$0xff] }
 0x553   :  { %7721 = vmatprep.subr.bf16.mxu1 %v12441_v42  ;;  %v3248_v42 = vld [vmem:[%s15497_s4 + $0x788] sm:$0xff]  ;;  %v12999_v52 = vpack.c.bf16 %v3239_v49, %v3231_v47  ;;  %v3019_v49 = vld [vmem:[%s15497_s4 + $0x60] sm:$0xff] }
 0x554   :  { %7563 = vmatpush1.bf16.msra.mxu0 %v12959_v51  ;;  %v13002_v4 = vpack.c.bf16 %v3256_v50, %v3248_v42  ;;  %v3036_v42 = vld [vmem:[%s15497_s4 + $0xe8] sm:$0xff] }
 0x555   :  { %7565 = vmatprep.subr.bf16.mxu0 %v12962_v23 }
 0x556   :  { %7723 = vmatpush1.bf16.msra.mxu1 %v12458_v6  ;;  %v3247_v6 = vld [vmem:[%s15497_s4 + $0x780] sm:$0xff] }
 0x557   :  { %7725 = vmatprep.subr.bf16.mxu1 %v12461_v63  ;;  %v3012_v63 = vld [vmem:[%s15497_s4 + $0x28] sm:$0xff]  ;;  %v13019_v24 = vpack.c.bf16 %v3255_v61, %v3247_v6  ;;  %v3035_v61 = vld [vmem:[%s15497_s4 + $0xe0] sm:$0xff] }
 0x558   :  { %7567 = vmatpush1.bf16.msra.mxu0 %v12979_v5  ;;  %v13022_v47 = vpack.c.bf16 %v3020_v30, %v3012_v63  ;;  %v3052_v63 = vld [vmem:[%s15497_s4 + $0x168] sm:$0xff] }
 0x559   :  { %7569 = vmatprep.subr.bf16.mxu0 %v12982_v44 }
 0x55a   :  { %7727 = vmatpush1.bf16.msra.mxu1 %v12478_v58  ;;  %v3011_v58 = vld [vmem:[%s15497_s4 + $0x20] sm:$0xff] }
 0x55b   :  { %7729 = vmatprep.subr.bf16.mxu1 %v12481_v25  ;;  %v3028_v25 = vld [vmem:[%s15497_s4 + $0xa8] sm:$0xff]  ;;  %v13039_v50 = vpack.c.bf16 %v3019_v49, %v3011_v58  ;;  %v3043_v58 = vld [vmem:[%s15497_s4 + $0x120] sm:$0xff] }
 0x55c   :  { %7571 = vmatpush1.bf16.msra.mxu0 %v12999_v52  ;;  %v13042_v6 = vpack.c.bf16 %v3036_v42, %v3028_v25  ;;  %v3051_v49 = vld [vmem:[%s15497_s4 + $0x160] sm:$0xff] }
 0x55d   :  { %7573 = vmatprep.subr.bf16.mxu0 %v13002_v4  ;;  %v13081_v25 = vpack.c.bf16 %v3051_v49, %v3043_v58  ;;  %v3083_v58 = vld [vmem:[%s15497_s4 + $0x260] sm:$0xff]  ;;  %v3100_v49 = vld [vmem:[%s15497_s4 + $0x2e8] sm:$0xff] }
 0x55e   :  { %7731 = vmatpush1.bf16.msra.mxu1 %v12498_v7  ;;  %v3027_v7 = vld [vmem:[%s15497_s4 + $0xa0] sm:$0xff] }
 0x55f   :  { %7733 = vmatprep.subr.bf16.mxu1 %v12501_v40  ;;  %v3044_v40 = vld [vmem:[%s15497_s4 + $0x128] sm:$0xff]  ;;  %v13061_v30 = vpack.c.bf16 %v3035_v61, %v3027_v7  ;;  %v3067_v7 = vld [vmem:[%s15497_s4 + $0x1e0] sm:$0xff] }
 0x560   :  { %7575 = vmatpush1.bf16.msra.mxu0 %v13019_v24  ;;  %v3084_v61 = vld [vmem:[%s15497_s4 + $0x268] sm:$0xff] }
 0x561   :  { %7641 = vmatprep.subr.bf16.mxu0 %v13022_v47 }
 0x562   :  { %7735 = vmatpush1.bf16.msra.mxu1 %v12518_v16  ;;  %v13064_v16 = vpack.c.bf16 %v3052_v63, %v3044_v40 }
 0x563   :  { %3328 = vmatmul.mubr.f32.vlgmr.msra.gmra.mrb[20].mxu0 %v12893_v48  ;;  %7737 = vmatprep.subr.bf16.mxu1 %v12521_v26  ;;  %v3060_v26 = vld [vmem:[%s15497_s4 + $0x1a8] sm:$0xff] }
 0x564   :  { %7643 = vmatpush1.bf16.msra.mxu0 %v13039_v50  ;;  %3469 = vmatprep.mubr.f32.mxu0 %v12562_v45  ;;  %v3068_v45 = vld [vmem:[%s15497_s4 + $0x1e8] sm:$0xff] }
 0x565   :  { %7645 = vmatprep.subr.bf16.mxu0 %v13042_v6  ;;  %v13084_v42 = vpack.c.bf16 %v3068_v45, %v3060_v26 }
 0x566   :  { %7739 = vmatpush1.bf16.msra.mxu1 %v12538_v60  ;;  %v3059_v60 = vld [vmem:[%s15497_s4 + $0x1a0] sm:$0xff] }
 0x567   :  { %7741 = vmatprep.subr.bf16.mxu1 %v12541_v57  ;;  %v3076_v57 = vld [vmem:[%s15497_s4 + $0x228] sm:$0xff]  ;;  %v13101_v40 = vpack.c.bf16 %v3067_v7, %v3059_v60  ;;  %v3099_v60 = vld [vmem:[%s15497_s4 + $0x2e0] sm:$0xff] }
 0x568   :  { %7647 = vmatpush1.bf16.msra.mxu0 %v13061_v30  ;;  %v13104_v63 = vpack.c.bf16 %v3084_v61, %v3076_v57  ;;  %v3116_v7 = vld [vmem:[%s15497_s4 + $0x368] sm:$0xff] }
 0x569   :  { %7649 = vmatprep.subr.bf16.mxu0 %v13064_v16 }
 0x56a   :  { %7743 = vmatpush1.bf16.msra.mxu1 %v12564_v53  ;;  %15517 = vst [vmem:[#allocation4_spill] sm:$0xff] %v13104_v63  ;;  %v3075_v53 = vld [vmem:[%s15497_s4 + $0x220] sm:$0xff] }
 0x56b   :  { %7745 = vmatprep.subr.bf16.mxu1 %v12568_v15  ;;  %v3092_v15 = vld [vmem:[%s15497_s4 + $0x2a8] sm:$0xff]  ;;  %v13121_v26 = vpack.c.bf16 %v3083_v58, %v3075_v53  ;;  %v3115_v53 = vld [vmem:[%s15497_s4 + $0x360] sm:$0xff] }
 0x56c   :  { %7651 = vmatpush1.bf16.msra.mxu0 %v13081_v25  ;;  %v13124_v45 = vpack.c.bf16 %v3100_v49, %v3092_v15  ;;  %v3132_v15 = vld [vmem:[%s15497_s4 + $0x3e8] sm:$0xff]  ;;  %v13162_v49 = vld [vmem:[%s15502_s6] ss:$0 sm:$0xff] }
 0x56d   :  { %7653 = vmatprep.subr.bf16.mxu0 %v13084_v42  ;;  %15518 = vst [vmem:[#allocation5_spill] sm:$0xff] %v13121_v26 }
 0x56e   :  { %7747 = vmatpush1.bf16.msra.mxu1 %v12586_v0  ;;  %15519 = vst [vmem:[#allocation6_spill] sm:$0xff] %v13124_v45  ;;  %v3091_v0 = vld [vmem:[%s15497_s4 + $0x2a0] sm:$0xff] }
 0x56f   :  { %7749 = vmatprep.subr.bf16.mxu1 %v12589_v62  ;;  %v3108_v62 = vld [vmem:[%s15497_s4 + $0x328] sm:$0xff]  ;;  %v13141_v57 = vpack.c.bf16 %v3099_v60, %v3091_v0 }
 0x570   :  { %7655 = vmatpush1.bf16.msra.mxu0 %v13101_v40  ;;  %v13144_v61 = vpack.c.bf16 %v3116_v7, %v3108_v62 }
 0x571   :  { %7657 = vmatprep.subr.bf16.mxu0 %v13104_v63  ;;  %v3131_v63 = vld [vmem:[%s15497_s4 + $0x3e0] sm:$0xff] }
 0x572   :  { %7751 = vmatpush1.bf16.msra.mxu1 %v12606_v39  ;;  %v3107_v39 = vld [vmem:[%s15497_s4 + $0x320] sm:$0xff] }
 0x573   :  { %7753 = vmatprep.subr.bf16.mxu1 %v12609_v55  ;;  %v3124_v55 = vld [vmem:[%s15497_s4 + $0x3a8] sm:$0xff]  ;;  %v13166_v62 = vpack.c.bf16 %v3115_v53, %v3107_v39 }
 0x574   :  { %7659 = vmatpush1.bf16.msra.mxu0 %v13121_v26  ;;  %v3123_v26 = vld [vmem:[%s15497_s4 + $0x3a0] sm:$0xff]  ;;  %v3140_v39 = vld [vmem:[%s15497_s4 + $0x428] sm:$0xff] }
 0x575   :  { %7661 = vmatprep.subr.bf16.mxu0 %v13124_v45  ;;  %v13169_v45 = vpack.c.bf16 %v3132_v15, %v3124_v55  ;;  %v3148_v53 = vld [vmem:[%s15497_s4 + $0x468] sm:$0xff]  ;;  %v3139_v55 = vld [vmem:[%s15497_s4 + $0x420] sm:$0xff] }
 0x576   :  { %7755 = vmatpush1.bf16.msra.mxu1 %v12626_v34  ;;  %v6182_v58 = vpop.f32.mrb[14].mxu0  ;;  %v3156_v15 = vld [vmem:[%s15497_s4 + $0x4a8] sm:$0xff] }
 0x577   :  { %v6183_v0 = vpop.f32.mrb[15].mxu0  ;;  %7757 = vmatprep.subr.bf16.mxu1 %v12629_v59 }
 0x578   :  { %v6184_v60 = vadd.f32 %v6183_v0, %v6182_v58  ;;  %7663 = vmatpush1.bf16.msra.mxu0 %v13141_v57  ;;  %v2593_v34 = vpop.f32.mrb[14].mxu1  ;;  %v13191_v58 = vpack.c.bf16 %v3131_v63, %v3123_v26  ;;  %v3164_v63 = vld [vmem:[%s15497_s4 + $0x4e8] sm:$0xff] }
 0x579   :  { %v2595_v7 = vpop.f32.mrb[15].mxu1  ;;  %7665 = vmatprep.subr.bf16.mxu0 %v13144_v61  ;;  %v13214_v0 = vpack.c.bf16 %v3164_v63, %v3156_v15  ;;  %v3180_v34 = vld [vmem:[%s15497_s4 + $0x568] sm:$0xff] }
 0x57a   :  { %v2246_v59 = vadd.f32 %v6184_v60, %v13162_v49  ;;  %7759 = vmatpush1.bf16.msra.mxu1 %v12646_v20  ;;  %v13194_v20 = vpack.c.bf16 %v3148_v53, %v3140_v39  ;;  %v3163_v60 = vld [vmem:[%s15497_s4 + $0x4e0] sm:$0xff]  ;;  %v13229_v7 = vpop.permute.xlu1 %3727  ;;  %v3196_v15 = vld [vmem:[%s15497_s4 + $0x5e8] sm:$0xff] }
 0x57b   :  { %7761 = vmatprep.subr.bf16.mxu1 %v12649_v35  ;;  %v3147_v35 = vld [vmem:[%s15497_s4 + $0x460] sm:$0xff] }
 0x57c   :  { %5994 = vst.msk [vmem:[%s15503_s7 + $0x10] sm:$0xff] %vm777_vm0, %v2246_v59  ;;  %7667 = vmatpush1.bf16.msra.mxu0 %v13166_v62  ;;  %v13211_v26 = vpack.c.bf16 %v3147_v35, %v3139_v55  ;;  %v13236_v59 = vld [vmem:[%s15505_s8 + $0x8] sm:$0xff]  ;;  %v3179_v55 = vld [vmem:[%s15497_s4 + $0x560] sm:$0xff] }
 0x57d   :  { %7669 = vmatprep.subr.bf16.mxu0 %v13169_v45  ;;  %v3188_v35 = vld [vmem:[%s15497_s4 + $0x5a8] sm:$0xff] }
 0x57e   :  { %7763 = vmatpush1.bf16.msra.mxu1 %v12666_v22  ;;  %v3155_v22 = vld [vmem:[%s15497_s4 + $0x4a0] sm:$0xff] }
 0x57f   :  { %7765 = vmatprep.subr.bf16.mxu1 %v12669_v27  ;;  %v3172_v27 = vld [vmem:[%s15497_s4 + $0x528] sm:$0xff]  ;;  %v13242_v39 = vpack.c.bf16 %v3163_v60, %v3155_v22  ;;  %v13267_v22 = vpack.c.bf16 %v3196_v15, %v3188_v35  ;;  %v3195_v60 = vld [vmem:[%s15497_s4 + $0x5e0] sm:$0xff] }
 0x580   :  { %7671 = vmatpush1.bf16.msra.mxu0 %v13191_v58  ;;  %v13246_v53 = vpack.c.bf16 %v3180_v34, %v3172_v27  ;;  %v3212_v27 = vld [vmem:[%s15497_s4 + $0x668] sm:$0xff] }
 0x581   :  { %7673 = vmatprep.subr.bf16.mxu0 %v13194_v20  ;;  %v3228_v35 = vld [vmem:[%s15497_s4 + $0x6e8] sm:$0xff] }
 0x582   :  { %7767 = vmatpush1.bf16.msra.mxu1 %v12686_v37  ;;  %v13240_v37 = vmul.f32 %v13236_v59, %v13229_v7 }
 0x583   :  { %7801 = vmatprep.subr.bf16.mxu1 %v12689_v3  ;;  %v3171_v3 = vld [vmem:[%s15497_s4 + $0x520] sm:$0xff] }
 0x584   :  { %7675 = vmatpush1.bf16.msra.mxu0 %v13211_v26  ;;  %v13264_v63 = vpack.c.bf16 %v3179_v55, %v3171_v3  ;;  %v3211_v55 = vld [vmem:[%s15497_s4 + $0x660] sm:$0xff] }
 0x585   :  { %3541 = vmatmul.mubr.f32.vlgmr.msra.gmra.mrb[22].mxu1 %v12893_v48  ;;  %7677 = vmatprep.subr.bf16.mxu0 %v13214_v0 }
 0x586   :  { %7803 = vmatpush1.bf16.msra.mxu1 %v12706_v28  ;;  %4063 = vmatprep.mubr.f32.mxu1 %v13240_v37  ;;  %v3187_v28 = vld [vmem:[%s15497_s4 + $0x5a0] sm:$0xff] }
 0x587   :  { %7805 = vmatprep.subr.bf16.mxu1 %v12709_v19  ;;  %v3204_v19 = vld [vmem:[%s15497_s4 + $0x628] sm:$0xff]  ;;  %v13284_v34 = vpack.c.bf16 %v3195_v60, %v3187_v28  ;;  %v3227_v60 = vld [vmem:[%s15497_s4 + $0x6e0] sm:$0xff] }
 0x588   :  { %7679 = vmatpush1.bf16.msra.mxu0 %v13242_v39  ;;  %v13287_v3 = vpack.c.bf16 %v3212_v27, %v3204_v19  ;;  %v3244_v19 = vld [vmem:[%s15497_s4 + $0x768] sm:$0xff] }
 0x589   :  { %7681 = vmatprep.subr.bf16.mxu0 %v13246_v53 }
 0x58a   :  { %7807 = vmatpush1.bf16.msra.mxu1 %v12728_v14  ;;  %v3203_v14 = vld [vmem:[%s15497_s4 + $0x620] sm:$0xff] }
 0x58b   :  { %7809 = vmatprep.subr.bf16.mxu1 %v12731_v13  ;;  %v3220_v13 = vld [vmem:[%s15497_s4 + $0x6a8] sm:$0xff]  ;;  %v13304_v15 = vpack.c.bf16 %v3211_v55, %v3203_v14  ;;  %v3243_v55 = vld [vmem:[%s15497_s4 + $0x760] sm:$0xff] }
 0x58c   :  { %7683 = vmatpush1.bf16.msra.mxu0 %v13264_v63  ;;  %v13307_v28 = vpack.c.bf16 %v3228_v35, %v3220_v13  ;;  %v3260_v13 = vld [vmem:[%s15497_s4 + $0x7e8] sm:$0xff] }
 0x58d   :  { %7685 = vmatprep.subr.bf16.mxu0 %v13267_v22 }
 0x58e   :  { %7811 = vmatpush1.bf16.msra.mxu1 %v12748_v54  ;;  %v3219_v54 = vld [vmem:[%s15497_s4 + $0x6a0] sm:$0xff] }
 0x58f   :  { %7813 = vmatprep.subr.bf16.mxu1 %v12751_v33  ;;  %v3236_v33 = vld [vmem:[%s15497_s4 + $0x728] sm:$0xff]  ;;  %v13324_v27 = vpack.c.bf16 %v3227_v60, %v3219_v54  ;;  %v3259_v60 = vld [vmem:[%s15497_s4 + $0x7e0] sm:$0xff] }
 0x590   :  { %7687 = vmatpush1.bf16.msra.mxu0 %v13284_v34  ;;  %v13327_v14 = vpack.c.bf16 %v3244_v19, %v3236_v33  ;;  %v3629_v33 = vld [vmem:[%s15499_s5 + $0x88] sm:$0xff] }
 0x591   :  { %7689 = vmatprep.subr.bf16.mxu0 %v13287_v3 }
 0x592   :  { %7815 = vmatpush1.bf16.msra.mxu1 %v12768_v8  ;;  %v3235_v8 = vld [vmem:[%s15497_s4 + $0x720] sm:$0xff] }
 0x593   :  { %7817 = vmatprep.subr.bf16.mxu1 %v12771_v56  ;;  %v3252_v56 = vld [vmem:[%s15497_s4 + $0x7a8] sm:$0xff]  ;;  %v13344_v35 = vpack.c.bf16 %v3243_v55, %v3235_v8 }
 0x594   :  { %7691 = vmatpush1.bf16.msra.mxu0 %v13304_v15  ;;  %v13347_v54 = vpack.c.bf16 %v3260_v13, %v3252_v56  ;;  %v3613_v55 = vld [vmem:[%s15499_s5 + $0x8] sm:$0xff]  ;;  %v3631_v56 = vld [vmem:[%s15499_s5 + $0x98] sm:$0xff] }
 0x595   :  { %7693 = vmatprep.subr.bf16.mxu0 %v13307_v28 }
 0x596   :  { %7819 = vmatpush1.bf16.msra.mxu1 %v12788_v11  ;;  %v3251_v11 = vld [vmem:[%s15497_s4 + $0x7a0] sm:$0xff] }
 0x597   :  { %7821 = vmatprep.subr.bf16.mxu1 %v12791_v21  ;;  %v3628_v21 = vld [vmem:[%s15499_s5 + $0x80] sm:$0xff]  ;;  %v13364_v19 = vpack.c.bf16 %v3259_v60, %v3251_v11  ;;  %v3615_v60 = vld [vmem:[%s15499_s5 + $0x18] sm:$0xff] }
 0x598   :  { %7695 = vmatpush1.bf16.msra.mxu0 %v13324_v27  ;;  %v13367_v8 = vpack.c.bf16 %v3629_v33, %v3628_v21  ;;  %v3633_v21 = vld [vmem:[%s15499_s5 + $0xa8] sm:$0xff] }
 0x599   :  { %7697 = vmatprep.subr.bf16.mxu0 %v13327_v14 }
 0x59a   :  { %7823 = vmatpush1.bf16.msra.mxu1 %v12808_v17  ;;  %v3612_v17 = vld [vmem:[%s15499_s5] sm:$0xff] }
 0x59b   :  { %7825 = vmatprep.subr.bf16.mxu1 %v12811_v43  ;;  %v3630_v43 = vld [vmem:[%s15499_s5 + $0x90] sm:$0xff]  ;;  %v13384_v13 = vpack.c.bf16 %v3613_v55, %v3612_v17  ;;  %v3616_v17 = vld [vmem:[%s15499_s5 + $0x20] sm:$0xff]  ;;  %v3635_v55 = vld [vmem:[%s15499_s5 + $0xb8] sm:$0xff] }
 0x59c   :  { %7699 = vmatpush1.bf16.msra.mxu0 %v13344_v35  ;;  %v13387_v11 = vpack.c.bf16 %v3631_v56, %v3630_v43 }
 0x59d   :  { %7701 = vmatprep.subr.bf16.mxu0 %v13347_v54 }
 0x59e   :  { %7827 = vmatpush1.bf16.msra.mxu1 %v12828_v29  ;;  %v3614_v29 = vld [vmem:[%s15499_s5 + $0x10] sm:$0xff] }
 0x59f   :  { %7829 = vmatprep.subr.bf16.mxu1 %v12831_v31  ;;  %v3632_v31 = vld [vmem:[%s15499_s5 + $0xa0] sm:$0xff]  ;;  %v13406_v33 = vpack.c.bf16 %v3615_v60, %v3614_v29  ;;  %v3619_v29 = vld [vmem:[%s15499_s5 + $0x38] sm:$0xff]  ;;  %v3637_v60 = vld [vmem:[%s15499_s5 + $0xc8] sm:$0xff] }
 0x5a0   :  { %7703 = vmatpush1.bf16.msra.mxu0 %v13364_v19 }
 0x5a1   :  { %7769 = vmatprep.subr.bf16.mxu0 %v13367_v8 }
 0x5a2   :  { %7831 = vmatpush1.bf16.msra.mxu1 %v12848_v41  ;;  %v13409_v41 = vpack.c.bf16 %v3633_v21, %v3632_v31 }
 0x5a3   :  { %3470 = vmatmul.mubr.f32.vlgmr.msra.gmra.mrb[22].mxu0 %v12893_v48  ;;  %7833 = vmatprep.subr.bf16.mxu1 %v12851_v38  ;;  %v3617_v48 = vld [vmem:[%s15499_s5 + $0x28] sm:$0xff]  ;;  %v3634_v38 = vld [vmem:[%s15499_s5 + $0xb0] sm:$0xff] }
 0x5a4   :  { %7771 = vmatpush3.bf16.msra.mxu0 %v13384_v13  ;;  %3715 = vmatprep.mubr.f32.mxu0 %v13236_v59  ;;  %v13426_v43 = vpack.c.bf16 %v3617_v48, %v3616_v17  ;;  %v13429_v56 = vpack.c.bf16 %v3635_v55, %v3634_v38  ;;  %v3621_v17 = vld [vmem:[%s15499_s5 + $0x48] sm:$0xff]  ;;  %v3639_v48 = vld [vmem:[%s15499_s5 + $0xd8] sm:$0xff] }
 0x5a5   :  { %7773 = vmatprep.subr.bf16.mxu0 %v13387_v11 }
 0x5a6   :  { %7835 = vmatpush1.bf16.msra.mxu1 %v12868_v2  ;;  %v3618_v2 = vld [vmem:[%s15499_s5 + $0x30] sm:$0xff] }
 0x5a7   :  { %7837 = vmatprep.subr.bf16.mxu1 %v12871_v36  ;;  %v3636_v36 = vld [vmem:[%s15499_s5 + $0xc0] sm:$0xff]  ;;  %v13446_v31 = vpack.c.bf16 %v3619_v29, %v3618_v2  ;;  %v3623_v2 = vld [vmem:[%s15499_s5 + $0x58] sm:$0xff]  ;;  %v3641_v29 = vld [vmem:[%s15499_s5 + $0xe8] sm:$0xff] }
 0x5a8   :  { %7775 = vmatpush3.bf16.msra.mxu0 %v13406_v33  ;;  %v13449_v21 = vpack.c.bf16 %v3637_v60, %v3636_v36 }
 0x5a9   :  { %7777 = vmatprep.subr.bf16.mxu0 %v13409_v41 }
 0x5aa   :  { %7839 = vmatpush1.bf16.msra.mxu1 %v12897_v12  ;;  %v3620_v12 = vld [vmem:[%s15499_s5 + $0x40] sm:$0xff] }
 0x5ab   :  { %7841 = vmatprep.subr.bf16.mxu1 %v12901_v18  ;;  %v3638_v18 = vld [vmem:[%s15499_s5 + $0xd0] sm:$0xff]  ;;  %v13466_v38 = vpack.c.bf16 %v3621_v17, %v3620_v12  ;;  %v3625_v12 = vld [vmem:[%s15499_s5 + $0x68] sm:$0xff] }
 0x5ac   :  { %7779 = vmatpush3.bf16.msra.mxu0 %v13426_v43  ;;  %v13469_v55 = vpack.c.bf16 %v3639_v48, %v3638_v18  ;;  %v3643_v18 = vld [vmem:[%s15499_s5 + $0xf8] sm:$0xff] }
 0x5ad   :  { %7781 = vmatprep.subr.bf16.mxu0 %v13429_v56 }
 0x5ae   :  { %7843 = vmatpush1.bf16.msra.mxu1 %v12919_v10  ;;  %v3622_v10 = vld [vmem:[%s15499_s5 + $0x50] sm:$0xff] }
 0x5af   :  { %7845 = vmatprep.subr.bf16.mxu1 %v12922_v32  ;;  %v3640_v32 = vld [vmem:[%s15499_s5 + $0xe0] sm:$0xff]  ;;  %v13486_v36 = vpack.c.bf16 %v3623_v2, %v3622_v10 }
 0x5b0   :  { %7783 = vmatpush3.bf16.msra.mxu0 %v13446_v31  ;;  %v13489_v60 = vpack.c.bf16 %v3641_v29, %v3640_v32  ;;  %v3626_v29 = vld [vmem:[%s15499_s5 + $0x70] sm:$0xff] }
 0x5b1   :  { %7785 = vmatprep.subr.bf16.mxu0 %v13449_v21 }
 0x5b2   :  { %7847 = vmatpush1.bf16.msra.mxu1 %v12939_v46  ;;  %v3624_v46 = vld [vmem:[%s15499_s5 + $0x60] sm:$0xff] }
 0x5b3   :  { %7849 = vmatprep.subr.bf16.mxu1 %v12942_v1  ;;  %v3642_v1 = vld [vmem:[%s15499_s5 + $0xf0] sm:$0xff]  ;;  %v13506_v2 = vpack.c.bf16 %v3625_v12, %v3624_v46  ;;  %v3754_v46 = vld [vmem:[%s15497_s4 + $0x58] sm:$0xff] }
 0x5b4   :  { %7787 = vmatpush3.bf16.msra.mxu0 %v13466_v38 }
 0x5b5   :  { %7789 = vmatprep.subr.bf16.mxu0 %v13469_v55 }
 0x5b6   :  { %v2664_v17 = vpop.f32.mrb[16].mxu0  ;;  %7851 = vmatpush1.bf16.msra.mxu1 %v12959_v51  ;;  %v13509_v51 = vpack.c.bf16 %v3643_v18, %v3642_v1  ;;  %v3753_v18 = vld [vmem:[%s15497_s4 + $0x50] sm:$0xff] }
 0x5b7   :  { %v2666_v48 = vpop.f32.mrb[17].mxu0  ;;  %7853 = vmatprep.subr.bf16.mxu1 %v12962_v23  ;;  %v3627_v17 = vld [vmem:[%s15499_s5 + $0x78] sm:$0xff] }
 0x5b8   :  { %v2735_v10 = vpop.f32.mrb[16].mxu1  ;;  %7791 = vmatpush3.bf16.msra.mxu0 %v13486_v36  ;;  %v3746_v23 = vld [vmem:[%s15497_s4 + $0x18] sm:$0xff]  ;;  %v13526_v12 = vpack.c.bf16 %v3627_v17, %v3626_v29  ;;  %v3769_v29 = vld [vmem:[%s15497_s4 + $0xd0] sm:$0xff] }
 0x5b9   :  { %v2737_v32 = vpop.f32.mrb[17].mxu1  ;;  %7793 = vmatprep.subr.bf16.mxu0 %v13489_v60  ;;  %v13529_v1 = vpack.c.bf16 %v3754_v46, %v3746_v23  ;;  %v3770_v48 = vld [vmem:[%s15497_s4 + $0xd8] sm:$0xff]  ;;  %v13567_v23 = vmul.f32 %v12889_v9, %v13229_v7 }
 0x5ba   :  { %7855 = vmatpush1.bf16.msra.mxu1 %v12979_v5  ;;  %v3745_v5 = vld [vmem:[%s15497_s4 + $0x10] sm:$0xff]  ;;  %v3786_v17 = vld [vmem:[%s15497_s4 + $0x158] sm:$0xff] }
 0x5bb   :  { %7857 = vmatprep.subr.bf16.mxu1 %v12982_v44  ;;  %v3762_v44 = vld [vmem:[%s15497_s4 + $0x98] sm:$0xff]  ;;  %v13546_v10 = vpack.c.bf16 %v3753_v18, %v3745_v5  ;;  %v3777_v5 = vld [vmem:[%s15497_s4 + $0x110] sm:$0xff] }
 0x5bc   :  { %7795 = vmatpush3.bf16.msra.mxu0 %v13506_v2  ;;  %v13549_v32 = vpack.c.bf16 %v3770_v48, %v3762_v44  ;;  %v3802_v7 = vld [vmem:[%s15497_s4 + $0x1d8] sm:$0xff]  ;;  %v3801_v48 = vld [vmem:[%s15497_s4 + $0x1d0] sm:$0xff] }
 0x5bd   :  { %7797 = vmatprep.subr.bf16.mxu0 %v13509_v51 }
 0x5be   :  { %7859 = vmatpush1.bf16.msra.mxu1 %v12999_v52  ;;  %v3761_v52 = vld [vmem:[%s15497_s4 + $0x90] sm:$0xff] }
 0x5bf   :  { %7861 = vmatprep.subr.bf16.mxu1 %v13002_v4  ;;  %v3778_v4 = vld [vmem:[%s15497_s4 + $0x118] sm:$0xff] }
 0x5c0   :  { %7799 = vmatpush3.bf16.msra.mxu0 %v13526_v12  ;;  %v13576_v46 = vpack.c.bf16 %v3786_v17, %v3778_v4  ;;  %v3817_v17 = vld [vmem:[%s15497_s4 + $0x250] sm:$0xff] }
 0x5c1   :  { %7865 = vmatprep.subr.bf16.mxu0 %v13529_v1 }
 0x5c2   :  { %7863 = vmatpush1.bf16.msra.mxu1 %v13019_v24  ;;  %v13572_v24 = vpack.c.bf16 %v3769_v29, %v3761_v52  ;;  %v3818_v52 = vld [vmem:[%s15497_s4 + $0x258] sm:$0xff] }
 0x5c3   :  { %3716 = vmatmul.mubr.f32.vlgmr.msra.gmra.mrb[24].mxu0 %v12889_v9  ;;  %7929 = vmatprep.subr.bf16.mxu1 %v13022_v47  ;;  %v3785_v9 = vld [vmem:[%s15497_s4 + $0x150] sm:$0xff]  ;;  %v3794_v47 = vld [vmem:[%s15497_s4 + $0x198] sm:$0xff] }
 0x5c4   :  { %7867 = vmatpush1.bf16.msra.mxu0 %v13546_v10  ;;  %4134 = vmatprep.mubr.f32.mxu0 %v13240_v37  ;;  %v13594_v18 = vpack.c.bf16 %v3785_v9, %v3777_v5  ;;  %v13597_v44 = vpack.c.bf16 %v3802_v7, %v3794_v47  ;;  %v3834_v5 = vld [vmem:[%s15497_s4 + $0x2d8] sm:$0xff]  ;;  %v3833_v7 = vld [vmem:[%s15497_s4 + $0x2d0] sm:$0xff] }
 0x5c5   :  { %4064 = vmatmul.mubr.f32.vlgmr.msra.gmra.mrb[24].mxu1 %v13567_v23  ;;  %7869 = vmatprep.subr.bf16.mxu0 %v13549_v32 }
 0x5c6   :  { %7931 = vmatpush1.bf16.msra.mxu1 %v13039_v50  ;;  %4205 = vmatprep.mubr.f32.mxu1 %v13240_v37  ;;  %v3793_v50 = vld [vmem:[%s15497_s4 + $0x190] sm:$0xff] }
 0x5c7   :  { %7933 = vmatprep.subr.bf16.mxu1 %v13042_v6  ;;  %v3810_v6 = vld [vmem:[%s15497_s4 + $0x218] sm:$0xff]  ;;  %v13614_v29 = vpack.c.bf16 %v3801_v48, %v3793_v50  ;;  %v15522_v48 = vld [vmem:[#allocation4_spill] sm:$0xff] }
 0x5c8   :  { %7871 = vmatpush1.bf16.msra.mxu0 %v13572_v24  ;;  %v13617_v4 = vpack.c.bf16 %v3818_v52, %v3810_v6  ;;  %v3850_v50 = vld [vmem:[%s15497_s4 + $0x358] sm:$0xff] }
 0x5c9   :  { %7873 = vmatprep.subr.bf16.mxu0 %v13576_v46 }
 0x5ca   :  { %7935 = vmatpush1.bf16.msra.mxu1 %v13061_v30  ;;  %v3809_v30 = vld [vmem:[%s15497_s4 + $0x210] sm:$0xff] }
 0x5cb   :  { %7937 = vmatprep.subr.bf16.mxu1 %v13064_v16  ;;  %v3826_v16 = vld [vmem:[%s15497_s4 + $0x298] sm:$0xff]  ;;  %v13634_v9 = vpack.c.bf16 %v3817_v17, %v3809_v30  ;;  %v3849_v30 = vld [vmem:[%s15497_s4 + $0x350] sm:$0xff]  ;;  %v15523_v17 = vld [vmem:[#allocation5_spill] sm:$0xff] }
 0x5cc   :  { %7875 = vmatpush1.bf16.msra.mxu0 %v13594_v18  ;;  %v13637_v47 = vpack.c.bf16 %v3834_v5, %v3826_v16  ;;  %v3858_v16 = vld [vmem:[%s15497_s4 + $0x398] sm:$0xff] }
 0x5cd   :  { %7877 = vmatprep.subr.bf16.mxu0 %v13597_v44  ;;  %15520 = vst [vmem:[#allocation7_spill] sm:$0xff] %v13634_v9  ;;  %v3866_v5 = vld [vmem:[%s15497_s4 + $0x3d8] sm:$0xff] }
 0x5ce   :  { %7939 = vmatpush1.bf16.msra.mxu1 %v13081_v25  ;;  %15521 = vst [vmem:[#allocation8_spill] sm:$0xff] %v13637_v47  ;;  %v3825_v25 = vld [vmem:[%s15497_s4 + $0x290] sm:$0xff] }
 0x5cf   :  { %7941 = vmatprep.subr.bf16.mxu1 %v13084_v42  ;;  %v3842_v42 = vld [vmem:[%s15497_s4 + $0x318] sm:$0xff]  ;;  %v13654_v6 = vpack.c.bf16 %v3833_v7, %v3825_v25  ;;  %v15524_v25 = vld [vmem:[#allocation6_spill] sm:$0xff] }
 0x5d0   :  { %7879 = vmatpush1.bf16.msra.mxu0 %v13614_v29  ;;  %v13657_v52 = vpack.c.bf16 %v3850_v50, %v3842_v42 }
 0x5d1   :  { %7881 = vmatprep.subr.bf16.mxu0 %v13617_v4 }
 0x5d2   :  { %7943 = vmatpush1.bf16.msra.mxu1 %v13101_v40  ;;  %v3841_v40 = vld [vmem:[%s15497_s4 + $0x310] sm:$0xff] }
 0x5d3   :  { %7945 = vmatprep.subr.bf16.mxu1 %v15522_v48  ;;  %v13674_v42 = vpack.c.bf16 %v3849_v30, %v3841_v40  ;;  %v13677_v48 = vpack.c.bf16 %v3866_v5, %v3858_v16  ;;  %v3874_v40 = vld [vmem:[%s15497_s4 + $0x418] sm:$0xff] }
 0x5d4   :  { %7883 = vmatpush1.bf16.msra.mxu0 %v13634_v9  ;;  %v3882_v30 = vld [vmem:[%s15497_s4 + $0x458] sm:$0xff] }
 0x5d5   :  { %7885 = vmatprep.subr.bf16.mxu0 %v13637_v47  ;;  %v3865_v47 = vld [vmem:[%s15497_s4 + $0x3d0] sm:$0xff] }
 0x5d6   :  { %7947 = vmatpush1.bf16.msra.mxu1 %v15523_v17  ;;  %v3857_v17 = vld [vmem:[%s15497_s4 + $0x390] sm:$0xff] }
 0x5d7   :  { %7949 = vmatprep.subr.bf16.mxu1 %v15524_v25  ;;  %v13695_v5 = vpack.c.bf16 %v3865_v47, %v3857_v17  ;;  %v13698_v25 = vpack.c.bf16 %v3882_v30, %v3874_v40  ;;  %v3914_v17 = vld [vmem:[%s15497_s4 + $0x558] sm:$0xff] }
 0x5d8   :  { %v6217_v7 = vpop.f32.mrb[18].mxu1  ;;  %7887 = vmatpush1.bf16.msra.mxu0 %v13654_v6 }
 0x5d9   :  { %v6218_v50 = vpop.f32.mrb[19].mxu1  ;;  %7889 = vmatprep.subr.bf16.mxu0 %v13657_v52 }
 0x5da   :  { %v6219_v9 = vadd.f32 %v6218_v50, %v6217_v7  ;;  %7951 = vmatpush1.bf16.msra.mxu1 %v13141_v57  ;;  %v3873_v57 = vld [vmem:[%s15497_s4 + $0x410] sm:$0xff] }
 0x5db   :  { %7953 = vmatprep.subr.bf16.mxu1 %v13144_v61  ;;  %v3881_v7 = vld [vmem:[%s15497_s4 + $0x450] sm:$0xff]  ;;  %v3890_v61 = vld [vmem:[%s15497_s4 + $0x498] sm:$0xff] }
 0x5dc   :  { %v2982_v16 = vadd.f32 %v6219_v9, %v13162_v49  ;;  %7891 = vmatpush1.bf16.msra.mxu0 %v13674_v42  ;;  %v3898_v49 = vld [vmem:[%s15497_s4 + $0x4d8] sm:$0xff]  ;;  %v13719_v9 = vpack.c.bf16 %v3881_v7, %v3873_v57  ;;  %v3897_v50 = vld [vmem:[%s15497_s4 + $0x4d0] sm:$0xff] }
 0x5dd   :  { %7893 = vmatprep.subr.bf16.mxu0 %v13677_v48  ;;  %v13722_v47 = vpack.c.bf16 %v3898_v49, %v3890_v61  ;;  %v3930_v57 = vld [vmem:[%s15497_s4 + $0x5d8] sm:$0xff]  ;;  %v3929_v49 = vld [vmem:[%s15497_s4 + $0x5d0] sm:$0xff] }
 0x5de   :  { %6011 = vst.msk [vmem:[%s15503_s7 + $0x18] sm:$0xff] %vm777_vm0, %v2982_v16  ;;  %7955 = vmatpush1.bf16.msra.mxu1 %v13166_v62  ;;  %v3889_v62 = vld [vmem:[%s15497_s4 + $0x490] sm:$0xff] }
 0x5df   :  { %7957 = vmatprep.subr.bf16.mxu1 %v13169_v45  ;;  %v3906_v45 = vld [vmem:[%s15497_s4 + $0x518] sm:$0xff]  ;;  %v13739_v40 = vpack.c.bf16 %v3897_v50, %v3889_v62  ;;  %v3913_v16 = vld [vmem:[%s15497_s4 + $0x550] sm:$0xff] }
 0x5e0   :  { %7895 = vmatpush1.bf16.msra.mxu0 %v13695_v5  ;;  %v13742_v30 = vpack.c.bf16 %v3914_v17, %v3906_v45  ;;  %v3946_v62 = vld [vmem:[%s15497_s4 + $0x658] sm:$0xff]  ;;  %v3945_v17 = vld [vmem:[%s15497_s4 + $0x650] sm:$0xff] }
 0x5e1   :  { %7897 = vmatprep.subr.bf16.mxu0 %v13698_v25 }
 0x5e2   :  { %7959 = vmatpush1.bf16.msra.mxu1 %v13191_v58  ;;  %v3905_v58 = vld [vmem:[%s15497_s4 + $0x510] sm:$0xff] }
 0x5e3   :  { %7961 = vmatprep.subr.bf16.mxu1 %v13194_v20  ;;  %v3922_v20 = vld [vmem:[%s15497_s4 + $0x598] sm:$0xff]  ;;  %v13759_v7 = vpack.c.bf16 %v3913_v16, %v3905_v58 }
 0x5e4   :  { %7899 = vmatpush1.bf16.msra.mxu0 %v13719_v9  ;;  %v13762_v61 = vpack.c.bf16 %v3930_v57, %v3922_v20  ;;  %v3962_v58 = vld [vmem:[%s15497_s4 + $0x6d8] sm:$0xff]  ;;  %v3961_v57 = vld [vmem:[%s15497_s4 + $0x6d0] sm:$0xff] }
 0x5e5   :  { %7901 = vmatprep.subr.bf16.mxu0 %v13722_v47 }
 0x5e6   :  { %7963 = vmatpush1.bf16.msra.mxu1 %v13211_v26  ;;  %v3921_v26 = vld [vmem:[%s15497_s4 + $0x590] sm:$0xff] }
 0x5e7   :  { %7965 = vmatprep.subr.bf16.mxu1 %v13214_v0  ;;  %v3938_v0 = vld [vmem:[%s15497_s4 + $0x618] sm:$0xff]  ;;  %v13779_v50 = vpack.c.bf16 %v3929_v49, %v3921_v26 }
 0x5e8   :  { %7903 = vmatpush1.bf16.msra.mxu0 %v13739_v40  ;;  %v13782_v45 = vpack.c.bf16 %v3946_v62, %v3938_v0  ;;  %v3978_v26 = vld [vmem:[%s15497_s4 + $0x758] sm:$0xff]  ;;  %v3977_v62 = vld [vmem:[%s15497_s4 + $0x750] sm:$0xff] }
 0x5e9   :  { %7905 = vmatprep.subr.bf16.mxu0 %v13742_v30 }
 0x5ea   :  { %7967 = vmatpush1.bf16.msra.mxu1 %v13242_v39  ;;  %v3937_v39 = vld [vmem:[%s15497_s4 + $0x610] sm:$0xff] }
 0x5eb   :  { %7969 = vmatprep.subr.bf16.mxu1 %v13246_v53  ;;  %v3954_v53 = vld [vmem:[%s15497_s4 + $0x698] sm:$0xff]  ;;  %v13799_v16 = vpack.c.bf16 %v3945_v17, %v3937_v39 }
 0x5ec   :  { %7907 = vmatpush1.bf16.msra.mxu0 %v13759_v7  ;;  %v13802_v20 = vpack.c.bf16 %v3962_v58, %v3954_v53  ;;  %v3994_v17 = vld [vmem:[%s15497_s4 + $0x7d8] sm:$0xff] }
 0x5ed   :  { %7909 = vmatprep.subr.bf16.mxu0 %v13762_v61 }
 0x5ee   :  { %7971 = vmatpush1.bf16.msra.mxu1 %v13264_v63  ;;  %v3953_v63 = vld [vmem:[%s15497_s4 + $0x690] sm:$0xff] }
 0x5ef   :  { %7973 = vmatprep.subr.bf16.mxu1 %v13267_v22  ;;  %v3970_v22 = vld [vmem:[%s15497_s4 + $0x718] sm:$0xff]  ;;  %v13819_v49 = vpack.c.bf16 %v3961_v57, %v3953_v63  ;;  %v3993_v57 = vld [vmem:[%s15497_s4 + $0x7d0] sm:$0xff] }
 0x5f0   :  { %7911 = vmatpush1.bf16.msra.mxu0 %v13779_v50  ;;  %v13822_v0 = vpack.c.bf16 %v3978_v26, %v3970_v22  ;;  %v3758_v22 = vld [vmem:[%s15497_s4 + $0x78] sm:$0xff] }
 0x5f1   :  { %7913 = vmatprep.subr.bf16.mxu0 %v13782_v45 }
 0x5f2   :  { %7975 = vmatpush1.bf16.msra.mxu1 %v13284_v34  ;;  %v3969_v34 = vld [vmem:[%s15497_s4 + $0x710] sm:$0xff] }
 0x5f3   :  { %7977 = vmatprep.subr.bf16.mxu1 %v13287_v3  ;;  %v3986_v3 = vld [vmem:[%s15497_s4 + $0x798] sm:$0xff]  ;;  %v13839_v58 = vpack.c.bf16 %v3977_v62, %v3969_v34  ;;  %v3757_v62 = vld [vmem:[%s15497_s4 + $0x70] sm:$0xff] }
 0x5f4   :  { %7915 = vmatpush1.bf16.msra.mxu0 %v13799_v16  ;;  %v13842_v63 = vpack.c.bf16 %v3994_v17, %v3986_v3 }
 0x5f5   :  { %7917 = vmatprep.subr.bf16.mxu0 %v13802_v20 }
 0x5f6   :  { %v2806_v39 = vpop.f32.mrb[18].mxu0  ;;  %7979 = vmatpush1.bf16.msra.mxu1 %v13304_v15  ;;  %v3985_v15 = vld [vmem:[%s15497_s4 + $0x790] sm:$0xff] }
 0x5f7   :  { %v2808_v53 = vpop.f32.mrb[19].mxu0  ;;  %7981 = vmatprep.subr.bf16.mxu1 %v13307_v28  ;;  %v3750_v28 = vld [vmem:[%s15497_s4 + $0x38] sm:$0xff]  ;;  %v13859_v26 = vpack.c.bf16 %v3993_v57, %v3985_v15 }
 0x5f8   :  { %7919 = vmatpush1.bf16.msra.mxu0 %v13819_v49  ;;  %v13862_v34 = vpack.c.bf16 %v3758_v22, %v3750_v28  ;;  %v3774_v39 = vld [vmem:[%s15497_s4 + $0xf8] sm:$0xff]  ;;  %v3773_v53 = vld [vmem:[%s15497_s4 + $0xf0] sm:$0xff] }
 0x5f9   :  { %7921 = vmatprep.subr.bf16.mxu0 %v13822_v0  ;;  %v3790_v15 = vld [vmem:[%s15497_s4 + $0x178] sm:$0xff]  ;;  %v3781_v28 = vld [vmem:[%s15497_s4 + $0x130] sm:$0xff] }
 0x5fa   :  { %7983 = vmatpush1.bf16.msra.mxu1 %v13324_v27  ;;  %v3749_v27 = vld [vmem:[%s15497_s4 + $0x30] sm:$0xff]  ;;  %v3806_v22 = vld [vmem:[%s15497_s4 + $0x1f8] sm:$0xff] }
 0x5fb   :  { %7985 = vmatprep.subr.bf16.mxu1 %v13327_v14  ;;  %v3766_v14 = vld [vmem:[%s15497_s4 + $0xb8] sm:$0xff]  ;;  %v13879_v3 = vpack.c.bf16 %v3757_v62, %v3749_v27 }
 0x5fc   :  { %7923 = vmatpush1.bf16.msra.mxu0 %v13839_v58  ;;  %v13882_v17 = vpack.c.bf16 %v3774_v39, %v3766_v14  ;;  %v3805_v14 = vld [vmem:[%s15497_s4 + $0x1f0] sm:$0xff]  ;;  %v3822_v39 = vld [vmem:[%s15497_s4 + $0x278] sm:$0xff] }
 0x5fd   :  { %7925 = vmatprep.subr.bf16.mxu0 %v13842_v63 }
 0x5fe   :  { %7987 = vmatpush1.bf16.msra.mxu1 %v13344_v35  ;;  %v3765_v35 = vld [vmem:[%s15497_s4 + $0xb0] sm:$0xff] }
 0x5ff   :  { %7989 = vmatprep.subr.bf16.mxu1 %v13347_v54  ;;  %v3782_v54 = vld [vmem:[%s15497_s4 + $0x138] sm:$0xff]  ;;  %v13901_v57 = vpack.c.bf16 %v3773_v53, %v3765_v35 }
 0x600   :  { %7927 = vmatpush1.bf16.msra.mxu0 %v13859_v26 }
 0x601   :  { %7993 = vmatprep.subr.bf16.mxu0 %v13862_v34 }
 0x602   :  { %7991 = vmatpush1.bf16.msra.mxu1 %v13364_v19  ;;  %v13905_v19 = vpack.c.bf16 %v3790_v15, %v3782_v54  ;;  %v3821_v54 = vld [vmem:[%s15497_s4 + $0x270] sm:$0xff]  ;;  %v3838_v15 = vld [vmem:[%s15497_s4 + $0x2f8] sm:$0xff] }
 0x603   :  { %4135 = vmatmul.mubr.f32.vlgmr.msra.gmra.mrb[26].mxu0 %v13567_v23  ;;  %8057 = vmatprep.subr.bf16.mxu1 %v13367_v8  ;;  %v3789_v8 = vld [vmem:[%s15497_s4 + $0x170] sm:$0xff] }
 0x604   :  { %7995 = vmatpush1.bf16.msra.mxu0 %v13879_v3  ;;  %4276 = vmatprep.mubr.f32.mxu0 %v13240_v37  ;;  %v3798_v37 = vld [vmem:[%s15497_s4 + $0x1b8] sm:$0xff]  ;;  %v13923_v27 = vpack.c.bf16 %v3789_v8, %v3781_v28 }
 0x605   :  { %4206 = vmatmul.mubr.f32.vlgmr.msra.gmra.mrb[26].mxu1 %v13567_v23  ;;  %7997 = vmatprep.subr.bf16.mxu0 %v13882_v17  ;;  %v13926_v62 = vpack.c.bf16 %v3806_v22, %v3798_v37  ;;  %v3837_v37 = vld [vmem:[%s15497_s4 + $0x2f0] sm:$0xff]  ;;  %v3854_v22 = vld [vmem:[%s15497_s4 + $0x378] sm:$0xff] }
 0x606   :  { %8059 = vmatpush3.bf16.msra.mxu1 %v13384_v13  ;;  %4451 = vmatprep.mubr.f32.mxu1 %v13236_v59  ;;  %v3797_v13 = vld [vmem:[%s15497_s4 + $0x1b0] sm:$0xff] }
 0x607   :  { %8061 = vmatprep.subr.bf16.mxu1 %v13387_v11  ;;  %v3814_v11 = vld [vmem:[%s15497_s4 + $0x238] sm:$0xff]  ;;  %v13943_v35 = vpack.c.bf16 %v3805_v14, %v3797_v13 }
 0x608   :  { %7999 = vmatpush1.bf16.msra.mxu0 %v13901_v57  ;;  %v13946_v53 = vpack.c.bf16 %v3822_v39, %v3814_v11  ;;  %v3853_v11 = vld [vmem:[%s15497_s4 + $0x370] sm:$0xff]  ;;  %v3870_v39 = vld [vmem:[%s15497_s4 + $0x3f8] sm:$0xff] }
 0x609   :  { %8001 = vmatprep.subr.bf16.mxu0 %v13905_v19 }
 0x60a   :  { %8063 = vmatpush3.bf16.msra.mxu1 %v13406_v33  ;;  %v3813_v33 = vld [vmem:[%s15497_s4 + $0x230] sm:$0xff] }
 0x60b   :  { %8065 = vmatprep.subr.bf16.mxu1 %v13409_v41  ;;  %v3830_v41 = vld [vmem:[%s15497_s4 + $0x2b8] sm:$0xff]  ;;  %v13963_v28 = vpack.c.bf16 %v3821_v54, %v3813_v33 }
 0x60c   :  { %8003 = vmatpush1.bf16.msra.mxu0 %v13923_v27  ;;  %v13966_v8 = vpack.c.bf16 %v3838_v15, %v3830_v41 }
 0x60d   :  { %8005 = vmatprep.subr.bf16.mxu0 %v13926_v62 }
 0x60e   :  { %8067 = vmatpush3.bf16.msra.mxu1 %v13426_v43  ;;  %v3829_v43 = vld [vmem:[%s15497_s4 + $0x2b0] sm:$0xff] }
 0x60f   :  { %8069 = vmatprep.subr.bf16.mxu1 %v13429_v56  ;;  %v3846_v56 = vld [vmem:[%s15497_s4 + $0x338] sm:$0xff]  ;;  %v13983_v13 = vpack.c.bf16 %v3837_v37, %v3829_v43  ;;  %v3869_v43 = vld [vmem:[%s15497_s4 + $0x3f0] sm:$0xff] }
 0x610   :  { %8007 = vmatpush1.bf16.msra.mxu0 %v13943_v35  ;;  %v13986_v14 = vpack.c.bf16 %v3854_v22, %v3846_v56  ;;  %v3886_v37 = vld [vmem:[%s15497_s4 + $0x478] sm:$0xff] }
 0x611   :  { %8009 = vmatprep.subr.bf16.mxu0 %v13946_v53 }
 0x612   :  { %8071 = vmatpush3.bf16.msra.mxu1 %v13446_v31  ;;  %v3845_v31 = vld [vmem:[%s15497_s4 + $0x330] sm:$0xff] }
 0x613   :  { %8073 = vmatprep.subr.bf16.mxu1 %v13449_v21  ;;  %v3862_v21 = vld [vmem:[%s15497_s4 + $0x3b8] sm:$0xff]  ;;  %v14003_v54 = vpack.c.bf16 %v3853_v11, %v3845_v31  ;;  %v3885_v31 = vld [vmem:[%s15497_s4 + $0x470] sm:$0xff] }
 0x614   :  { %8011 = vmatpush1.bf16.msra.mxu0 %v13963_v28  ;;  %v14006_v15 = vpack.c.bf16 %v3870_v39, %v3862_v21  ;;  %v3902_v11 = vld [vmem:[%s15497_s4 + $0x4f8] sm:$0xff] }
 0x615   :  { %8013 = vmatprep.subr.bf16.mxu0 %v13966_v8 }
 0x616   :  { %8075 = vmatpush3.bf16.msra.mxu1 %v13466_v38  ;;  %v3861_v38 = vld [vmem:[%s15497_s4 + $0x3b0] sm:$0xff] }
 0x617   :  { %8077 = vmatprep.subr.bf16.mxu1 %v13469_v55  ;;  %v3878_v55 = vld [vmem:[%s15497_s4 + $0x438] sm:$0xff]  ;;  %v14023_v56 = vpack.c.bf16 %v3869_v43, %v3861_v38  ;;  %v14061_v38 = vpop.permute.xlu0 %4463 }
 0x618   :  { %v3400_v33 = vpop.f32.mrb[20].mxu1  ;;  %8015 = vmatpush1.bf16.msra.mxu0 %v13983_v13  ;;  %v14026_v22 = vpack.c.bf16 %v3886_v37, %v3878_v55  ;;  %v14067_v43 = vmul.f32 %v13236_v59, %v14061_v38  ;;  %v3917_v59 = vld [vmem:[%s15497_s4 + $0x570] sm:$0xff] }
 0x619   :  { %v3402_v41 = vpop.f32.mrb[21].mxu1  ;;  %8017 = vmatprep.subr.bf16.mxu0 %v13986_v14  ;;  %v3901_v33 = vld [vmem:[%s15497_s4 + $0x4f0] sm:$0xff] }
 0x61a   :  { %8079 = vmatpush3.bf16.msra.mxu1 %v13486_v36  ;;  %v3877_v36 = vld [vmem:[%s15497_s4 + $0x430] sm:$0xff]  ;;  %v3918_v41 = vld [vmem:[%s15497_s4 + $0x578] sm:$0xff] }
 0x61b   :  { %8081 = vmatprep.subr.bf16.mxu1 %v13489_v60  ;;  %v3894_v60 = vld [vmem:[%s15497_s4 + $0x4b8] sm:$0xff]  ;;  %v14043_v21 = vpack.c.bf16 %v3885_v31, %v3877_v36 }
 0x61c   :  { %8019 = vmatpush1.bf16.msra.mxu0 %v14003_v54  ;;  %v14046_v39 = vpack.c.bf16 %v3902_v11, %v3894_v60  ;;  %v3926_v36 = vld [vmem:[%s15497_s4 + $0x5b8] sm:$0xff] }
 0x61d   :  { %8021 = vmatprep.subr.bf16.mxu0 %v14006_v15  ;;  %v3934_v31 = vld [vmem:[%s15497_s4 + $0x5f8] sm:$0xff] }
 0x61e   :  { %8083 = vmatpush3.bf16.msra.mxu1 %v13506_v2  ;;  %v3893_v2 = vld [vmem:[%s15497_s4 + $0x4b0] sm:$0xff]  ;;  %v14099_v11 = vpack.c.bf16 %v3934_v31, %v3926_v36 }
 0x61f   :  { %8085 = vmatprep.subr.bf16.mxu1 %v13509_v51  ;;  %v3910_v51 = vld [vmem:[%s15497_s4 + $0x538] sm:$0xff]  ;;  %v14069_v55 = vpack.c.bf16 %v3901_v33, %v3893_v2  ;;  %v3933_v2 = vld [vmem:[%s15497_s4 + $0x5f0] sm:$0xff] }
 0x620   :  { %8023 = vmatpush1.bf16.msra.mxu0 %v14023_v56  ;;  %v14078_v37 = vpack.c.bf16 %v3918_v41, %v3910_v51  ;;  %v3950_v33 = vld [vmem:[%s15497_s4 + $0x678] sm:$0xff] }
 0x621   :  { %8025 = vmatprep.subr.bf16.mxu0 %v14026_v22 }
 0x622   :  { %8087 = vmatpush3.bf16.msra.mxu1 %v13526_v12  ;;  %v14074_v12 = vld [vmem:[%s15505_s8] sm:$0xff] }
 0x623   :  { %8153 = vmatprep.subr.bf16.mxu1 %v13529_v1  ;;  %v3909_v1 = vld [vmem:[%s15497_s4 + $0x530] sm:$0xff] }
 0x624   :  { %8027 = vmatpush1.bf16.msra.mxu0 %v14043_v21  ;;  %v14096_v60 = vpack.c.bf16 %v3917_v59, %v3909_v1  ;;  %v3949_v1 = vld [vmem:[%s15497_s4 + $0x670] sm:$0xff]  ;;  %v3966_v59 = vld [vmem:[%s15497_s4 + $0x6f8] sm:$0xff] }
 0x625   :  { %4452 = vmatmul.mubr.f32.vlgmr.msra.gmra.mrb[28].mxu1 %v14074_v12  ;;  %8029 = vmatprep.subr.bf16.mxu0 %v14046_v39 }
 0x626   :  { %8155 = vmatpush1.bf16.msra.mxu1 %v13546_v10  ;;  %4870 = vmatprep.mubr.f32.mxu1 %v14067_v43  ;;  %v3925_v10 = vld [vmem:[%s15497_s4 + $0x5b0] sm:$0xff] }
 0x627   :  { %8157 = vmatprep.subr.bf16.mxu1 %v13549_v32  ;;  %v3942_v32 = vld [vmem:[%s15497_s4 + $0x638] sm:$0xff]  ;;  %v14116_v51 = vpack.c.bf16 %v3933_v2, %v3925_v10  ;;  %v3965_v10 = vld [vmem:[%s15497_s4 + $0x6f0] sm:$0xff] }
 0x628   :  { %8031 = vmatpush1.bf16.msra.mxu0 %v14069_v55  ;;  %v14119_v41 = vpack.c.bf16 %v3950_v33, %v3942_v32  ;;  %v3982_v2 = vld [vmem:[%s15497_s4 + $0x778] sm:$0xff] }
 0x629   :  { %8033 = vmatprep.subr.bf16.mxu0 %v14078_v37 }
 0x62a   :  { %8159 = vmatpush1.bf16.msra.mxu1 %v13572_v24  ;;  %v3941_v24 = vld [vmem:[%s15497_s4 + $0x630] sm:$0xff] }
 0x62b   :  { %8161 = vmatprep.subr.bf16.mxu1 %v13576_v46  ;;  %v3958_v46 = vld [vmem:[%s15497_s4 + $0x6b8] sm:$0xff]  ;;  %v14136_v36 = vpack.c.bf16 %v3949_v1, %v3941_v24  ;;  %v3981_v24 = vld [vmem:[%s15497_s4 + $0x770] sm:$0xff] }
 0x62c   :  { %8035 = vmatpush1.bf16.msra.mxu0 %v14096_v60  ;;  %v14139_v31 = vpack.c.bf16 %v3966_v59, %v3958_v46  ;;  %v15525_v46 = vld [vmem:[#allocation7_spill] sm:$0xff] }
 0x62d   :  { %8037 = vmatprep.subr.bf16.mxu0 %v14099_v11  ;;  %v3998_v59 = vld [vmem:[%s15497_s4 + $0x7f8] sm:$0xff] }
 0x62e   :  { %8163 = vmatpush1.bf16.msra.mxu1 %v13594_v18  ;;  %v3957_v18 = vld [vmem:[%s15497_s4 + $0x6b0] sm:$0xff] }
 0x62f   :  { %8165 = vmatprep.subr.bf16.mxu1 %v13597_v44  ;;  %v3974_v44 = vld [vmem:[%s15497_s4 + $0x738] sm:$0xff]  ;;  %v14156_v32 = vpack.c.bf16 %v3965_v10, %v3957_v18  ;;  %v15526_v10 = vld [vmem:[#allocation8_spill] sm:$0xff] }
 0x630   :  { %8039 = vmatpush1.bf16.msra.mxu0 %v14116_v51  ;;  %v14159_v33 = vpack.c.bf16 %v3982_v2, %v3974_v44 }
 0x631   :  { %8041 = vmatprep.subr.bf16.mxu0 %v14119_v41 }
 0x632   :  { %8167 = vmatpush1.bf16.msra.mxu1 %v13614_v29  ;;  %v3973_v29 = vld [vmem:[%s15497_s4 + $0x730] sm:$0xff] }
 0x633   :  { %8169 = vmatprep.subr.bf16.mxu1 %v13617_v4  ;;  %v3990_v4 = vld [vmem:[%s15497_s4 + $0x7b8] sm:$0xff]  ;;  %v14176_v44 = vpack.c.bf16 %v3981_v24, %v3973_v29  ;;  %v4488_v29 = vld [vmem:[%s15497_s4 + $0x48] sm:$0xff] }
 0x634   :  { %8043 = vmatpush1.bf16.msra.mxu0 %v14136_v36  ;;  %v14179_v2 = vpack.c.bf16 %v3998_v59, %v3990_v4  ;;  %v4487_v59 = vld [vmem:[%s15497_s4 + $0x40] sm:$0xff] }
 0x635   :  { %8045 = vmatprep.subr.bf16.mxu0 %v14139_v31 }
 0x636   :  { %v3329_v1 = vpop.f32.mrb[20].mxu0  ;;  %8171 = vmatpush1.bf16.msra.mxu1 %v15525_v46  ;;  %v3997_v46 = vld [vmem:[%s15497_s4 + $0x7f0] sm:$0xff] }
 0x637   :  { %v3331_v18 = vpop.f32.mrb[21].mxu0  ;;  %8173 = vmatprep.subr.bf16.mxu1 %v15526_v10  ;;  %v3989_v1 = vld [vmem:[%s15497_s4 + $0x7b0] sm:$0xff]  ;;  %v4504_v10 = vld [vmem:[%s15497_s4 + $0xc8] sm:$0xff] }
 0x638   :  { %8047 = vmatpush1.bf16.msra.mxu0 %v14156_v32  ;;  %v4480_v18 = vld [vmem:[%s15497_s4 + $0x8] sm:$0xff]  ;;  %v14196_v24 = vpack.c.bf16 %v3997_v46, %v3989_v1 }
 0x639   :  { %8049 = vmatprep.subr.bf16.mxu0 %v14159_v33  ;;  %v14199_v4 = vpack.c.bf16 %v4488_v29, %v4480_v18  ;;  %v4503_v18 = vld [vmem:[%s15497_s4 + $0xc0] sm:$0xff]  ;;  %v4520_v29 = vld [vmem:[%s15497_s4 + $0x148] sm:$0xff] }
 0x63a   :  { %8175 = vmatpush1.bf16.msra.mxu1 %v13654_v6  ;;  %v4479_v6 = vld [vmem:[%s15497_s4] sm:$0xff] }
 0x63b   :  { %8177 = vmatprep.subr.bf16.mxu1 %v13657_v52  ;;  %v4496_v52 = vld [vmem:[%s15497_s4 + $0x88] sm:$0xff]  ;;  %v14216_v1 = vpack.c.bf16 %v4487_v59, %v4479_v6  ;;  %v4511_v59 = vld [vmem:[%s15497_s4 + $0x100] sm:$0xff] }
 0x63c   :  { %8051 = vmatpush1.bf16.msra.mxu0 %v14176_v44  ;;  %v14219_v46 = vpack.c.bf16 %v4504_v10, %v4496_v52  ;;  %v4536_v52 = vld [vmem:[%s15497_s4 + $0x1c8] sm:$0xff] }
 0x63d   :  { %8053 = vmatprep.subr.bf16.mxu0 %v14179_v2 }
 0x63e   :  { %8179 = vmatpush1.bf16.msra.mxu1 %v13674_v42  ;;  %v4495_v42 = vld [vmem:[%s15497_s4 + $0x80] sm:$0xff] }
 0x63f   :  { %8181 = vmatprep.subr.bf16.mxu1 %v13677_v48  ;;  %v4512_v48 = vld [vmem:[%s15497_s4 + $0x108] sm:$0xff]  ;;  %v14238_v6 = vpack.c.bf16 %v4503_v18, %v4495_v42  ;;  %v4535_v18 = vld [vmem:[%s15497_s4 + $0x1c0] sm:$0xff] }
 0x640   :  { %8055 = vmatpush1.bf16.msra.mxu0 %v14196_v24 }
 0x641   :  { %8089 = vmatprep.subr.bf16.mxu0 %v14199_v4 }
 0x642   :  { %8183 = vmatpush1.bf16.msra.mxu1 %v13695_v5  ;;  %v14241_v5 = vpack.c.bf16 %v4520_v29, %v4512_v48  ;;  %v4552_v48 = vld [vmem:[%s15497_s4 + $0x248] sm:$0xff] }
 0x643   :  { %4277 = vmatmul.mubr.f32.vlgmr.msra.gmra.mrb[28].mxu0 %v13567_v23  ;;  %8185 = vmatprep.subr.bf16.mxu1 %v13698_v25  ;;  %v4519_v23 = vld [vmem:[%s15497_s4 + $0x140] sm:$0xff]  ;;  %v4528_v25 = vld [vmem:[%s15497_s4 + $0x188] sm:$0xff] }
 0x644   :  { %8091 = vmatpush1.bf16.msra.mxu0 %v14216_v1  ;;  %4799 = vmatprep.mubr.f32.mxu0 %v14067_v43  ;;  %v14258_v10 = vpack.c.bf16 %v4519_v23, %v4511_v59  ;;  %v14261_v42 = vpack.c.bf16 %v4536_v52, %v4528_v25  ;;  %v4551_v23 = vld [vmem:[%s15497_s4 + $0x240] sm:$0xff]  ;;  %v4568_v25 = vld [vmem:[%s15497_s4 + $0x2c8] sm:$0xff] }
 0x645   :  { %8093 = vmatprep.subr.bf16.mxu0 %v14219_v46 }
 0x646   :  { %8187 = vmatpush1.bf16.msra.mxu1 %v13719_v9  ;;  %v4527_v9 = vld [vmem:[%s15497_s4 + $0x180] sm:$0xff] }
 0x647   :  { %8189 = vmatprep.subr.bf16.mxu1 %v13722_v47  ;;  %v4544_v47 = vld [vmem:[%s15497_s4 + $0x208] sm:$0xff]  ;;  %v14278_v29 = vpack.c.bf16 %v4535_v18, %v4527_v9  ;;  %v4567_v18 = vld [vmem:[%s15497_s4 + $0x2c0] sm:$0xff] }
 0x648   :  { %8095 = vmatpush1.bf16.msra.mxu0 %v14238_v6  ;;  %v14281_v59 = vpack.c.bf16 %v4552_v48, %v4544_v47  ;;  %v4584_v47 = vld [vmem:[%s15497_s4 + $0x348] sm:$0xff] }
 0x649   :  { %8097 = vmatprep.subr.bf16.mxu0 %v14241_v5 }
 0x64a   :  { %8191 = vmatpush1.bf16.msra.mxu1 %v13739_v40  ;;  %v4543_v40 = vld [vmem:[%s15497_s4 + $0x200] sm:$0xff] }
 0x64b   :  { %8193 = vmatprep.subr.bf16.mxu1 %v13742_v30  ;;  %v4560_v30 = vld [vmem:[%s15497_s4 + $0x288] sm:$0xff]  ;;  %v14298_v52 = vpack.c.bf16 %v4551_v23, %v4543_v40  ;;  %v4583_v23 = vld [vmem:[%s15497_s4 + $0x340] sm:$0xff] }
 0x64c   :  { %8099 = vmatpush1.bf16.msra.mxu0 %v14258_v10  ;;  %v14301_v9 = vpack.c.bf16 %v4568_v25, %v4560_v30  ;;  %v4600_v30 = vld [vmem:[%s15497_s4 + $0x3c8] sm:$0xff] }
 0x64d   :  { %8101 = vmatprep.subr.bf16.mxu0 %v14261_v42 }
 0x64e   :  { %8195 = vmatpush1.bf16.msra.mxu1 %v13759_v7  ;;  %v4559_v7 = vld [vmem:[%s15497_s4 + $0x280] sm:$0xff] }
 0x64f   :  { %8197 = vmatprep.subr.bf16.mxu1 %v13762_v61  ;;  %v4576_v61 = vld [vmem:[%s15497_s4 + $0x308] sm:$0xff]  ;;  %v14318_v48 = vpack.c.bf16 %v4567_v18, %v4559_v7 }
 0x650   :  { %8103 = vmatpush1.bf16.msra.mxu0 %v14278_v29  ;;  %v14321_v40 = vpack.c.bf16 %v4584_v47, %v4576_v61  ;;  %v4599_v47 = vld [vmem:[%s15497_s4 + $0x3c0] sm:$0xff] }
 0x651   :  { %8105 = vmatprep.subr.bf16.mxu0 %v14281_v59 }
 0x652   :  { %8199 = vmatpush1.bf16.msra.mxu1 %v13779_v50  ;;  %v4575_v50 = vld [vmem:[%s15497_s4 + $0x300] sm:$0xff] }
 0x653   :  { %8201 = vmatprep.subr.bf16.mxu1 %v13782_v45  ;;  %v4592_v45 = vld [vmem:[%s15497_s4 + $0x388] sm:$0xff]  ;;  %v14338_v7 = vpack.c.bf16 %v4583_v23, %v4575_v50 }
 0x654   :  { %8107 = vmatpush1.bf16.msra.mxu0 %v14298_v52  ;;  %v14341_v61 = vpack.c.bf16 %v4600_v30, %v4592_v45  ;;  %v4616_v50 = vld [vmem:[%s15497_s4 + $0x448] sm:$0xff]  ;;  %v4615_v30 = vld [vmem:[%s15497_s4 + $0x440] sm:$0xff] }
 0x655   :  { %8109 = vmatprep.subr.bf16.mxu0 %v14301_v9 }
 0x656   :  { %8203 = vmatpush1.bf16.msra.mxu1 %v13799_v16  ;;  %v4591_v16 = vld [vmem:[%s15497_s4 + $0x380] sm:$0xff] }
 0x657   :  { %8205 = vmatprep.subr.bf16.mxu1 %v13802_v20  ;;  %v4608_v20 = vld [vmem:[%s15497_s4 + $0x408] sm:$0xff]  ;;  %v14358_v23 = vpack.c.bf16 %v4599_v47, %v4591_v16  ;;  %v4631_v47 = vld [vmem:[%s15497_s4 + $0x4c0] sm:$0xff] }
 0x658   :  { %v3542_v25 = vpop.f32.mrb[22].mxu1  ;;  %8111 = vmatpush1.bf16.msra.mxu0 %v14318_v48  ;;  %v14361_v45 = vpack.c.bf16 %v4616_v50, %v4608_v20  ;;  %v4648_v20 = vld [vmem:[%s15497_s4 + $0x548] sm:$0xff]  ;;  %v14398_v50 = vmul.f32 %v14074_v12, %v14061_v38  ;;  %v4647_v38 = vld [vmem:[%s15497_s4 + $0x540] sm:$0xff] }
 0x659   :  { %v3544_v18 = vpop.f32.mrb[23].mxu1  ;;  %8113 = vmatprep.subr.bf16.mxu0 %v14321_v40  ;;  %v4632_v25 = vld [vmem:[%s15497_s4 + $0x4c8] sm:$0xff] }
 0x65a   :  { %8207 = vmatpush1.bf16.msra.mxu1 %v13819_v49  ;;  %v4607_v49 = vld [vmem:[%s15497_s4 + $0x400] sm:$0xff] }
 0x65b   :  { %8209 = vmatprep.subr.bf16.mxu1 %v13822_v0  ;;  %v4624_v0 = vld [vmem:[%s15497_s4 + $0x488] sm:$0xff]  ;;  %v14378_v18 = vpack.c.bf16 %v4615_v30, %v4607_v49  ;;  %v4639_v30 = vld [vmem:[%s15497_s4 + $0x500] sm:$0xff] }
 0x65c   :  { %8115 = vmatpush1.bf16.msra.mxu0 %v14338_v7  ;;  %v14381_v16 = vpack.c.bf16 %v4632_v25, %v4624_v0  ;;  %v4664_v0 = vld [vmem:[%s15497_s4 + $0x5c8] sm:$0xff]  ;;  %v14424_v25 = vpack.c.bf16 %v4647_v38, %v4639_v30  ;;  %v4679_v38 = vld [vmem:[%s15497_s4 + $0x640] sm:$0xff] }
 0x65d   :  { %8117 = vmatprep.subr.bf16.mxu0 %v14341_v61 }
 0x65e   :  { %8211 = vmatpush1.bf16.msra.mxu1 %v13839_v58  ;;  %v4623_v58 = vld [vmem:[%s15497_s4 + $0x480] sm:$0xff] }
 0x65f   :  { %8213 = vmatprep.subr.bf16.mxu1 %v13842_v63  ;;  %v4640_v63 = vld [vmem:[%s15497_s4 + $0x508] sm:$0xff]  ;;  %v14402_v49 = vpack.c.bf16 %v4631_v47, %v4623_v58  ;;  %v4663_v47 = vld [vmem:[%s15497_s4 + $0x5c0] sm:$0xff] }
 0x660   :  { %8119 = vmatpush1.bf16.msra.mxu0 %v14358_v23 }
 0x661   :  { %8121 = vmatprep.subr.bf16.mxu0 %v14361_v45 }
 0x662   :  { %8215 = vmatpush1.bf16.msra.mxu1 %v13859_v26  ;;  %v14406_v26 = vpack.c.bf16 %v4648_v20, %v4640_v63  ;;  %v4680_v63 = vld [vmem:[%s15497_s4 + $0x648] sm:$0xff] }
 0x663   :  { %8281 = vmatprep.subr.bf16.mxu1 %v13862_v34  ;;  %v4656_v34 = vld [vmem:[%s15497_s4 + $0x588] sm:$0xff] }
 0x664   :  { %8123 = vmatpush1.bf16.msra.mxu0 %v14378_v18  ;;  %v14427_v58 = vpack.c.bf16 %v4664_v0, %v4656_v34  ;;  %v4696_v34 = vld [vmem:[%s15497_s4 + $0x6c8] sm:$0xff] }
 0x665   :  { %4871 = vmatmul.mubr.f32.vlgmr.msra.gmra.mrb[30].mxu1 %v14398_v50  ;;  %8125 = vmatprep.subr.bf16.mxu0 %v14381_v16 }
 0x666   :  { %8283 = vmatpush1.bf16.msra.mxu1 %v13879_v3  ;;  %5012 = vmatprep.mubr.f32.mxu1 %v14067_v43  ;;  %v4655_v3 = vld [vmem:[%s15497_s4 + $0x580] sm:$0xff] }
 0x667   :  { %8285 = vmatprep.subr.bf16.mxu1 %v13882_v17  ;;  %v4672_v17 = vld [vmem:[%s15497_s4 + $0x608] sm:$0xff]  ;;  %v14444_v20 = vpack.c.bf16 %v4663_v47, %v4655_v3  ;;  %v4695_v47 = vld [vmem:[%s15497_s4 + $0x6c0] sm:$0xff] }
 0x668   :  { %8127 = vmatpush1.bf16.msra.mxu0 %v14402_v49  ;;  %v14447_v30 = vpack.c.bf16 %v4680_v63, %v4672_v17  ;;  %v4712_v17 = vld [vmem:[%s15497_s4 + $0x748] sm:$0xff] }
 0x669   :  { %8129 = vmatprep.subr.bf16.mxu0 %v14406_v26 }
 0x66a   :  { %8287 = vmatpush1.bf16.msra.mxu1 %v13901_v57  ;;  %v4671_v57 = vld [vmem:[%s15497_s4 + $0x600] sm:$0xff] }
 0x66b   :  { %8289 = vmatprep.subr.bf16.mxu1 %v13905_v19  ;;  %v4688_v19 = vld [vmem:[%s15497_s4 + $0x688] sm:$0xff]  ;;  %v14464_v0 = vpack.c.bf16 %v4679_v38, %v4671_v57  ;;  %v4711_v38 = vld [vmem:[%s15497_s4 + $0x740] sm:$0xff] }
 0x66c   :  { %8131 = vmatpush1.bf16.msra.mxu0 %v14424_v25  ;;  %v14467_v3 = vpack.c.bf16 %v4696_v34, %v4688_v19  ;;  %v4728_v34 = vld [vmem:[%s15497_s4 + $0x7c8] sm:$0xff] }
 0x66d   :  { %8133 = vmatprep.subr.bf16.mxu0 %v14427_v58 }
 0x66e   :  { %8291 = vmatpush1.bf16.msra.mxu1 %v13923_v27  ;;  %v4687_v27 = vld [vmem:[%s15497_s4 + $0x680] sm:$0xff] }
 0x66f   :  { %8293 = vmatprep.subr.bf16.mxu1 %v13926_v62  ;;  %v4704_v62 = vld [vmem:[%s15497_s4 + $0x708] sm:$0xff]  ;;  %v14484_v63 = vpack.c.bf16 %v4695_v47, %v4687_v27 }
 0x670   :  { %8135 = vmatpush1.bf16.msra.mxu0 %v14444_v20  ;;  %v14487_v57 = vpack.c.bf16 %v4712_v17, %v4704_v62  ;;  %v4727_v17 = vld [vmem:[%s15497_s4 + $0x7c0] sm:$0xff] }
 0x671   :  { %8137 = vmatprep.subr.bf16.mxu0 %v14447_v30 }
 0x672   :  { %8295 = vmatpush1.bf16.msra.mxu1 %v13943_v35  ;;  %v4703_v35 = vld [vmem:[%s15497_s4 + $0x700] sm:$0xff] }
 0x673   :  { %8297 = vmatprep.subr.bf16.mxu1 %v13946_v53  ;;  %v4720_v53 = vld [vmem:[%s15497_s4 + $0x788] sm:$0xff]  ;;  %v14504_v47 = vpack.c.bf16 %v4711_v38, %v4703_v35 }
 0x674   :  { %8139 = vmatpush1.bf16.msra.mxu0 %v14464_v0  ;;  %v14507_v62 = vpack.c.bf16 %v4728_v34, %v4720_v53  ;;  %v4492_v35 = vld [vmem:[%s15497_s4 + $0x68] sm:$0xff]  ;;  %v4491_v53 = vld [vmem:[%s15497_s4 + $0x60] sm:$0xff] }
 0x675   :  { %8141 = vmatprep.subr.bf16.mxu0 %v14467_v3  ;;  %v4508_v34 = vld [vmem:[%s15497_s4 + $0xe8] sm:$0xff] }
 0x676   :  { %v3471_v19 = vpop.f32.mrb[22].mxu0  ;;  %8299 = vmatpush1.bf16.msra.mxu1 %v13963_v28  ;;  %v4719_v28 = vld [vmem:[%s15497_s4 + $0x780] sm:$0xff] }
 0x677   :  { %v3473_v27 = vpop.f32.mrb[23].mxu0  ;;  %8301 = vmatprep.subr.bf16.mxu1 %v13966_v8  ;;  %v4484_v8 = vld [vmem:[%s15497_s4 + $0x28] sm:$0xff]  ;;  %v14524_v38 = vpack.c.bf16 %v4727_v17, %v4719_v28  ;;  %v4507_v17 = vld [vmem:[%s15497_s4 + $0xe0] sm:$0xff] }
 0x678   :  { %8143 = vmatpush1.bf16.msra.mxu0 %v14484_v63  ;;  %v14527_v19 = vpack.c.bf16 %v4492_v35, %v4484_v8  ;;  %v4524_v8 = vld [vmem:[%s15497_s4 + $0x168] sm:$0xff] }
 0x679   :  { %8145 = vmatprep.subr.bf16.mxu0 %v14487_v57 }
 0x67a   :  { %8303 = vmatpush1.bf16.msra.mxu1 %v13983_v13  ;;  %v4483_v13 = vld [vmem:[%s15497_s4 + $0x20] sm:$0xff] }
 0x67b   :  { %8305 = vmatprep.subr.bf16.mxu1 %v13986_v14  ;;  %v4500_v14 = vld [vmem:[%s15497_s4 + $0xa8] sm:$0xff]  ;;  %v14544_v27 = vpack.c.bf16 %v4491_v53, %v4483_v13  ;;  %v4515_v13 = vld [vmem:[%s15497_s4 + $0x120] sm:$0xff] }
 0x67c   :  { %8147 = vmatpush1.bf16.msra.mxu0 %v14504_v47  ;;  %v14547_v28 = vpack.c.bf16 %v4508_v34, %v4500_v14  ;;  %v4523_v53 = vld [vmem:[%s15497_s4 + $0x160] sm:$0xff] }
 0x67d   :  { %8149 = vmatprep.subr.bf16.mxu0 %v14507_v62  ;;  %v14586_v14 = vpack.c.bf16 %v4523_v53, %v4515_v13  ;;  %v4555_v13 = vld [vmem:[%s15497_s4 + $0x260] sm:$0xff]  ;;  %v4572_v53 = vld [vmem:[%s15497_s4 + $0x2e8] sm:$0xff] }
 0x67e   :  { %8307 = vmatpush1.bf16.msra.mxu1 %v14003_v54  ;;  %v4499_v54 = vld [vmem:[%s15497_s4 + $0xa0] sm:$0xff] }
 0x67f   :  { %8309 = vmatprep.subr.bf16.mxu1 %v14006_v15  ;;  %v4516_v15 = vld [vmem:[%s15497_s4 + $0x128] sm:$0xff]  ;;  %v14566_v35 = vpack.c.bf16 %v4507_v17, %v4499_v54  ;;  %v4539_v54 = vld [vmem:[%s15497_s4 + $0x1e0] sm:$0xff] }
 0x680   :  { %8151 = vmatpush1.bf16.msra.mxu0 %v14524_v38  ;;  %v4556_v17 = vld [vmem:[%s15497_s4 + $0x268] sm:$0xff] }
 0x681   :  { %8217 = vmatprep.subr.bf16.mxu0 %v14527_v19 }
 0x682   :  { %8311 = vmatpush1.bf16.msra.mxu1 %v14023_v56  ;;  %v14569_v56 = vpack.c.bf16 %v4524_v8, %v4516_v15 }
 0x683   :  { %4800 = vmatmul.mubr.f32.vlgmr.msra.gmra.mrb[30].mxu0 %v14398_v50  ;;  %8313 = vmatprep.subr.bf16.mxu1 %v14026_v22  ;;  %v4532_v22 = vld [vmem:[%s15497_s4 + $0x1a8] sm:$0xff] }
 0x684   :  { %8219 = vmatpush1.bf16.msra.mxu0 %v14544_v27  ;;  %4941 = vmatprep.mubr.f32.mxu0 %v14067_v43  ;;  %v4540_v43 = vld [vmem:[%s15497_s4 + $0x1e8] sm:$0xff] }
 0x685   :  { %8221 = vmatprep.subr.bf16.mxu0 %v14547_v28  ;;  %v14589_v34 = vpack.c.bf16 %v4540_v43, %v4532_v22 }
 0x686   :  { %8315 = vmatpush1.bf16.msra.mxu1 %v14043_v21  ;;  %v4531_v21 = vld [vmem:[%s15497_s4 + $0x1a0] sm:$0xff] }
 0x687   :  { %8317 = vmatprep.subr.bf16.mxu1 %v14046_v39  ;;  %v4548_v39 = vld [vmem:[%s15497_s4 + $0x228] sm:$0xff]  ;;  %v14606_v15 = vpack.c.bf16 %v4539_v54, %v4531_v21  ;;  %v4571_v21 = vld [vmem:[%s15497_s4 + $0x2e0] sm:$0xff] }
 0x688   :  { %8223 = vmatpush1.bf16.msra.mxu0 %v14566_v35  ;;  %v14609_v8 = vpack.c.bf16 %v4556_v17, %v4548_v39  ;;  %v4588_v54 = vld [vmem:[%s15497_s4 + $0x368] sm:$0xff] }
 0x689   :  { %8225 = vmatprep.subr.bf16.mxu0 %v14569_v56 }
 0x68a   :  { %8319 = vmatpush1.bf16.msra.mxu1 %v14069_v55  ;;  %15527 = vst [vmem:[#allocation4_spill] sm:$0xff] %v14609_v8  ;;  %v4547_v55 = vld [vmem:[%s15497_s4 + $0x220] sm:$0xff] }
 0x68b   :  { %8321 = vmatprep.subr.bf16.mxu1 %v14078_v37  ;;  %v4564_v37 = vld [vmem:[%s15497_s4 + $0x2a8] sm:$0xff]  ;;  %v14626_v22 = vpack.c.bf16 %v4555_v13, %v4547_v55  ;;  %v4587_v55 = vld [vmem:[%s15497_s4 + $0x360] sm:$0xff] }
 0x68c   :  { %8227 = vmatpush1.bf16.msra.mxu0 %v14586_v14  ;;  %v14629_v43 = vpack.c.bf16 %v4572_v53, %v4564_v37  ;;  %v4604_v37 = vld [vmem:[%s15497_s4 + $0x3e8] sm:$0xff]  ;;  %v14667_v53 = vld [vmem:[%s15502_s6] ss:$0 sm:$0xff] }
 0x68d   :  { %8229 = vmatprep.subr.bf16.mxu0 %v14589_v34  ;;  %15528 = vst [vmem:[#allocation5_spill] sm:$0xff] %v14626_v22 }
 0x68e   :  { %8323 = vmatpush1.bf16.msra.mxu1 %v14096_v60  ;;  %15529 = vst [vmem:[#allocation6_spill] sm:$0xff] %v14629_v43  ;;  %v4563_v60 = vld [vmem:[%s15497_s4 + $0x2a0] sm:$0xff] }
 0x68f   :  { %8325 = vmatprep.subr.bf16.mxu1 %v14099_v11  ;;  %v4580_v11 = vld [vmem:[%s15497_s4 + $0x328] sm:$0xff]  ;;  %v14646_v39 = vpack.c.bf16 %v4571_v21, %v4563_v60 }
 0x690   :  { %8231 = vmatpush1.bf16.msra.mxu0 %v14606_v15  ;;  %v14649_v17 = vpack.c.bf16 %v4588_v54, %v4580_v11 }
 0x691   :  { %8233 = vmatprep.subr.bf16.mxu0 %v14609_v8  ;;  %v4603_v8 = vld [vmem:[%s15497_s4 + $0x3e0] sm:$0xff] }
 0x692   :  { %8327 = vmatpush1.bf16.msra.mxu1 %v14116_v51  ;;  %v4579_v51 = vld [vmem:[%s15497_s4 + $0x320] sm:$0xff] }
 0x693   :  { %8329 = vmatprep.subr.bf16.mxu1 %v14119_v41  ;;  %v4596_v41 = vld [vmem:[%s15497_s4 + $0x3a8] sm:$0xff] }
 0x694   :  { %8235 = vmatpush1.bf16.msra.mxu0 %v14626_v22  ;;  %v4595_v22 = vld [vmem:[%s15497_s4 + $0x3a0] sm:$0xff] }
 0x695   :  { %8237 = vmatprep.subr.bf16.mxu0 %v14629_v43  ;;  %v14674_v43 = vpack.c.bf16 %v4604_v37, %v4596_v41  ;;  %v4611_v41 = vld [vmem:[%s15497_s4 + $0x420] sm:$0xff]  ;;  %v4628_v37 = vld [vmem:[%s15497_s4 + $0x4a8] sm:$0xff] }
 0x696   :  { %v6252_v13 = vpop.f32.mrb[24].mxu0  ;;  %8331 = vmatpush1.bf16.msra.mxu1 %v14136_v36  ;;  %v14671_v36 = vpack.c.bf16 %v4587_v55, %v4579_v51  ;;  %v4612_v51 = vld [vmem:[%s15497_s4 + $0x428] sm:$0xff] }
 0x697   :  { %v6253_v60 = vpop.f32.mrb[25].mxu0  ;;  %8333 = vmatprep.subr.bf16.mxu1 %v14139_v31  ;;  %v4620_v55 = vld [vmem:[%s15497_s4 + $0x468] sm:$0xff] }
 0x698   :  { %v6254_v21 = vadd.f32 %v6253_v60, %v6252_v13  ;;  %v4065_v11 = vpop.f32.mrb[24].mxu1  ;;  %8239 = vmatpush1.bf16.msra.mxu0 %v14646_v39  ;;  %v14696_v13 = vpack.c.bf16 %v4603_v8, %v4595_v22  ;;  %v4636_v8 = vld [vmem:[%s15497_s4 + $0x4e8] sm:$0xff] }
 0x699   :  { %v4067_v54 = vpop.f32.mrb[25].mxu1  ;;  %8241 = vmatprep.subr.bf16.mxu0 %v14649_v17  ;;  %v14719_v60 = vpack.c.bf16 %v4636_v8, %v4628_v37  ;;  %v4652_v11 = vld [vmem:[%s15497_s4 + $0x568] sm:$0xff] }
 0x69a   :  { %v3718_v31 = vadd.f32 %v6254_v21, %v14667_v53  ;;  %8335 = vmatpush1.bf16.msra.mxu1 %v14156_v32  ;;  %v14699_v32 = vpack.c.bf16 %v4620_v55, %v4612_v51  ;;  %v4635_v21 = vld [vmem:[%s15497_s4 + $0x4e0] sm:$0xff]  ;;  %v14734_v54 = vpop.permute.xlu1 %5199  ;;  %v4668_v37 = vld [vmem:[%s15497_s4 + $0x5e8] sm:$0xff] }
 0x69b   :  { %8337 = vmatprep.subr.bf16.mxu1 %v14159_v33  ;;  %v4619_v33 = vld [vmem:[%s15497_s4 + $0x460] sm:$0xff] }
 0x69c   :  { %6028 = vst.msk [vmem:[%s15503_s7 + $0x20] sm:$0xff] %vm777_vm0, %v3718_v31  ;;  %8243 = vmatpush1.bf16.msra.mxu0 %v14671_v36  ;;  %v14716_v22 = vpack.c.bf16 %v4619_v33, %v4611_v41  ;;  %v14741_v31 = vld [vmem:[%s15505_s8 + $0x8] sm:$0xff]  ;;  %v4651_v41 = vld [vmem:[%s15497_s4 + $0x560] sm:$0xff] }
 0x69d   :  { %8245 = vmatprep.subr.bf16.mxu0 %v14674_v43  ;;  %v4660_v33 = vld [vmem:[%s15497_s4 + $0x5a8] sm:$0xff] }
 0x69e   :  { %8339 = vmatpush1.bf16.msra.mxu1 %v14176_v44  ;;  %v4627_v44 = vld [vmem:[%s15497_s4 + $0x4a0] sm:$0xff] }
 0x69f   :  { %8341 = vmatprep.subr.bf16.mxu1 %v14179_v2  ;;  %v4644_v2 = vld [vmem:[%s15497_s4 + $0x528] sm:$0xff]  ;;  %v14747_v51 = vpack.c.bf16 %v4635_v21, %v4627_v44  ;;  %v14772_v44 = vpack.c.bf16 %v4668_v37, %v4660_v33  ;;  %v4667_v21 = vld [vmem:[%s15497_s4 + $0x5e0] sm:$0xff] }
 0x6a0   :  { %8247 = vmatpush1.bf16.msra.mxu0 %v14696_v13  ;;  %v14751_v55 = vpack.c.bf16 %v4652_v11, %v4644_v2  ;;  %v4684_v2 = vld [vmem:[%s15497_s4 + $0x668] sm:$0xff] }
 0x6a1   :  { %8249 = vmatprep.subr.bf16.mxu0 %v14699_v32  ;;  %v4700_v33 = vld [vmem:[%s15497_s4 + $0x6e8] sm:$0xff] }
 0x6a2   :  { %8343 = vmatpush1.bf16.msra.mxu1 %v14196_v24  ;;  %v14745_v24 = vmul.f32 %v14741_v31, %v14734_v54 }
 0x6a3   :  { %8377 = vmatprep.subr.bf16.mxu1 %v14199_v4  ;;  %v4643_v4 = vld [vmem:[%s15497_s4 + $0x520] sm:$0xff] }
 0x6a4   :  { %8251 = vmatpush1.bf16.msra.mxu0 %v14716_v22  ;;  %v14769_v8 = vpack.c.bf16 %v4651_v41, %v4643_v4  ;;  %v4683_v41 = vld [vmem:[%s15497_s4 + $0x660] sm:$0xff] }
 0x6a5   :  { %5013 = vmatmul.mubr.f32.vlgmr.msra.gmra.mrb[32].mxu1 %v14398_v50  ;;  %8253 = vmatprep.subr.bf16.mxu0 %v14719_v60 }
 0x6a6   :  { %8379 = vmatpush1.bf16.msra.mxu1 %v14216_v1  ;;  %5535 = vmatprep.mubr.f32.mxu1 %v14745_v24  ;;  %v4659_v1 = vld [vmem:[%s15497_s4 + $0x5a0] sm:$0xff] }
 0x6a7   :  { %8381 = vmatprep.subr.bf16.mxu1 %v14219_v46  ;;  %v4676_v46 = vld [vmem:[%s15497_s4 + $0x628] sm:$0xff]  ;;  %v14789_v11 = vpack.c.bf16 %v4667_v21, %v4659_v1  ;;  %v4699_v21 = vld [vmem:[%s15497_s4 + $0x6e0] sm:$0xff] }
 0x6a8   :  { %8255 = vmatpush1.bf16.msra.mxu0 %v14747_v51  ;;  %v14792_v4 = vpack.c.bf16 %v4684_v2, %v4676_v46  ;;  %v4716_v46 = vld [vmem:[%s15497_s4 + $0x768] sm:$0xff] }
 0x6a9   :  { %8257 = vmatprep.subr.bf16.mxu0 %v14751_v55 }
 0x6aa   :  { %8383 = vmatpush1.bf16.msra.mxu1 %v14238_v6  ;;  %v4675_v6 = vld [vmem:[%s15497_s4 + $0x620] sm:$0xff] }
 0x6ab   :  { %8385 = vmatprep.subr.bf16.mxu1 %v14241_v5  ;;  %v4692_v5 = vld [vmem:[%s15497_s4 + $0x6a8] sm:$0xff]  ;;  %v14809_v37 = vpack.c.bf16 %v4683_v41, %v4675_v6  ;;  %v4715_v41 = vld [vmem:[%s15497_s4 + $0x760] sm:$0xff] }
 0x6ac   :  { %8259 = vmatpush1.bf16.msra.mxu0 %v14769_v8  ;;  %v14812_v1 = vpack.c.bf16 %v4700_v33, %v4692_v5  ;;  %v4732_v5 = vld [vmem:[%s15497_s4 + $0x7e8] sm:$0xff] }
 0x6ad   :  { %8261 = vmatprep.subr.bf16.mxu0 %v14772_v44 }
 0x6ae   :  { %8387 = vmatpush1.bf16.msra.mxu1 %v14258_v10  ;;  %v4691_v10 = vld [vmem:[%s15497_s4 + $0x6a0] sm:$0xff] }
 0x6af   :  { %8389 = vmatprep.subr.bf16.mxu1 %v14261_v42  ;;  %v4708_v42 = vld [vmem:[%s15497_s4 + $0x728] sm:$0xff]  ;;  %v14829_v2 = vpack.c.bf16 %v4699_v21, %v4691_v10  ;;  %v4731_v21 = vld [vmem:[%s15497_s4 + $0x7e0] sm:$0xff] }
 0x6b0   :  { %8263 = vmatpush1.bf16.msra.mxu0 %v14789_v11  ;;  %v14832_v6 = vpack.c.bf16 %v4716_v46, %v4708_v42  ;;  %v5101_v42 = vld [vmem:[%s15499_s5 + $0x88] sm:$0xff] }
 0x6b1   :  { %8265 = vmatprep.subr.bf16.mxu0 %v14792_v4 }
 0x6b2   :  { %8391 = vmatpush1.bf16.msra.mxu1 %v14278_v29  ;;  %v4707_v29 = vld [vmem:[%s15497_s4 + $0x720] sm:$0xff] }
 0x6b3   :  { %8393 = vmatprep.subr.bf16.mxu1 %v14281_v59  ;;  %v4724_v59 = vld [vmem:[%s15497_s4 + $0x7a8] sm:$0xff]  ;;  %v14849_v33 = vpack.c.bf16 %v4715_v41, %v4707_v29 }
 0x6b4   :  { %8267 = vmatpush1.bf16.msra.mxu0 %v14809_v37  ;;  %v14852_v10 = vpack.c.bf16 %v4732_v5, %v4724_v59  ;;  %v5085_v41 = vld [vmem:[%s15499_s5 + $0x8] sm:$0xff]  ;;  %v5103_v59 = vld [vmem:[%s15499_s5 + $0x98] sm:$0xff] }
 0x6b5   :  { %8269 = vmatprep.subr.bf16.mxu0 %v14812_v1 }
 0x6b6   :  { %8395 = vmatpush1.bf16.msra.mxu1 %v14298_v52  ;;  %v4723_v52 = vld [vmem:[%s15497_s4 + $0x7a0] sm:$0xff] }
 0x6b7   :  { %8397 = vmatprep.subr.bf16.mxu1 %v14301_v9  ;;  %v5100_v9 = vld [vmem:[%s15499_s5 + $0x80] sm:$0xff]  ;;  %v14869_v46 = vpack.c.bf16 %v4731_v21, %v4723_v52  ;;  %v5087_v21 = vld [vmem:[%s15499_s5 + $0x18] sm:$0xff] }
 0x6b8   :  { %8271 = vmatpush1.bf16.msra.mxu0 %v14829_v2  ;;  %v14872_v29 = vpack.c.bf16 %v5101_v42, %v5100_v9  ;;  %v5105_v9 = vld [vmem:[%s15499_s5 + $0xa8] sm:$0xff] }
 0x6b9   :  { %8273 = vmatprep.subr.bf16.mxu0 %v14832_v6 }
 0x6ba   :  { %8399 = vmatpush1.bf16.msra.mxu1 %v14318_v48  ;;  %v5084_v48 = vld [vmem:[%s15499_s5] sm:$0xff] }
 0x6bb   :  { %8401 = vmatprep.subr.bf16.mxu1 %v14321_v40  ;;  %v5102_v40 = vld [vmem:[%s15499_s5 + $0x90] sm:$0xff]  ;;  %v14889_v5 = vpack.c.bf16 %v5085_v41, %v5084_v48  ;;  %v5088_v48 = vld [vmem:[%s15499_s5 + $0x20] sm:$0xff]  ;;  %v5107_v41 = vld [vmem:[%s15499_s5 + $0xb8] sm:$0xff] }
 0x6bc   :  { %8275 = vmatpush1.bf16.msra.mxu0 %v14849_v33  ;;  %v14892_v52 = vpack.c.bf16 %v5103_v59, %v5102_v40 }
 0x6bd   :  { %8277 = vmatprep.subr.bf16.mxu0 %v14852_v10 }
 0x6be   :  { %8403 = vmatpush1.bf16.msra.mxu1 %v14338_v7  ;;  %v5086_v7 = vld [vmem:[%s15499_s5 + $0x10] sm:$0xff] }
 0x6bf   :  { %8405 = vmatprep.subr.bf16.mxu1 %v14341_v61  ;;  %v5104_v61 = vld [vmem:[%s15499_s5 + $0xa0] sm:$0xff]  ;;  %v14911_v42 = vpack.c.bf16 %v5087_v21, %v5086_v7  ;;  %v5091_v7 = vld [vmem:[%s15499_s5 + $0x38] sm:$0xff]  ;;  %v5109_v21 = vld [vmem:[%s15499_s5 + $0xc8] sm:$0xff] }
 0x6c0   :  { %8279 = vmatpush1.bf16.msra.mxu0 %v14869_v46 }
 0x6c1   :  { %8345 = vmatprep.subr.bf16.mxu0 %v14872_v29 }
 0x6c2   :  { %8407 = vmatpush1.bf16.msra.mxu1 %v14358_v23  ;;  %v14914_v23 = vpack.c.bf16 %v5105_v9, %v5104_v61 }
 0x6c3   :  { %4942 = vmatmul.mubr.f32.vlgmr.msra.gmra.mrb[32].mxu0 %v14398_v50  ;;  %8409 = vmatprep.subr.bf16.mxu1 %v14361_v45  ;;  %v5089_v50 = vld [vmem:[%s15499_s5 + $0x28] sm:$0xff]  ;;  %v5106_v45 = vld [vmem:[%s15499_s5 + $0xb0] sm:$0xff] }
 0x6c4   :  { %8347 = vmatpush3.bf16.msra.mxu0 %v14889_v5  ;;  %5187 = vmatprep.mubr.f32.mxu0 %v14741_v31  ;;  %v14931_v40 = vpack.c.bf16 %v5089_v50, %v5088_v48  ;;  %v14934_v59 = vpack.c.bf16 %v5107_v41, %v5106_v45  ;;  %v5093_v48 = vld [vmem:[%s15499_s5 + $0x48] sm:$0xff]  ;;  %v5111_v50 = vld [vmem:[%s15499_s5 + $0xd8] sm:$0xff] }
 0x6c5   :  { %8349 = vmatprep.subr.bf16.mxu0 %v14892_v52 }
 0x6c6   :  { %8411 = vmatpush1.bf16.msra.mxu1 %v14378_v18  ;;  %v5090_v18 = vld [vmem:[%s15499_s5 + $0x30] sm:$0xff] }
 0x6c7   :  { %8413 = vmatprep.subr.bf16.mxu1 %v14381_v16  ;;  %v5108_v16 = vld [vmem:[%s15499_s5 + $0xc0] sm:$0xff]  ;;  %v14951_v61 = vpack.c.bf16 %v5091_v7, %v5090_v18  ;;  %v5095_v18 = vld [vmem:[%s15499_s5 + $0x58] sm:$0xff]  ;;  %v5113_v7 = vld [vmem:[%s15499_s5 + $0xe8] sm:$0xff] }
 0x6c8   :  { %8351 = vmatpush3.bf16.msra.mxu0 %v14911_v42  ;;  %v14954_v9 = vpack.c.bf16 %v5109_v21, %v5108_v16 }
 0x6c9   :  { %8353 = vmatprep.subr.bf16.mxu0 %v14914_v23 }
 0x6ca   :  { %8415 = vmatpush1.bf16.msra.mxu1 %v14402_v49  ;;  %v5092_v49 = vld [vmem:[%s15499_s5 + $0x40] sm:$0xff] }
 0x6cb   :  { %8417 = vmatprep.subr.bf16.mxu1 %v14406_v26  ;;  %v5110_v26 = vld [vmem:[%s15499_s5 + $0xd0] sm:$0xff]  ;;  %v14971_v45 = vpack.c.bf16 %v5093_v48, %v5092_v49  ;;  %v5097_v49 = vld [vmem:[%s15499_s5 + $0x68] sm:$0xff] }
 0x6cc   :  { %8355 = vmatpush3.bf16.msra.mxu0 %v14931_v40  ;;  %v14974_v41 = vpack.c.bf16 %v5111_v50, %v5110_v26  ;;  %v5115_v26 = vld [vmem:[%s15499_s5 + $0xf8] sm:$0xff] }
 0x6cd   :  { %8357 = vmatprep.subr.bf16.mxu0 %v14934_v59 }
 0x6ce   :  { %8419 = vmatpush1.bf16.msra.mxu1 %v14424_v25  ;;  %v5094_v25 = vld [vmem:[%s15499_s5 + $0x50] sm:$0xff] }
 0x6cf   :  { %8421 = vmatprep.subr.bf16.mxu1 %v14427_v58  ;;  %v5112_v58 = vld [vmem:[%s15499_s5 + $0xe0] sm:$0xff]  ;;  %v14991_v16 = vpack.c.bf16 %v5095_v18, %v5094_v25 }
 0x6d0   :  { %8359 = vmatpush3.bf16.msra.mxu0 %v14951_v61  ;;  %v14994_v21 = vpack.c.bf16 %v5113_v7, %v5112_v58  ;;  %v5098_v7 = vld [vmem:[%s15499_s5 + $0x70] sm:$0xff] }
 0x6d1   :  { %8361 = vmatprep.subr.bf16.mxu0 %v14954_v9 }
 0x6d2   :  { %8423 = vmatpush1.bf16.msra.mxu1 %v14444_v20  ;;  %v5096_v20 = vld [vmem:[%s15499_s5 + $0x60] sm:$0xff] }
 0x6d3   :  { %8425 = vmatprep.subr.bf16.mxu1 %v14447_v30  ;;  %v5114_v30 = vld [vmem:[%s15499_s5 + $0xf0] sm:$0xff]  ;;  %v15011_v18 = vpack.c.bf16 %v5097_v49, %v5096_v20  ;;  %v5226_v20 = vld [vmem:[%s15497_s4 + $0x58] sm:$0xff] }
 0x6d4   :  { %8363 = vmatpush3.bf16.msra.mxu0 %v14971_v45 }
 0x6d5   :  { %8365 = vmatprep.subr.bf16.mxu0 %v14974_v41 }
 0x6d6   :  { %v4136_v48 = vpop.f32.mrb[26].mxu0  ;;  %8427 = vmatpush1.bf16.msra.mxu1 %v14464_v0  ;;  %v15014_v0 = vpack.c.bf16 %v5115_v26, %v5114_v30  ;;  %v5225_v26 = vld [vmem:[%s15497_s4 + $0x50] sm:$0xff] }
 0x6d7   :  { %v4138_v50 = vpop.f32.mrb[27].mxu0  ;;  %8429 = vmatprep.subr.bf16.mxu1 %v14467_v3  ;;  %v5099_v48 = vld [vmem:[%s15499_s5 + $0x78] sm:$0xff] }
 0x6d8   :  { %v4207_v25 = vpop.f32.mrb[26].mxu1  ;;  %8367 = vmatpush3.bf16.msra.mxu0 %v14991_v16  ;;  %v5218_v3 = vld [vmem:[%s15497_s4 + $0x18] sm:$0xff]  ;;  %v15031_v49 = vpack.c.bf16 %v5099_v48, %v5098_v7  ;;  %v5233_v7 = vld [vmem:[%s15497_s4 + $0x90] sm:$0xff] }
 0x6d9   :  { %v4209_v58 = vpop.f32.mrb[27].mxu1  ;;  %8369 = vmatprep.subr.bf16.mxu0 %v14994_v21  ;;  %v8440_v30 = vpack.c.bf16 %v5226_v20, %v5218_v3  ;;  %v5242_v50 = vld [vmem:[%s15497_s4 + $0xd8] sm:$0xff]  ;;  %v15065_v3 = vmul.f32 %v14074_v12, %v14734_v54 }
 0x6da   :  { %8431 = vmatpush1.bf16.msra.mxu1 %v14484_v63  ;;  %v5217_v63 = vld [vmem:[%s15497_s4 + $0x10] sm:$0xff]  ;;  %v5250_v48 = vld [vmem:[%s15497_s4 + $0x118] sm:$0xff] }
 0x6db   :  { %8433 = vmatprep.subr.bf16.mxu1 %v14487_v57  ;;  %v5234_v57 = vld [vmem:[%s15497_s4 + $0x98] sm:$0xff]  ;;  %v8442_v25 = vpack.c.bf16 %v5225_v26, %v5217_v63  ;;  %v5257_v63 = vld [vmem:[%s15497_s4 + $0x150] sm:$0xff] }
 0x6dc   :  { %8371 = vmatpush3.bf16.msra.mxu0 %v15011_v18  ;;  %v8444_v58 = vpack.c.bf16 %v5242_v50, %v5234_v57  ;;  %v5273_v57 = vld [vmem:[%s15497_s4 + $0x1d0] sm:$0xff]  ;;  %v5282_v50 = vld [vmem:[%s15497_s4 + $0x218] sm:$0xff] }
 0x6dd   :  { %8373 = vmatprep.subr.bf16.mxu0 %v15014_v0 }
 0x6de   :  { %8435 = vmatpush1.bf16.msra.mxu1 %v14504_v47  ;;  %v5241_v47 = vld [vmem:[%s15497_s4 + $0xd0] sm:$0xff] }
 0x6df   :  { %8437 = vmatprep.subr.bf16.mxu1 %v14507_v62  ;;  %v5258_v62 = vld [vmem:[%s15497_s4 + $0x158] sm:$0xff] }
 0x6e0   :  { %8375 = vmatpush3.bf16.msra.mxu0 %v15031_v49  ;;  %v8448_v20 = vpack.c.bf16 %v5258_v62, %v5250_v48 }
 0x6e1   :  { %8441 = vmatprep.subr.bf16.mxu0 %v8440_v30  ;;  %v5249_v30 = vld [vmem:[%s15497_s4 + $0x110] sm:$0xff] }
 0x6e2   :  { %8439 = vmatpush1.bf16.msra.mxu1 %v14524_v38  ;;  %v8446_v38 = vpack.c.bf16 %v5241_v47, %v5233_v7  ;;  %v8450_v54 = vpack.c.bf16 %v5257_v63, %v5249_v30  ;;  %v5281_v7 = vld [vmem:[%s15497_s4 + $0x210] sm:$0xff]  ;;  %v5298_v47 = vld [vmem:[%s15497_s4 + $0x298] sm:$0xff]  ;;  %v15530_v30 = vld [vmem:[#allocation4_spill] sm:$0xff] }
 0x6e3   :  { %5188 = vmatmul.mubr.f32.vlgmr.msra.gmra.mrb[34].mxu0 %v14074_v12  ;;  %8505 = vmatprep.subr.bf16.mxu1 %v14527_v19  ;;  %v5266_v12 = vld [vmem:[%s15497_s4 + $0x198] sm:$0xff] }
 0x6e4   :  { %8443 = vmatpush1.bf16.msra.mxu0 %v8442_v25  ;;  %5606 = vmatprep.mubr.f32.mxu0 %v14745_v24  ;;  %v5274_v19 = vld [vmem:[%s15497_s4 + $0x1d8] sm:$0xff] }
 0x6e5   :  { %5536 = vmatmul.mubr.f32.vlgmr.msra.gmra.mrb[34].mxu1 %v15065_v3  ;;  %8445 = vmatprep.subr.bf16.mxu0 %v8444_v58  ;;  %v8452_v26 = vpack.c.bf16 %v5274_v19, %v5266_v12  ;;  %v5313_v19 = vld [vmem:[%s15497_s4 + $0x310] sm:$0xff] }
 0x6e6   :  { %8507 = vmatpush1.bf16.msra.mxu1 %v14544_v27  ;;  %5677 = vmatprep.mubr.f32.mxu1 %v14745_v24  ;;  %v5265_v27 = vld [vmem:[%s15497_s4 + $0x190] sm:$0xff] }
 0x6e7   :  { %8509 = vmatprep.subr.bf16.mxu1 %v14547_v28  ;;  %v5290_v28 = vld [vmem:[%s15497_s4 + $0x258] sm:$0xff]  ;;  %v8454_v25 = vpack.c.bf16 %v5273_v57, %v5265_v27  ;;  %v15532_v57 = vld [vmem:[#allocation6_spill] sm:$0xff] }
 0x6e8   :  { %8447 = vmatpush1.bf16.msra.mxu0 %v8446_v38  ;;  %v8456_v58 = vpack.c.bf16 %v5290_v28, %v5282_v50  ;;  %v5297_v38 = vld [vmem:[%s15497_s4 + $0x290] sm:$0xff]  ;;  %v5338_v27 = vld [vmem:[%s15497_s4 + $0x3d8] sm:$0xff] }
 0x6e9   :  { %8449 = vmatprep.subr.bf16.mxu0 %v8448_v20  ;;  %v5314_v20 = vld [vmem:[%s15497_s4 + $0x318] sm:$0xff] }
 0x6ea   :  { %8511 = vmatpush1.bf16.msra.mxu1 %v14566_v35  ;;  %v5289_v35 = vld [vmem:[%s15497_s4 + $0x250] sm:$0xff] }
 0x6eb   :  { %8513 = vmatprep.subr.bf16.mxu1 %v14569_v56  ;;  %v5306_v56 = vld [vmem:[%s15497_s4 + $0x2d8] sm:$0xff]  ;;  %v8458_v48 = vpack.c.bf16 %v5289_v35, %v5281_v7  ;;  %v5329_v7 = vld [vmem:[%s15497_s4 + $0x390] sm:$0xff] }
 0x6ec   :  { %8451 = vmatpush1.bf16.msra.mxu0 %v8450_v54  ;;  %v8460_v62 = vpack.c.bf16 %v5306_v56, %v5298_v47  ;;  %v15531_v54 = vld [vmem:[#allocation5_spill] sm:$0xff]  ;;  %v5337_v35 = vld [vmem:[%s15497_s4 + $0x3d0] sm:$0xff]  ;;  %v5346_v56 = vld [vmem:[%s15497_s4 + $0x418] sm:$0xff] }
 0x6ed   :  { %8453 = vmatprep.subr.bf16.mxu0 %v8452_v26  ;;  %v5330_v26 = vld [vmem:[%s15497_s4 + $0x398] sm:$0xff] }
 0x6ee   :  { %8515 = vmatpush1.bf16.msra.mxu1 %v14586_v14  ;;  %v5305_v14 = vld [vmem:[%s15497_s4 + $0x2d0] sm:$0xff] }
 0x6ef   :  { %8517 = vmatprep.subr.bf16.mxu1 %v14589_v34  ;;  %v5322_v34 = vld [vmem:[%s15497_s4 + $0x358] sm:$0xff]  ;;  %v8462_v63 = vpack.c.bf16 %v5305_v14, %v5297_v38  ;;  %v8470_v38 = vpack.c.bf16 %v5337_v35, %v5329_v7  ;;  %v5409_v7 = vld [vmem:[%s15497_s4 + $0x610] sm:$0xff] }
 0x6f0   :  { %8455 = vmatpush1.bf16.msra.mxu0 %v8454_v25  ;;  %v8464_v12 = vpack.c.bf16 %v5322_v34, %v5314_v20  ;;  %v5353_v20 = vld [vmem:[%s15497_s4 + $0x450] sm:$0xff]  ;;  %v5426_v35 = vld [vmem:[%s15497_s4 + $0x698] sm:$0xff] }
 0x6f1   :  { %8457 = vmatprep.subr.bf16.mxu0 %v8456_v58  ;;  %v8468_v58 = vpack.c.bf16 %v5338_v27, %v5330_v26  ;;  %v5394_v26 = vld [vmem:[%s15497_s4 + $0x598] sm:$0xff] }
 0x6f2   :  { %8519 = vmatpush1.bf16.msra.mxu1 %v14606_v15  ;;  %v5321_v15 = vld [vmem:[%s15497_s4 + $0x350] sm:$0xff] }
 0x6f3   :  { %8521 = vmatprep.subr.bf16.mxu1 %v15530_v30  ;;  %v8466_v28 = vpack.c.bf16 %v5321_v15, %v5313_v19 }
 0x6f4   :  { %8459 = vmatpush1.bf16.msra.mxu0 %v8458_v48  ;;  %v5354_v48 = vld [vmem:[%s15497_s4 + $0x458] sm:$0xff] }
 0x6f5   :  { %8461 = vmatprep.subr.bf16.mxu0 %v8460_v62  ;;  %v8472_v14 = vpack.c.bf16 %v5354_v48, %v5346_v56  ;;  %v5425_v48 = vld [vmem:[%s15497_s4 + $0x690] sm:$0xff] }
 0x6f6   :  { %8523 = vmatpush1.bf16.msra.mxu1 %v15531_v54  ;;  %v5377_v54 = vld [vmem:[%s15497_s4 + $0x510] sm:$0xff] }
 0x6f7   :  { %8525 = vmatprep.subr.bf16.mxu1 %v15532_v57 }
 0x6f8   :  { %v6287_v50 = vpop.f32.mrb[28].mxu1  ;;  %8463 = vmatpush1.bf16.msra.mxu0 %v8462_v63  ;;  %v5361_v63 = vld [vmem:[%s15497_s4 + $0x490] sm:$0xff] }
 0x6f9   :  { %v6288_v25 = vpop.f32.mrb[29].mxu1  ;;  %8465 = vmatprep.subr.bf16.mxu0 %v8464_v12  ;;  %v5378_v12 = vld [vmem:[%s15497_s4 + $0x518] sm:$0xff] }
 0x6fa   :  { %v6289_v47 = vadd.f32 %v6288_v25, %v6287_v50  ;;  %8527 = vmatpush1.bf16.msra.mxu1 %v14646_v39  ;;  %v5345_v39 = vld [vmem:[%s15497_s4 + $0x410] sm:$0xff] }
 0x6fb   :  { %8529 = vmatprep.subr.bf16.mxu1 %v14649_v17  ;;  %v5362_v17 = vld [vmem:[%s15497_s4 + $0x498] sm:$0xff]  ;;  %v8474_v34 = vpack.c.bf16 %v5353_v20, %v5345_v39  ;;  %v5393_v50 = vld [vmem:[%s15497_s4 + $0x590] sm:$0xff] }
 0x6fc   :  { %v4454_v62 = vadd.f32 %v6289_v47, %v14667_v53  ;;  %8467 = vmatpush1.bf16.msra.mxu0 %v8466_v28  ;;  %v5370_v53 = vld [vmem:[%s15497_s4 + $0x4d8] sm:$0xff]  ;;  %v5441_v39 = vld [vmem:[%s15497_s4 + $0x710] sm:$0xff] }
 0x6fd   :  { %8469 = vmatprep.subr.bf16.mxu0 %v8468_v58  ;;  %v8476_v30 = vpack.c.bf16 %v5370_v53, %v5362_v17  ;;  %v5410_v28 = vld [vmem:[%s15497_s4 + $0x618] sm:$0xff] }
 0x6fe   :  { %6045 = vst.msk [vmem:[%s15503_s7 + $0x28] sm:$0xff] %vm777_vm0, %v4454_v62  ;;  %8531 = vmatpush1.bf16.msra.mxu1 %v14671_v36  ;;  %v5369_v36 = vld [vmem:[%s15497_s4 + $0x4d0] sm:$0xff]  ;;  %v5442_v62 = vld [vmem:[%s15497_s4 + $0x718] sm:$0xff] }
 0x6ff   :  { %8533 = vmatprep.subr.bf16.mxu1 %v14674_v43  ;;  %v5386_v43 = vld [vmem:[%s15497_s4 + $0x558] sm:$0xff]  ;;  %v8478_v19 = vpack.c.bf16 %v5369_v36, %v5361_v63  ;;  %v5457_v63 = vld [vmem:[%s15497_s4 + $0x790] sm:$0xff] }
 0x700   :  { %8471 = vmatpush1.bf16.msra.mxu0 %v8470_v38  ;;  %v8480_v15 = vpack.c.bf16 %v5386_v43, %v5378_v12  ;;  %v5458_v17 = vld [vmem:[%s15497_s4 + $0x798] sm:$0xff] }
 0x701   :  { %8473 = vmatprep.subr.bf16.mxu0 %v8472_v14  ;;  %v5222_v36 = vld [vmem:[%s15497_s4 + $0x38] sm:$0xff] }
 0x702   :  { %8535 = vmatpush1.bf16.msra.mxu1 %v14696_v13  ;;  %v5385_v13 = vld [vmem:[%s15497_s4 + $0x550] sm:$0xff] }
 0x703   :  { %8537 = vmatprep.subr.bf16.mxu1 %v14699_v32  ;;  %v5402_v32 = vld [vmem:[%s15497_s4 + $0x5d8] sm:$0xff]  ;;  %v8482_v27 = vpack.c.bf16 %v5385_v13, %v5377_v54 }
 0x704   :  { %8475 = vmatpush1.bf16.msra.mxu0 %v8474_v34  ;;  %v8484_v57 = vpack.c.bf16 %v5402_v32, %v5394_v26  ;;  %v5237_v26 = vld [vmem:[%s15497_s4 + $0xb0] sm:$0xff]  ;;  %v5254_v32 = vld [vmem:[%s15497_s4 + $0x138] sm:$0xff] }
 0x705   :  { %8477 = vmatprep.subr.bf16.mxu0 %v8476_v30 }
 0x706   :  { %8539 = vmatpush1.bf16.msra.mxu1 %v14716_v22  ;;  %v5401_v22 = vld [vmem:[%s15497_s4 + $0x5d0] sm:$0xff] }
 0x707   :  { %8541 = vmatprep.subr.bf16.mxu1 %v14719_v60  ;;  %v5418_v60 = vld [vmem:[%s15497_s4 + $0x658] sm:$0xff]  ;;  %v8486_v25 = vpack.c.bf16 %v5401_v22, %v5393_v50  ;;  %v5261_v50 = vld [vmem:[%s15497_s4 + $0x170] sm:$0xff] }
 0x708   :  { %8479 = vmatpush1.bf16.msra.mxu0 %v8478_v19  ;;  %v8488_v58 = vpack.c.bf16 %v5418_v60, %v5410_v28  ;;  %v5221_v19 = vld [vmem:[%s15497_s4 + $0x30] sm:$0xff]  ;;  %v5286_v60 = vld [vmem:[%s15497_s4 + $0x238] sm:$0xff] }
 0x709   :  { %8481 = vmatprep.subr.bf16.mxu0 %v8480_v15  ;;  %v5238_v15 = vld [vmem:[%s15497_s4 + $0xb8] sm:$0xff] }
 0x70a   :  { %8543 = vmatpush1.bf16.msra.mxu1 %v14747_v51  ;;  %v5417_v51 = vld [vmem:[%s15497_s4 + $0x650] sm:$0xff] }
 0x70b   :  { %8545 = vmatprep.subr.bf16.mxu1 %v14751_v55  ;;  %v5434_v55 = vld [vmem:[%s15497_s4 + $0x6d8] sm:$0xff]  ;;  %v8490_v47 = vpack.c.bf16 %v5417_v51, %v5409_v7  ;;  %v5285_v7 = vld [vmem:[%s15497_s4 + $0x230] sm:$0xff] }
 0x70c   :  { %8483 = vmatpush1.bf16.msra.mxu0 %v8482_v27  ;;  %v8492_v56 = vpack.c.bf16 %v5434_v55, %v5426_v35  ;;  %v5302_v51 = vld [vmem:[%s15497_s4 + $0x2b8] sm:$0xff] }
 0x70d   :  { %8485 = vmatprep.subr.bf16.mxu0 %v8484_v57  ;;  %v5253_v57 = vld [vmem:[%s15497_s4 + $0x130] sm:$0xff] }
 0x70e   :  { %8547 = vmatpush1.bf16.msra.mxu1 %v14769_v8  ;;  %v5433_v8 = vld [vmem:[%s15497_s4 + $0x6d0] sm:$0xff]  ;;  %v8578_v22 = vpack.c.bf16 %v5261_v50, %v5253_v57 }
 0x70f   :  { %8549 = vmatprep.subr.bf16.mxu1 %v14772_v44  ;;  %v5450_v44 = vld [vmem:[%s15497_s4 + $0x758] sm:$0xff]  ;;  %v8494_v38 = vpack.c.bf16 %v5433_v8, %v5425_v48  ;;  %v5413_v57 = vld [vmem:[%s15497_s4 + $0x630] sm:$0xff] }
 0x710   :  { %8487 = vmatpush1.bf16.msra.mxu0 %v8486_v25  ;;  %v8496_v14 = vpack.c.bf16 %v5450_v44, %v5442_v62  ;;  %v5317_v62 = vld [vmem:[%s15497_s4 + $0x330] sm:$0xff]  ;;  %v5334_v44 = vld [vmem:[%s15497_s4 + $0x3b8] sm:$0xff] }
 0x711   :  { %8489 = vmatprep.subr.bf16.mxu0 %v8488_v58  ;;  %v5421_v50 = vld [vmem:[%s15497_s4 + $0x670] sm:$0xff] }
 0x712   :  { %8551 = vmatpush1.bf16.msra.mxu1 %v14789_v11  ;;  %v5449_v11 = vld [vmem:[%s15497_s4 + $0x750] sm:$0xff] }
 0x713   :  { %8553 = vmatprep.subr.bf16.mxu1 %v14792_v4  ;;  %v5466_v4 = vld [vmem:[%s15497_s4 + $0x7d8] sm:$0xff]  ;;  %v8498_v34 = vpack.c.bf16 %v5449_v11, %v5441_v39 }
 0x714   :  { %8491 = vmatpush1.bf16.msra.mxu0 %v8490_v47  ;;  %v8500_v30 = vpack.c.bf16 %v5466_v4, %v5458_v17  ;;  %v5301_v47 = vld [vmem:[%s15497_s4 + $0x2b0] sm:$0xff]  ;;  %v5358_v17 = vld [vmem:[%s15497_s4 + $0x478] sm:$0xff] }
 0x715   :  { %8493 = vmatprep.subr.bf16.mxu0 %v8492_v56  ;;  %v5318_v56 = vld [vmem:[%s15497_s4 + $0x338] sm:$0xff] }
 0x716   :  { %v4278_v20 = vpop.f32.mrb[28].mxu0  ;;  %8555 = vmatpush1.bf16.msra.mxu1 %v14809_v37  ;;  %v5465_v37 = vld [vmem:[%s15497_s4 + $0x7d0] sm:$0xff] }
 0x717   :  { %v4280_v53 = vpop.f32.mrb[29].mxu0  ;;  %8557 = vmatprep.subr.bf16.mxu1 %v14812_v1  ;;  %v5230_v1 = vld [vmem:[%s15497_s4 + $0x78] sm:$0xff]  ;;  %v8502_v12 = vpack.c.bf16 %v5465_v37, %v5457_v63  ;;  %v5341_v20 = vld [vmem:[%s15497_s4 + $0x3f0] sm:$0xff] }
 0x718   :  { %8495 = vmatpush1.bf16.msra.mxu0 %v8494_v38  ;;  %v8568_v43 = vpack.c.bf16 %v5230_v1, %v5222_v36  ;;  %v5365_v36 = vld [vmem:[%s15497_s4 + $0x4b0] sm:$0xff]  ;;  %v5382_v1 = vld [vmem:[%s15497_s4 + $0x538] sm:$0xff] }
 0x719   :  { %8497 = vmatprep.subr.bf16.mxu0 %v8496_v14 }
 0x71a   :  { %8559 = vmatpush1.bf16.msra.mxu1 %v14829_v2  ;;  %v5229_v2 = vld [vmem:[%s15497_s4 + $0x70] sm:$0xff] }
 0x71b   :  { %8561 = vmatprep.subr.bf16.mxu1 %v14832_v6  ;;  %v5246_v6 = vld [vmem:[%s15497_s4 + $0xf8] sm:$0xff]  ;;  %v8570_v54 = vpack.c.bf16 %v5229_v2, %v5221_v19  ;;  %v5389_v2 = vld [vmem:[%s15497_s4 + $0x570] sm:$0xff] }
 0x71c   :  { %8499 = vmatpush1.bf16.msra.mxu0 %v8498_v34  ;;  %v8572_v13 = vpack.c.bf16 %v5246_v6, %v5238_v15  ;;  %v5349_v34 = vld [vmem:[%s15497_s4 + $0x430] sm:$0xff]  ;;  %v5398_v15 = vld [vmem:[%s15497_s4 + $0x5b8] sm:$0xff] }
 0x71d   :  { %8501 = vmatprep.subr.bf16.mxu0 %v8500_v30  ;;  %v5366_v30 = vld [vmem:[%s15497_s4 + $0x4b8] sm:$0xff] }
 0x71e   :  { %8563 = vmatpush1.bf16.msra.mxu1 %v14849_v33  ;;  %v5245_v33 = vld [vmem:[%s15497_s4 + $0xf0] sm:$0xff]  ;;  %v5406_v6 = vld [vmem:[%s15497_s4 + $0x5f8] sm:$0xff] }
 0x71f   :  { %8565 = vmatprep.subr.bf16.mxu1 %v14852_v10  ;;  %v5262_v10 = vld [vmem:[%s15497_s4 + $0x178] sm:$0xff]  ;;  %v8574_v27 = vpack.c.bf16 %v5245_v33, %v5237_v26  ;;  %v5397_v26 = vld [vmem:[%s15497_s4 + $0x5b0] sm:$0xff] }
 0x720   :  { %8503 = vmatpush1.bf16.msra.mxu0 %v8502_v12  ;;  %v5405_v33 = vld [vmem:[%s15497_s4 + $0x5f0] sm:$0xff] }
 0x721   :  { %8569 = vmatprep.subr.bf16.mxu0 %v8568_v43  ;;  %v8767_v43 = vld [vmem:[%s15505_s8] sm:$0xff] }
 0x722   :  { %8567 = vmatpush1.bf16.msra.mxu1 %v14869_v46  ;;  %v8576_v46 = vpack.c.bf16 %v5262_v10, %v5254_v32  ;;  %v5414_v32 = vld [vmem:[%s15497_s4 + $0x638] sm:$0xff] }
 0x723   :  { %5607 = vmatmul.mubr.f32.vlgmr.msra.gmra.mrb[36].mxu0 %v15065_v3  ;;  %8633 = vmatprep.subr.bf16.mxu1 %v14872_v29  ;;  %v5278_v29 = vld [vmem:[%s15497_s4 + $0x1f8] sm:$0xff] }
 0x724   :  { %8571 = vmatpush1.bf16.msra.mxu0 %v8570_v54  ;;  %5748 = vmatprep.mubr.f32.mxu0 %v14745_v24  ;;  %v5270_v24 = vld [vmem:[%s15497_s4 + $0x1b8] sm:$0xff] }
 0x725   :  { %5678 = vmatmul.mubr.f32.vlgmr.msra.gmra.mrb[36].mxu1 %v15065_v3  ;;  %8573 = vmatprep.subr.bf16.mxu0 %v8572_v13  ;;  %v8580_v28 = vpack.c.bf16 %v5278_v29, %v5270_v24  ;;  %v8612_v13 = vpack.c.bf16 %v5406_v6, %v5398_v15  ;;  %v5422_v10 = vld [vmem:[%s15497_s4 + $0x678] sm:$0xff] }
 0x726   :  { %8635 = vmatpush3.bf16.msra.mxu1 %v14889_v5  ;;  %5923 = vmatprep.mubr.f32.mxu1 %v14741_v31  ;;  %v5269_v5 = vld [vmem:[%s15497_s4 + $0x1b0] sm:$0xff]  ;;  %v5430_v24 = vld [vmem:[%s15497_s4 + $0x6b8] sm:$0xff] }
 0x727   :  { %8637 = vmatprep.subr.bf16.mxu1 %v14892_v52  ;;  %v5277_v31 = vld [vmem:[%s15497_s4 + $0x1f0] sm:$0xff]  ;;  %v5294_v52 = vld [vmem:[%s15497_s4 + $0x278] sm:$0xff] }
 0x728   :  { %8575 = vmatpush1.bf16.msra.mxu0 %v8574_v27  ;;  %v8582_v25 = vpack.c.bf16 %v5277_v31, %v5269_v5  ;;  %v8584_v58 = vpack.c.bf16 %v5294_v52, %v5286_v60  ;;  %v8614_v27 = vpack.c.bf16 %v5405_v33, %v5397_v26  ;;  %v5438_v29 = vld [vmem:[%s15497_s4 + $0x6f8] sm:$0xff]  ;;  %v5429_v5 = vld [vmem:[%s15497_s4 + $0x6b0] sm:$0xff] }
 0x729   :  { %8577 = vmatprep.subr.bf16.mxu0 %v8576_v46  ;;  %v8616_v46 = vpack.c.bf16 %v5422_v10, %v5414_v32  ;;  %v5437_v31 = vld [vmem:[%s15497_s4 + $0x6f0] sm:$0xff]  ;;  %v5446_v60 = vld [vmem:[%s15497_s4 + $0x738] sm:$0xff] }
 0x72a   :  { %8639 = vmatpush3.bf16.msra.mxu1 %v14911_v42  ;;  %v5293_v42 = vld [vmem:[%s15497_s4 + $0x270] sm:$0xff]  ;;  %v5454_v52 = vld [vmem:[%s15497_s4 + $0x778] sm:$0xff] }
 0x72b   :  { %8641 = vmatprep.subr.bf16.mxu1 %v14914_v23  ;;  %v5310_v23 = vld [vmem:[%s15497_s4 + $0x2f8] sm:$0xff]  ;;  %v8586_v35 = vpack.c.bf16 %v5293_v42, %v5285_v7  ;;  %v5445_v7 = vld [vmem:[%s15497_s4 + $0x730] sm:$0xff] }
 0x72c   :  { %8579 = vmatpush1.bf16.msra.mxu0 %v8578_v22  ;;  %v8588_v55 = vpack.c.bf16 %v5310_v23, %v5302_v51  ;;  %v8618_v22 = vpack.c.bf16 %v5421_v50, %v5413_v57  ;;  %v5453_v42 = vld [vmem:[%s15497_s4 + $0x770] sm:$0xff]  ;;  %v5462_v23 = vld [vmem:[%s15497_s4 + $0x7b8] sm:$0xff] }
 0x72d   :  { %8581 = vmatprep.subr.bf16.mxu0 %v8580_v28  ;;  %v8620_v28 = vpack.c.bf16 %v5438_v29, %v5430_v24 }
 0x72e   :  { %8643 = vmatpush3.bf16.msra.mxu1 %v14931_v40  ;;  %v5309_v40 = vld [vmem:[%s15497_s4 + $0x2f0] sm:$0xff] }
 0x72f   :  { %8645 = vmatprep.subr.bf16.mxu1 %v14934_v59  ;;  %v5326_v59 = vld [vmem:[%s15497_s4 + $0x378] sm:$0xff]  ;;  %v8590_v48 = vpack.c.bf16 %v5309_v40, %v5301_v47  ;;  %v8626_v47 = vpack.c.bf16 %v5453_v42, %v5445_v7 }
 0x730   :  { %8583 = vmatpush1.bf16.msra.mxu0 %v8582_v25  ;;  %v8592_v8 = vpack.c.bf16 %v5326_v59, %v5318_v56  ;;  %v8622_v25 = vpack.c.bf16 %v5437_v31, %v5429_v5  ;;  %v5461_v56 = vld [vmem:[%s15497_s4 + $0x7b0] sm:$0xff] }
 0x731   :  { %8585 = vmatprep.subr.bf16.mxu0 %v8584_v58  ;;  %v8624_v58 = vpack.c.bf16 %v5454_v52, %v5446_v60  ;;  %v5469_v59 = vld [vmem:[%s15497_s4 + $0x7f0] sm:$0xff] }
 0x732   :  { %8647 = vmatpush3.bf16.msra.mxu1 %v14951_v61  ;;  %v5325_v61 = vld [vmem:[%s15497_s4 + $0x370] sm:$0xff] }
 0x733   :  { %8649 = vmatprep.subr.bf16.mxu1 %v14954_v9  ;;  %v5342_v9 = vld [vmem:[%s15497_s4 + $0x3f8] sm:$0xff]  ;;  %v8594_v14 = vpack.c.bf16 %v5325_v61, %v5317_v62 }
 0x734   :  { %8587 = vmatpush1.bf16.msra.mxu0 %v8586_v35  ;;  %v8596_v11 = vpack.c.bf16 %v5342_v9, %v5334_v44  ;;  %v5470_v35 = vld [vmem:[%s15497_s4 + $0x7f8] sm:$0xff] }
 0x735   :  { %8589 = vmatprep.subr.bf16.mxu0 %v8588_v55  ;;  %v8628_v40 = vpack.c.bf16 %v5470_v35, %v5462_v23 }
 0x736   :  { %8651 = vmatpush3.bf16.msra.mxu1 %v14971_v45  ;;  %v5333_v45 = vld [vmem:[%s15497_s4 + $0x3b0] sm:$0xff] }
 0x737   :  { %8653 = vmatprep.subr.bf16.mxu1 %v14974_v41  ;;  %v5350_v41 = vld [vmem:[%s15497_s4 + $0x438] sm:$0xff]  ;;  %v8598_v4 = vpack.c.bf16 %v5341_v20, %v5333_v45 }
 0x738   :  { %v4872_v38 = vpop.f32.mrb[30].mxu1  ;;  %8591 = vmatpush1.bf16.msra.mxu0 %v8590_v48  ;;  %v8600_v53 = vpack.c.bf16 %v5358_v17, %v5350_v41  ;;  %v8630_v48 = vpack.c.bf16 %v5469_v59, %v5461_v56 }
 0x739   :  { %v4874_v39 = vpop.f32.mrb[31].mxu1  ;;  %8593 = vmatprep.subr.bf16.mxu0 %v8592_v8  ;;  %v6061_v38 = vld [vmem:[%s15502_s6] ss:$0 sm:$0xff] }
 0x73a   :  { %8655 = vmatpush3.bf16.msra.mxu1 %v14991_v16  ;;  %v5357_v16 = vld [vmem:[%s15497_s4 + $0x470] sm:$0xff] }
 0x73b   :  { %8657 = vmatprep.subr.bf16.mxu1 %v14994_v21  ;;  %v5374_v21 = vld [vmem:[%s15497_s4 + $0x4f8] sm:$0xff]  ;;  %v8602_v63 = vpack.c.bf16 %v5357_v16, %v5349_v34 }
 0x73c   :  { %8595 = vmatpush1.bf16.msra.mxu0 %v8594_v14  ;;  %v8604_v37 = vpack.c.bf16 %v5374_v21, %v5366_v30 }
 0x73d   :  { %8597 = vmatprep.subr.bf16.mxu0 %v8596_v11 }
 0x73e   :  { %8659 = vmatpush3.bf16.msra.mxu1 %v15011_v18  ;;  %v5373_v18 = vld [vmem:[%s15497_s4 + $0x4f0] sm:$0xff] }
 0x73f   :  { %8661 = vmatprep.subr.bf16.mxu1 %v15014_v0  ;;  %v5390_v0 = vld [vmem:[%s15497_s4 + $0x578] sm:$0xff]  ;;  %v8606_v12 = vpack.c.bf16 %v5373_v18, %v5365_v36 }
 0x740   :  { %8599 = vmatpush1.bf16.msra.mxu0 %v8598_v4  ;;  %v8608_v19 = vpack.c.bf16 %v5390_v0, %v5382_v1 }
 0x741   :  { %8601 = vmatprep.subr.bf16.mxu0 %v8600_v53 }
 0x742   :  { %8663 = vmatpush3.bf16.msra.mxu1 %v15031_v49  ;;  %v5381_v49 = vld [vmem:[%s15497_s4 + $0x530] sm:$0xff] }
 0x743   :  { %v8610_v54 = vpack.c.bf16 %v5389_v2, %v5381_v49 }
 0x744   :  { %8603 = vmatpush1.bf16.msra.mxu0 %v8602_v63 }
 0x745   :  { %5924 = vmatmul.mubr.f32.vlgmr.msra.gmra.mrb[38].mxu1 %v8767_v43  ;;  %8605 = vmatprep.subr.bf16.mxu0 %v8604_v37 }
 0x748   :  { %8607 = vmatpush1.bf16.msra.mxu0 %v8606_v12 }
 0x749   :  { %8609 = vmatprep.subr.bf16.mxu0 %v8608_v19 }
 0x74c   :  { %8611 = vmatpush1.bf16.msra.mxu0 %v8610_v54 }
 0x74d   :  { %8613 = vmatprep.subr.bf16.mxu0 %v8612_v13 }
 0x750   :  { %8615 = vmatpush1.bf16.msra.mxu0 %v8614_v27 }
 0x751   :  { %8617 = vmatprep.subr.bf16.mxu0 %v8616_v46 }
 0x754   :  { %8619 = vmatpush1.bf16.msra.mxu0 %v8618_v22 }
 0x755   :  { %8621 = vmatprep.subr.bf16.mxu0 %v8620_v28 }
 0x756   :  { %v4801_v51 = vpop.f32.mrb[30].mxu0 }
 0x757   :  { %v4803_v55 = vpop.f32.mrb[31].mxu0 }
 0x758   :  { %8623 = vmatpush1.bf16.msra.mxu0 %v8622_v25 }
 0x759   :  { %8625 = vmatprep.subr.bf16.mxu0 %v8624_v58 }
 0x75c   :  { %8627 = vmatpush1.bf16.msra.mxu0 %v8626_v47 }
 0x75d   :  { %8629 = vmatprep.subr.bf16.mxu0 %v8628_v40 }
 0x760   :  { %8631 = vmatpush1.bf16.msra.mxu0 %v8630_v48 }
 0x763   :  { %5749 = vmatmul.mubr.f32.vlgmr.msra.gmra.mrb[38].mxu0 %v15065_v3 }
 0x778   :  { %v5014_v8 = vpop.f32.mrb[32].mxu1 }
 0x779   :  { %v5016_v62 = vpop.f32.mrb[33].mxu1 }
 0x796   :  { %v4943_v61 = vpop.f32.mrb[32].mxu0 }
 0x797   :  { %v4945_v44 = vpop.f32.mrb[33].mxu0 }
 0x7b6   :  { %v6322_v9 = vpop.f32.mrb[34].mxu0 }
 0x7b7   :  { %v6323_v14 = vpop.f32.mrb[35].mxu0 }
 0x7b8   :  { %v6324_v39 = vadd.f32 %v6323_v14, %v6322_v9  ;;  %v5537_v11 = vpop.f32.mrb[34].mxu1 }
 0x7b9   :  { %v5539_v45 = vpop.f32.mrb[35].mxu1 }
 0x7ba   :  { %v5190_v20 = vadd.f32 %v6324_v39, %v6061_v38 }
 0x7bc   :  { %6062 = vst.msk [vmem:[%s15503_s7 + $0x30] sm:$0xff] %vm777_vm0, %v5190_v20 }
 0x7f6   :  { %v5608_v3 = vpop.f32.mrb[36].mxu0 }
 0x7f7   :  { %v5610_v41 = vpop.f32.mrb[37].mxu0 }
 0x7f8   :  { %v5679_v17 = vpop.f32.mrb[36].mxu1 }
 0x7f9   :  { %v5681_v4 = vpop.f32.mrb[37].mxu1 }
 0x818   :  { %v6357_v53 = vpop.f32.mrb[38].mxu1 }
 0x819   :  { %v6358_v34 = vpop.f32.mrb[39].mxu1 }
 0x81a   :  { %v6359_v16 = vadd.f32 %v6358_v34, %v6357_v53 }
 0x81c   :  { %v5926_v30 = vadd.f32 %v6359_v16, %v6061_v38 }
 0x81e   :  { %6079 = vst.msk [vmem:[%s15503_s7 + $0x38] sm:$0xff] %vm777_vm0, %v5926_v30 }
 0x836   :  { %v5750_v21 = vpop.f32.mrb[38].mxu0 }
 0x837   :  { %v5752_v63 = vpop.f32.mrb[39].mxu0 }

</bundles_post_ra>
